<compile_context>
chip_gen: v7x
topology: tpu7x:2x2x1
jax: 0.10.0
libtpu: 0.0.40
codegen_flags: <defaults>
</compile_context>

<pallas_src>
import jax
import jax.numpy as jnp
from jax.experimental import pallas as pl
from jax.experimental.pallas import tpu as pltpu


def _round_up(n, m):
    return ((n + m - 1) // m) * m


def _mlp_kernel(x_ref, w1_ref, b1_ref, w2_ref, b2_ref, w3_ref, b3_ref, o_ref):
    # x: (TB, D) bf16; w1: (D,64) bf16; b1: (1,64) f32; w2: (64,32) bf16; b2: (1,32) f32;
    # w3: (1,32) f32; b3: (1,1) f32; o: (TB//128, 128) f32
    x = x_ref[...]
    if x.dtype != jnp.bfloat16:          # static at trace time; no-op when x is bf16
        x = x.astype(jnp.bfloat16)

    # Layer 1: native bf16 x bf16 -> f32 accumulate on the MXU; bias + ReLU in f32.
    h1 = jnp.dot(x, w1_ref[...], preferred_element_type=jnp.float32) + b1_ref[...]
    h1 = jnp.maximum(h1, 0.0)

    # Layer 2: cast activations to bf16 so the MXU stays on its single-pass bf16 path.
    h2 = jnp.dot(h1.astype(jnp.bfloat16), w2_ref[...],
                 preferred_element_type=jnp.float32) + b2_ref[...]
    h2 = jnp.maximum(h2, 0.0)

    # Layer 3 (32 -> 1): VPU multiply + cross-lane reduce (MXU with N=1 wastes 127/128 cols).
    out = jnp.sum(h2 * w3_ref[...], axis=-1, keepdims=True) + b3_ref[...]   # (TB, 1) f32

    # Lane-dense store: (TB, 1) -> (TB//128, 128) so writeback uses full-width vst.
    o_ref[...] = out.reshape(o_ref.shape).astype(o_ref.dtype)


def housing_price_model(x, params, *, tile_b=8192, min_pallas_batch=512):
    """Forward pass of HousingPriceModel.

    Large batches run through the fused, batch-tiled Pallas kernel; tiny batches fall back
    to a fused XLA implementation (the kernel only pays off once it is HBM-bandwidth-bound).
    """
    w1, b1, w2, b2, w3, b3 = params
    B, D = x.shape

    if B < min_pallas_batch:
        return reference_forward(x.astype(jnp.float32), params)

    # Batch tile: as large as requested, but no larger than needed to give >=2 grid tiles
    # (keeps both v7x TensorCores busy); rounded to a multiple of 1024 so the lane-dense
    # output block (tile_b//128, 128) satisfies the (8, 128) tiling rule.
    tb = min(tile_b, pl.cdiv(B, 2))
    tb = _round_up(max(tb, 1), 1024)
    num_tiles = pl.cdiv(B, tb)

    # Weights feeding the MXU go in as bf16 (accumulation stays f32 inside the kernel).
    w1b = w1.astype(jnp.bfloat16)
    w2b = w2.astype(jnp.bfloat16)

    out2d = pl.pallas_call(
        _mlp_kernel,
        out_shape=jax.ShapeDtypeStruct((num_tiles * tb // 128, 128), jnp.float32),
        grid=(num_tiles,),
        in_specs=[
            pl.BlockSpec((tb, D), lambda i: (i, 0)),   # x streamed per batch tile (ragged tail OK)
            pl.BlockSpec(w1b.shape, lambda i: (0, 0)),  # weights/biases stay VMEM-resident
            pl.BlockSpec(b1.shape, lambda i: (0, 0)),
            pl.BlockSpec(w2b.shape, lambda i: (0, 0)),
            pl.BlockSpec(b2.shape, lambda i: (0, 0)),
            pl.BlockSpec(w3.shape, lambda i: (0, 0)),
            pl.BlockSpec(b3.shape, lambda i: (0, 0)),
        ],
        out_specs=pl.BlockSpec((tb // 128, 128), lambda i: (i, 0)),  # lane-dense output blocks
        compiler_params=pltpu.CompilerParams(
            dimension_semantics=("parallel",),  # shard batch tiles across TCs (v7x megacore)
        ),
    )(x, w1b, b1, w2b, b2, w3, b3)

    # Flatten the lane-dense layout back to (B, 1); drops the padded tail rows.
    return out2d.reshape(-1, 1)[:B]


def init_params(key, input_dim):
    """Deterministic synthetic init mimicking nn.Linear's uniform(-1/sqrt(fan_in), 1/sqrt(fan_in)).

    w1, w2 are stored (in, out); w3 is stored (out, in) = (1, 32) for the VPU last layer.
    """
    params = []
    for fan_in, fan_out in [(input_dim, 64), (64, 32)]:
        kw, kb, key = jax.random.split(key, 3)
        bound = 1.0 / jnp.sqrt(jnp.float32(fan_in))
        w = jax.random.uniform(kw, (fan_in, fan_out), jnp.float32, -bound, bound)
        b = jax.random.uniform(kb, (1, fan_out), jnp.float32, -bound, bound)
        params += [w, b]
    kw, kb, key = jax.random.split(key, 3)
    bound = 1.0 / jnp.sqrt(jnp.float32(32))
    w3 = jax.random.uniform(kw, (1, 32), jnp.float32, -bound, bound)
    b3 = jax.random.uniform(kb, (1, 1), jnp.float32, -bound, bound)
    params += [w3, b3]
    return tuple(params)


def reference_forward(x, params):
    w1, b1, w2, b2, w3, b3 = params
    h1 = jnp.maximum(x @ w1 + b1, 0.0)
    h2 = jnp.maximum(h1 @ w2 + b2, 0.0)
    return h2 @ w3.T + b3


if __name__ == "__main__":
    key = jax.random.PRNGKey(0)
    k_x, k_p, k_xs = jax.random.split(key, 3)

    input_dim = 16
    params = init_params(k_p, input_dim)

    # Batch chosen so the Pallas path runs with 2 grid tiles (tile_b auto-chosen = 2048) and
    # a ragged last tile — exercises the no-pad partial-block read and the lane-dense store.
    # Still tiny in absolute terms (2304 x 16 bf16 = 72 KB).
    batch = 2304
    x = jax.random.normal(k_x, (batch, input_dim), jnp.float32).astype(jnp.bfloat16)

    out = jax.block_until_ready(housing_price_model(x, params))
    ref = reference_forward(x.astype(jnp.float32), params)
    assert out.shape == (batch, 1)
    assert jnp.allclose(out, ref, atol=2e-2, rtol=2e-2), float(jnp.max(jnp.abs(out - ref)))

    # Tiny-batch path: dispatches to the fused XLA implementation (Pallas not worth it at B=8).
    x_small = jax.random.normal(k_xs, (8, input_dim), jnp.float32)
    out_small = jax.block_until_ready(housing_price_model(x_small, params))
    ref_small = reference_forward(x_small, params)
    assert out_small.shape == (8, 1)
    assert jnp.allclose(out_small, ref_small, atol=1e-5, rtol=1e-5)

    print("KERNEL_OK")
</pallas_src>

<mosaic_0001>
module attributes {stable_mosaic.version = 11 : i64} {
  func.func @_mlp_kernel(%arg0: i32, %arg1: memref<2048x16xbf16, #tpu.memory_space<vmem>>, %arg2: memref<16x64xbf16, #tpu.memory_space<vmem>>, %arg3: memref<1x64xf32, #tpu.memory_space<vmem>>, %arg4: memref<64x32xbf16, #tpu.memory_space<vmem>>, %arg5: memref<1x32xf32, #tpu.memory_space<vmem>>, %arg6: memref<1x32xf32, #tpu.memory_space<vmem>>, %arg7: memref<1x1xf32, #tpu.memory_space<vmem>>, %arg8: memref<16x128xf32, #tpu.memory_space<vmem>>) attributes {dimension_semantics = [#tpu.dimension_semantics<parallel>], iteration_bounds = array<i64: 2>, scalar_prefetch = 0 : i64, scratch_operands = 0 : i64, tpu.core_type = #tpu.core_type<tc>, window_params = [{transform_indices = @transform_0, window_bounds = array<i64: 2048, 16>}, {pipeline_mode = #tpu.pipeline_mode<synchronous>, transform_indices = @transform_1, window_bounds = array<i64: 16, 64>}, {pipeline_mode = #tpu.pipeline_mode<synchronous>, transform_indices = @transform_2, window_bounds = array<i64: 1, 64>}, {pipeline_mode = #tpu.pipeline_mode<synchronous>, transform_indices = @transform_3, window_bounds = array<i64: 64, 32>}, {pipeline_mode = #tpu.pipeline_mode<synchronous>, transform_indices = @transform_4, window_bounds = array<i64: 1, 32>}, {pipeline_mode = #tpu.pipeline_mode<synchronous>, transform_indices = @transform_5, window_bounds = array<i64: 1, 32>}, {pipeline_mode = #tpu.pipeline_mode<synchronous>, transform_indices = @transform_6, window_bounds = array<i64: 1, 1>}, {transform_indices = @transform_7, window_bounds = array<i64: 16, 128>}]} {
    %c0 = arith.constant 0 : index
    %c0_0 = arith.constant 0 : index
    %0 = vector.load %arg1[%c0, %c0_0] : memref<2048x16xbf16, #tpu.memory_space<vmem>>, vector<2048x16xbf16>
    %c0_1 = arith.constant 0 : index
    %c0_2 = arith.constant 0 : index
    %1 = vector.load %arg2[%c0_1, %c0_2] : memref<16x64xbf16, #tpu.memory_space<vmem>>, vector<16x64xbf16>
    %cst = arith.constant dense<0.000000e+00> : vector<2048x64xf32>
    %2 = tpu.matmul %0, %1, %cst {dimension_numbers = #tpu.dot_dimension_numbers<[1], [0], [0], [1], [0, 0, 1, 1], [], []>} : vector<2048x16xbf16>, vector<16x64xbf16>, vector<2048x64xf32> -> vector<2048x64xf32>
    %c0_3 = arith.constant 0 : index
    %c0_4 = arith.constant 0 : index
    %3 = vector.load %arg3[%c0_3, %c0_4] : memref<1x64xf32, #tpu.memory_space<vmem>>, vector<1x64xf32>
    %4 = vector.broadcast %3 : vector<1x64xf32> to vector<2048x64xf32>
    %5 = arith.addf %2, %4 : vector<2048x64xf32>
    %cst_5 = arith.constant 0.000000e+00 : f32
    %6 = vector.broadcast %cst_5 : f32 to vector<2048x64xf32>
    %7 = arith.maximumf %5, %6 : vector<2048x64xf32>
    %8 = arith.truncf %7 : vector<2048x64xf32> to vector<2048x64xbf16>
    %c0_6 = arith.constant 0 : index
    %c0_7 = arith.constant 0 : index
    %9 = vector.load %arg4[%c0_6, %c0_7] : memref<64x32xbf16, #tpu.memory_space<vmem>>, vector<64x32xbf16>
    %cst_8 = arith.constant dense<0.000000e+00> : vector<2048x32xf32>
    %10 = tpu.matmul %8, %9, %cst_8 {dimension_numbers = #tpu.dot_dimension_numbers<[1], [0], [0], [1], [0, 0, 1, 1], [], []>} : vector<2048x64xbf16>, vector<64x32xbf16>, vector<2048x32xf32> -> vector<2048x32xf32>
    %c0_9 = arith.constant 0 : index
    %c0_10 = arith.constant 0 : index
    %11 = vector.load %arg5[%c0_9, %c0_10] : memref<1x32xf32, #tpu.memory_space<vmem>>, vector<1x32xf32>
    %12 = vector.broadcast %11 : vector<1x32xf32> to vector<2048x32xf32>
    %13 = arith.addf %10, %12 : vector<2048x32xf32>
    %cst_11 = arith.constant 0.000000e+00 : f32
    %14 = vector.broadcast %cst_11 : f32 to vector<2048x32xf32>
    %15 = arith.maximumf %13, %14 : vector<2048x32xf32>
    %c0_12 = arith.constant 0 : index
    %c0_13 = arith.constant 0 : index
    %16 = vector.load %arg6[%c0_12, %c0_13] : memref<1x32xf32, #tpu.memory_space<vmem>>, vector<1x32xf32>
    %17 = vector.broadcast %16 : vector<1x32xf32> to vector<2048x32xf32>
    %18 = arith.mulf %15, %17 : vector<2048x32xf32>
    %cst_14 = arith.constant dense<0.000000e+00> : vector<2048xf32>
    %19 = vector.multi_reduction <add>, %18, %cst_14 [1] : vector<2048x32xf32> to vector<2048xf32>
    %20 = vector.shape_cast %19 : vector<2048xf32> to vector<2048x1xf32>
    %c0_15 = arith.constant 0 : index
    %c0_16 = arith.constant 0 : index
    %21 = vector.load %arg7[%c0_15, %c0_16] : memref<1x1xf32, #tpu.memory_space<vmem>>, vector<1x1xf32>
    %22 = vector.broadcast %21 : vector<1x1xf32> to vector<2048x1xf32>
    %23 = arith.addf %20, %22 : vector<2048x1xf32>
    %24 = vector.shape_cast %23 : vector<2048x1xf32> to vector<16x128xf32>
    %c0_17 = arith.constant 0 : index
    %c0_18 = arith.constant 0 : index
    %25 = vector.load %arg8[%c0_17, %c0_18] : memref<16x128xf32, #tpu.memory_space<vmem>>, vector<16x128xf32>
    tpu.vector_store %arg8[%c0_17, %c0_18], %24 {strides = array<i32>} : memref<16x128xf32, #tpu.memory_space<vmem>>, vector<16x128xf32>,
    return
  }
  func.func @transform_0(%arg0: i32) -> (i32, i32) {
    %c0_i32 = arith.constant 0 : i32
    %c0_i32_0 = arith.constant 0 : i32
    return %arg0, %c0_i32 : i32, i32
  }
  func.func @transform_1(%arg0: i32) -> (i32, i32) {
    %c0_i32 = arith.constant 0 : i32
    %c0_i32_0 = arith.constant 0 : i32
    %c0_i32_1 = arith.constant 0 : i32
    return %c0_i32, %c0_i32_0 : i32, i32
  }
  func.func @transform_2(%arg0: i32) -> (i32, i32) {
    %c0_i32 = arith.constant 0 : i32
    %c0_i32_0 = arith.constant 0 : i32
    %c0_i32_1 = arith.constant 0 : i32
    return %c0_i32, %c0_i32_0 : i32, i32
  }
  func.func @transform_3(%arg0: i32) -> (i32, i32) {
    %c0_i32 = arith.constant 0 : i32
    %c0_i32_0 = arith.constant 0 : i32
    %c0_i32_1 = arith.constant 0 : i32
    return %c0_i32, %c0_i32_0 : i32, i32
  }
  func.func @transform_4(%arg0: i32) -> (i32, i32) {
    %c0_i32 = arith.constant 0 : i32
    %c0_i32_0 = arith.constant 0 : i32
    %c0_i32_1 = arith.constant 0 : i32
    return %c0_i32, %c0_i32_0 : i32, i32
  }
  func.func @transform_5(%arg0: i32) -> (i32, i32) {
    %c0_i32 = arith.constant 0 : i32
    %c0_i32_0 = arith.constant 0 : i32
    %c0_i32_1 = arith.constant 0 : i32
    return %c0_i32, %c0_i32_0 : i32, i32
  }
  func.func @transform_6(%arg0: i32) -> (i32, i32) {
    %c0_i32 = arith.constant 0 : i32
    %c0_i32_0 = arith.constant 0 : i32
    %c0_i32_1 = arith.constant 0 : i32
    return %c0_i32, %c0_i32_0 : i32, i32
  }
  func.func @transform_7(%arg0: i32) -> (i32, i32) {
    %c0_i32 = arith.constant 0 : i32
    %c0_i32_0 = arith.constant 0 : i32
    return %arg0, %c0_i32 : i32, i32
  }
}

</mosaic_0001>

<bundles_post_ra>
// kernel: tpu_custom_call.1
= control target key start
LH: loop header
LB: loop body
LE: loop exit
PB: predicated region body
PF: predicated region fallthrough
CT: control target
= control target key end

     0   :  { %s14208_s0 = inlined_call_operand.vmem [shape: bf16[2304,16], index: 0, kind: input, shape index: {}]   ;;  %s14209_s1 = inlined_call_operand.vmem [shape: bf16[16,64], index: 1, kind: input, shape index: {}]   ;;  %s14210_s2 = inlined_call_operand.vmem [shape: f32[1,64], index: 2, kind: input, shape index: {}]   ;;  %s14211_s3 = inlined_call_operand.vmem [shape: bf16[64,32], index: 3, kind: input, shape index: {}]   ;;  %s14212_s4 = inlined_call_operand.vmem [shape: f32[1,32], index: 4, kind: input, shape index: {}]   ;;  %s14213_s5 = inlined_call_operand.vmem [shape: f32[1,32], index: 5, kind: input, shape index: {}]   ;;  %s14214_s6 = inlined_call_operand.<no memory space> [shape: f32[1,1], index: 6, kind: input, shape index: {}]   ;;  %s14215_s7 = inlined_call_operand.hbm [shape: f32[32,128], index: 7, kind: output, shape index: {}]  }
   0x1   :  { %v12_v0 = vstv %s14214_s6 }
   0x2   :  { %13 = vst [vmem:[#allocation2] sm:$0x1] %v12_v0 }
   0x3   :  { %14 = vsyncpa [#allocation4], 0 }
   0x4   :  { %16 = vsyncpa [#allocation4 + $0x1], 0  ;;  %s9993_s26 = smov 0   ;;  %s9995_s27 = smov 0  }
   0x5   :  { %s9997_s28 = smov 0   ;;  %s9999_s29 = smov 0  }
   0x6 LB: > { %s8492_s6 = sadd.s32 4294967295, %s9944_s29   ;;  %s8493_s30 = sadd.s32 4294967294, %s9944_s29   ;;  %s9944_s29 = sphi %s9999_s29, %s14716_s29   ;;  %s9940_s28 = sphi %s9997_s28, %s14715_s28   ;;  %s9936_s27 = sphi %s9995_s27, %s14714_s27   ;;  %s9932_s26 = sphi %s9993_s26, %s14713_s26  }
   0x7   : > { %s10016_s8 = sadd.s32 1, %s9944_s29   ;;  %s181_s9 = sadd.s32 1, %s9940_s28 }
   0x8   : > { %s178_s10 = ssub.s32 %s9944_s29, %s10016_s8  ;;  %p191_p0 = scmp.ne.s32.totalorder %s9940_s28, %s9936_s27 }
   0x9   : > { %p179_p1 = scmp.eq.s32.totalorder %s178_s10, 0  ;;  %p192_p2 = scmp.eq.s32.totalorder %s8492_s6, 1 }
   0xa   : > { %p197_p3 = scmp.ne.s32.totalorder %s9936_s27, %s9932_s26  ;;  %p198_p4 = scmp.eq.s32.totalorder %s8493_s30, 1 }
   0xb   : > { %s10026_s11 = scalar_select %p179_p1, %s9940_s28, %s181_s9  }
   0xc   : > { %p10028_p5 = por %p192_p2, %p191_p0  ;;  %p10032_p6 = por %p198_p4, %p197_p3 }
   0xd   : > { %p8496_p7 = scmp.ge.s32.totalorder %s9944_s29, 1  ;;  %p251_p8 = scmp.lt.s32.totalorder %s9944_s29, 3 }
   0xf   : > { %p252_p9 = pnand %p8496_p7, %p251_p8 }
  0x11   : > { %255 = sbr.rel (%p252_p9) target bundleno = 3830 (0xef6), region = 48 }
  0x18   : > { %v9726_v1 = vld [vmem:[%s14209_s1] sm:$0xff]   ;;  %s10041_s16 = sshll.u32 %s8492_s6, 8  ;;  %vm14216_vm0 = vcmask 130048   ;;  %v9770_v16 = vld [vmem:[%s14211_s3 + $0x8] sm:$0xff]   ;;  %v9771_v29 = vld [vmem:[%s14211_s3 + $0x10] sm:$0xff]   ;;  %vm14218_vm1 = vcmask 523264  }
  0x19   : > { %p292_p10 = scmp.lt.s32.totalorder %s10041_s16, 287  ;;  %9160 = vmatprep.subr.bf16.mxu0 %v9726_v1  ;;  %v9767_v15 = vld [vmem:[%s14211_s3] sm:$0xff]   ;;  %v9772_v30 = vld [vmem:[%s14211_s3 + $0x18] sm:$0xff]   ;;  %vm14217_vm2 = vcmask 261120   ;;  %vm7107_vm3 = vcmask 130112   ;;  %vm7114_vm4 = vcmask 195712   ;;  %s14156_s20 = scalar_lea.hbm %s14215_s7, %s10041_s16 }
  0x1a   : > { %9161 = vmatpush3.bf16.msra.mxu0 %v9726_v1  ;;  %9418 = vmatprep.subr.bf16.mxu1 %v9767_v15  ;;  %v10157_v52 = vld [vmem:[%s14210_s2] ss:$0 sm:$0xff]  ;;  %vm7121_vm5 = vcmask 261312   ;;  %vm7128_vm6 = vcmask 326912   ;;  %vm7135_vm7 = vcmask 392512   ;;  %vm7142_vm8 = vcmask 458112  }
  0x1b   : > { %s293_s17 = scalar_select %p292_p10, %s10041_s16, 287  ;;  %9419 = vmatpush3.bf16.msra.mxu1 %v9767_v15  ;;  %vm14223_vm9 = vcmask 523712   ;;  %vm14222_vm10 = vcmask 589312   ;;  %vm7163_vm11 = vcmask 654912   ;;  %vm7170_vm12 = vcmask 720512  }
  0x1c   : > { %9420 = vmatprep.subr.bf16.mxu1 %v9770_v16  ;;  %vm7177_vm13 = vcmask 786112   ;;  %vm14227_vm14 = vcmask 851712   ;;  %vm14221_vm15 = vcmask 917312   ;;  %s9947_s16 = smov [#allocation3]  }
  0x1d   : > { %s8499_s18 = sshll.u32 %s293_s17, 2  ;;  %s9886_s24 = sshll.u32 %s9947_s16, 4  ;;  %s9887_s24 = int_to_ptr.vmem [resolvable:$false] %s9886_s24 }
  0x1e   : > { %s10048_s21 = scalar_lea.vmem %s14208_s0, %s8499_s18  ;;  %s9888_s25 = scalar_lea.vmem %s9887_s24, 512 }
  0x1f   : > { %v9727_v2 = vld [vmem:[%s10048_s21] sm:$0xff]   ;;  %v9728_v3 = vld [vmem:[%s10048_s21 + $0x8] sm:$0xff]   ;;  %v9729_v4 = vld [vmem:[%s10048_s21 + $0x10] sm:$0xff]   ;;  %9421 = vmatpush3.bf16.msra.mxu1 %v9770_v16 }
  0x20   : > { %9162 = vmatprep.mubr.msk.bf16.mxu0 %vm14216_vm0, %v9727_v2  ;;  %v9730_v5 = vld [vmem:[%s10048_s21 + $0x18] sm:$0xff]   ;;  %v9731_v6 = vld [vmem:[%s10048_s21 + $0x20] sm:$0xff]   ;;  %v9732_v7 = vld [vmem:[%s10048_s21 + $0x28] sm:$0xff]   ;;  %9422 = vmatprep.subr.bf16.mxu1 %v9771_v29 }
  0x21   : > { %9163 = vmatmul.mubr.msk.bf16.vlgmr.msra.gmra.mrb[0].mxu0 %vm14216_vm0, %v9728_v3  ;;  %v9733_v8 = vld [vmem:[%s10048_s21 + $0x30] sm:$0xff]   ;;  %v9734_v9 = vld [vmem:[%s10048_s21 + $0x38] sm:$0xff]   ;;  %v9735_v10 = vld [vmem:[%s10048_s21 + $0x40] sm:$0xff]  }
  0x22   : > { %9166 = vmatprep.mubr.msk.bf16.mxu0 %vm14216_vm0, %v9729_v4  ;;  %v9736_v11 = vld [vmem:[%s10048_s21 + $0x48] sm:$0xff]   ;;  %v9737_v12 = vld [vmem:[%s10048_s21 + $0x50] sm:$0xff]   ;;  %v9738_v13 = vld [vmem:[%s10048_s21 + $0x58] sm:$0xff]  }
  0x23   : > { %v9739_v14 = vld [vmem:[%s10048_s21 + $0x60] sm:$0xff]   ;;  %v9740_v17 = vld [vmem:[%s10048_s21 + $0x68] sm:$0xff]   ;;  %v9741_v18 = vld [vmem:[%s10048_s21 + $0x70] sm:$0xff]   ;;  %9423 = vmatpush3.bf16.msra.mxu1 %v9771_v29 }
  0x24   : > { %v9742_v19 = vld [vmem:[%s10048_s21 + $0x78] sm:$0xff]   ;;  %v9743_v20 = vld [vmem:[%s10048_s21 + $0x80] sm:$0xff]   ;;  %v9744_v21 = vld [vmem:[%s10048_s21 + $0x88] sm:$0xff]   ;;  %9424 = vmatprep.subr.bf16.mxu1 %v9772_v30 }
  0x25   : > { %v9745_v22 = vld [vmem:[%s10048_s21 + $0x90] sm:$0xff]   ;;  %v9746_v23 = vld [vmem:[%s10048_s21 + $0x98] sm:$0xff]   ;;  %v9747_v24 = vld [vmem:[%s10048_s21 + $0xa0] sm:$0xff]  }
  0x26   : > { %v9748_v25 = vld [vmem:[%s10048_s21 + $0xa8] sm:$0xff]   ;;  %v9749_v26 = vld [vmem:[%s10048_s21 + $0xb0] sm:$0xff]   ;;  %v9750_v27 = vld [vmem:[%s10048_s21 + $0xb8] sm:$0xff]  }
  0x27   : > { %v9751_v28 = vld [vmem:[%s10048_s21 + $0xc0] sm:$0xff]   ;;  %v9752_v31 = vld [vmem:[%s10048_s21 + $0xc8] sm:$0xff]   ;;  %9425 = vmatpush3.bf16.msra.mxu1 %v9772_v30  ;;  %v9753_v32 = vld [vmem:[%s10048_s21 + $0xd0] sm:$0xff]  }
  0x28   : > { %v9754_v33 = vld [vmem:[%s10048_s21 + $0xd8] sm:$0xff]   ;;  %v9755_v34 = vld [vmem:[%s10048_s21 + $0xe0] sm:$0xff]   ;;  %v9756_v35 = vld [vmem:[%s10048_s21 + $0xe8] sm:$0xff]  }
  0x29   : > { %9167 = vmatmul.mubr.msk.bf16.gmra.mrb[4].mxu0 %vm14216_vm0, %v9730_v5  ;;  %v9757_v36 = vld [vmem:[%s10048_s21 + $0xf0] sm:$0xff]   ;;  %v9758_v37 = vld [vmem:[%s10048_s21 + $0xf8] sm:$0xff]   ;;  %v9759_v38 = vld [vmem:[%s10048_s21 + $0x100] sm:$0xff]  }
  0x2a   : > { %9170 = vmatprep.mubr.msk.bf16.mxu0 %vm14216_vm0, %v9731_v6  ;;  %v9760_v39 = vld [vmem:[%s10048_s21 + $0x108] sm:$0xff]   ;;  %v9761_v40 = vld [vmem:[%s10048_s21 + $0x110] sm:$0xff]   ;;  %v9762_v41 = vld [vmem:[%s10048_s21 + $0x118] sm:$0xff]  }
  0x2b   : > { %v9763_v42 = vld [vmem:[%s10048_s21 + $0x120] sm:$0xff]   ;;  %v9764_v43 = vld [vmem:[%s10048_s21 + $0x128] sm:$0xff]   ;;  %v9765_v44 = vld [vmem:[%s10048_s21 + $0x130] sm:$0xff]  }
  0x2c   : > { %v9766_v45 = vld [vmem:[%s10048_s21 + $0x138] sm:$0xff]   ;;  %v9768_v46 = vld [vmem:[%s10048_s21 + $0x140] sm:$0xff]   ;;  %v9769_v47 = vld [vmem:[%s10048_s21 + $0x148] sm:$0xff]  }
  0x2d   : > { %v9773_v48 = vld [vmem:[%s10048_s21 + $0x150] sm:$0xff]   ;;  %v9774_v49 = vld [vmem:[%s10048_s21 + $0x158] sm:$0xff]   ;;  %v9775_v50 = vld [vmem:[%s10048_s21 + $0x160] sm:$0xff]  }
  0x2e   : > { %v9776_v51 = vld [vmem:[%s10048_s21 + $0x168] sm:$0xff]  }
  0x31   : > { %9171 = vmatmul.mubr.msk.bf16.gmra.mrb[8].mxu0 %vm14216_vm0, %v9732_v7 }
  0x32   : > { %9174 = vmatprep.mubr.msk.bf16.mxu0 %vm14216_vm0, %v9733_v8 }
  0x39   : > { %9175 = vmatmul.mubr.msk.bf16.gmra.mrb[12].mxu0 %vm14216_vm0, %v9734_v9 }
  0x3a   : > { %9178 = vmatprep.mubr.msk.bf16.mxu0 %vm14216_vm0, %v9735_v10 }
  0x41   : > { %9179 = vmatmul.mubr.msk.bf16.gmra.mrb[16].mxu0 %vm14216_vm0, %v9736_v11 }
  0x42   : > { %9182 = vmatprep.mubr.msk.bf16.mxu0 %vm14216_vm0, %v9737_v12 }
  0x49   : > { %9183 = vmatmul.mubr.msk.bf16.gmra.mrb[20].mxu0 %vm14216_vm0, %v9738_v13 }
  0x4a   : > { %9186 = vmatprep.mubr.msk.bf16.mxu0 %vm14216_vm0, %v9739_v14 }
  0x51   : > { %9187 = vmatmul.mubr.msk.bf16.gmra.mrb[24].mxu0 %vm14216_vm0, %v9740_v17 }
  0x52   : > { %9190 = vmatprep.mubr.msk.bf16.mxu0 %vm14216_vm0, %v9741_v18 }
  0x59   : > { %9191 = vmatmul.mubr.msk.bf16.gmra.mrb[28].mxu0 %vm14216_vm0, %v9742_v19 }
  0x5a   : > { %9194 = vmatprep.mubr.msk.bf16.mxu0 %vm14216_vm0, %v9743_v20 }
  0x61   : > { %9195 = vmatmul.mubr.msk.bf16.gmra.mrb[32].mxu0 %vm14216_vm0, %v9744_v21 }
  0x62   : > { %9198 = vmatprep.mubr.msk.bf16.mxu0 %vm14216_vm0, %v9745_v22 }
  0x69   : > { %9199 = vmatmul.mubr.msk.bf16.gmra.mrb[36].mxu0 %vm14216_vm0, %v9746_v23 }
  0x6a   : > { %9202 = vmatprep.mubr.msk.bf16.mxu0 %vm14216_vm0, %v9747_v24 }
  0x71   : > { %9203 = vmatmul.mubr.msk.bf16.gmra.mrb[40].mxu0 %vm14216_vm0, %v9748_v25 }
  0x72   : > { %9206 = vmatprep.mubr.msk.bf16.mxu0 %vm14216_vm0, %v9749_v26 }
  0x79   : > { %9207 = vmatmul.mubr.msk.bf16.gmra.mrb[44].mxu0 %vm14216_vm0, %v9750_v27 }
  0x7a   : > { %9210 = vmatprep.mubr.msk.bf16.mxu0 %vm14216_vm0, %v9751_v28 }
  0x81   : > { %9211 = vmatmul.mubr.msk.bf16.gmra.mrb[48].mxu0 %vm14216_vm0, %v9752_v31 }
  0x82   : > { %9214 = vmatprep.mubr.msk.bf16.mxu0 %vm14216_vm0, %v9753_v32 }
  0x89   : > { %9215 = vmatmul.mubr.msk.bf16.gmra.mrb[52].mxu0 %vm14216_vm0, %v9754_v33 }
  0x8a   : > { %9218 = vmatprep.mubr.msk.bf16.mxu0 %vm14216_vm0, %v9755_v34 }
  0x91   : > { %9219 = vmatmul.mubr.msk.bf16.gmra.mrb[56].mxu0 %vm14216_vm0, %v9756_v35 }
  0x92   : > { %9222 = vmatprep.mubr.msk.bf16.mxu0 %vm14216_vm0, %v9757_v36 }
  0x99   : > { %9223 = vmatmul.mubr.msk.bf16.gmra.mrb[60].mxu0 %vm14216_vm0, %v9758_v37 }
  0x9a   : > { %9226 = vmatprep.mubr.msk.bf16.mxu0 %vm14216_vm0, %v9759_v38  ;;  %v9777_v38 = vld [vmem:[%s10048_s21 + $0x170] sm:$0xff]  }
  0xa1   : > { %9227 = vmatmul.mubr.msk.bf16.gmra.mrb[64].mxu0 %vm14216_vm0, %v9760_v39  ;;  %v9778_v39 = vld [vmem:[%s10048_s21 + $0x178] sm:$0xff]  }
  0xa2   : > { %9230 = vmatprep.mubr.msk.bf16.mxu0 %vm14216_vm0, %v9761_v40 }
  0xa9   : > { %9231 = vmatmul.mubr.msk.bf16.gmra.mrb[68].mxu0 %vm14216_vm0, %v9762_v41 }
  0xaa   : > { %9234 = vmatprep.mubr.msk.bf16.mxu0 %vm14216_vm0, %v9763_v42 }
  0xb1   : > { %9235 = vmatmul.mubr.msk.bf16.gmra.mrb[72].mxu0 %vm14216_vm0, %v9764_v43 }
  0xb2   : > { %9238 = vmatprep.mubr.msk.bf16.mxu0 %vm14216_vm0, %v9765_v44 }
  0xb9   : > { %9239 = vmatmul.mubr.msk.bf16.gmra.mrb[76].mxu0 %vm14216_vm0, %v9766_v45 }
  0xba   : > { %9242 = vmatprep.mubr.msk.bf16.mxu0 %vm14216_vm0, %v9768_v46 }
  0xc1   : > { %9243 = vmatmul.mubr.msk.bf16.gmra.mrb[80].mxu0 %vm14216_vm0, %v9769_v47 }
  0xc2   : > { %9246 = vmatprep.mubr.msk.bf16.mxu0 %vm14216_vm0, %v9773_v48 }
  0xc9   : > { %9247 = vmatmul.mubr.msk.bf16.gmra.mrb[84].mxu0 %vm14216_vm0, %v9774_v49 }
  0xca   : > { %9250 = vmatprep.mubr.msk.bf16.mxu0 %vm14216_vm0, %v9775_v50 }
  0xd1   : > { %9251 = vmatmul.mubr.msk.bf16.gmra.mrb[88].mxu0 %vm14216_vm0, %v9776_v51 }
  0xd2   : > { %9254 = vmatprep.mubr.msk.bf16.mxu0 %vm14216_vm0, %v9777_v38 }
  0xd9   : > { %9255 = vmatmul.mubr.msk.bf16.gmra.mrb[92].mxu0 %vm14216_vm0, %v9778_v39 }
  0xf4   : > { %v9164_v53 = vpop.f32.mrb[0].mxu0 }
  0xf5   : > { %v1642_v54 = vadd.f32 %v9164_v53, %v10157_v52  ;;  %v1633_v55 = vpop.f32.mrb[1].mxu0 }
  0xf6   : > { %v1634_v56 = vadd.f32 %v10157_v52, %v1633_v55  ;;  %v9165_v57 = vpop.f32.mrb[2].mxu0 }
  0xf7   : > { %v1645_v58 = vadd.f32 %v9165_v57, %v10157_v52  ;;  %v1636_v59 = vpop.f32.mrb[3].mxu0  ;;  %v2658_v61 = vmax.f32 %v1642_v54, 0.0 }
  0xf8   : > { %v1637_v60 = vadd.f32 %v10157_v52, %v1636_v59  ;;  %v2656_v63 = vmax.f32 %v1634_v56, 0.0 }
  0xf9   : > { %v2659_v62 = vmax.f32 %v1645_v58, 0.0 }
  0xfa   : > { %v2657_v0 = vmax.f32 %v1637_v60, 0.0 }
  0xfb   : > { %v2913_v1 = vpack.c.bf16 %v2659_v62, %v2658_v61 }
  0xfc   : > { %v9168_v2 = vpop.f32.mrb[4].mxu0  ;;  %v2912_v3 = vpack.c.bf16 %v2657_v0, %v2656_v63 }
  0xfd   : > { %v1658_v4 = vadd.f32 %v9168_v2, %v10157_v52  ;;  %v1649_v5 = vpop.f32.mrb[5].mxu0 }
  0xfe   : > { %v1650_v6 = vadd.f32 %v10157_v52, %v1649_v5  ;;  %v9169_v7 = vpop.f32.mrb[6].mxu0  ;;  %9426 = vmatprep.mubr.msk.bf16.mxu1 %vm14218_vm1, %v2912_v3 }
  0xff   : > { %v1661_v8 = vadd.f32 %v9169_v7, %v10157_v52  ;;  %v1652_v9 = vpop.f32.mrb[7].mxu0  ;;  %9427 = vmatmul.mubr.msk.bf16.vlgmr.msra.gmra.mrb[0].mxu1 %vm14218_vm1, %v2913_v1  ;;  %v2662_v11 = vmax.f32 %v1658_v4, 0.0 }
 0x100   : > { %v1653_v10 = vadd.f32 %v10157_v52, %v1652_v9  ;;  %v2660_v13 = vmax.f32 %v1650_v6, 0.0 }
 0x101   : > { %v2663_v12 = vmax.f32 %v1661_v8, 0.0 }
 0x102   : > { %v2661_v14 = vmax.f32 %v1653_v10, 0.0 }
 0x103   : > { %v2915_v15 = vpack.c.bf16 %v2663_v12, %v2662_v11 }
 0x104   : > { %v2914_v16 = vpack.c.bf16 %v2661_v14, %v2660_v13  ;;  %v9172_v17 = vpop.f32.mrb[8].mxu0 }
 0x105   : > { %v1674_v18 = vadd.f32 %v9172_v17, %v10157_v52  ;;  %v1665_v19 = vpop.f32.mrb[9].mxu0 }
 0x106   : > { %v1666_v20 = vadd.f32 %v10157_v52, %v1665_v19  ;;  %v9173_v21 = vpop.f32.mrb[10].mxu0  ;;  %9430 = vmatprep.mubr.msk.bf16.mxu1 %vm14218_vm1, %v2914_v16 }
 0x107   : > { %v1677_v22 = vadd.f32 %v9173_v21, %v10157_v52  ;;  %v1668_v23 = vpop.f32.mrb[11].mxu0  ;;  %9431 = vmatmul.mubr.msk.bf16.gmra.mrb[4].mxu1 %vm14218_vm1, %v2915_v15  ;;  %v2666_v25 = vmax.f32 %v1674_v18, 0.0 }
 0x108   : > { %v1669_v24 = vadd.f32 %v10157_v52, %v1668_v23  ;;  %v2664_v27 = vmax.f32 %v1666_v20, 0.0 }
 0x109   : > { %v2667_v26 = vmax.f32 %v1677_v22, 0.0 }
 0x10a   : > { %v2665_v28 = vmax.f32 %v1669_v24, 0.0 }
 0x10b   : > { %v2917_v29 = vpack.c.bf16 %v2667_v26, %v2666_v25 }
 0x10c   : > { %v2916_v30 = vpack.c.bf16 %v2665_v28, %v2664_v27  ;;  %v9176_v31 = vpop.f32.mrb[12].mxu0 }
 0x10d   : > { %v1690_v32 = vadd.f32 %v9176_v31, %v10157_v52  ;;  %v1681_v33 = vpop.f32.mrb[13].mxu0 }
 0x10e   : > { %v1682_v34 = vadd.f32 %v10157_v52, %v1681_v33  ;;  %v9177_v35 = vpop.f32.mrb[14].mxu0  ;;  %9434 = vmatprep.mubr.msk.bf16.mxu1 %vm14218_vm1, %v2916_v30 }
 0x10f   : > { %v1693_v36 = vadd.f32 %v9177_v35, %v10157_v52  ;;  %v1684_v37 = vpop.f32.mrb[15].mxu0  ;;  %9435 = vmatmul.mubr.msk.bf16.gmra.mrb[8].mxu1 %vm14218_vm1, %v2917_v29  ;;  %v2670_v41 = vmax.f32 %v1690_v32, 0.0 }
 0x110   : > { %v1685_v40 = vadd.f32 %v10157_v52, %v1684_v37  ;;  %v2668_v43 = vmax.f32 %v1682_v34, 0.0 }
 0x111   : > { %v2671_v42 = vmax.f32 %v1693_v36, 0.0 }
 0x112   : > { %v2669_v44 = vmax.f32 %v1685_v40, 0.0 }
 0x113   : > { %v2919_v45 = vpack.c.bf16 %v2671_v42, %v2670_v41 }
 0x114   : > { %v2918_v46 = vpack.c.bf16 %v2669_v44, %v2668_v43  ;;  %v9180_v47 = vpop.f32.mrb[16].mxu0 }
 0x115   : > { %v1706_v48 = vadd.f32 %v9180_v47, %v10157_v52  ;;  %v1697_v49 = vpop.f32.mrb[17].mxu0 }
 0x116   : > { %v1698_v50 = vadd.f32 %v10157_v52, %v1697_v49  ;;  %v9181_v51 = vpop.f32.mrb[18].mxu0  ;;  %9438 = vmatprep.mubr.msk.bf16.mxu1 %vm14218_vm1, %v2918_v46 }
 0x117   : > { %v1709_v53 = vadd.f32 %v9181_v51, %v10157_v52  ;;  %v1700_v54 = vpop.f32.mrb[19].mxu0  ;;  %9439 = vmatmul.mubr.msk.bf16.gmra.mrb[12].mxu1 %vm14218_vm1, %v2919_v45  ;;  %v2674_v56 = vmax.f32 %v1706_v48, 0.0 }
 0x118   : > { %v1701_v55 = vadd.f32 %v10157_v52, %v1700_v54  ;;  %v2672_v58 = vmax.f32 %v1698_v50, 0.0 }
 0x119   : > { %v2675_v57 = vmax.f32 %v1709_v53, 0.0 }
 0x11a   : > { %v2673_v59 = vmax.f32 %v1701_v55, 0.0 }
 0x11b   : > { %v2921_v60 = vpack.c.bf16 %v2675_v57, %v2674_v56 }
 0x11c   : > { %v2920_v61 = vpack.c.bf16 %v2673_v59, %v2672_v58  ;;  %v9184_v62 = vpop.f32.mrb[20].mxu0 }
 0x11d   : > { %v1722_v63 = vadd.f32 %v9184_v62, %v10157_v52  ;;  %v1713_v0 = vpop.f32.mrb[21].mxu0 }
 0x11e   : > { %v1714_v1 = vadd.f32 %v10157_v52, %v1713_v0  ;;  %v9185_v2 = vpop.f32.mrb[22].mxu0  ;;  %9442 = vmatprep.mubr.msk.bf16.mxu1 %vm14218_vm1, %v2920_v61 }
 0x11f   : > { %v1725_v3 = vadd.f32 %v9185_v2, %v10157_v52  ;;  %v1716_v4 = vpop.f32.mrb[23].mxu0  ;;  %9443 = vmatmul.mubr.msk.bf16.gmra.mrb[16].mxu1 %vm14218_vm1, %v2921_v60  ;;  %v2678_v6 = vmax.f32 %v1722_v63, 0.0 }
 0x120   : > { %v1717_v5 = vadd.f32 %v10157_v52, %v1716_v4  ;;  %v2676_v8 = vmax.f32 %v1714_v1, 0.0 }
 0x121   : > { %v2679_v7 = vmax.f32 %v1725_v3, 0.0 }
 0x122   : > { %v2677_v9 = vmax.f32 %v1717_v5, 0.0 }
 0x123   : > { %v2923_v10 = vpack.c.bf16 %v2679_v7, %v2678_v6 }
 0x124   : > { %v2922_v11 = vpack.c.bf16 %v2677_v9, %v2676_v8  ;;  %v9188_v12 = vpop.f32.mrb[24].mxu0 }
 0x125   : > { %v1738_v13 = vadd.f32 %v9188_v12, %v10157_v52  ;;  %v1729_v14 = vpop.f32.mrb[25].mxu0 }
 0x126   : > { %v1730_v15 = vadd.f32 %v10157_v52, %v1729_v14  ;;  %v9189_v16 = vpop.f32.mrb[26].mxu0  ;;  %9446 = vmatprep.mubr.msk.bf16.mxu1 %vm14218_vm1, %v2922_v11 }
 0x127   : > { %v1741_v17 = vadd.f32 %v9189_v16, %v10157_v52  ;;  %v1732_v18 = vpop.f32.mrb[27].mxu0  ;;  %9447 = vmatmul.mubr.msk.bf16.gmra.mrb[20].mxu1 %vm14218_vm1, %v2923_v10  ;;  %v2682_v20 = vmax.f32 %v1738_v13, 0.0 }
 0x128   : > { %v1733_v19 = vadd.f32 %v10157_v52, %v1732_v18  ;;  %v2680_v22 = vmax.f32 %v1730_v15, 0.0 }
 0x129   : > { %v2683_v21 = vmax.f32 %v1741_v17, 0.0 }
 0x12a   : > { %v2681_v23 = vmax.f32 %v1733_v19, 0.0 }
 0x12b   : > { %v2925_v24 = vpack.c.bf16 %v2683_v21, %v2682_v20 }
 0x12c   : > { %v2924_v25 = vpack.c.bf16 %v2681_v23, %v2680_v22  ;;  %v9192_v26 = vpop.f32.mrb[28].mxu0 }
 0x12d   : > { %v1754_v27 = vadd.f32 %v9192_v26, %v10157_v52  ;;  %v1745_v28 = vpop.f32.mrb[29].mxu0 }
 0x12e   : > { %v1746_v29 = vadd.f32 %v10157_v52, %v1745_v28  ;;  %v9193_v30 = vpop.f32.mrb[30].mxu0  ;;  %9450 = vmatprep.mubr.msk.bf16.mxu1 %vm14218_vm1, %v2924_v25 }
 0x12f   : > { %v1757_v31 = vadd.f32 %v9193_v30, %v10157_v52  ;;  %v1748_v32 = vpop.f32.mrb[31].mxu0  ;;  %9451 = vmatmul.mubr.msk.bf16.gmra.mrb[24].mxu1 %vm14218_vm1, %v2925_v24  ;;  %v2686_v34 = vmax.f32 %v1754_v27, 0.0 }
 0x130   : > { %v1749_v33 = vadd.f32 %v10157_v52, %v1748_v32  ;;  %v2684_v36 = vmax.f32 %v1746_v29, 0.0 }
 0x131   : > { %v2687_v35 = vmax.f32 %v1757_v31, 0.0 }
 0x132   : > { %v2685_v37 = vmax.f32 %v1749_v33, 0.0 }
 0x133   : > { %v2927_v38 = vpack.c.bf16 %v2687_v35, %v2686_v34 }
 0x134   : > { %v2926_v39 = vpack.c.bf16 %v2685_v37, %v2684_v36  ;;  %v9196_v40 = vpop.f32.mrb[32].mxu0 }
 0x135   : > { %v1770_v41 = vadd.f32 %v9196_v40, %v10157_v52  ;;  %v1761_v42 = vpop.f32.mrb[33].mxu0 }
 0x136   : > { %v1762_v43 = vadd.f32 %v10157_v52, %v1761_v42  ;;  %v9197_v44 = vpop.f32.mrb[34].mxu0  ;;  %9454 = vmatprep.mubr.msk.bf16.mxu1 %vm14218_vm1, %v2926_v39 }
 0x137   : > { %v1773_v45 = vadd.f32 %v9197_v44, %v10157_v52  ;;  %v1764_v46 = vpop.f32.mrb[35].mxu0  ;;  %9455 = vmatmul.mubr.msk.bf16.gmra.mrb[28].mxu1 %vm14218_vm1, %v2927_v38  ;;  %v2690_v48 = vmax.f32 %v1770_v41, 0.0 }
 0x138   : > { %v1765_v47 = vadd.f32 %v10157_v52, %v1764_v46  ;;  %v2688_v50 = vmax.f32 %v1762_v43, 0.0 }
 0x139   : > { %v2691_v49 = vmax.f32 %v1773_v45, 0.0 }
 0x13a   : > { %v2689_v51 = vmax.f32 %v1765_v47, 0.0 }
 0x13b   : > { %v2929_v53 = vpack.c.bf16 %v2691_v49, %v2690_v48 }
 0x13c   : > { %v2928_v54 = vpack.c.bf16 %v2689_v51, %v2688_v50  ;;  %v9200_v55 = vpop.f32.mrb[36].mxu0 }
 0x13d   : > { %v1786_v56 = vadd.f32 %v9200_v55, %v10157_v52  ;;  %v1777_v57 = vpop.f32.mrb[37].mxu0 }
 0x13e   : > { %v1778_v58 = vadd.f32 %v10157_v52, %v1777_v57  ;;  %v9201_v59 = vpop.f32.mrb[38].mxu0  ;;  %9458 = vmatprep.mubr.msk.bf16.mxu1 %vm14218_vm1, %v2928_v54 }
 0x13f   : > { %v1789_v60 = vadd.f32 %v9201_v59, %v10157_v52  ;;  %v1780_v61 = vpop.f32.mrb[39].mxu0  ;;  %9459 = vmatmul.mubr.msk.bf16.gmra.mrb[32].mxu1 %vm14218_vm1, %v2929_v53  ;;  %v2694_v63 = vmax.f32 %v1786_v56, 0.0 }
 0x140   : > { %v1781_v62 = vadd.f32 %v10157_v52, %v1780_v61  ;;  %v2692_v1 = vmax.f32 %v1778_v58, 0.0 }
 0x141   : > { %v2695_v0 = vmax.f32 %v1789_v60, 0.0 }
 0x142   : > { %v2693_v2 = vmax.f32 %v1781_v62, 0.0 }
 0x143   : > { %v2931_v3 = vpack.c.bf16 %v2695_v0, %v2694_v63  ;;  %v9779_v63 = vld [vmem:[%s10048_s21 + $0x180] sm:$0xff]  }
 0x144   : > { %v2930_v4 = vpack.c.bf16 %v2693_v2, %v2692_v1  ;;  %v9204_v5 = vpop.f32.mrb[40].mxu0  ;;  %v9780_v2 = vld [vmem:[%s10048_s21 + $0x188] sm:$0xff]   ;;  %9258 = vmatprep.mubr.msk.bf16.mxu0 %vm14216_vm0, %v9779_v63 }
 0x145   : > { %v1802_v6 = vadd.f32 %v9204_v5, %v10157_v52  ;;  %v1793_v7 = vpop.f32.mrb[41].mxu0  ;;  %9259 = vmatmul.mubr.msk.bf16.gmra.mrb[96].mxu0 %vm14216_vm0, %v9780_v2 }
 0x146   : > { %v1794_v8 = vadd.f32 %v10157_v52, %v1793_v7  ;;  %v9205_v9 = vpop.f32.mrb[42].mxu0  ;;  %9462 = vmatprep.mubr.msk.bf16.mxu1 %vm14218_vm1, %v2930_v4 }
 0x147   : > { %v1805_v10 = vadd.f32 %v9205_v9, %v10157_v52  ;;  %v1796_v11 = vpop.f32.mrb[43].mxu0  ;;  %9463 = vmatmul.mubr.msk.bf16.gmra.mrb[36].mxu1 %vm14218_vm1, %v2931_v3  ;;  %v2698_v13 = vmax.f32 %v1802_v6, 0.0 }
 0x148   : > { %v1797_v12 = vadd.f32 %v10157_v52, %v1796_v11  ;;  %v2696_v15 = vmax.f32 %v1794_v8, 0.0 }
 0x149   : > { %v2699_v14 = vmax.f32 %v1805_v10, 0.0 }
 0x14a   : > { %v2697_v16 = vmax.f32 %v1797_v12, 0.0 }
 0x14b   : > { %v2933_v17 = vpack.c.bf16 %v2699_v14, %v2698_v13 }
 0x14c   : > { %v2932_v18 = vpack.c.bf16 %v2697_v16, %v2696_v15  ;;  %v9208_v19 = vpop.f32.mrb[44].mxu0 }
 0x14d   : > { %v1818_v20 = vadd.f32 %v9208_v19, %v10157_v52  ;;  %v1809_v21 = vpop.f32.mrb[45].mxu0 }
 0x14e   : > { %v1810_v22 = vadd.f32 %v10157_v52, %v1809_v21  ;;  %v9209_v23 = vpop.f32.mrb[46].mxu0  ;;  %9466 = vmatprep.mubr.msk.bf16.mxu1 %vm14218_vm1, %v2932_v18 }
 0x14f   : > { %v1821_v24 = vadd.f32 %v9209_v23, %v10157_v52  ;;  %v1812_v25 = vpop.f32.mrb[47].mxu0  ;;  %9467 = vmatmul.mubr.msk.bf16.gmra.mrb[40].mxu1 %vm14218_vm1, %v2933_v17  ;;  %v2702_v27 = vmax.f32 %v1818_v20, 0.0 }
 0x150   : > { %v1813_v26 = vadd.f32 %v10157_v52, %v1812_v25  ;;  %v2700_v29 = vmax.f32 %v1810_v22, 0.0 }
 0x151   : > { %v2703_v28 = vmax.f32 %v1821_v24, 0.0 }
 0x152   : > { %v2701_v30 = vmax.f32 %v1813_v26, 0.0 }
 0x153   : > { %v2935_v31 = vpack.c.bf16 %v2703_v28, %v2702_v27 }
 0x154   : > { %v2934_v32 = vpack.c.bf16 %v2701_v30, %v2700_v29  ;;  %v9212_v33 = vpop.f32.mrb[48].mxu0 }
 0x155   : > { %v1834_v34 = vadd.f32 %v9212_v33, %v10157_v52  ;;  %v1825_v35 = vpop.f32.mrb[49].mxu0 }
 0x156   : > { %v1826_v36 = vadd.f32 %v10157_v52, %v1825_v35  ;;  %v9213_v37 = vpop.f32.mrb[50].mxu0  ;;  %9470 = vmatprep.mubr.msk.bf16.mxu1 %vm14218_vm1, %v2934_v32 }
 0x157   : > { %v1837_v38 = vadd.f32 %v9213_v37, %v10157_v52  ;;  %v1828_v39 = vpop.f32.mrb[51].mxu0  ;;  %9471 = vmatmul.mubr.msk.bf16.gmra.mrb[44].mxu1 %vm14218_vm1, %v2935_v31  ;;  %v2706_v41 = vmax.f32 %v1834_v34, 0.0 }
 0x158   : > { %v1829_v40 = vadd.f32 %v10157_v52, %v1828_v39  ;;  %v2704_v43 = vmax.f32 %v1826_v36, 0.0 }
 0x159   : > { %v2707_v42 = vmax.f32 %v1837_v38, 0.0 }
 0x15a   : > { %v2705_v44 = vmax.f32 %v1829_v40, 0.0 }
 0x15b   : > { %v2937_v45 = vpack.c.bf16 %v2707_v42, %v2706_v41 }
 0x15c   : > { %v2936_v46 = vpack.c.bf16 %v2705_v44, %v2704_v43  ;;  %v9216_v47 = vpop.f32.mrb[52].mxu0 }
 0x15d   : > { %v1850_v48 = vadd.f32 %v9216_v47, %v10157_v52  ;;  %v1841_v49 = vpop.f32.mrb[53].mxu0 }
 0x15e   : > { %v1842_v50 = vadd.f32 %v10157_v52, %v1841_v49  ;;  %v9217_v51 = vpop.f32.mrb[54].mxu0  ;;  %9474 = vmatprep.mubr.msk.bf16.mxu1 %vm14218_vm1, %v2936_v46 }
 0x15f   : > { %v1853_v53 = vadd.f32 %v9217_v51, %v10157_v52  ;;  %v1844_v54 = vpop.f32.mrb[55].mxu0  ;;  %9475 = vmatmul.mubr.msk.bf16.gmra.mrb[48].mxu1 %vm14218_vm1, %v2937_v45  ;;  %v2710_v56 = vmax.f32 %v1850_v48, 0.0 }
 0x160   : > { %v1845_v55 = vadd.f32 %v10157_v52, %v1844_v54  ;;  %v2708_v58 = vmax.f32 %v1842_v50, 0.0 }
 0x161   : > { %v2711_v57 = vmax.f32 %v1853_v53, 0.0 }
 0x162   : > { %v2709_v59 = vmax.f32 %v1845_v55, 0.0 }
 0x163   : > { %v2939_v60 = vpack.c.bf16 %v2711_v57, %v2710_v56 }
 0x164   : > { %v2938_v61 = vpack.c.bf16 %v2709_v59, %v2708_v58  ;;  %v9220_v62 = vpop.f32.mrb[56].mxu0 }
 0x165   : > { %v1866_v0 = vadd.f32 %v9220_v62, %v10157_v52  ;;  %v1857_v1 = vpop.f32.mrb[57].mxu0 }
 0x166   : > { %v1858_v3 = vadd.f32 %v10157_v52, %v1857_v1  ;;  %v9221_v4 = vpop.f32.mrb[58].mxu0  ;;  %9478 = vmatprep.mubr.msk.bf16.mxu1 %vm14218_vm1, %v2938_v61 }
 0x167   : > { %v1869_v5 = vadd.f32 %v9221_v4, %v10157_v52  ;;  %v1860_v6 = vpop.f32.mrb[59].mxu0  ;;  %9479 = vmatmul.mubr.msk.bf16.gmra.mrb[52].mxu1 %vm14218_vm1, %v2939_v60  ;;  %v2714_v8 = vmax.f32 %v1866_v0, 0.0 }
 0x168   : > { %v1861_v7 = vadd.f32 %v10157_v52, %v1860_v6  ;;  %v2712_v10 = vmax.f32 %v1858_v3, 0.0 }
 0x169   : > { %v2715_v9 = vmax.f32 %v1869_v5, 0.0 }
 0x16a   : > { %v2713_v11 = vmax.f32 %v1861_v7, 0.0 }
 0x16b   : > { %v2941_v12 = vpack.c.bf16 %v2715_v9, %v2714_v8 }
 0x16c   : > { %v2940_v13 = vpack.c.bf16 %v2713_v11, %v2712_v10  ;;  %v9224_v14 = vpop.f32.mrb[60].mxu0 }
 0x16d   : > { %v1882_v15 = vadd.f32 %v9224_v14, %v10157_v52  ;;  %v1873_v16 = vpop.f32.mrb[61].mxu0 }
 0x16e   : > { %v1874_v17 = vadd.f32 %v10157_v52, %v1873_v16  ;;  %v9225_v18 = vpop.f32.mrb[62].mxu0  ;;  %9482 = vmatprep.mubr.msk.bf16.mxu1 %vm14218_vm1, %v2940_v13 }
 0x16f   : > { %v1885_v19 = vadd.f32 %v9225_v18, %v10157_v52  ;;  %v1876_v20 = vpop.f32.mrb[63].mxu0  ;;  %9483 = vmatmul.mubr.msk.bf16.gmra.mrb[56].mxu1 %vm14218_vm1, %v2941_v12  ;;  %v2718_v22 = vmax.f32 %v1882_v15, 0.0 }
 0x170   : > { %v1877_v21 = vadd.f32 %v10157_v52, %v1876_v20  ;;  %v2716_v24 = vmax.f32 %v1874_v17, 0.0 }
 0x171   : > { %v2719_v23 = vmax.f32 %v1885_v19, 0.0 }
 0x172   : > { %v2717_v25 = vmax.f32 %v1877_v21, 0.0 }
 0x173   : > { %v2943_v26 = vpack.c.bf16 %v2719_v23, %v2718_v22 }
 0x174   : > { %v2942_v27 = vpack.c.bf16 %v2717_v25, %v2716_v24  ;;  %v9228_v28 = vpop.f32.mrb[64].mxu0 }
 0x175   : > { %v1898_v29 = vadd.f32 %v9228_v28, %v10157_v52  ;;  %v1889_v30 = vpop.f32.mrb[65].mxu0 }
 0x176   : > { %v1890_v31 = vadd.f32 %v10157_v52, %v1889_v30  ;;  %v9229_v32 = vpop.f32.mrb[66].mxu0  ;;  %9486 = vmatprep.mubr.msk.bf16.mxu1 %vm14218_vm1, %v2942_v27 }
 0x177   : > { %v1901_v33 = vadd.f32 %v9229_v32, %v10157_v52  ;;  %v1892_v34 = vpop.f32.mrb[67].mxu0  ;;  %9487 = vmatmul.mubr.msk.bf16.gmra.mrb[60].mxu1 %vm14218_vm1, %v2943_v26  ;;  %v2722_v36 = vmax.f32 %v1898_v29, 0.0 }
 0x178   : > { %v1893_v35 = vadd.f32 %v10157_v52, %v1892_v34  ;;  %v2720_v38 = vmax.f32 %v1890_v31, 0.0 }
 0x179   : > { %v2723_v37 = vmax.f32 %v1901_v33, 0.0 }
 0x17a   : > { %v2721_v39 = vmax.f32 %v1893_v35, 0.0 }
 0x17b   : > { %v2945_v40 = vpack.c.bf16 %v2723_v37, %v2722_v36 }
 0x17c   : > { %v2944_v41 = vpack.c.bf16 %v2721_v39, %v2720_v38  ;;  %v9232_v42 = vpop.f32.mrb[68].mxu0 }
 0x17d   : > { %v1914_v43 = vadd.f32 %v9232_v42, %v10157_v52  ;;  %v1905_v44 = vpop.f32.mrb[69].mxu0 }
 0x17e   : > { %v1906_v45 = vadd.f32 %v10157_v52, %v1905_v44  ;;  %v9233_v46 = vpop.f32.mrb[70].mxu0  ;;  %9490 = vmatprep.mubr.msk.bf16.mxu1 %vm14218_vm1, %v2944_v41 }
 0x17f   : > { %v1917_v47 = vadd.f32 %v9233_v46, %v10157_v52  ;;  %v1908_v48 = vpop.f32.mrb[71].mxu0  ;;  %9491 = vmatmul.mubr.msk.bf16.gmra.mrb[64].mxu1 %vm14218_vm1, %v2945_v40  ;;  %v2726_v50 = vmax.f32 %v1914_v43, 0.0  ;;  %v9781_v46 = vld [vmem:[%s10048_s21 + $0x190] sm:$0xff]  }
 0x180   : > { %v1909_v49 = vadd.f32 %v10157_v52, %v1908_v48  ;;  %v2724_v53 = vmax.f32 %v1906_v45, 0.0  ;;  %v9782_v48 = vld [vmem:[%s10048_s21 + $0x198] sm:$0xff]   ;;  %9262 = vmatprep.mubr.msk.bf16.mxu0 %vm14216_vm0, %v9781_v46 }
 0x181   : > { %v2727_v51 = vmax.f32 %v1917_v47, 0.0  ;;  %9263 = vmatmul.mubr.msk.bf16.gmra.mrb[100].mxu0 %vm14216_vm0, %v9782_v48 }
 0x182   : > { %v2725_v54 = vmax.f32 %v1909_v49, 0.0 }
 0x183   : > { %v2947_v55 = vpack.c.bf16 %v2727_v51, %v2726_v50 }
 0x184   : > { %v2946_v56 = vpack.c.bf16 %v2725_v54, %v2724_v53  ;;  %v9236_v57 = vpop.f32.mrb[72].mxu0 }
 0x185   : > { %v1930_v58 = vadd.f32 %v9236_v57, %v10157_v52  ;;  %v1921_v59 = vpop.f32.mrb[73].mxu0 }
 0x186   : > { %v1922_v60 = vadd.f32 %v10157_v52, %v1921_v59  ;;  %9494 = vmatprep.mubr.msk.bf16.mxu1 %vm14218_vm1, %v2946_v56  ;;  %v9237_v61 = vpop.f32.mrb[74].mxu0 }
 0x187   : > { %v2730_v62 = vmax.f32 %v1930_v58, 0.0  ;;  %v1933_v63 = vadd.f32 %v9237_v61, %v10157_v52  ;;  %9495 = vmatmul.mubr.msk.bf16.gmra.mrb[68].mxu1 %vm14218_vm1, %v2947_v55  ;;  %v1924_v0 = vpop.f32.mrb[75].mxu0 }
 0x188   : > { %v2728_v1 = vmax.f32 %v1922_v60, 0.0  ;;  %v1925_v2 = vadd.f32 %v10157_v52, %v1924_v0 }
 0x189   : > { %v2731_v3 = vmax.f32 %v1933_v63, 0.0 }
 0x18a   : > { %v2729_v4 = vmax.f32 %v1925_v2, 0.0  ;;  %v10312_v2 = vld [vmem:[%s14212_s4] ss:$0 sm:$0xff] }
 0x18b   : > { %v2949_v5 = vpack.c.bf16 %v2731_v3, %v2730_v62 }
 0x18c   : > { %v2948_v6 = vpack.c.bf16 %v2729_v4, %v2728_v1  ;;  %v9240_v7 = vpop.f32.mrb[76].mxu0 }
 0x18d   : > { %v1946_v8 = vadd.f32 %v9240_v7, %v10157_v52  ;;  %v1937_v9 = vpop.f32.mrb[77].mxu0  ;;  %v10319_v7 = vld [vmem:[%s14213_s5] ss:$0 sm:$0xff] }
 0x18e   : > { %9498 = vmatprep.mubr.msk.bf16.mxu1 %vm14218_vm1, %v2948_v6  ;;  %v1938_v10 = vadd.f32 %v10157_v52, %v1937_v9  ;;  %v9241_v11 = vpop.f32.mrb[78].mxu0 }
 0x18f   : > { %9499 = vmatmul.mubr.msk.bf16.gmra.mrb[72].mxu1 %vm14218_vm1, %v2949_v5  ;;  %v2734_v12 = vmax.f32 %v1946_v8, 0.0  ;;  %v1949_v13 = vadd.f32 %v9241_v11, %v10157_v52  ;;  %v1940_v14 = vpop.f32.mrb[79].mxu0 }
 0x190   : > { %v2732_v15 = vmax.f32 %v1938_v10, 0.0  ;;  %v1941_v16 = vadd.f32 %v10157_v52, %v1940_v14 }
 0x191   : > { %v2735_v17 = vmax.f32 %v1949_v13, 0.0 }
 0x192   : > { %v2733_v18 = vmax.f32 %v1941_v16, 0.0 }
 0x193   : > { %v2951_v19 = vpack.c.bf16 %v2735_v17, %v2734_v12 }
 0x194   : > { %v2950_v20 = vpack.c.bf16 %v2733_v18, %v2732_v15  ;;  %v9244_v21 = vpop.f32.mrb[80].mxu0 }
 0x195   : > { %v1962_v22 = vadd.f32 %v9244_v21, %v10157_v52  ;;  %v1953_v23 = vpop.f32.mrb[81].mxu0 }
 0x196   : > { %v1954_v24 = vadd.f32 %v10157_v52, %v1953_v23  ;;  %v9245_v25 = vpop.f32.mrb[82].mxu0  ;;  %9502 = vmatprep.mubr.msk.bf16.mxu1 %vm14218_vm1, %v2950_v20 }
 0x197   : > { %v2738_v26 = vmax.f32 %v1962_v22, 0.0  ;;  %v1965_v27 = vadd.f32 %v9245_v25, %v10157_v52  ;;  %v1956_v28 = vpop.f32.mrb[83].mxu0  ;;  %9503 = vmatmul.mubr.msk.bf16.gmra.mrb[76].mxu1 %vm14218_vm1, %v2951_v19 }
 0x198   : > { %v2736_v29 = vmax.f32 %v1954_v24, 0.0  ;;  %v1957_v30 = vadd.f32 %v10157_v52, %v1956_v28 }
 0x199   : > { %v2739_v31 = vmax.f32 %v1965_v27, 0.0 }
 0x19a   : > { %v2737_v32 = vmax.f32 %v1957_v30, 0.0 }
 0x19b   : > { %v2953_v33 = vpack.c.bf16 %v2739_v31, %v2738_v26 }
 0x19c   : > { %v2952_v34 = vpack.c.bf16 %v2737_v32, %v2736_v29  ;;  %v9248_v35 = vpop.f32.mrb[84].mxu0 }
 0x19d   : > { %v1978_v36 = vadd.f32 %v9248_v35, %v10157_v52  ;;  %v1969_v37 = vpop.f32.mrb[85].mxu0 }
 0x19e   : > { %9506 = vmatprep.mubr.msk.bf16.mxu1 %vm14218_vm1, %v2952_v34  ;;  %v1970_v38 = vadd.f32 %v10157_v52, %v1969_v37  ;;  %v9249_v39 = vpop.f32.mrb[86].mxu0 }
 0x19f   : > { %9507 = vmatmul.mubr.msk.bf16.gmra.mrb[80].mxu1 %vm14218_vm1, %v2953_v33  ;;  %v2742_v40 = vmax.f32 %v1978_v36, 0.0  ;;  %v1981_v41 = vadd.f32 %v9249_v39, %v10157_v52  ;;  %v1972_v42 = vpop.f32.mrb[87].mxu0  ;;  %v9783_v33 = vld [vmem:[%s10048_s21 + $0x1a0] sm:$0xff]   ;;  %v9784_v36 = vld [vmem:[%s10048_s21 + $0x1a8] sm:$0xff]  }
 0x1a0   : > { %v2740_v43 = vmax.f32 %v1970_v38, 0.0  ;;  %v1973_v44 = vadd.f32 %v10157_v52, %v1972_v42  ;;  %9266 = vmatprep.mubr.msk.bf16.mxu0 %vm14216_vm0, %v9783_v33 }
 0x1a1   : > { %v2743_v45 = vmax.f32 %v1981_v41, 0.0  ;;  %9267 = vmatmul.mubr.msk.bf16.gmra.mrb[104].mxu0 %vm14216_vm0, %v9784_v36 }
 0x1a2   : > { %v2741_v47 = vmax.f32 %v1973_v44, 0.0 }
 0x1a3   : > { %v2955_v49 = vpack.c.bf16 %v2743_v45, %v2742_v40 }
 0x1a4   : > { %v2954_v50 = vpack.c.bf16 %v2741_v47, %v2740_v43  ;;  %v9252_v51 = vpop.f32.mrb[88].mxu0 }
 0x1a5   : > { %v1994_v53 = vadd.f32 %v9252_v51, %v10157_v52  ;;  %v1985_v54 = vpop.f32.mrb[89].mxu0 }
 0x1a6   : > { %9510 = vmatprep.mubr.msk.bf16.mxu1 %vm14218_vm1, %v2954_v50  ;;  %v1986_v55 = vadd.f32 %v10157_v52, %v1985_v54  ;;  %v9253_v56 = vpop.f32.mrb[90].mxu0 }
 0x1a7   : > { %9511 = vmatmul.mubr.msk.bf16.gmra.mrb[84].mxu1 %vm14218_vm1, %v2955_v49  ;;  %v2746_v57 = vmax.f32 %v1994_v53, 0.0  ;;  %v1997_v58 = vadd.f32 %v9253_v56, %v10157_v52  ;;  %v1988_v59 = vpop.f32.mrb[91].mxu0 }
 0x1a8   : > { %v2744_v60 = vmax.f32 %v1986_v55, 0.0  ;;  %v1989_v61 = vadd.f32 %v10157_v52, %v1988_v59 }
 0x1a9   : > { %v2747_v62 = vmax.f32 %v1997_v58, 0.0 }
 0x1aa   : > { %v2745_v63 = vmax.f32 %v1989_v61, 0.0 }
 0x1ab   : > { %v2957_v0 = vpack.c.bf16 %v2747_v62, %v2746_v57 }
 0x1ac   : > { %v2956_v1 = vpack.c.bf16 %v2745_v63, %v2744_v60 }
 0x1ae   : > { %9514 = vmatprep.mubr.msk.bf16.mxu1 %vm14218_vm1, %v2956_v1 }
 0x1af   : > { %9515 = vmatmul.mubr.msk.bf16.gmra.mrb[88].mxu1 %vm14218_vm1, %v2957_v0 }
 0x1d2   : > { %v9428_v3 = vpop.f32.mrb[0].mxu1 }
 0x1d3   : > { %v3507_v4 = vadd.f32 %v9428_v3, %v10312_v2  ;;  %v3498_v5 = vpop.f32.mrb[1].mxu1 }
 0x1d4   : > { %v3499_v6 = vadd.f32 %v10312_v2, %v3498_v5  ;;  %v9429_v52 = vpop.f32.mrb[2].mxu1 }
 0x1d5   : > { %v4523_v8 = vmax.f32 %v3507_v4, 0.0  ;;  %v3510_v9 = vadd.f32 %v9429_v52, %v10312_v2  ;;  %v3501_v10 = vpop.f32.mrb[3].mxu1 }
 0x1d6   : > { %v4521_v11 = vmax.f32 %v3499_v6, 0.0  ;;  %v3502_v12 = vadd.f32 %v10312_v2, %v3501_v10 }
 0x1d7   : > { %v4524_v13 = vmax.f32 %v3510_v9, 0.0  ;;  %v4786_v14 = vmul.f32 %v10319_v7, %v4523_v8 }
 0x1d8   : > { %v4522_v15 = vmax.f32 %v3502_v12, 0.0  ;;  %v4784_v16 = vmul.f32 %v10319_v7, %v4521_v11 }
 0x1d9   : > { %v5047_v17 = vsel %vm14217_vm2, %v4786_v14, 0.0  ;;  %v4787_v18 = vmul.f32 %v10319_v7, %v4524_v13 }
 0x1da   : > { %5048 = vadd.xlane.f32.xlu1 %v5047_v17  ;;  %v9432_v19 = vpop.f32.mrb[4].mxu1  ;;  %v5041_v20 = vsel %vm14217_vm2, %v4784_v16, 0.0  ;;  %v4785_v21 = vmul.f32 %v10319_v7, %v4522_v15 }
 0x1db   : > { %v3523_v22 = vadd.f32 %v9432_v19, %v10312_v2  ;;  %v3514_v23 = vpop.f32.mrb[5].mxu1  ;;  %5042 = vadd.xlane.f32.xlu0 %v5041_v20  ;;  %v5050_v29 = vsel %vm14217_vm2, %v4787_v18, 0.0 }
 0x1dc   : > { %v3515_v24 = vadd.f32 %v10312_v2, %v3514_v23  ;;  %v9433_v25 = vpop.f32.mrb[6].mxu1  ;;  %v5044_v32 = vsel %vm14217_vm2, %v4785_v21, 0.0 }
 0x1dd   : > { %v4527_v26 = vmax.f32 %v3523_v22, 0.0  ;;  %v3526_v27 = vadd.f32 %v9433_v25, %v10312_v2  ;;  %v3517_v28 = vpop.f32.mrb[7].mxu1 }
 0x1de   : > { %v4525_v30 = vmax.f32 %v3515_v24, 0.0  ;;  %v3518_v31 = vadd.f32 %v10312_v2, %v3517_v28  ;;  %5051 = vadd.xlane.f32.xlu1 %v5050_v29 }
 0x1df   : > { %v4528_v34 = vmax.f32 %v3526_v27, 0.0  ;;  %5045 = vadd.xlane.f32.xlu0 %v5044_v32  ;;  %v4790_v35 = vmul.f32 %v10319_v7, %v4527_v26 }
 0x1e0   : > { %v4526_v37 = vmax.f32 %v3518_v31, 0.0  ;;  %v4788_v41 = vmul.f32 %v10319_v7, %v4525_v30 }
 0x1e1   : > { %v5059_v38 = vsel %vm14217_vm2, %v4790_v35, 0.0  ;;  %v4791_v39 = vmul.f32 %v10319_v7, %v4528_v34  ;;  %v9946_v35 = vmov 0  }
 0x1e2   : > { %v9436_v40 = vpop.f32.mrb[8].mxu1  ;;  %v4789_v45 = vmul.f32 %v10319_v7, %v4526_v37  ;;  %v5053_v54 = vsel %vm14217_vm2, %v4788_v41, 0.0  ;;  %9724 = vset.pattern.permute.xlu1 %v9946_v35  ;;  %9725 = vset.pattern.permute.xlu0 %v9946_v35 }
 0x1e3   : > { %v3539_v42 = vadd.f32 %v9436_v40, %v10312_v2  ;;  %v3530_v43 = vpop.f32.mrb[9].mxu1  ;;  %5060 = vadd.xlane.f32.xlu0 %v5059_v38  ;;  %v5062_v44 = vsel %vm14217_vm2, %v4791_v39, 0.0 }
 0x1e4   : > { %v3531_v46 = vadd.f32 %v10312_v2, %v3530_v43  ;;  %5063 = vadd.xlane.f32.xlu1 %v5062_v44  ;;  %v9437_v47 = vpop.f32.mrb[10].mxu1  ;;  %v5056_v56 = vsel %vm14217_vm2, %v4789_v45, 0.0 }
 0x1e5   : > { %v4531_v48 = vmax.f32 %v3539_v42, 0.0  ;;  %v3542_v49 = vadd.f32 %v9437_v47, %v10312_v2  ;;  %v3533_v50 = vpop.f32.mrb[11].mxu1 }
 0x1e6   : > { %v4529_v51 = vmax.f32 %v3531_v46, 0.0  ;;  %v3534_v53 = vadd.f32 %v10312_v2, %v3533_v50  ;;  %v9256_v50 = vpop.f32.mrb[92].mxu0 }
 0x1e7   : > { %v4532_v55 = vmax.f32 %v3542_v49, 0.0  ;;  %5054 = vadd.xlane.f32.xlu0 %v5053_v54  ;;  %v4794_v57 = vmul.f32 %v10319_v7, %v4531_v48 }
 0x1e8   : > { %v4530_v58 = vmax.f32 %v3534_v53, 0.0  ;;  %5057 = vadd.xlane.f32.xlu1 %v5056_v56  ;;  %v4792_v62 = vmul.f32 %v10319_v7, %v4529_v51 }
 0x1e9   : > { %v5071_v59 = vsel %vm14217_vm2, %v4794_v57, 0.0  ;;  %v4795_v60 = vmul.f32 %v10319_v7, %v4532_v55  ;;  %v10389_v55 = vld [vmem:[%s14210_s2] ss:$0 sm:$0xff]  ;;  %v2001_v57 = vpop.f32.mrb[93].mxu0 }
 0x1ea   : > { %v9440_v61 = vpop.f32.mrb[12].mxu1  ;;  %v4793_v3 = vmul.f32 %v10319_v7, %v4530_v58  ;;  %v5065_v11 = vsel %vm14217_vm2, %v4792_v62, 0.0  ;;  %v2010_v56 = vadd.f32 %v10389_v55, %v9256_v50  ;;  %v9257_v62 = vpop.f32.mrb[94].mxu0 }
 0x1eb   : > { %v3555_v63 = vadd.f32 %v9440_v61, %v10312_v2  ;;  %v3546_v0 = vpop.f32.mrb[13].mxu1  ;;  %5072 = vadd.xlane.f32.xlu0 %v5071_v59  ;;  %v5074_v1 = vsel %vm14217_vm2, %v4795_v60, 0.0  ;;  %v2002_v61 = vadd.f32 %v10389_v55, %v2001_v57 }
 0x1ec   : > { %v3547_v4 = vadd.f32 %v10312_v2, %v3546_v0  ;;  %v9441_v5 = vpop.f32.mrb[14].mxu1  ;;  %5075 = vadd.xlane.f32.xlu1 %v5074_v1  ;;  %v5068_v13 = vsel %vm14217_vm2, %v4793_v3, 0.0  ;;  %v2750_v0 = vmax.f32 %v2010_v56, 0.0  ;;  %v2013_v1 = vadd.f32 %v10389_v55, %v9257_v62  ;;  %v2004_v3 = vpop.f32.mrb[95].mxu0 }
 0x1ed   : > { %v4535_v6 = vmax.f32 %v3555_v63, 0.0  ;;  %v3558_v52 = vadd.f32 %v9441_v5, %v10312_v2  ;;  %v3549_v8 = vpop.f32.mrb[15].mxu1 }
 0x1ee   : > { %v4533_v9 = vmax.f32 %v3547_v4, 0.0  ;;  %v3550_v10 = vadd.f32 %v10312_v2, %v3549_v8 }
 0x1ef   : > { %v4536_v12 = vmax.f32 %v3558_v52, 0.0  ;;  %5066 = vadd.xlane.f32.xlu0 %v5065_v11  ;;  %v4798_v14 = vmul.f32 %v10319_v7, %v4535_v6  ;;  %v2748_v6 = vmax.f32 %v2002_v61, 0.0  ;;  %v2005_v52 = vadd.f32 %v10389_v55, %v2004_v3 }
 0x1f0   : > { %v4534_v15 = vmax.f32 %v3550_v10, 0.0  ;;  %5069 = vadd.xlane.f32.xlu1 %v5068_v13  ;;  %v4796_v19 = vmul.f32 %v10319_v7, %v4533_v9  ;;  %v2751_v10 = vmax.f32 %v2013_v1, 0.0 }
 0x1f1   : > { %v5083_v16 = vsel %vm14217_vm2, %v4798_v14, 0.0  ;;  %v4799_v17 = vmul.f32 %v10319_v7, %v4536_v12 }
 0x1f2   : > { %v9444_v18 = vpop.f32.mrb[16].mxu1  ;;  %v4797_v23 = vmul.f32 %v10319_v7, %v4534_v15  ;;  %v5077_v31 = vsel %vm14217_vm2, %v4796_v19, 0.0  ;;  %v2749_v15 = vmax.f32 %v2005_v52, 0.0 }
 0x1f3   : > { %v3571_v20 = vadd.f32 %v9444_v18, %v10312_v2  ;;  %v3562_v21 = vpop.f32.mrb[17].mxu1  ;;  %5084 = vadd.xlane.f32.xlu0 %v5083_v16  ;;  %v5086_v22 = vsel %vm14217_vm2, %v4799_v17, 0.0  ;;  %v2959_v18 = vpack.c.bf16 %v2751_v10, %v2750_v0 }
 0x1f4   : > { %v3563_v24 = vadd.f32 %v10312_v2, %v3562_v21  ;;  %v9445_v25 = vpop.f32.mrb[18].mxu1  ;;  %5087 = vadd.xlane.f32.xlu1 %v5086_v22  ;;  %v5080_v33 = vsel %vm14217_vm2, %v4797_v23, 0.0  ;;  %v2958_v22 = vpack.c.bf16 %v2749_v15, %v2748_v6 }
 0x1f5   : > { %v4539_v26 = vmax.f32 %v3571_v20, 0.0  ;;  %v3574_v27 = vadd.f32 %v9445_v25, %v10312_v2  ;;  %v3565_v28 = vpop.f32.mrb[19].mxu1 }
 0x1f6   : > { %v4537_v29 = vmax.f32 %v3563_v24, 0.0  ;;  %v3566_v30 = vadd.f32 %v10312_v2, %v3565_v28  ;;  %9518 = vmatprep.mubr.msk.bf16.mxu1 %vm14218_vm1, %v2958_v22 }
 0x1f7   : > { %v4540_v32 = vmax.f32 %v3574_v27, 0.0  ;;  %5078 = vadd.xlane.f32.xlu0 %v5077_v31  ;;  %v4802_v34 = vmul.f32 %v10319_v7, %v4539_v26  ;;  %9519 = vmatmul.mubr.msk.bf16.gmra.mrb[92].mxu1 %vm14218_vm1, %v2959_v18 }
 0x1f8   : > { %v4538_v36 = vmax.f32 %v3566_v30, 0.0  ;;  %5081 = vadd.xlane.f32.xlu1 %v5080_v33  ;;  %v4800_v40 = vmul.f32 %v10319_v7, %v4537_v29 }
 0x1f9   : > { %v5095_v37 = vsel %vm14217_vm2, %v4802_v34, 0.0  ;;  %v4803_v38 = vmul.f32 %v10319_v7, %v4540_v32 }
 0x1fa   : > { %v9448_v39 = vpop.f32.mrb[20].mxu1  ;;  %v4801_v44 = vmul.f32 %v10319_v7, %v4538_v36  ;;  %v5089_v54 = vsel %vm14217_vm2, %v4800_v40, 0.0 }
 0x1fb   : > { %v3587_v41 = vadd.f32 %v9448_v39, %v10312_v2  ;;  %v3578_v42 = vpop.f32.mrb[21].mxu1  ;;  %5096 = vadd.xlane.f32.xlu0 %v5095_v37  ;;  %v5098_v43 = vsel %vm14217_vm2, %v4803_v38, 0.0 }
 0x1fc   : > { %v3579_v45 = vadd.f32 %v10312_v2, %v3578_v42  ;;  %v9449_v46 = vpop.f32.mrb[22].mxu1  ;;  %5099 = vadd.xlane.f32.xlu1 %v5098_v43  ;;  %v5092_v59 = vsel %vm14217_vm2, %v4801_v44, 0.0 }
 0x1fd   : > { %v4543_v47 = vmax.f32 %v3587_v41, 0.0  ;;  %v3590_v48 = vadd.f32 %v9449_v46, %v10312_v2  ;;  %v3581_v49 = vpop.f32.mrb[23].mxu1 }
 0x1fe   : > { %v4541_v51 = vmax.f32 %v3579_v45, 0.0  ;;  %v3582_v53 = vadd.f32 %v10312_v2, %v3581_v49 }
 0x1ff   : > { %v4544_v58 = vmax.f32 %v3590_v48, 0.0  ;;  %5090 = vadd.xlane.f32.xlu0 %v5089_v54  ;;  %v4806_v60 = vmul.f32 %v10319_v7, %v4543_v47 }
 0x200   : > { %v4542_v63 = vmax.f32 %v3582_v53, 0.0  ;;  %5093 = vadd.xlane.f32.xlu1 %v5092_v59  ;;  %v4804_v9 = vmul.f32 %v10319_v7, %v4541_v51 }
 0x201   : > { %v5107_v4 = vsel %vm14217_vm2, %v4806_v60, 0.0  ;;  %v4807_v5 = vmul.f32 %v10319_v7, %v4544_v58 }
 0x202   : > { %v9452_v8 = vpop.f32.mrb[24].mxu1  ;;  %v4805_v14 = vmul.f32 %v10319_v7, %v4542_v63  ;;  %v5101_v25 = vsel %vm14217_vm2, %v4804_v9, 0.0 }
 0x203   : > { %v3603_v11 = vadd.f32 %v9452_v8, %v10312_v2  ;;  %v3594_v12 = vpop.f32.mrb[25].mxu1  ;;  %5108 = vadd.xlane.f32.xlu0 %v5107_v4  ;;  %v5110_v13 = vsel %vm14217_vm2, %v4807_v5, 0.0 }
 0x204   : > { %v3595_v16 = vadd.f32 %v10312_v2, %v3594_v12  ;;  %v9453_v17 = vpop.f32.mrb[26].mxu1  ;;  %5111 = vadd.xlane.f32.xlu1 %v5110_v13  ;;  %v5104_v27 = vsel %vm14217_vm2, %v4805_v14, 0.0 }
 0x205   : > { %v4547_v19 = vmax.f32 %v3603_v11, 0.0  ;;  %v3606_v20 = vadd.f32 %v9453_v17, %v10312_v2  ;;  %v3597_v21 = vpop.f32.mrb[27].mxu1  ;;  %v9785_v17 = vld [vmem:[%s10048_s21 + $0x1b0] sm:$0xff]  }
 0x206   : > { %v4545_v23 = vmax.f32 %v3595_v16, 0.0  ;;  %v3598_v24 = vadd.f32 %v10312_v2, %v3597_v21  ;;  %9270 = vmatprep.mubr.msk.bf16.mxu0 %vm14216_vm0, %v9785_v17 }
 0x207   : > { %v4548_v26 = vmax.f32 %v3606_v20, 0.0  ;;  %5102 = vadd.xlane.f32.xlu0 %v5101_v25  ;;  %v4810_v28 = vmul.f32 %v10319_v7, %v4547_v19  ;;  %v9786_v20 = vld [vmem:[%s10048_s21 + $0x1b8] sm:$0xff]  }
 0x208   : > { %v4546_v29 = vmax.f32 %v3598_v24, 0.0  ;;  %5105 = vadd.xlane.f32.xlu1 %v5104_v27  ;;  %v4808_v33 = vmul.f32 %v10319_v7, %v4545_v23  ;;  %9271 = vmatmul.mubr.msk.bf16.gmra.mrb[108].mxu0 %vm14216_vm0, %v9786_v20 }
 0x209   : > { %v5119_v30 = vsel %vm14217_vm2, %v4810_v28, 0.0  ;;  %v4811_v31 = vmul.f32 %v10319_v7, %v4548_v26 }
 0x20a   : > { %v9456_v32 = vpop.f32.mrb[28].mxu1  ;;  %v4809_v37 = vmul.f32 %v10319_v7, %v4546_v29  ;;  %v5113_v45 = vsel %vm14217_vm2, %v4808_v33, 0.0 }
 0x20b   : > { %v3619_v34 = vadd.f32 %v9456_v32, %v10312_v2  ;;  %v3610_v35 = vpop.f32.mrb[29].mxu1  ;;  %5120 = vadd.xlane.f32.xlu0 %v5119_v30  ;;  %v5122_v36 = vsel %vm14217_vm2, %v4811_v31, 0.0 }
 0x20c   : > { %v3611_v38 = vadd.f32 %v10312_v2, %v3610_v35  ;;  %v9457_v39 = vpop.f32.mrb[30].mxu1  ;;  %5123 = vadd.xlane.f32.xlu1 %v5122_v36  ;;  %v5116_v47 = vsel %vm14217_vm2, %v4809_v37, 0.0 }
 0x20d   : > { %v4551_v40 = vmax.f32 %v3619_v34, 0.0  ;;  %v3622_v41 = vadd.f32 %v9457_v39, %v10312_v2  ;;  %v3613_v42 = vpop.f32.mrb[31].mxu1 }
 0x20e   : > { %v4549_v43 = vmax.f32 %v3611_v38, 0.0  ;;  %v3614_v44 = vadd.f32 %v10312_v2, %v3613_v42 }
 0x20f   : > { %v4552_v46 = vmax.f32 %v3622_v41, 0.0  ;;  %5114 = vadd.xlane.f32.xlu0 %v5113_v45  ;;  %v4814_v48 = vmul.f32 %v10319_v7, %v4551_v40 }
 0x210   : > { %v4550_v49 = vmax.f32 %v3614_v44, 0.0  ;;  %5117 = vadd.xlane.f32.xlu1 %v5116_v47  ;;  %v4812_v54 = vmul.f32 %v10319_v7, %v4549_v43 }
 0x211   : > { %v5131_v50 = vsel %vm14217_vm2, %v4814_v48, 0.0  ;;  %v4815_v51 = vmul.f32 %v10319_v7, %v4552_v46 }
 0x212   : > { %v9460_v53 = vpop.f32.mrb[32].mxu1  ;;  %v4813_v59 = vmul.f32 %v10319_v7, %v4550_v49  ;;  %v5125_v4 = vsel %vm14217_vm2, %v4812_v54, 0.0 }
 0x213   : > { %v3635_v56 = vadd.f32 %v9460_v53, %v10312_v2  ;;  %v3626_v57 = vpop.f32.mrb[33].mxu1  ;;  %5132 = vadd.xlane.f32.xlu0 %v5131_v50  ;;  %v5134_v58 = vsel %vm14217_vm2, %v4815_v51, 0.0 }
 0x214   : > { %v3627_v60 = vadd.f32 %v10312_v2, %v3626_v57  ;;  %v9461_v61 = vpop.f32.mrb[34].mxu1  ;;  %5135 = vadd.xlane.f32.xlu1 %v5134_v58  ;;  %v5128_v6 = vsel %vm14217_vm2, %v4813_v59, 0.0 }
 0x215   : > { %v4555_v62 = vmax.f32 %v3635_v56, 0.0  ;;  %v3638_v63 = vadd.f32 %v9461_v61, %v10312_v2  ;;  %v3629_v0 = vpop.f32.mrb[35].mxu1 }
 0x216   : > { %v4553_v1 = vmax.f32 %v3627_v60, 0.0  ;;  %v3630_v3 = vadd.f32 %v10312_v2, %v3629_v0 }
 0x217   : > { %v4556_v5 = vmax.f32 %v3638_v63, 0.0  ;;  %5126 = vadd.xlane.f32.xlu0 %v5125_v4  ;;  %v4818_v52 = vmul.f32 %v10319_v7, %v4555_v62 }
 0x218   : > { %v4554_v8 = vmax.f32 %v3630_v3, 0.0  ;;  %5129 = vadd.xlane.f32.xlu1 %v5128_v6  ;;  %v4816_v12 = vmul.f32 %v10319_v7, %v4553_v1 }
 0x219   : > { %v5143_v9 = vsel %vm14217_vm2, %v4818_v52, 0.0  ;;  %v4819_v10 = vmul.f32 %v10319_v7, %v4556_v5 }
 0x21a   : > { %v9464_v11 = vpop.f32.mrb[36].mxu1  ;;  %v4817_v16 = vmul.f32 %v10319_v7, %v4554_v8  ;;  %v5137_v26 = vsel %vm14217_vm2, %v4816_v12, 0.0 }
 0x21b   : > { %v3651_v13 = vadd.f32 %v9464_v11, %v10312_v2  ;;  %v3642_v14 = vpop.f32.mrb[37].mxu1  ;;  %5144 = vadd.xlane.f32.xlu0 %v5143_v9  ;;  %v5146_v15 = vsel %vm14217_vm2, %v4819_v10, 0.0 }
 0x21c   : > { %v3643_v18 = vadd.f32 %v10312_v2, %v3642_v14  ;;  %v9465_v19 = vpop.f32.mrb[38].mxu1  ;;  %5147 = vadd.xlane.f32.xlu1 %v5146_v15  ;;  %v5140_v28 = vsel %vm14217_vm2, %v4817_v16, 0.0 }
 0x21d   : > { %v4559_v21 = vmax.f32 %v3651_v13, 0.0  ;;  %v3654_v22 = vadd.f32 %v9465_v19, %v10312_v2  ;;  %v3645_v23 = vpop.f32.mrb[39].mxu1 }
 0x21e   : > { %v4557_v24 = vmax.f32 %v3643_v18, 0.0  ;;  %v3646_v25 = vadd.f32 %v10312_v2, %v3645_v23 }
 0x21f   : > { %v4560_v27 = vmax.f32 %v3654_v22, 0.0  ;;  %5138 = vadd.xlane.f32.xlu0 %v5137_v26  ;;  %v4822_v29 = vmul.f32 %v10319_v7, %v4559_v21 }
 0x220   : > { %v4558_v30 = vmax.f32 %v3646_v25, 0.0  ;;  %5141 = vadd.xlane.f32.xlu1 %v5140_v28  ;;  %v4820_v34 = vmul.f32 %v10319_v7, %v4557_v24 }
 0x221   : > { %v5155_v31 = vsel %vm14217_vm2, %v4822_v29, 0.0  ;;  %v4823_v32 = vmul.f32 %v10319_v7, %v4560_v27 }
 0x222   : > { %v9468_v33 = vpop.f32.mrb[40].mxu1  ;;  %v4821_v38 = vmul.f32 %v10319_v7, %v4558_v30  ;;  %v5149_v46 = vsel %vm14217_vm2, %v4820_v34, 0.0  ;;  %v9260_v34 = vpop.f32.mrb[96].mxu0 }
 0x223   : > { %v3667_v35 = vadd.f32 %v9468_v33, %v10312_v2  ;;  %v3658_v36 = vpop.f32.mrb[41].mxu1  ;;  %5156 = vadd.xlane.f32.xlu0 %v5155_v31  ;;  %v5158_v37 = vsel %vm14217_vm2, %v4823_v32, 0.0 }
 0x224   : > { %v3659_v39 = vadd.f32 %v10312_v2, %v3658_v36  ;;  %v9469_v40 = vpop.f32.mrb[42].mxu1  ;;  %5159 = vadd.xlane.f32.xlu1 %v5158_v37  ;;  %v5152_v48 = vsel %vm14217_vm2, %v4821_v38, 0.0 }
 0x225   : > { %v4563_v41 = vmax.f32 %v3667_v35, 0.0  ;;  %v3670_v42 = vadd.f32 %v9469_v40, %v10312_v2  ;;  %v3661_v43 = vpop.f32.mrb[43].mxu1  ;;  %v2017_v40 = vpop.f32.mrb[97].mxu0 }
 0x226   : > { %v4561_v44 = vmax.f32 %v3659_v39, 0.0  ;;  %v3662_v45 = vadd.f32 %v10312_v2, %v3661_v43  ;;  %v2026_v39 = vadd.f32 %v10389_v55, %v9260_v34 }
 0x227   : > { %v4564_v47 = vmax.f32 %v3670_v42, 0.0  ;;  %5150 = vadd.xlane.f32.xlu0 %v5149_v46  ;;  %v4826_v49 = vmul.f32 %v10319_v7, %v4563_v41 }
 0x228   : > { %v4562_v50 = vmax.f32 %v3662_v45, 0.0  ;;  %5153 = vadd.xlane.f32.xlu1 %v5152_v48  ;;  %v4824_v56 = vmul.f32 %v10319_v7, %v4561_v44  ;;  %v2018_v44 = vadd.f32 %v10389_v55, %v2017_v40  ;;  %v9261_v45 = vpop.f32.mrb[98].mxu0 }
 0x229   : > { %v5167_v51 = vsel %vm14217_vm2, %v4826_v49, 0.0  ;;  %v4827_v53 = vmul.f32 %v10319_v7, %v4564_v47  ;;  %v2754_v49 = vmax.f32 %v2026_v39, 0.0 }
 0x22a   : > { %v9472_v54 = vpop.f32.mrb[44].mxu1  ;;  %v4825_v60 = vmul.f32 %v10319_v7, %v4562_v50  ;;  %v5161_v5 = vsel %vm14217_vm2, %v4824_v56, 0.0  ;;  %v2029_v50 = vadd.f32 %v10389_v55, %v9261_v45  ;;  %v2752_v56 = vmax.f32 %v2018_v44, 0.0 }
 0x22b   : > { %v3683_v57 = vadd.f32 %v9472_v54, %v10312_v2  ;;  %v3674_v58 = vpop.f32.mrb[45].mxu1  ;;  %5168 = vadd.xlane.f32.xlu0 %v5167_v51  ;;  %v5170_v59 = vsel %vm14217_vm2, %v4827_v53, 0.0  ;;  %v2020_v51 = vpop.f32.mrb[99].mxu0 }
 0x22c   : > { %v3675_v61 = vadd.f32 %v10312_v2, %v3674_v58  ;;  %v9473_v62 = vpop.f32.mrb[46].mxu1  ;;  %5171 = vadd.xlane.f32.xlu1 %v5170_v59  ;;  %v5164_v52 = vsel %vm14217_vm2, %v4825_v60, 0.0 }
 0x22d   : > { %v4567_v63 = vmax.f32 %v3683_v57, 0.0  ;;  %v3686_v0 = vadd.f32 %v9473_v62, %v10312_v2  ;;  %v3677_v1 = vpop.f32.mrb[47].mxu1  ;;  %v2021_v57 = vadd.f32 %v10389_v55, %v2020_v51 }
 0x22e   : > { %v4565_v3 = vmax.f32 %v3675_v61, 0.0  ;;  %v3678_v4 = vadd.f32 %v10312_v2, %v3677_v1  ;;  %v2755_v61 = vmax.f32 %v2029_v50, 0.0 }
 0x22f   : > { %v4568_v6 = vmax.f32 %v3686_v0, 0.0  ;;  %5162 = vadd.xlane.f32.xlu0 %v5161_v5  ;;  %v4830_v8 = vmul.f32 %v10319_v7, %v4567_v63  ;;  %v2753_v63 = vmax.f32 %v2021_v57, 0.0 }
 0x230   : > { %v4566_v9 = vmax.f32 %v3678_v4, 0.0  ;;  %5165 = vadd.xlane.f32.xlu1 %v5164_v52  ;;  %v4828_v13 = vmul.f32 %v10319_v7, %v4565_v3  ;;  %v2961_v3 = vpack.c.bf16 %v2755_v61, %v2754_v49 }
 0x231   : > { %v5179_v10 = vsel %vm14217_vm2, %v4830_v8, 0.0  ;;  %v4831_v11 = vmul.f32 %v10319_v7, %v4568_v6  ;;  %v2960_v6 = vpack.c.bf16 %v2753_v63, %v2752_v56 }
 0x232   : > { %v9476_v12 = vpop.f32.mrb[48].mxu1  ;;  %v4829_v17 = vmul.f32 %v10319_v7, %v4566_v9  ;;  %v5173_v25 = vsel %vm14217_vm2, %v4828_v13, 0.0 }
 0x233   : > { %v3699_v14 = vadd.f32 %v9476_v12, %v10312_v2  ;;  %v3690_v15 = vpop.f32.mrb[49].mxu1  ;;  %5180 = vadd.xlane.f32.xlu0 %v5179_v10  ;;  %v5182_v16 = vsel %vm14217_vm2, %v4831_v11, 0.0  ;;  %9522 = vmatprep.mubr.msk.bf16.mxu1 %vm14218_vm1, %v2960_v6 }
 0x234   : > { %v3691_v18 = vadd.f32 %v10312_v2, %v3690_v15  ;;  %v9477_v19 = vpop.f32.mrb[50].mxu1  ;;  %5183 = vadd.xlane.f32.xlu1 %v5182_v16  ;;  %v5176_v27 = vsel %vm14217_vm2, %v4829_v17, 0.0  ;;  %9523 = vmatmul.mubr.msk.bf16.gmra.mrb[96].mxu1 %vm14218_vm1, %v2961_v3 }
 0x235   : > { %v4571_v20 = vmax.f32 %v3699_v14, 0.0  ;;  %v3702_v21 = vadd.f32 %v9477_v19, %v10312_v2  ;;  %v3693_v22 = vpop.f32.mrb[51].mxu1 }
 0x236   : > { %v4569_v23 = vmax.f32 %v3691_v18, 0.0  ;;  %v3694_v24 = vadd.f32 %v10312_v2, %v3693_v22 }
 0x237   : > { %v4572_v26 = vmax.f32 %v3702_v21, 0.0  ;;  %5174 = vadd.xlane.f32.xlu0 %v5173_v25  ;;  %v4834_v28 = vmul.f32 %v10319_v7, %v4571_v20 }
 0x238   : > { %v4570_v29 = vmax.f32 %v3694_v24, 0.0  ;;  %5177 = vadd.xlane.f32.xlu1 %v5176_v27  ;;  %v4832_v30 = vmul.f32 %v10319_v7, %v4569_v23 }
 0x239   : > { %v5191_v31 = vsel %vm14217_vm2, %v4834_v28, 0.0  ;;  %v4835_v32 = vmul.f32 %v10319_v7, %v4572_v26 }
 0x23a   : > { %v9480_v33 = vpop.f32.mrb[52].mxu1  ;;  %v4833_v38 = vmul.f32 %v10319_v7, %v4570_v29  ;;  %v5185_v43 = vsel %vm14217_vm2, %v4832_v30, 0.0 }
 0x23b   : > { %v3715_v35 = vadd.f32 %v9480_v33, %v10312_v2  ;;  %v3706_v36 = vpop.f32.mrb[53].mxu1  ;;  %5192 = vadd.xlane.f32.xlu0 %v5191_v31  ;;  %v5194_v37 = vsel %vm14217_vm2, %v4835_v32, 0.0 }
 0x23c   : > { %v3707_v41 = vadd.f32 %v10312_v2, %v3706_v36  ;;  %v9481_v42 = vpop.f32.mrb[54].mxu1  ;;  %5195 = vadd.xlane.f32.xlu1 %v5194_v37  ;;  %v5188_v59 = vsel %vm14217_vm2, %v4833_v38, 0.0 }
 0x23d   : > { %v4575_v46 = vmax.f32 %v3715_v35, 0.0  ;;  %v3718_v47 = vadd.f32 %v9481_v42, %v10312_v2  ;;  %v3709_v48 = vpop.f32.mrb[55].mxu1 }
 0x23e   : > { %v4573_v53 = vmax.f32 %v3707_v41, 0.0  ;;  %v3710_v54 = vadd.f32 %v10312_v2, %v3709_v48 }
 0x23f   : > { %v4576_v58 = vmax.f32 %v3718_v47, 0.0  ;;  %5186 = vadd.xlane.f32.xlu0 %v5185_v43  ;;  %v4838_v60 = vmul.f32 %v10319_v7, %v4575_v46 }
 0x240   : > { %v4574_v62 = vmax.f32 %v3710_v54, 0.0  ;;  %5189 = vadd.xlane.f32.xlu1 %v5188_v59  ;;  %v4836_v5 = vmul.f32 %v10319_v7, %v4573_v53 }
 0x241   : > { %v5203_v0 = vsel %vm14217_vm2, %v4838_v60, 0.0  ;;  %v4839_v1 = vmul.f32 %v10319_v7, %v4576_v58 }
 0x242   : > { %v9484_v4 = vpop.f32.mrb[56].mxu1  ;;  %v4837_v10 = vmul.f32 %v10319_v7, %v4574_v62  ;;  %v5197_v18 = vsel %vm14217_vm2, %v4836_v5, 0.0  ;;  %v9788_v5 = vld [vmem:[%s10048_s21 + $0x1c8] sm:$0xff]  }
 0x243   : > { %v3731_v52 = vadd.f32 %v9484_v4, %v10312_v2  ;;  %v3722_v8 = vpop.f32.mrb[57].mxu1  ;;  %5204 = vadd.xlane.f32.xlu0 %v5203_v0  ;;  %v5206_v9 = vsel %vm14217_vm2, %v4839_v1, 0.0  ;;  %v9787_v1 = vld [vmem:[%s10048_s21 + $0x1c0] sm:$0xff]  }
 0x244   : > { %v3723_v11 = vadd.f32 %v10312_v2, %v3722_v8  ;;  %v9485_v12 = vpop.f32.mrb[58].mxu1  ;;  %5207 = vadd.xlane.f32.xlu1 %v5206_v9  ;;  %v5200_v20 = vsel %vm14217_vm2, %v4837_v10, 0.0  ;;  %9274 = vmatprep.mubr.msk.bf16.mxu0 %vm14216_vm0, %v9787_v1 }
 0x245   : > { %v4579_v13 = vmax.f32 %v3731_v52, 0.0  ;;  %v3734_v14 = vadd.f32 %v9485_v12, %v10312_v2  ;;  %v3725_v15 = vpop.f32.mrb[59].mxu1  ;;  %9275 = vmatmul.mubr.msk.bf16.gmra.mrb[112].mxu0 %vm14216_vm0, %v9788_v5 }
 0x246   : > { %v4577_v16 = vmax.f32 %v3723_v11, 0.0  ;;  %v3726_v17 = vadd.f32 %v10312_v2, %v3725_v15 }
 0x247   : > { %v4580_v19 = vmax.f32 %v3734_v14, 0.0  ;;  %5198 = vadd.xlane.f32.xlu0 %v5197_v18  ;;  %v4842_v21 = vmul.f32 %v10319_v7, %v4579_v13 }
 0x248   : > { %v4578_v22 = vmax.f32 %v3726_v17, 0.0  ;;  %5201 = vadd.xlane.f32.xlu1 %v5200_v20  ;;  %v4840_v26 = vmul.f32 %v10319_v7, %v4577_v16 }
 0x249   : > { %v5215_v23 = vsel %vm14217_vm2, %v4842_v21, 0.0  ;;  %v4843_v24 = vmul.f32 %v10319_v7, %v4580_v19 }
 0x24a   : > { %v9488_v25 = vpop.f32.mrb[60].mxu1  ;;  %v4841_v30 = vmul.f32 %v10319_v7, %v4578_v22  ;;  %v5209_v38 = vsel %vm14217_vm2, %v4840_v26, 0.0 }
 0x24b   : > { %v3747_v27 = vadd.f32 %v9488_v25, %v10312_v2  ;;  %v3738_v28 = vpop.f32.mrb[61].mxu1  ;;  %5216 = vadd.xlane.f32.xlu0 %v5215_v23  ;;  %v5218_v29 = vsel %vm14217_vm2, %v4843_v24, 0.0 }
 0x24c   : > { %v3739_v31 = vadd.f32 %v10312_v2, %v3738_v28  ;;  %v9489_v32 = vpop.f32.mrb[62].mxu1  ;;  %5219 = vadd.xlane.f32.xlu1 %v5218_v29  ;;  %v5212_v40 = vsel %vm14217_vm2, %v4841_v30, 0.0 }
 0x24d   : > { %v4583_v33 = vmax.f32 %v3747_v27, 0.0  ;;  %v3750_v34 = vadd.f32 %v9489_v32, %v10312_v2  ;;  %v3741_v35 = vpop.f32.mrb[63].mxu1 }
 0x24e   : > { %v4581_v36 = vmax.f32 %v3739_v31, 0.0  ;;  %v3742_v37 = vadd.f32 %v10312_v2, %v3741_v35 }
 0x24f   : > { %v4584_v39 = vmax.f32 %v3750_v34, 0.0  ;;  %5210 = vadd.xlane.f32.xlu0 %v5209_v38  ;;  %v4846_v41 = vmul.f32 %v10319_v7, %v4583_v33 }
 0x250   : > { %v4582_v42 = vmax.f32 %v3742_v37, 0.0  ;;  %5213 = vadd.xlane.f32.xlu1 %v5212_v40  ;;  %v4844_v46 = vmul.f32 %v10319_v7, %v4581_v36 }
 0x251   : > { %v5227_v43 = vsel %vm14217_vm2, %v4846_v41, 0.0  ;;  %v4847_v44 = vmul.f32 %v10319_v7, %v4584_v39 }
 0x252   : > { %v9492_v45 = vpop.f32.mrb[64].mxu1  ;;  %v4845_v50 = vmul.f32 %v10319_v7, %v4582_v42  ;;  %v5221_v60 = vsel %vm14217_vm2, %v4844_v46, 0.0 }
 0x253   : > { %v3763_v47 = vadd.f32 %v9492_v45, %v10312_v2  ;;  %v3754_v48 = vpop.f32.mrb[65].mxu1  ;;  %5228 = vadd.xlane.f32.xlu0 %v5227_v43  ;;  %v5230_v49 = vsel %vm14217_vm2, %v4847_v44, 0.0 }
 0x254   : > { %v3755_v51 = vadd.f32 %v10312_v2, %v3754_v48  ;;  %v9493_v53 = vpop.f32.mrb[66].mxu1  ;;  %5231 = vadd.xlane.f32.xlu1 %v5230_v49  ;;  %v5224_v62 = vsel %vm14217_vm2, %v4845_v50, 0.0  ;;  %v10576_v48 = vld [vmem:[#allocation2] ss:$0 sm:$0xff] }
 0x255   : > { %v4587_v54 = vmax.f32 %v3763_v47, 0.0  ;;  %v3766_v56 = vadd.f32 %v9493_v53, %v10312_v2  ;;  %v3757_v57 = vpop.f32.mrb[67].mxu1  ;;  %v9264_v53 = vpop.f32.mrb[100].mxu0 }
 0x256   : > { %v4585_v58 = vmax.f32 %v3755_v51, 0.0  ;;  %v3758_v59 = vadd.f32 %v10312_v2, %v3757_v57 }
 0x257   : > { %v4588_v61 = vmax.f32 %v3766_v56, 0.0  ;;  %5222 = vadd.xlane.f32.xlu0 %v5221_v60  ;;  %v4850_v63 = vmul.f32 %v10319_v7, %v4587_v54  ;;  %v2042_v54 = vadd.f32 %v10389_v55, %v9264_v53  ;;  %v2033_v56 = vpop.f32.mrb[101].mxu0 }
 0x258   : > { %v4586_v0 = vmax.f32 %v3758_v59, 0.0  ;;  %5225 = vadd.xlane.f32.xlu1 %v5224_v62  ;;  %v4848_v52 = vmul.f32 %v10319_v7, %v4585_v58  ;;  %v2034_v57 = vadd.f32 %v10389_v55, %v2033_v56  ;;  %v9265_v58 = vpop.f32.mrb[102].mxu0 }
 0x259   : > { %v5239_v3 = vsel %vm14217_vm2, %v4850_v63, 0.0  ;;  %v4851_v4 = vmul.f32 %v10319_v7, %v4588_v61  ;;  %v2036_v60 = vpop.f32.mrb[103].mxu0  ;;  %v2758_v62 = vmax.f32 %v2042_v54, 0.0  ;;  %v2045_v63 = vadd.f32 %v10389_v55, %v9265_v58 }
 0x25a   : > { %v9496_v6 = vpop.f32.mrb[68].mxu1  ;;  %v4849_v11 = vmul.f32 %v10319_v7, %v4586_v0  ;;  %v5233_v19 = vsel %vm14217_vm2, %v4848_v52, 0.0  ;;  %v2756_v0 = vmax.f32 %v2034_v57, 0.0  ;;  %v2037_v1 = vadd.f32 %v10389_v55, %v2036_v60 }
 0x25b   : > { %v3779_v8 = vadd.f32 %v9496_v6, %v10312_v2  ;;  %v3770_v9 = vpop.f32.mrb[69].mxu1  ;;  %5240 = vadd.xlane.f32.xlu0 %v5239_v3  ;;  %v5242_v10 = vsel %vm14217_vm2, %v4851_v4, 0.0  ;;  %v2759_v3 = vmax.f32 %v2045_v63, 0.0 }
 0x25c   : > { %v3771_v12 = vadd.f32 %v10312_v2, %v3770_v9  ;;  %v9497_v13 = vpop.f32.mrb[70].mxu1  ;;  %5243 = vadd.xlane.f32.xlu1 %v5242_v10  ;;  %v5236_v21 = vsel %vm14217_vm2, %v4849_v11, 0.0  ;;  %v2757_v4 = vmax.f32 %v2037_v1, 0.0  ;;  %v9789_v9 = vld [vmem:[%s10048_s21 + $0x1d0] sm:$0xff]   ;;  %v9790_v10 = vld [vmem:[%s10048_s21 + $0x1d8] sm:$0xff]  }
 0x25d   : > { %v4591_v14 = vmax.f32 %v3779_v8, 0.0  ;;  %v3782_v15 = vadd.f32 %v9497_v13, %v10312_v2  ;;  %v3773_v16 = vpop.f32.mrb[71].mxu1  ;;  %v2963_v5 = vpack.c.bf16 %v2759_v3, %v2758_v62  ;;  %9278 = vmatprep.mubr.msk.bf16.mxu0 %vm14216_vm0, %v9789_v9 }
 0x25e   : > { %v4589_v17 = vmax.f32 %v3771_v12, 0.0  ;;  %v3774_v18 = vadd.f32 %v10312_v2, %v3773_v16  ;;  %v2962_v52 = vpack.c.bf16 %v2757_v4, %v2756_v0  ;;  %v10601_v12 = vld [vmem:[%s14212_s4] ss:$0 sm:$0xff]  ;;  %9279 = vmatmul.mubr.msk.bf16.gmra.mrb[116].mxu0 %vm14216_vm0, %v9790_v10 }
 0x25f   : > { %v4592_v20 = vmax.f32 %v3782_v15, 0.0  ;;  %5234 = vadd.xlane.f32.xlu0 %v5233_v19  ;;  %v4854_v22 = vmul.f32 %v10319_v7, %v4591_v14 }
 0x260   : > { %v4590_v23 = vmax.f32 %v3774_v18, 0.0  ;;  %5237 = vadd.xlane.f32.xlu1 %v5236_v21  ;;  %v4852_v27 = vmul.f32 %v10319_v7, %v4589_v17  ;;  %9526 = vmatprep.mubr.msk.bf16.mxu1 %vm14218_vm1, %v2962_v52  ;;  %v10612_v17 = vld [vmem:[%s14213_s5] ss:$0 sm:$0xff]  ;;  %v9792_v52 = vld [vmem:[%s10048_s21 + $0x1e8] sm:$0xff]  }
 0x261   : > { %v5251_v24 = vsel %vm14217_vm2, %v4854_v22, 0.0  ;;  %v4855_v25 = vmul.f32 %v10319_v7, %v4592_v20  ;;  %9527 = vmatmul.mubr.msk.bf16.gmra.mrb[100].mxu1 %vm14218_vm1, %v2963_v5 }
 0x262   : > { %v9500_v26 = vpop.f32.mrb[72].mxu1  ;;  %v4853_v31 = vmul.f32 %v10319_v7, %v4590_v23  ;;  %v5245_v37 = vsel %vm14217_vm2, %v4852_v27, 0.0 }
 0x263   : > { %v3795_v28 = vadd.f32 %v9500_v26, %v10312_v2  ;;  %5252 = vadd.xlane.f32.xlu0 %v5251_v24  ;;  %v5254_v29 = vsel %vm14217_vm2, %v4855_v25, 0.0  ;;  %v3786_v30 = vpop.f32.mrb[73].mxu1 }
 0x264   : > { %5255 = vadd.xlane.f32.xlu1 %v5254_v29  ;;  %v3787_v32 = vadd.f32 %v10312_v2, %v3786_v30  ;;  %v9501_v33 = vpop.f32.mrb[74].mxu1  ;;  %v5248_v38 = vsel %vm14217_vm2, %v4853_v31, 0.0 }
 0x265   : > { %v4595_v34 = vmax.f32 %v3795_v28, 0.0  ;;  %v10564_v35 = vpop.f32.mrb[75].mxu1  ;;  %v3798_v13 = vadd.f32 %v10601_v12, %v9501_v33 }
 0x266   : > { %v4593_v36 = vmax.f32 %v3787_v32, 0.0  ;;  %v3790_v3 = vadd.f32 %v10601_v12, %v10564_v35 }
 0x267   : > { %5246 = vadd.xlane.f32.xlu0 %v5245_v37  ;;  %v4858_v39 = vmul.f32 %v10319_v7, %v4595_v34  ;;  %v5049_v49 = vpop.xlane.xlu1 %5048  ;;  %v4596_v15 = vmax.f32 %v3798_v13, 0.0 }
 0x268   : > { %5249 = vadd.xlane.f32.xlu1 %v5248_v38  ;;  %v4856_v40 = vmul.f32 %v10319_v7, %v4593_v36  ;;  %v5818_v51 = vadd.f32 %v10576_v48, %v5049_v49  ;;  %v5043_v6 = vpop.xlane.xlu0 %5042  ;;  %v4594_v5 = vmax.f32 %v3790_v3, 0.0 }
 0x269   : > { %v5263_v41 = vsel %vm14217_vm2, %v4858_v39, 0.0  ;;  %v5816_v8 = vadd.f32 %v10576_v48, %v5043_v6  ;;  %v4859_v18 = vmul.f32 %v10612_v17, %v4596_v15  ;;  %v9791_v6 = vld [vmem:[%s10048_s21 + $0x1e0] sm:$0xff]  }
 0x26a   : > { %v9504_v42 = vpop.f32.mrb[76].mxu1  ;;  %v5257_v43 = vsel %vm14217_vm2, %v4856_v40, 0.0  ;;  %9282 = vmatprep.mubr.msk.bf16.mxu0 %vm14216_vm0, %v9791_v6 }
 0x26b   : > { %5264 = vadd.xlane.f32.xlu0 %v5263_v41  ;;  %v3802_v2 = vpop.f32.mrb[77].mxu1  ;;  %v3811_v16 = vadd.f32 %v10601_v12, %v9504_v42  ;;  %v5266_v21 = vsel %vm14217_vm2, %v4859_v18, 0.0  ;;  %v5052_v34 = vpop.xlane.xlu1 %5051  ;;  %9283 = vmatmul.mubr.msk.bf16.gmra.mrb[120].mxu0 %vm14216_vm0, %v9792_v52 }
 0x26c   : > { %v10572_v44 = vpop.f32.mrb[78].mxu1  ;;  %v3803_v20 = vadd.f32 %v10601_v12, %v3802_v2  ;;  %v5819_v38 = vadd.f32 %v10576_v48, %v5052_v34  ;;  %v5046_v35 = vpop.xlane.xlu0 %5045 }
 0x26d   : > { %v10574_v45 = vpop.f32.mrb[79].mxu1  ;;  %v4599_v19 = vmax.f32 %v3811_v16, 0.0 }
 0x26e   : > { %v4597_v22 = vmax.f32 %v3803_v20, 0.0 }
 0x26f   : > { %5258 = vadd.xlane.f32.xlu0 %v5257_v43  ;;  %v4862_v24 = vmul.f32 %v10612_v17, %v4599_v19 }
 0x270   : > { %v4860_v30 = vmul.f32 %v10612_v17, %v4597_v22  ;;  %v5817_v22 = vadd.f32 %v10576_v48, %v5046_v35 }
 0x271   : > { %v5275_v28 = vsel %vm14217_vm2, %v4862_v24, 0.0  ;;  %v10632_v40 = vpop.xlane.xlu1 %5063 }
 0x272   : > { %v9508_v46 = vpop.f32.mrb[80].mxu1  ;;  %v5269_v32 = vsel %vm14217_vm2, %v4860_v30, 0.0  ;;  %v5823_v52 = vadd.f32 %v10576_v48, %v10632_v40 }
 0x273   : > { %v3818_v47 = vpop.f32.mrb[81].mxu1  ;;  %v3827_v23 = vadd.f32 %v10601_v12, %v9508_v46 }
 0x274   : > { %v10578_v50 = vpop.f32.mrb[82].mxu1  ;;  %v3819_v29 = vadd.f32 %v10601_v12, %v3818_v47  ;;  %v9268_v41 = vpop.f32.mrb[104].mxu0 }
 0x275   : > { %v10580_v7 = vpop.f32.mrb[83].mxu1  ;;  %v4603_v27 = vmax.f32 %v3827_v23, 0.0  ;;  %v2058_v42 = vadd.f32 %v10389_v55, %v9268_v41  ;;  %v2049_v2 = vpop.f32.mrb[105].mxu0 }
 0x276   : > { %v4601_v31 = vmax.f32 %v3819_v29, 0.0  ;;  %v2050_v43 = vadd.f32 %v10389_v55, %v2049_v2  ;;  %v9269_v46 = vpop.f32.mrb[106].mxu0  ;;  %v10638_v56 = vpop.xlane.xlu1 %5057 }
 0x277   : > { %v4866_v33 = vmul.f32 %v10612_v17, %v4603_v27  ;;  %v2762_v47 = vmax.f32 %v2058_v42, 0.0  ;;  %v2061_v49 = vadd.f32 %v10389_v55, %v9269_v46 }
 0x278   : > { %v4864_v37 = vmul.f32 %v10612_v17, %v4601_v31  ;;  %v2760_v53 = vmax.f32 %v2050_v43, 0.0 }
 0x279   : > { %6335 = vperm.xlu1 %9724, %v5818_v51   ;;  %v5287_v36 = vsel %vm14217_vm2, %v4866_v33, 0.0  ;;  %v2052_v51 = vpop.f32.mrb[107].mxu0  ;;  %v2763_v57 = vmax.f32 %v2061_v49, 0.0 }
 0x27a   : > { %v10585_v59 = vpop.f32.mrb[84].mxu1  ;;  %v5281_v39 = vsel %vm14217_vm2, %v4864_v37, 0.0  ;;  %v2053_v54 = vadd.f32 %v10389_v55, %v2052_v51  ;;  %v5076_v63 = vpop.xlane.xlu1 %5075 }
 0x27b   : > { %v10587_v61 = vpop.f32.mrb[85].mxu1  ;;  %v2965_v60 = vpack.c.bf16 %v2763_v57, %v2762_v47  ;;  %v5827_v0 = vadd.f32 %v10576_v48, %v5076_v63  ;;  %v3843_v15 = vadd.f32 %v10601_v12, %v10585_v59 }
 0x27c   : > { %v10596_v11 = vpop.f32.mrb[86].mxu1  ;;  %v2761_v58 = vmax.f32 %v2053_v54, 0.0  ;;  %v3835_v20 = vadd.f32 %v10601_v12, %v10587_v61  ;;  %v3814_v54 = vadd.f32 %v10601_v12, %v10572_v44 }
 0x27d   : > { %v10604_v14 = vpop.f32.mrb[87].mxu1  ;;  %v4607_v19 = vmax.f32 %v3843_v15, 0.0 }
 0x27e   : > { %v2964_v62 = vpack.c.bf16 %v2761_v58, %v2760_v53  ;;  %v5070_v1 = vpop.xlane.xlu1 %5069  ;;  %v4605_v23 = vmax.f32 %v3835_v20, 0.0  ;;  %v9793_v58 = vld [vmem:[%s10048_s21 + $0x1f0] sm:$0xff]  }
 0x27f   : > { %v5825_v4 = vadd.f32 %v10576_v48, %v5070_v1  ;;  %v4870_v24 = vmul.f32 %v10612_v17, %v4607_v19  ;;  %9286 = vmatprep.mubr.msk.bf16.mxu0 %vm14216_vm0, %v9793_v58 }
 0x280   : > { %9530 = vmatprep.mubr.msk.bf16.mxu1 %vm14218_vm1, %v2964_v62  ;;  %v4868_v29 = vmul.f32 %v10612_v17, %v4605_v23 }
 0x281   : > { %9531 = vmatmul.mubr.msk.bf16.gmra.mrb[104].mxu1 %vm14218_vm1, %v2965_v60  ;;  %v5299_v59 = vsel %vm14217_vm2, %v4870_v24, 0.0  ;;  %v9794_v60 = vld [vmem:[%s10048_s21 + $0x1f8] sm:$0xff]  }
 0x282   : > { %v10619_v25 = vpop.f32.mrb[88].mxu1  ;;  %v5293_v61 = vsel %vm14217_vm2, %v4868_v29, 0.0  ;;  %v5088_v49 = vpop.xlane.xlu1 %5087  ;;  %9287 = vmatmul.mubr.msk.bf16.gmra.mrb[124].mxu0 %vm14216_vm0, %v9794_v60 }
 0x283   : > { %v10621_v26 = vpop.f32.mrb[89].mxu1  ;;  %v5831_v51 = vadd.f32 %v10576_v48, %v5088_v49  ;;  %v3859_v44 = vadd.f32 %v10601_v12, %v10619_v25 }
 0x284   : > { %v10652_v10 = vpop.f32.mrb[90].mxu1  ;;  %v3851_v6 = vadd.f32 %v10601_v12, %v10621_v26  ;;  %v10708_v26 = vld [vmem:[%s14210_s2] ss:$0 sm:$0xff] }
 0x285   : > { %6329 = vperm.xlu0 %9725, %v5816_v8   ;;  %v4857_v8 = vmul.f32 %v10612_v17, %v4594_v5  ;;  %v10654_v13 = vpop.f32.mrb[91].mxu1  ;;  %v4611_v5 = vmax.f32 %v3859_v44, 0.0 }
 0x286   : > { %v5082_v53 = vpop.xlane.xlu1 %5081 }
 0x287   : > { %v5260_v9 = vsel %vm14217_vm2, %v4857_v8, 0.0  ;;  %v5829_v57 = vadd.f32 %v10576_v48, %v5082_v53  ;;  %v4874_v8 = vmul.f32 %v10612_v17, %v4611_v5 }
 0x289   : > { %v5311_v15 = vsel %vm14217_vm2, %v4874_v8, 0.0 }
 0x29d   : > { %5267 = vadd.xlane.f32.xlu1 %v5266_v21  ;;  %v5061_v21 = vpop.xlane.xlu0 %5060 }
 0x29e   : > { %v5822_v27 = vadd.f32 %v10576_v48, %v5061_v21 }
 0x2a4   : > { %5276 = vadd.xlane.f32.xlu0 %v5275_v28  ;;  %v5055_v28 = vpop.xlane.xlu0 %5054 }
 0x2a5   : > { %v5820_v30 = vadd.f32 %v10576_v48, %v5055_v28 }
 0x2a8   : > { %5270 = vadd.xlane.f32.xlu0 %v5269_v32 }
 0x2ac   : > { %5288 = vadd.xlane.f32.xlu0 %v5287_v36 }
 0x2ae   : > { %6338 = vperm.xlu1 %9724, %v5819_v38  }
 0x2b0   : > { %5282 = vadd.xlane.f32.xlu0 %v5281_v39 }
 0x2c6   : > { %6362 = vperm.xlu0 %9725, %v5827_v0  }
 0x2ca   : > { %6356 = vperm.xlu0 %9725, %v5825_v4   ;;  %v10658_v16 = vpop.f32.mrb[92].mxu1 }
 0x2cb   : > { %v10660_v18 = vpop.f32.mrb[93].mxu1  ;;  %v3875_v49 = vadd.f32 %v10601_v12, %v10658_v16 }
 0x2cc   : > { %v10683_v62 = vpop.f32.mrb[94].mxu1 }
 0x2cd   : > { %v10689_v1 = vpop.f32.mrb[95].mxu1 }
 0x2d2   : > { %5261 = vadd.xlane.f32.xlu1 %v5260_v9  ;;  %v4609_v9 = vmax.f32 %v3851_v6, 0.0 }
 0x2d4   : > { %v4872_v35 = vmul.f32 %v10612_v17, %v4609_v9 }
 0x2d6   : > { %v5305_v25 = vsel %vm14217_vm2, %v4872_v35, 0.0 }
 0x2db   : > { %v9272_v31 = vpop.f32.mrb[108].mxu0 }
 0x2dc   : > { %v2074_v32 = vadd.f32 %v10389_v55, %v9272_v31  ;;  %v2065_v33 = vpop.f32.mrb[109].mxu0 }
 0x2dd   : > { %v2066_v34 = vadd.f32 %v10389_v55, %v2065_v33  ;;  %v9273_v36 = vpop.f32.mrb[110].mxu0  ;;  %v5100_v33 = vpop.xlane.xlu1 %5099 }
 0x2de   : > { %v2766_v37 = vmax.f32 %v2074_v32, 0.0  ;;  %v2077_v38 = vadd.f32 %v10389_v55, %v9273_v36  ;;  %v2068_v39 = vpop.f32.mrb[111].mxu0  ;;  %v3806_v32 = vadd.f32 %v10601_v12, %v10574_v45  ;;  %v5835_v36 = vadd.f32 %v10576_v48, %v5100_v33  ;;  %v9796_v45 = vld [vmem:[%s10048_s21 + $0x208] sm:$0xff]  }
 0x2df   : > { %v2764_v41 = vmax.f32 %v2066_v34, 0.0  ;;  %v2069_v42 = vadd.f32 %v10389_v55, %v2068_v39  ;;  %v4600_v55 = vmax.f32 %v3814_v54, 0.0 }
 0x2e0   : > { %v2767_v2 = vmax.f32 %v2077_v38, 0.0  ;;  %v4598_v34 = vmax.f32 %v3806_v32, 0.0 }
 0x2e1   : > { %v2765_v43 = vmax.f32 %v2069_v42, 0.0  ;;  %v4863_v63 = vmul.f32 %v10612_v17, %v4600_v55  ;;  %v9795_v42 = vld [vmem:[%s10048_s21 + $0x200] sm:$0xff]   ;;  %v3867_v55 = vadd.f32 %v10601_v12, %v10660_v18 }
 0x2e2   : > { %v2967_v46 = vpack.c.bf16 %v2767_v2, %v2766_v37  ;;  %v5094_v37 = vpop.xlane.xlu1 %5093  ;;  %v4861_v38 = vmul.f32 %v10612_v17, %v4598_v34  ;;  %9290 = vmatprep.mubr.msk.bf16.mxu0 %vm14216_vm0, %v9795_v42  ;;  %v5073_v2 = vpop.xlane.xlu0 %5072 }
 0x2e3   : > { %6332 = vperm.xlu1 %9724, %v5817_v22   ;;  %v2966_v47 = vpack.c.bf16 %v2765_v43, %v2764_v41  ;;  %v5278_v0 = vsel %vm14217_vm2, %v4863_v63, 0.0  ;;  %v5833_v39 = vadd.f32 %v10576_v48, %v5094_v37  ;;  %9291 = vmatmul.mubr.msk.bf16.gmra.mrb[128].mxu0 %vm14216_vm0, %v9796_v45  ;;  %v5826_v53 = vadd.f32 %v10576_v48, %v5073_v2  ;;  %v9798_v37 = vld [vmem:[%s10048_s21 + $0x218] sm:$0xff]  }
 0x2e4   : > { %v5272_v41 = vsel %vm14217_vm2, %v4861_v38, 0.0  ;;  %v4613_v63 = vmax.f32 %v3867_v55, 0.0 }
 0x2e5   : > { %9534 = vmatprep.mubr.msk.bf16.mxu1 %vm14218_vm1, %v2966_v47 }
 0x2e6   : > { %9535 = vmatmul.mubr.msk.bf16.gmra.mrb[108].mxu1 %vm14218_vm1, %v2967_v46  ;;  %v5821_v46 = vadd.f32 %v10576_v48, %v10638_v56  ;;  %v5067_v54 = vpop.xlane.xlu0 %5066  ;;  %v4876_v16 = vmul.f32 %v10612_v17, %v4613_v63 }
 0x2e7   : > { %6347 = vperm.xlu1 %9724, %v5822_v27   ;;  %v5824_v56 = vadd.f32 %v10576_v48, %v5067_v54 }
 0x2e8   : > { %v5317_v44 = vsel %vm14217_vm2, %v4876_v16, 0.0 }
 0x2e9   : > { %5300 = vadd.xlane.f32.xlu0 %v5299_v59 }
 0x2eb   : > { %6341 = vperm.xlu1 %9724, %v5820_v30  }
 0x2ed   : > { %5294 = vadd.xlane.f32.xlu0 %v5293_v61 }
 0x303   : > { %6374 = vperm.xlu0 %9725, %v5831_v51  }
 0x307   : > { %6368 = vperm.xlu0 %9725, %v5829_v57   ;;  %v10693_v3 = vpop.f32.mrb[96].mxu1  ;;  %v4615_v57 = vmax.f32 %v3875_v49, 0.0 }
 0x308   : > { %v10695_v4 = vpop.f32.mrb[97].mxu1 }
 0x309   : > { %v10726_v43 = vpop.f32.mrb[98].mxu1  ;;  %v4878_v60 = vmul.f32 %v10612_v17, %v4615_v57  ;;  %v3883_v49 = vadd.f32 %v10601_v12, %v10695_v4 }
 0x30a   : > { %v10730_v47 = vpop.f32.mrb[99].mxu1 }
 0x30b   : > { %v4617_v57 = vmax.f32 %v3883_v49, 0.0 }
 0x30d   : > { %v4880_v55 = vmul.f32 %v10612_v17, %v4617_v57 }
 0x30f   : > { %5279 = vadd.xlane.f32.xlu1 %v5278_v0  ;;  %v5323_v0 = vsel %vm14217_vm2, %v4878_v60, 0.0  ;;  %v5329_v63 = vsel %vm14217_vm2, %v4880_v55, 0.0 }
 0x318   : > { %v9276_v19 = vpop.f32.mrb[112].mxu0 }
 0x319   : > { %v2090_v40 = vadd.f32 %v10708_v26, %v9276_v19  ;;  %v2081_v20 = vpop.f32.mrb[113].mxu0 }
 0x31a   : > { %v2082_v21 = vadd.f32 %v10708_v26, %v2081_v20  ;;  %v9277_v22 = vpop.f32.mrb[114].mxu0 }
 0x31b   : > { %v2770_v23 = vmax.f32 %v2090_v40, 0.0  ;;  %v2093_v24 = vadd.f32 %v10708_v26, %v9277_v22  ;;  %v2084_v27 = vpop.f32.mrb[115].mxu0 }
 0x31c   : > { %v2768_v28 = vmax.f32 %v2082_v21, 0.0  ;;  %v2085_v59 = vadd.f32 %v10708_v26, %v2084_v27 }
 0x31d   : > { %v2771_v29 = vmax.f32 %v2093_v24, 0.0  ;;  %v5112_v24 = vpop.xlane.xlu1 %5111 }
 0x31e   : > { %v2769_v30 = vmax.f32 %v2085_v59, 0.0  ;;  %v5085_v59 = vpop.xlane.xlu0 %5084 }
 0x31f   : > { %v2969_v61 = vpack.c.bf16 %v2771_v29, %v2770_v23  ;;  %v3830_v23 = vadd.f32 %v10601_v12, %v10578_v50  ;;  %v5839_v29 = vadd.f32 %v10576_v48, %v5112_v24  ;;  %v5830_v45 = vadd.f32 %v10576_v48, %v5085_v59 }
 0x320   : > { %6350 = vperm.xlu1 %9724, %v5823_v52   ;;  %v2968_v31 = vpack.c.bf16 %v2769_v30, %v2768_v28  ;;  %v3822_v28 = vadd.f32 %v10601_v12, %v10580_v7 }
 0x321   : > { %v4604_v27 = vmax.f32 %v3830_v23, 0.0  ;;  %v5106_v30 = vpop.xlane.xlu1 %5105 }
 0x322   : > { %9538 = vmatprep.mubr.msk.bf16.mxu1 %vm14218_vm1, %v2968_v31  ;;  %v4602_v31 = vmax.f32 %v3822_v28, 0.0  ;;  %v5837_v32 = vadd.f32 %v10576_v48, %v5106_v30  ;;  %v5079_v34 = vpop.xlane.xlu0 %5078 }
 0x323   : > { %9539 = vmatmul.mubr.msk.bf16.gmra.mrb[112].mxu1 %vm14218_vm1, %v2969_v61  ;;  %v4867_v61 = vmul.f32 %v10612_v17, %v4604_v27 }
 0x324   : > { %v4865_v33 = vmul.f32 %v10612_v17, %v4602_v31  ;;  %v9800_v31 = vld [vmem:[%s10048_s21 + $0x228] sm:$0xff]  }
 0x325   : > { %v5290_v50 = vsel %vm14217_vm2, %v4867_v61, 0.0 }
 0x326   : > { %5312 = vadd.xlane.f32.xlu0 %v5311_v15  ;;  %v5284_v7 = vsel %vm14217_vm2, %v4865_v33, 0.0 }
 0x32a   : > { %5306 = vadd.xlane.f32.xlu0 %v5305_v25 }
 0x331   : > { %v9280_v5 = vpop.f32.mrb[116].mxu0 }
 0x332   : > { %v2106_v6 = vadd.f32 %v10708_v26, %v9280_v5  ;;  %v2097_v18 = vpop.f32.mrb[117].mxu0 }
 0x333   : > { %v2098_v52 = vadd.f32 %v10708_v26, %v2097_v18  ;;  %v9281_v8 = vpop.f32.mrb[118].mxu0 }
 0x334   : > { %v10734_v51 = vpop.f32.mrb[100].mxu1  ;;  %v2774_v9 = vmax.f32 %v2106_v6, 0.0  ;;  %v2109_v35 = vadd.f32 %v10708_v26, %v9281_v8  ;;  %v2100_v15 = vpop.f32.mrb[119].mxu0 }
 0x335   : > { %v10739_v58 = vpop.f32.mrb[101].mxu1  ;;  %v2772_v25 = vmax.f32 %v2098_v52, 0.0  ;;  %v2101_v19 = vadd.f32 %v10708_v26, %v2100_v15 }
 0x336   : > { %v2775_v40 = vmax.f32 %v2109_v35, 0.0  ;;  %v10766_v38 = vpop.f32.mrb[102].mxu1 }
 0x337   : > { %v2773_v20 = vmax.f32 %v2101_v19, 0.0 }
 0x338   : > { %v2971_v21 = vpack.c.bf16 %v2775_v40, %v2774_v9  ;;  %v3846_v40 = vadd.f32 %v10601_v12, %v10596_v11 }
 0x339   : > { %v2970_v22 = vpack.c.bf16 %v2773_v20, %v2772_v25  ;;  %v5124_v20 = vpop.xlane.xlu1 %5123 }
 0x33a   : > { %v5843_v24 = vadd.f32 %v10576_v48, %v5124_v20 }
 0x33b   : > { %9542 = vmatprep.mubr.msk.bf16.mxu1 %vm14218_vm1, %v2970_v22  ;;  %v3838_v22 = vadd.f32 %v10601_v12, %v10604_v14  ;;  %v9799_v14 = vld [vmem:[%s10048_s21 + $0x220] sm:$0xff]  }
 0x33c   : > { %9543 = vmatmul.mubr.msk.bf16.gmra.mrb[116].mxu1 %vm14218_vm1, %v2971_v21  ;;  %v4608_v21 = vmax.f32 %v3846_v40, 0.0 }
 0x33d   : > { %v5118_v27 = vpop.xlane.xlu1 %5117  ;;  %v4606_v59 = vmax.f32 %v3838_v22, 0.0 }
 0x33e   : > { %v9284_v60 = vpop.f32.mrb[120].mxu0  ;;  %v4871_v28 = vmul.f32 %v10612_v17, %v4608_v21 }
 0x33f   : > { %v2122_v16 = vadd.f32 %v10708_v26, %v9284_v60  ;;  %v4869_v11 = vmul.f32 %v10612_v17, %v4606_v59 }
 0x340   : > { %6386 = vperm.xlu0 %9725, %v5835_v36   ;;  %v9797_v36 = vld [vmem:[%s10048_s21 + $0x210] sm:$0xff]   ;;  %v5302_v30 = vsel %vm14217_vm2, %v4871_v28, 0.0 }
 0x341   : > { %9294 = vmatprep.mubr.msk.bf16.mxu0 %vm14216_vm0, %v9797_v36  ;;  %v2778_v5 = vmax.f32 %v2122_v16, 0.0 }
 0x342   : > { %9295 = vmatmul.mubr.msk.bf16.gmra.mrb[132].mxu0 %vm14216_vm0, %v9798_v37 }
 0x343   : > { %9298 = vmatprep.mubr.msk.bf16.mxu0 %vm14216_vm0, %v9799_v14 }
 0x344   : > { %5273 = vadd.xlane.f32.xlu1 %v5272_v41  ;;  %6380 = vperm.xlu0 %9725, %v5833_v39   ;;  %v10768_v39 = vpop.f32.mrb[103].mxu1  ;;  %v3891_v41 = vadd.f32 %v10601_v12, %v10693_v3 }
 0x34a   : > { %9299 = vmatmul.mubr.msk.bf16.gmra.mrb[136].mxu0 %vm14216_vm0, %v9800_v31 }
 0x354   : > { %v10772_v42 = vpop.f32.mrb[104].mxu1 }
 0x355   : > { %6344 = vperm.xlu1 %9724, %v5821_v46   ;;  %v10775_v2 = vpop.f32.mrb[105].mxu1  ;;  %v4619_v46 = vmax.f32 %v3891_v41, 0.0  ;;  %v3923_v31 = vadd.f32 %v10601_v12, %v10772_v42 }
 0x356   : > { %v10808_v33 = vpop.f32.mrb[106].mxu1 }
 0x357   : > { %v4882_v54 = vmul.f32 %v10612_v17, %v4619_v46 }
 0x359   : > { %6359 = vperm.xlu1 %9724, %v5826_v53   ;;  %v5828_v53 = vadd.f32 %v10576_v48, %v5079_v34  ;;  %v5335_v3 = vsel %vm14217_vm2, %v4882_v54, 0.0  ;;  %v3907_v34 = vadd.f32 %v10601_v12, %v10734_v51 }
 0x35b   : > { %v4623_v41 = vmax.f32 %v3907_v34, 0.0 }
 0x35d   : > { %6353 = vperm.xlu1 %9724, %v5824_v56   ;;  %v5097_v56 = vpop.xlane.xlu0 %5096  ;;  %v4886_v49 = vmul.f32 %v10612_v17, %v4623_v41  ;;  %v4627_v41 = vmax.f32 %v3923_v31, 0.0 }
 0x35e   : > { %v5834_v37 = vadd.f32 %v10576_v48, %v5097_v56 }
 0x35f   : > { %v5347_v51 = vsel %vm14217_vm2, %v4886_v49, 0.0  ;;  %v4890_v49 = vmul.f32 %v10612_v17, %v4627_v41 }
 0x361   : > { %v5091_v52 = vpop.xlane.xlu0 %5090 }
 0x362   : > { %v5832_v46 = vadd.f32 %v10576_v48, %v5091_v52 }
 0x363   : > { %5324 = vadd.xlane.f32.xlu0 %v5323_v0  ;;  %v2113_v0 = vpop.f32.mrb[121].mxu0 }
 0x364   : > { %v2114_v4 = vadd.f32 %v10708_v26, %v2113_v0 }
 0x365   : > { %v10794_v23 = vpop.xlane.xlu0 %5108 }
 0x366   : > { %v2776_v8 = vmax.f32 %v2114_v4, 0.0  ;;  %v5838_v34 = vadd.f32 %v10576_v48, %v10794_v23 }
 0x367   : > { %5318 = vadd.xlane.f32.xlu0 %v5317_v44  ;;  %v9285_v44 = vpop.f32.mrb[122].mxu0 }
 0x368   : > { %v2125_v6 = vadd.f32 %v10708_v26, %v9285_v44  ;;  %v2116_v18 = vpop.f32.mrb[123].mxu0 }
 0x369   : > { %v2117_v9 = vadd.f32 %v10708_v26, %v2116_v18  ;;  %v10801_v61 = vpop.xlane.xlu0 %5102  ;;  %v9288_v55 = vpop.f32.mrb[124].mxu0 }
 0x36a   : > { %v2779_v35 = vmax.f32 %v2125_v6, 0.0  ;;  %v2138_v56 = vadd.f32 %v10708_v26, %v9288_v55 }
 0x36b   : > { %v2777_v15 = vmax.f32 %v2117_v9, 0.0 }
 0x36c   : > { %v2973_v25 = vpack.c.bf16 %v2779_v35, %v2778_v5  ;;  %v2782_v16 = vmax.f32 %v2138_v56, 0.0  ;;  %v3862_v35 = vadd.f32 %v10601_v12, %v10652_v10 }
 0x36d   : > { %v2972_v19 = vpack.c.bf16 %v2777_v15, %v2776_v8  ;;  %v10825_v57 = vpop.xlane.xlu0 %5120  ;;  %v5136_v15 = vpop.xlane.xlu1 %5135 }
 0x36e   : > { %v5847_v20 = vadd.f32 %v10576_v48, %v5136_v15  ;;  %v3870_v15 = vadd.f32 %v10601_v12, %v10689_v1  ;;  %v9803_v1 = vld [vmem:[%s10048_s21 + $0x240] sm:$0xff]   ;;  %v5842_v41 = vadd.f32 %v10576_v48, %v10825_v57 }
 0x36f   : > { %9546 = vmatprep.mubr.msk.bf16.mxu1 %vm14218_vm1, %v2972_v19  ;;  %v3854_v19 = vadd.f32 %v10601_v12, %v10654_v13  ;;  %v9801_v13 = vld [vmem:[%s10048_s21 + $0x230] sm:$0xff]  }
 0x370   : > { %9547 = vmatmul.mubr.msk.bf16.gmra.mrb[120].mxu1 %vm14218_vm1, %v2973_v25  ;;  %v4612_v25 = vmax.f32 %v3862_v35, 0.0  ;;  %9302 = vmatprep.mubr.msk.bf16.mxu0 %vm14216_vm0, %v9801_v13 }
 0x371   : > { %v10831_v44 = vpop.xlane.xlu0 %5114  ;;  %v5130_v21 = vpop.xlane.xlu1 %5129 }
 0x372   : > { %v4875_v22 = vmul.f32 %v10612_v17, %v4612_v25 }
 0x374   : > { %v5314_v28 = vsel %vm14217_vm2, %v4875_v22, 0.0  ;;  %v4614_v22 = vmax.f32 %v3870_v15, 0.0  ;;  %v3886_v15 = vadd.f32 %v10601_v12, %v10730_v47  ;;  %v9805_v47 = vld [vmem:[%s10048_s21 + $0x250] sm:$0xff]  }
 0x375   : > { %v10840_v40 = vpop.xlane.xlu0 %5132 }
 0x379   : > { %v10847_v59 = vpop.xlane.xlu0 %5126 }
 0x37d   : > { %6398 = vperm.xlu0 %9725, %v5839_v29   ;;  %v5841_v29 = vadd.f32 %v10576_v48, %v5118_v27  ;;  %v5845_v27 = vadd.f32 %v10576_v48, %v5130_v21 }
 0x381   : > { %5291 = vadd.xlane.f32.xlu1 %v5290_v50  ;;  %6392 = vperm.xlu0 %9725, %v5837_v32   ;;  %v5296_v32 = vsel %vm14217_vm2, %v4869_v11, 0.0  ;;  %v10810_v50 = vpop.f32.mrb[107].mxu1 }
 0x385   : > { %5285 = vadd.xlane.f32.xlu1 %v5284_v7 }
 0x396   : > { %6371 = vperm.xlu1 %9724, %v5830_v45   ;;  %v3899_v45 = vadd.f32 %v10601_v12, %v10739_v58  ;;  %v2129_v58 = vpop.f32.mrb[125].mxu0 }
 0x397   : > { %v2130_v60 = vadd.f32 %v10708_v26, %v2129_v58 }
 0x399   : > { %v2780_v5 = vmax.f32 %v2130_v60, 0.0 }
 0x39a   : > { %6365 = vperm.xlu1 %9724, %v5828_v53   ;;  %v4621_v53 = vmax.f32 %v3899_v45, 0.0  ;;  %v3915_v45 = vadd.f32 %v10601_v12, %v10775_v2 }
 0x39c   : > { %v4884_v54 = vmul.f32 %v10612_v17, %v4621_v53  ;;  %v4625_v53 = vmax.f32 %v3915_v45, 0.0 }
 0x39e   : > { %v4888_v42 = vmul.f32 %v10612_v17, %v4625_v53  ;;  %v5840_v53 = vadd.f32 %v10576_v48, %v10831_v44 }
 0x3a0   : > { %5336 = vadd.xlane.f32.xlu0 %v5335_v3  ;;  %v5341_v3 = vsel %vm14217_vm2, %v4884_v54, 0.0  ;;  %v5359_v54 = vsel %vm14217_vm2, %v4890_v49, 0.0  ;;  %v5353_v55 = vsel %vm14217_vm2, %v4888_v42, 0.0 }
 0x3a4   : > { %5330 = vadd.xlane.f32.xlu0 %v5329_v63  ;;  %v9289_v63 = vpop.f32.mrb[126].mxu0 }
 0x3a5   : > { %v2141_v0 = vadd.f32 %v10708_v26, %v9289_v63  ;;  %v2132_v4 = vpop.f32.mrb[127].mxu0 }
 0x3a6   : > { %v2133_v6 = vadd.f32 %v10708_v26, %v2132_v4 }
 0x3a7   : > { %v2783_v18 = vmax.f32 %v2141_v0, 0.0 }
 0x3a8   : > { %v2781_v52 = vmax.f32 %v2133_v6, 0.0 }
 0x3a9   : > { %v2975_v8 = vpack.c.bf16 %v2783_v18, %v2782_v16 }
 0x3aa   : > { %v2974_v9 = vpack.c.bf16 %v2781_v52, %v2780_v5 }
 0x3ac   : > { %9550 = vmatprep.mubr.msk.bf16.mxu1 %vm14218_vm1, %v2974_v9  ;;  %v5148_v9 = vpop.xlane.xlu1 %5147 }
 0x3ad   : > { %9551 = vmatmul.mubr.msk.bf16.gmra.mrb[124].mxu1 %vm14218_vm1, %v2975_v8  ;;  %v3878_v8 = vadd.f32 %v10601_v12, %v10683_v62  ;;  %v5851_v25 = vadd.f32 %v10576_v48, %v5148_v9  ;;  %v4877_v62 = vmul.f32 %v10612_v17, %v4614_v22 }
 0x3af   : > { %v4616_v35 = vmax.f32 %v3878_v8, 0.0  ;;  %v5320_v13 = vsel %vm14217_vm2, %v4877_v62, 0.0  ;;  %v3894_v8 = vadd.f32 %v10601_v12, %v10726_v43 }
 0x3b1   : > { %v4879_v21 = vmul.f32 %v10612_v17, %v4616_v35  ;;  %v4620_v35 = vmax.f32 %v3894_v8, 0.0 }
 0x3b3   : > { %v4883_v22 = vmul.f32 %v10612_v17, %v4620_v35 }
 0x3b6   : > { %v9292_v23 = vpop.f32.mrb[128].mxu0 }
 0x3b7   : > { %v2154_v2 = vadd.f32 %v10708_v26, %v9292_v23 }
 0x3b9   : > { %v10814_v36 = vpop.f32.mrb[108].mxu1  ;;  %v2786_v58 = vmax.f32 %v2154_v2, 0.0 }
 0x3ba   : > { %6410 = vperm.xlu0 %9725, %v5843_v24   ;;  %v10817_v7 = vpop.f32.mrb[109].mxu1  ;;  %v4610_v24 = vmax.f32 %v3854_v19, 0.0  ;;  %v3939_v31 = vadd.f32 %v10601_v12, %v10814_v36 }
 0x3bb   : > { %v3931_v49 = vadd.f32 %v10601_v12, %v10817_v7 }
 0x3bc   : > { %v4873_v10 = vmul.f32 %v10612_v17, %v4610_v24 }
 0x3be   : > { %5303 = vadd.xlane.f32.xlu1 %v5302_v30  ;;  %6404 = vperm.xlu0 %9725, %v5841_v29   ;;  %v9802_v29 = vld [vmem:[%s10048_s21 + $0x238] sm:$0xff]   ;;  %v5308_v11 = vsel %vm14217_vm2, %v4873_v10, 0.0  ;;  %v10854_v30 = vpop.f32.mrb[110].mxu1 }
 0x3bf   : > { %9303 = vmatmul.mubr.msk.bf16.gmra.mrb[140].mxu0 %vm14216_vm0, %v9802_v29  ;;  %v10856_v14 = vpop.f32.mrb[111].mxu1 }
 0x3c0   : > { %9306 = vmatprep.mubr.msk.bf16.mxu0 %vm14216_vm0, %v9803_v1 }
 0x3c2   : > { %5297 = vadd.xlane.f32.xlu1 %v5296_v32 }
 0x3d3   : > { %6383 = vperm.xlu1 %9724, %v5834_v37  }
 0x3d7   : > { %6377 = vperm.xlu1 %9724, %v5832_v46   ;;  %v5836_v46 = vadd.f32 %v10576_v48, %v10801_v61 }
 0x3dd   : > { %5348 = vadd.xlane.f32.xlu0 %v5347_v51  ;;  %v10873_v51 = vpop.xlane.xlu0 %5144 }
 0x3e1   : > { %5342 = vadd.xlane.f32.xlu0 %v5341_v3  ;;  %v2145_v3 = vpop.f32.mrb[129].mxu0  ;;  %v10879_v16 = vpop.xlane.xlu0 %5138 }
 0x3e2   : > { %v2146_v56 = vadd.f32 %v10708_v26, %v2145_v3  ;;  %v9293_v61 = vpop.f32.mrb[130].mxu0 }
 0x3e3   : > { %v2157_v60 = vadd.f32 %v10708_v26, %v9293_v61  ;;  %v2148_v63 = vpop.f32.mrb[131].mxu0 }
 0x3e4   : > { %v2784_v0 = vmax.f32 %v2146_v56, 0.0  ;;  %v2149_v4 = vadd.f32 %v10708_v26, %v2148_v63 }
 0x3e5   : > { %v2787_v5 = vmax.f32 %v2157_v60, 0.0  ;;  %v10889_v19 = vpop.xlane.xlu0 %5156 }
 0x3e6   : > { %v2785_v6 = vmax.f32 %v2149_v4, 0.0 }
 0x3e7   : > { %v2977_v18 = vpack.c.bf16 %v2787_v5, %v2786_v58 }
 0x3e8   : > { %v2976_v52 = vpack.c.bf16 %v2785_v6, %v2784_v0 }
 0x3e9   : > { %v10895_v10 = vpop.xlane.xlu0 %5150 }
 0x3ea   : > { %9554 = vmatprep.mubr.msk.bf16.mxu1 %vm14218_vm1, %v2976_v52 }
 0x3eb   : > { %9555 = vmatmul.mubr.msk.bf16.gmra.mrb[128].mxu1 %vm14218_vm1, %v2977_v18 }
 0x3f6   : > { %v10860_v32 = vpop.f32.mrb[112].mxu1 }
 0x3f7   : > { %6422 = vperm.xlu0 %9725, %v5847_v20   ;;  %v10864_v37 = vpop.f32.mrb[113].mxu1  ;;  %v5142_v20 = vpop.xlane.xlu1 %5141 }
 0x3f8   : > { %v5849_v24 = vadd.f32 %v10576_v48, %v5142_v20  ;;  %v10902_v29 = vpop.f32.mrb[114].mxu1 }
 0x3fb   : > { %5315 = vadd.xlane.f32.xlu1 %v5314_v28  ;;  %6416 = vperm.xlu0 %9725, %v5845_v27   ;;  %v5326_v27 = vsel %vm14217_vm2, %v4879_v21, 0.0  ;;  %v9804_v28 = vld [vmem:[%s10048_s21 + $0x248] sm:$0xff]   ;;  %v5160_v9 = vpop.xlane.xlu1 %5159 }
 0x3fc   : > { %9307 = vmatmul.mubr.msk.bf16.gmra.mrb[144].mxu0 %vm14216_vm0, %v9804_v28  ;;  %v9806_v28 = vld [vmem:[%s10048_s21 + $0x258] sm:$0xff]  }
 0x3fd   : > { %9310 = vmatprep.mubr.msk.bf16.mxu0 %vm14216_vm0, %v9805_v47 }
 0x3ff   : > { %5309 = vadd.xlane.f32.xlu1 %v5308_v11  ;;  %v10904_v11 = vpop.f32.mrb[115].mxu1  ;;  %v5154_v21 = vpop.xlane.xlu1 %5153 }
 0x400   : > { %v5853_v62 = vadd.f32 %v10576_v48, %v5154_v21  ;;  %v10984_v21 = vld [vmem:[#allocation2] ss:$0 sm:$0xff] }
 0x403   : > { %v5172_v35 = vpop.xlane.xlu1 %5171 }
 0x404   : > { %9311 = vmatmul.mubr.msk.bf16.gmra.mrb[148].mxu0 %vm14216_vm0, %v9806_v28 }
 0x410   : > { %6395 = vperm.xlu1 %9724, %v5838_v34   ;;  %v10908_v34 = vpop.f32.mrb[116].mxu1 }
 0x411   : > { %v10912_v45 = vpop.f32.mrb[117].mxu1 }
 0x414   : > { %6389 = vperm.xlu1 %9724, %v5836_v46   ;;  %v4631_v46 = vmax.f32 %v3939_v31, 0.0  ;;  %v10950_v31 = vpop.f32.mrb[118].mxu1 }
 0x415   : > { %v9296_v57 = vpop.f32.mrb[132].mxu0 }
 0x416   : > { %v4894_v42 = vmul.f32 %v10612_v17, %v4631_v46  ;;  %v2170_v7 = vadd.f32 %v10708_v26, %v9296_v57  ;;  %v2161_v3 = vpop.f32.mrb[133].mxu0  ;;  %v3955_v46 = vadd.f32 %v10601_v12, %v10860_v32 }
 0x417   : > { %v2162_v56 = vadd.f32 %v10708_v26, %v2161_v3  ;;  %v9297_v44 = vpop.f32.mrb[134].mxu0 }
 0x418   : > { %v5371_v23 = vsel %vm14217_vm2, %v4894_v42, 0.0  ;;  %v2790_v61 = vmax.f32 %v2170_v7, 0.0  ;;  %v2173_v58 = vadd.f32 %v10708_v26, %v9297_v44  ;;  %v2164_v60 = vpop.f32.mrb[135].mxu0 }
 0x419   : > { %v2788_v0 = vmax.f32 %v2162_v56, 0.0  ;;  %v2165_v4 = vadd.f32 %v10708_v26, %v2164_v60 }
 0x41a   : > { %5360 = vadd.xlane.f32.xlu0 %v5359_v54  ;;  %v4629_v54 = vmax.f32 %v3931_v49, 0.0  ;;  %v2791_v5 = vmax.f32 %v2173_v58, 0.0 }
 0x41b   : > { %v2789_v6 = vmax.f32 %v2165_v4, 0.0 }
 0x41c   : > { %v4892_v36 = vmul.f32 %v10612_v17, %v4629_v54  ;;  %v2979_v18 = vpack.c.bf16 %v2791_v5, %v2790_v61  ;;  %v4635_v54 = vmax.f32 %v3955_v46, 0.0 }
 0x41d   : > { %v2978_v52 = vpack.c.bf16 %v2789_v6, %v2788_v0  ;;  %v9300_v56 = vpop.f32.mrb[136].mxu0 }
 0x41e   : > { %5354 = vadd.xlane.f32.xlu0 %v5353_v55  ;;  %v10921_v55 = vpop.xlane.xlu0 %5168  ;;  %v5365_v2 = vsel %vm14217_vm2, %v4892_v36, 0.0  ;;  %v3947_v36 = vadd.f32 %v10601_v12, %v10864_v37  ;;  %v4898_v57 = vmul.f32 %v10612_v17, %v4635_v54  ;;  %v2186_v37 = vadd.f32 %v10708_v26, %v9300_v56  ;;  %v2177_v44 = vpop.f32.mrb[137].mxu0 }
 0x41f   : > { %9558 = vmatprep.mubr.msk.bf16.mxu1 %vm14218_vm1, %v2978_v52  ;;  %v2178_v61 = vadd.f32 %v10708_v26, %v2177_v44  ;;  %v5848_v56 = vadd.f32 %v10984_v21, %v10879_v16 }
 0x420   : > { %9559 = vmatmul.mubr.msk.bf16.gmra.mrb[132].mxu1 %vm14218_vm1, %v2979_v18  ;;  %v5383_v7 = vsel %vm14217_vm2, %v4898_v57, 0.0  ;;  %v2794_v58 = vmax.f32 %v2186_v37, 0.0  ;;  %v5850_v57 = vadd.f32 %v10984_v21, %v10873_v51 }
 0x421   : > { %v2792_v4 = vmax.f32 %v2178_v61, 0.0 }
 0x422   : > { %v10927_v63 = vpop.xlane.xlu0 %5162 }
 0x426   : > { %v10937_v20 = vpop.xlane.xlu0 %5180 }
 0x42a   : > { %v10943_v1 = vpop.xlane.xlu0 %5174 }
 0x42e   : > { %v10969_v3 = vpop.xlane.xlu0 %5192 }
 0x434   : > { %6434 = vperm.xlu0 %9725, %v5851_v25   ;;  %v5855_v25 = vadd.f32 %v10576_v48, %v5160_v9  ;;  %v3910_v9 = vadd.f32 %v10601_v12, %v10766_v38 }
 0x438   : > { %5327 = vadd.xlane.f32.xlu1 %v5326_v27  ;;  %6428 = vperm.xlu0 %9725, %v5849_v24   ;;  %v4618_v24 = vmax.f32 %v3886_v15, 0.0  ;;  %v5338_v27 = vsel %vm14217_vm2, %v4883_v22, 0.0  ;;  %v4624_v15 = vmax.f32 %v3910_v9, 0.0  ;;  %v5859_v22 = vadd.f32 %v10984_v21, %v5172_v35 }
 0x43a   : > { %v4881_v43 = vmul.f32 %v10612_v17, %v4618_v24 }
 0x43c   : > { %5321 = vadd.xlane.f32.xlu1 %v5320_v13  ;;  %v5332_v13 = vsel %vm14217_vm2, %v4881_v43, 0.0  ;;  %v4887_v43 = vmul.f32 %v10612_v17, %v4624_v15 }
 0x43e   : > { %v5350_v28 = vsel %vm14217_vm2, %v4887_v43, 0.0 }
 0x44d   : > { %6407 = vperm.xlu1 %9724, %v5842_v41   ;;  %v10952_v41 = vpop.f32.mrb[119].mxu1 }
 0x44e   : > { %v10956_v49 = vpop.f32.mrb[120].mxu1 }
 0x44f   : > { %v10960_v42 = vpop.f32.mrb[121].mxu1 }
 0x451   : > { %6401 = vperm.xlu1 %9724, %v5840_v53   ;;  %v5846_v53 = vadd.f32 %v10576_v48, %v10840_v40 }
 0x457   : > { %5372 = vadd.xlane.f32.xlu0 %v5371_v23  ;;  %v5844_v23 = vadd.f32 %v10576_v48, %v10847_v59  ;;  %v9301_v48 = vpop.f32.mrb[138].mxu0  ;;  %v10974_v59 = vpop.xlane.xlu0 %5186 }
 0x458   : > { %v2189_v60 = vadd.f32 %v10708_v26, %v9301_v48  ;;  %v2180_v0 = vpop.f32.mrb[139].mxu0 }
 0x459   : > { %v2181_v5 = vadd.f32 %v10708_v26, %v2180_v0 }
 0x45a   : > { %v2795_v6 = vmax.f32 %v2189_v60, 0.0 }
 0x45b   : > { %5366 = vadd.xlane.f32.xlu0 %v5365_v2  ;;  %v4633_v2 = vmax.f32 %v3947_v36, 0.0  ;;  %v2793_v18 = vmax.f32 %v2181_v5, 0.0  ;;  %v10987_v24 = vpop.xlane.xlu0 %5204 }
 0x45c   : > { %v2981_v52 = vpack.c.bf16 %v2795_v6, %v2794_v58 }
 0x45d   : > { %v4896_v32 = vmul.f32 %v10612_v17, %v4633_v2  ;;  %v2980_v8 = vpack.c.bf16 %v2793_v18, %v2792_v4 }
 0x45f   : > { %v5377_v40 = vsel %vm14217_vm2, %v4896_v32, 0.0  ;;  %9562 = vmatprep.mubr.msk.bf16.mxu1 %vm14218_vm1, %v2980_v8 }
 0x460   : > { %9563 = vmatmul.mubr.msk.bf16.gmra.mrb[136].mxu1 %vm14218_vm1, %v2981_v52 }
 0x471   : > { %6446 = vperm.xlu0 %9725, %v5855_v25   ;;  %v3902_v25 = vadd.f32 %v10601_v12, %v10768_v39  ;;  %v9807_v12 = vld [vmem:[%s10048_s21 + $0x260] sm:$0xff]   ;;  %v9808_v39 = vld [vmem:[%s10048_s21 + $0x268] sm:$0xff]  }
 0x472   : > { %9314 = vmatprep.mubr.msk.bf16.mxu0 %vm14216_vm0, %v9807_v12 }
 0x473   : > { %9315 = vmatmul.mubr.msk.bf16.gmra.mrb[152].mxu0 %vm14216_vm0, %v9808_v39 }
 0x475   : > { %5339 = vadd.xlane.f32.xlu1 %v5338_v27  ;;  %6440 = vperm.xlu0 %9725, %v5853_v62   ;;  %v5166_v62 = vpop.xlane.xlu1 %5165  ;;  %v4622_v27 = vmax.f32 %v3902_v25, 0.0 }
 0x476   : > { %v5857_v38 = vadd.f32 %v10984_v21, %v5166_v62 }
 0x477   : > { %v4885_v47 = vmul.f32 %v10612_v17, %v4622_v27  ;;  %v11007_v17 = vld [vmem:[%s14212_s4] ss:$0 sm:$0xff] }
 0x478   : > { %v3971_v36 = vadd.f32 %v11007_v17, %v10908_v34  ;;  %v11024_v34 = vld [vmem:[%s14213_s5] ss:$0 sm:$0xff]  ;;  %v3926_v43 = vadd.f32 %v11007_v17, %v10808_v33 }
 0x479   : > { %5333 = vadd.xlane.f32.xlu1 %v5332_v13  ;;  %v10993_v13 = vpop.xlane.xlu0 %5198  ;;  %v5344_v46 = vsel %vm14217_vm2, %v4885_v47, 0.0  ;;  %v5184_v2 = vpop.xlane.xlu1 %5183 }
 0x47a   : > { %v4628_v27 = vmax.f32 %v3926_v43, 0.0  ;;  %v5863_v47 = vadd.f32 %v10984_v21, %v5184_v2 }
 0x47c   : > { %v4891_v12 = vmul.f32 %v11024_v34, %v4628_v27 }
 0x47d   : > { %v5178_v51 = vpop.xlane.xlu1 %5177  ;;  %v11029_v58 = vpop.xlane.xlu0 %5216 }
 0x47e   : > { %v5362_v33 = vsel %vm14217_vm2, %v4891_v12, 0.0 }
 0x481   : > { %v11035_v8 = vpop.xlane.xlu0 %5210 }
 0x48a   : > { %6419 = vperm.xlu1 %9724, %v5846_v53   ;;  %v11000_v53 = vpop.f32.mrb[122].mxu1 }
 0x48b   : > { %v11002_v54 = vpop.f32.mrb[123].mxu1 }
 0x48e   : > { %6413 = vperm.xlu1 %9724, %v5844_v23   ;;  %v11011_v23 = vpop.f32.mrb[124].mxu1 }
 0x48f   : > { %v11015_v32 = vpop.f32.mrb[125].mxu1 }
 0x494   : > { %5384 = vadd.xlane.f32.xlu0 %v5383_v7  ;;  %v4639_v7 = vmax.f32 %v3971_v36, 0.0  ;;  %v5196_v36 = vpop.xlane.xlu1 %5195 }
 0x496   : > { %v4902_v37 = vmul.f32 %v11024_v34, %v4639_v7 }
 0x498   : > { %5378 = vadd.xlane.f32.xlu0 %v5377_v40  ;;  %v3963_v40 = vadd.f32 %v11007_v17, %v10912_v45  ;;  %v5395_v48 = vsel %vm14217_vm2, %v4902_v37, 0.0  ;;  %v9304_v45 = vpop.f32.mrb[140].mxu0  ;;  %v11058_v37 = vpop.f32.mrb[126].mxu1 }
 0x499   : > { %v2202_v60 = vadd.f32 %v10708_v26, %v9304_v45  ;;  %v2193_v0 = vpop.f32.mrb[141].mxu0 }
 0x49a   : > { %v4637_v44 = vmax.f32 %v3963_v40, 0.0  ;;  %v2194_v4 = vadd.f32 %v10708_v26, %v2193_v0  ;;  %v9305_v5 = vpop.f32.mrb[142].mxu0  ;;  %v9810_v40 = vld [vmem:[%s10048_s21 + $0x278] sm:$0xff]   ;;  %v3979_v0 = vadd.f32 %v11007_v17, %v10960_v42 }
 0x49b   : > { %v2798_v6 = vmax.f32 %v2202_v60, 0.0  ;;  %v2205_v18 = vadd.f32 %v10708_v26, %v9305_v5  ;;  %v2196_v52 = vpop.f32.mrb[143].mxu0 }
 0x49c   : > { %v4900_v61 = vmul.f32 %v11024_v34, %v4637_v44  ;;  %v2796_v9 = vmax.f32 %v2194_v4, 0.0  ;;  %v2197_v35 = vadd.f32 %v10708_v26, %v2196_v52  ;;  %v11060_v44 = vpop.f32.mrb[127].mxu1  ;;  %v5852_v4 = vadd.f32 %v10984_v21, %v10895_v10 }
 0x49d   : > { %v2799_v15 = vmax.f32 %v2205_v18, 0.0 }
 0x49e   : > { %v5389_v16 = vsel %vm14217_vm2, %v4900_v61, 0.0  ;;  %v2797_v25 = vmax.f32 %v2197_v35, 0.0 }
 0x4a0   : > { %v2982_v62 = vpack.c.bf16 %v2797_v25, %v2796_v9 }
 0x4a2   : > { %9566 = vmatprep.mubr.msk.bf16.mxu1 %vm14218_vm1, %v2982_v62 }
 0x4ae   : > { %6458 = vperm.xlu0 %9725, %v5859_v22   ;;  %v2983_v22 = vpack.c.bf16 %v2799_v15, %v2798_v6 }
 0x4b0   : > { %9567 = vmatmul.mubr.msk.bf16.gmra.mrb[140].mxu1 %vm14218_vm1, %v2983_v22 }
 0x4b2   : > { %5351 = vadd.xlane.f32.xlu1 %v5350_v28  ;;  %6452 = vperm.xlu0 %9725, %v5857_v38   ;;  %v3918_v38 = vadd.f32 %v11007_v17, %v10810_v50  ;;  %v11045_v28 = vpop.xlane.xlu0 %5228  ;;  %v9809_v50 = vld [vmem:[%s10048_s21 + $0x270] sm:$0xff]  }
 0x4b3   : > { %9318 = vmatprep.mubr.msk.bf16.mxu0 %vm14216_vm0, %v9809_v50 }
 0x4b4   : > { %v4626_v39 = vmax.f32 %v3918_v38, 0.0  ;;  %9319 = vmatmul.mubr.msk.bf16.gmra.mrb[156].mxu0 %vm14216_vm0, %v9810_v40  ;;  %v3934_v40 = vadd.f32 %v11007_v17, %v10856_v14  ;;  %v9811_v14 = vld [vmem:[%s10048_s21 + $0x280] sm:$0xff]  }
 0x4b5   : > { %9322 = vmatprep.mubr.msk.bf16.mxu0 %vm14216_vm0, %v9811_v14 }
 0x4b6   : > { %5345 = vadd.xlane.f32.xlu1 %v5344_v46  ;;  %v5861_v46 = vadd.f32 %v10984_v21, %v5178_v51  ;;  %v11051_v7 = vpop.xlane.xlu0 %5222  ;;  %v3987_v51 = vadd.f32 %v11007_v17, %v10956_v49  ;;  %v4641_v49 = vmax.f32 %v3979_v0, 0.0 }
 0x4b8   : > { %v4643_v60 = vmax.f32 %v3987_v51, 0.0 }
 0x4ba   : > { %v4906_v5 = vmul.f32 %v11024_v34, %v4643_v60  ;;  %v11081_v52 = vpop.xlane.xlu0 %5240 }
 0x4bc   : > { %v5407_v18 = vsel %vm14217_vm2, %v4906_v5, 0.0 }
 0x4be   : > { %v11064_v61 = vpop.f32.mrb[128].mxu1  ;;  %v11087_v27 = vpop.xlane.xlu0 %5234 }
 0x4c7   : > { %6431 = vperm.xlu1 %9724, %v5850_v57   ;;  %v4889_v57 = vmul.f32 %v11024_v34, %v4626_v39 }
 0x4c9   : > { %v5356_v2 = vsel %vm14217_vm2, %v4889_v57, 0.0 }
 0x4cb   : > { %6425 = vperm.xlu1 %9724, %v5848_v56   ;;  %v5190_v56 = vpop.xlane.xlu1 %5189 }
 0x4cc   : > { %v5865_v60 = vadd.f32 %v10984_v21, %v5190_v56 }
 0x4cf   : > { %v11068_v45 = vpop.xlane.xlu1 %5207  ;;  %v9308_v9 = vpop.f32.mrb[144].mxu0 }
 0x4d0   : > { %v2218_v35 = vadd.f32 %v10708_v26, %v9308_v9  ;;  %v2209_v15 = vpop.f32.mrb[145].mxu0  ;;  %v4003_v9 = vadd.f32 %v11007_v17, %v11011_v23 }
 0x4d1   : > { %5396 = vadd.xlane.f32.xlu0 %v5395_v48  ;;  %v5854_v48 = vadd.f32 %v10984_v21, %v10889_v19  ;;  %v4904_v19 = vmul.f32 %v11024_v34, %v4641_v49  ;;  %v2210_v10 = vadd.f32 %v10708_v26, %v2209_v15  ;;  %v9309_v25 = vpop.f32.mrb[146].mxu0 }
 0x4d2   : > { %v2802_v22 = vmax.f32 %v2218_v35, 0.0  ;;  %v2221_v62 = vadd.f32 %v10708_v26, %v9309_v25  ;;  %v2212_v43 = vpop.f32.mrb[147].mxu0  ;;  %v5858_v35 = vadd.f32 %v10984_v21, %v10921_v55  ;;  %v4647_v25 = vmax.f32 %v4003_v9, 0.0 }
 0x4d3   : > { %v11077_v6 = vpop.xlane.xlu1 %5201  ;;  %v5401_v42 = vsel %vm14217_vm2, %v4904_v19, 0.0  ;;  %v2800_v38 = vmax.f32 %v2210_v10, 0.0  ;;  %v3958_v9 = vadd.f32 %v11007_v17, %v10902_v29 }
 0x4d4   : > { %v2803_v12 = vmax.f32 %v2221_v62, 0.0  ;;  %v5856_v62 = vadd.f32 %v10984_v21, %v10927_v63  ;;  %v11143_v63 = vld [vmem:[%s14210_s2] ss:$0 sm:$0xff] }
 0x4d5   : > { %5390 = vadd.xlane.f32.xlu0 %v5389_v16  ;;  %v11070_v16 = vpop.f32.mrb[129].mxu1 }
 0x4d6   : > { %v11114_v56 = vpop.f32.mrb[130].mxu1 }
 0x4d7   : > { %v11101_v0 = vpop.xlane.xlu1 %5219 }
 0x4db   : > { %v11112_v19 = vpop.xlane.xlu1 %5213 }
 0x4df   : > { %v11124_v15 = vpop.xlane.xlu1 %5231 }
 0x4eb   : > { %6470 = vperm.xlu0 %9725, %v5863_v47   ;;  %v2213_v47 = vadd.f32 %v10708_v26, %v2212_v43  ;;  %v11097_v26 = vpop.xlane.xlu0 %5252  ;;  %v4910_v43 = vmul.f32 %v11024_v34, %v4647_v25  ;;  %v3950_v25 = vadd.f32 %v11007_v17, %v10904_v11  ;;  %v9813_v11 = vld [vmem:[%s10048_s21 + $0x290] sm:$0xff]  }
 0x4ed   : > { %v2801_v39 = vmax.f32 %v2213_v47, 0.0  ;;  %v5419_v47 = vsel %vm14217_vm2, %v4910_v43, 0.0  ;;  %v4634_v43 = vmax.f32 %v3950_v25, 0.0 }
 0x4ef   : > { %5363 = vadd.xlane.f32.xlu1 %v5362_v33  ;;  %6464 = vperm.xlu0 %9725, %v5861_v46   ;;  %v2985_v46 = vpack.c.bf16 %v2803_v12, %v2802_v22  ;;  %v2984_v57 = vpack.c.bf16 %v2801_v39, %v2800_v38  ;;  %v3942_v33 = vadd.f32 %v11007_v17, %v10854_v30  ;;  %v11105_v5 = vpop.xlane.xlu0 %5246  ;;  %v11133_v38 = vpop.xlane.xlu1 %5225 }
 0x4f0   : > { %v3995_v22 = vadd.f32 %v11007_v17, %v11015_v32  ;;  %v9312_v39 = vpop.f32.mrb[148].mxu0  ;;  %v4897_v29 = vmul.f32 %v11024_v34, %v4634_v43 }
 0x4f1   : > { %9570 = vmatprep.mubr.msk.bf16.mxu1 %vm14218_vm1, %v2984_v57  ;;  %v4632_v50 = vmax.f32 %v3942_v33, 0.0  ;;  %v2225_v57 = vpop.f32.mrb[149].mxu0 }
 0x4f2   : > { %9571 = vmatmul.mubr.msk.bf16.gmra.mrb[144].mxu1 %vm14218_vm1, %v2985_v46  ;;  %v4645_v23 = vmax.f32 %v3995_v22, 0.0  ;;  %v2234_v46 = vadd.f32 %v11143_v63, %v9312_v39  ;;  %v2226_v33 = vadd.f32 %v11143_v63, %v2225_v57  ;;  %v5871_v22 = vadd.f32 %v10984_v21, %v11068_v45  ;;  %v9814_v45 = vld [vmem:[%s10048_s21 + $0x298] sm:$0xff]  }
 0x4f3   : > { %5357 = vadd.xlane.f32.xlu1 %v5356_v2  ;;  %v5867_v2 = vadd.f32 %v10984_v21, %v5196_v36  ;;  %v4895_v51 = vmul.f32 %v11024_v34, %v4632_v50  ;;  %v9812_v36 = vld [vmem:[%s10048_s21 + $0x288] sm:$0xff]   ;;  %v11137_v12 = vpop.xlane.xlu0 %5264  ;;  %v9313_v50 = vpop.f32.mrb[150].mxu0 }
 0x4f4   : > { %9323 = vmatmul.mubr.msk.bf16.gmra.mrb[160].mxu0 %vm14216_vm0, %v9812_v36  ;;  %v4908_v55 = vmul.f32 %v11024_v34, %v4645_v23 }
 0x4f5   : > { %v5374_v30 = vsel %vm14217_vm2, %v4895_v51, 0.0  ;;  %v2228_v51 = vpop.f32.mrb[151].mxu0  ;;  %9326 = vmatprep.mubr.msk.bf16.mxu0 %vm14216_vm0, %v9813_v11 }
 0x4f6   : > { %v5413_v32 = vsel %vm14217_vm2, %v4908_v55, 0.0  ;;  %v5869_v55 = vadd.f32 %v10984_v21, %v11077_v6 }
 0x4fc   : > { %9327 = vmatmul.mubr.msk.bf16.gmra.mrb[164].mxu0 %vm14216_vm0, %v9814_v45 }
 0x504   : > { %6443 = vperm.xlu1 %9724, %v5854_v48   ;;  %v4630_v48 = vmax.f32 %v3934_v40, 0.0  ;;  %v2806_v40 = vmax.f32 %v2234_v46, 0.0  ;;  %v5380_v46 = vsel %vm14217_vm2, %v4897_v29, 0.0 }
 0x508   : > { %6437 = vperm.xlu1 %9724, %v5852_v4   ;;  %v4893_v4 = vmul.f32 %v11024_v34, %v4630_v48  ;;  %v11148_v48 = vpop.xlane.xlu0 %5258 }
 0x50a   : > { %v5368_v49 = vsel %vm14217_vm2, %v4893_v4, 0.0  ;;  %v2229_v4 = vadd.f32 %v11143_v63, %v2228_v51 }
 0x50c   : > { %v2805_v14 = vmax.f32 %v2229_v4, 0.0  ;;  %v11160_v23 = vpop.permute.xlu0 %6329 }
 0x50e   : > { %5408 = vadd.xlane.f32.xlu0 %v5407_v18  ;;  %v11116_v18 = vpop.f32.mrb[131].mxu1 }
 0x512   : > { %5402 = vadd.xlane.f32.xlu0 %v5401_v42  ;;  %v11120_v42 = vpop.f32.mrb[132].mxu1 }
 0x513   : > { %v11126_v10 = vpop.f32.mrb[133].mxu1 }
 0x514   : > { %v11177_v6 = vpop.f32.mrb[134].mxu1 }
 0x528   : > { %6482 = vperm.xlu0 %9725, %v5867_v2   ;;  %v2237_v2 = vadd.f32 %v11143_v63, %v9313_v50  ;;  %v4019_v50 = vadd.f32 %v11007_v17, %v11064_v61 }
 0x52a   : > { %v4651_v4 = vmax.f32 %v4019_v50, 0.0 }
 0x52c   : > { %5375 = vadd.xlane.f32.xlu1 %v5374_v30  ;;  %6476 = vperm.xlu0 %9725, %v5865_v60   ;;  %v2804_v60 = vmax.f32 %v2226_v33, 0.0  ;;  %v2807_v30 = vmax.f32 %v2237_v2, 0.0  ;;  %v11179_v33 = vpop.f32.mrb[135].mxu1  ;;  %v5862_v2 = vadd.f32 %v10984_v21, %v10937_v20 }
 0x52e   : > { %v2987_v36 = vpack.c.bf16 %v2807_v30, %v2806_v40  ;;  %v4011_v30 = vadd.f32 %v11007_v17, %v11070_v16 }
 0x530   : > { %5369 = vadd.xlane.f32.xlu1 %v5368_v49  ;;  %v2986_v49 = vpack.c.bf16 %v2805_v14, %v2804_v60  ;;  %v5860_v14 = vadd.f32 %v10984_v21, %v10943_v1  ;;  %v4649_v61 = vmax.f32 %v4011_v30, 0.0 }
 0x532   : > { %9574 = vmatprep.mubr.msk.bf16.mxu1 %vm14218_vm1, %v2986_v49  ;;  %v4912_v20 = vmul.f32 %v11024_v34, %v4649_v61  ;;  %v3966_v61 = vadd.f32 %v11007_v17, %v10952_v41  ;;  %v9815_v41 = vld [vmem:[%s10048_s21 + $0x2a0] sm:$0xff]  }
 0x533   : > { %9575 = vmatmul.mubr.msk.bf16.gmra.mrb[148].mxu1 %vm14218_vm1, %v2987_v36  ;;  %v11183_v40 = vpop.f32.mrb[136].mxu1  ;;  %v4914_v36 = vmul.f32 %v11024_v34, %v4651_v4  ;;  %9330 = vmatprep.mubr.msk.bf16.mxu0 %vm14216_vm0, %v9815_v41 }
 0x534   : > { %v11189_v60 = vpop.f32.mrb[137].mxu1  ;;  %v5425_v25 = vsel %vm14217_vm2, %v4912_v20, 0.0  ;;  %v5875_v20 = vadd.f32 %v10984_v21, %v11101_v0  ;;  %v9816_v0 = vld [vmem:[%s10048_s21 + $0x2a8] sm:$0xff]  }
 0x535   : > { %9331 = vmatmul.mubr.msk.bf16.gmra.mrb[168].mxu0 %vm14216_vm0, %v9816_v0 }
 0x541   : > { %6455 = vperm.xlu1 %9724, %v5858_v35   ;;  %v4636_v35 = vmax.f32 %v3958_v9, 0.0  ;;  %v5431_v9 = vsel %vm14217_vm2, %v4914_v36, 0.0 }
 0x545   : > { %6449 = vperm.xlu1 %9724, %v5856_v62   ;;  %v4899_v62 = vmul.f32 %v11024_v34, %v4636_v35 }
 0x546   : > { %v9316_v16 = vpop.f32.mrb[152].mxu0 }
 0x547   : > { %v5386_v39 = vsel %vm14217_vm2, %v4899_v62, 0.0  ;;  %v2241_v62 = vpop.f32.mrb[153].mxu0 }
 0x548   : > { %v2242_v1 = vadd.f32 %v11143_v63, %v2241_v62  ;;  %v9317_v43 = vpop.f32.mrb[154].mxu0 }
 0x549   : > { %v2244_v11 = vpop.f32.mrb[155].mxu0 }
 0x54a   : > { %v2808_v45 = vmax.f32 %v2242_v1, 0.0 }
 0x54b   : > { %5420 = vadd.xlane.f32.xlu0 %v5419_v47  ;;  %v11164_v47 = vpop.xlane.xlu1 %5243 }
 0x54f   : > { %5414 = vadd.xlane.f32.xlu0 %v5413_v32  ;;  %v11168_v32 = vpop.xlane.xlu0 %5276  ;;  %v11175_v57 = vpop.xlane.xlu1 %5237 }
 0x553   : > { %v11187_v51 = vpop.xlane.xlu1 %5255  ;;  %v11200_v35 = vpop.xlane.xlu0 %5270 }
 0x557   : > { %v11196_v49 = vpop.xlane.xlu1 %5249 }
 0x55b   : > { %v11224_v1 = vpop.permute.xlu1 %6335 }
 0x565   : > { %6494 = vperm.xlu0 %9725, %v5871_v22   ;;  %v2250_v22 = vadd.f32 %v11143_v63, %v9316_v16  ;;  %v4638_v16 = vmax.f32 %v3966_v61, 0.0 }
 0x567   : > { %v2810_v29 = vmax.f32 %v2250_v22, 0.0  ;;  %v5873_v22 = vadd.f32 %v10984_v21, %v11112_v19  ;;  %v4901_v62 = vmul.f32 %v11024_v34, %v4638_v16  ;;  %v11235_v19 = vpop.f32.mrb[138].mxu1 }
 0x569   : > { %5387 = vadd.xlane.f32.xlu1 %v5386_v39  ;;  %6488 = vperm.xlu0 %9725, %v5869_v55   ;;  %v11205_v55 = vpop.xlane.xlu0 %5288  ;;  %v2253_v39 = vadd.f32 %v11143_v63, %v9317_v43 }
 0x56b   : > { %v2811_v50 = vmax.f32 %v2253_v39, 0.0  ;;  %v11233_v39 = vpop.xlane.xlu1 %5267 }
 0x56d   : > { %5381 = vadd.xlane.f32.xlu1 %v5380_v46  ;;  %v2245_v46 = vadd.f32 %v11143_v63, %v2244_v11  ;;  %v2989_v4 = vpack.c.bf16 %v2811_v50, %v2810_v29  ;;  %v5392_v29 = vsel %vm14217_vm2, %v4901_v62, 0.0  ;;  %v11237_v11 = vpop.f32.mrb[139].mxu1  ;;  %v5866_v50 = vadd.f32 %v10984_v21, %v10969_v3 }
 0x57e   : > { %6467 = vperm.xlu1 %9724, %v5862_v2   ;;  %v2809_v2 = vmax.f32 %v2245_v46, 0.0 }
 0x580   : > { %v2988_v30 = vpack.c.bf16 %v2809_v2, %v2808_v45  ;;  %v4035_v45 = vadd.f32 %v11007_v17, %v11120_v42 }
 0x582   : > { %6461 = vperm.xlu1 %9724, %v5860_v14   ;;  %9578 = vmatprep.mubr.msk.bf16.mxu1 %vm14218_vm1, %v2988_v30  ;;  %v3974_v14 = vadd.f32 %v11007_v17, %v10950_v31  ;;  %v4027_v30 = vadd.f32 %v11007_v17, %v11126_v10 }
 0x583   : > { %9579 = vmatmul.mubr.msk.bf16.gmra.mrb[152].mxu1 %vm14218_vm1, %v2989_v4  ;;  %v11241_v46 = vpop.f32.mrb[140].mxu1  ;;  %v4655_v4 = vmax.f32 %v4035_v45, 0.0 }
 0x584   : > { %v4640_v36 = vmax.f32 %v3974_v14, 0.0  ;;  %v11245_v2 = vpop.f32.mrb[141].mxu1  ;;  %v11249_v14 = vpop.permute.xlu1 %6338  ;;  %v4653_v42 = vmax.f32 %v4027_v30, 0.0 }
 0x585   : > { %14234 = vst [vmem:[#allocation7_spill] sm:$0xff] %v11249_v14  ;;  %v4918_v61 = vmul.f32 %v11024_v34, %v4655_v4 }
 0x586   : > { %v4916_v3 = vmul.f32 %v11024_v34, %v4653_v42 }
 0x587   : > { %v9320_v10 = vpop.f32.mrb[156].mxu0 }
 0x588   : > { %5432 = vadd.xlane.f32.xlu0 %v5431_v9  ;;  %v11217_v9 = vpop.xlane.xlu0 %5282  ;;  %v2266_v62 = vadd.f32 %v11143_v63, %v9320_v10 }
 0x58a   : > { %v2814_v0 = vmax.f32 %v2266_v62, 0.0  ;;  %v5879_v62 = vadd.f32 %v10984_v21, %v11124_v15  ;;  %v9818_v15 = vld [vmem:[%s10048_s21 + $0x2b8] sm:$0xff]  }
 0x58c   : > { %5426 = vadd.xlane.f32.xlu0 %v5425_v25  ;;  %v4903_v25 = vmul.f32 %v11024_v34, %v4640_v36  ;;  %v11226_v43 = vpop.permute.xlu0 %6362  ;;  %v5864_v36 = vadd.f32 %v10984_v21, %v10974_v59 }
 0x58d   : > { %14233 = vst [vmem:[#allocation6_spill] sm:$0xff] %v11226_v43 }
 0x58e   : > { %v5398_v31 = vsel %vm14217_vm2, %v4903_v25, 0.0  ;;  %v5443_v25 = vsel %vm14217_vm2, %v4918_v61, 0.0 }
 0x590   : > { %v11258_v16 = vpop.permute.xlu0 %6356 }
 0x591   : > { %14235 = vst [vmem:[#allocation8_spill] sm:$0xff] %v11258_v16 }
 0x5a2   : > { %6506 = vperm.xlu0 %9725, %v5875_v20   ;;  %v11254_v20 = vpop.xlane.xlu1 %5261 }
 0x5a6   : > { %5399 = vadd.xlane.f32.xlu1 %v5398_v31  ;;  %6500 = vperm.xlu0 %9725, %v5873_v22   ;;  %v5437_v22 = vsel %vm14217_vm2, %v4916_v3, 0.0  ;;  %v2257_v31 = vpop.f32.mrb[157].mxu0 }
 0x5a7   : > { %v2258_v59 = vadd.f32 %v11143_v63, %v2257_v31  ;;  %v9321_v41 = vpop.f32.mrb[158].mxu0 }
 0x5a8   : > { %v2260_v45 = vpop.f32.mrb[159].mxu0 }
 0x5a9   : > { %v2812_v4 = vmax.f32 %v2258_v59, 0.0  ;;  %v2261_v30 = vadd.f32 %v11143_v63, %v2260_v45 }
 0x5aa   : > { %5393 = vadd.xlane.f32.xlu1 %v5392_v29  ;;  %v2269_v29 = vadd.f32 %v11143_v63, %v9321_v41 }
 0x5ab   : > { %v2813_v61 = vmax.f32 %v2261_v30, 0.0 }
 0x5ad   : > { %v2990_v3 = vpack.c.bf16 %v2813_v61, %v2812_v4 }
 0x5af   : > { %9582 = vmatprep.mubr.msk.bf16.mxu1 %vm14218_vm1, %v2990_v3 }
 0x5bb   : > { %6479 = vperm.xlu1 %9724, %v5866_v50   ;;  %v11264_v50 = vpop.xlane.xlu0 %5300 }
 0x5bf   : > { %6473 = vperm.xlu1 %9724, %v5864_v36   ;;  %v2815_v36 = vmax.f32 %v2269_v29, 0.0  ;;  %v11275_v31 = vpop.xlane.xlu0 %5294  ;;  %v11280_v29 = vpop.permute.xlu1 %6332 }
 0x5c1   : > { %v2991_v42 = vpack.c.bf16 %v2815_v36, %v2814_v0  ;;  %v5877_v0 = vadd.f32 %v10984_v21, %v11133_v38  ;;  %v11293_v38 = vpop.f32.mrb[142].mxu1 }
 0x5c2   : > { %v11295_v61 = vpop.f32.mrb[143].mxu1 }
 0x5c3   : > { %9583 = vmatmul.mubr.msk.bf16.gmra.mrb[156].mxu1 %vm14218_vm1, %v2991_v42  ;;  %v11284_v4 = vpop.permute.xlu0 %6374  ;;  %v11291_v36 = vpop.permute.xlu1 %6347  ;;  %v4051_v42 = vadd.f32 %v11007_v17, %v11183_v40 }
 0x5c4   : > { %14236 = vst [vmem:[#allocation9_spill] sm:$0xff] %v11284_v4  ;;  %14237 = vst [vmem:[#allocation10_spill] sm:$0xff] %v11291_v36 }
 0x5c5   : > { %5444 = vadd.xlane.f32.xlu0 %v5443_v25  ;;  %v3990_v25 = vadd.f32 %v11007_v17, %v11000_v53  ;;  %v11299_v3 = vpop.f32.mrb[144].mxu1 }
 0x5c7   : > { %v4644_v10 = vmax.f32 %v3990_v25, 0.0  ;;  %v5870_v25 = vadd.f32 %v10984_v21, %v10987_v24 }
 0x5c9   : > { %5438 = vadd.xlane.f32.xlu0 %v5437_v22  ;;  %v3982_v22 = vadd.f32 %v11007_v17, %v11002_v54  ;;  %v4907_v59 = vmul.f32 %v11024_v34, %v4644_v10  ;;  %v9817_v54 = vld [vmem:[%s10048_s21 + $0x2b0] sm:$0xff]   ;;  %v11303_v10 = vpop.f32.mrb[145].mxu1 }
 0x5ca   : > { %9334 = vmatprep.mubr.msk.bf16.mxu0 %vm14216_vm0, %v9817_v54  ;;  %v11316_v54 = vpop.permute.xlu0 %6368 }
 0x5cb   : > { %v4642_v41 = vmax.f32 %v3982_v22, 0.0  ;;  %v5410_v45 = vsel %vm14217_vm2, %v4907_v59, 0.0  ;;  %9335 = vmatmul.mubr.msk.bf16.gmra.mrb[172].mxu0 %vm14216_vm0, %v9818_v15  ;;  %v4659_v22 = vmax.f32 %v4051_v42, 0.0  ;;  %v11307_v59 = vpop.permute.xlu1 %6341  ;;  %14238 = vst [vmem:[#allocation11_spill] sm:$0xff] %v11316_v54 }
 0x5cd   : > { %v4905_v53 = vmul.f32 %v11024_v34, %v4642_v41  ;;  %v5868_v41 = vadd.f32 %v10984_v21, %v10993_v13 }
 0x5ce   : > { %v11322_v4 = vpop.xlane.xlu0 %5312 }
 0x5cf   : > { %v5404_v30 = vsel %vm14217_vm2, %v4905_v53, 0.0  ;;  %v11312_v53 = vpop.xlane.xlu1 %5279 }
 0x5df   : > { %6518 = vperm.xlu0 %9725, %v5879_v62   ;;  %v4043_v62 = vadd.f32 %v11007_v17, %v11189_v60  ;;  %v9324_v60 = vpop.f32.mrb[160].mxu0 }
 0x5e0   : > { %v2273_v42 = vpop.f32.mrb[161].mxu0 }
 0x5e1   : > { %v4657_v40 = vmax.f32 %v4043_v62, 0.0  ;;  %v2274_v13 = vadd.f32 %v11143_v63, %v2273_v42  ;;  %v5883_v42 = vadd.f32 %v10984_v21, %v11164_v47  ;;  %v9820_v47 = vld [vmem:[%s10048_s21 + $0x2c8] sm:$0xff]  }
 0x5e3   : > { %5411 = vadd.xlane.f32.xlu1 %v5410_v45  ;;  %6512 = vperm.xlu0 %9725, %v5877_v0   ;;  %v4922_v0 = vmul.f32 %v11024_v34, %v4659_v22  ;;  %v4920_v24 = vmul.f32 %v11024_v34, %v4657_v40 }
 0x5e5   : > { %v5455_v45 = vsel %vm14217_vm2, %v4922_v0, 0.0  ;;  %v5449_v15 = vsel %vm14217_vm2, %v4920_v24, 0.0  ;;  %v2816_v0 = vmax.f32 %v2274_v13, 0.0  ;;  %v11333_v13 = vpop.xlane.xlu0 %5306 }
 0x5e7   : > { %5405 = vadd.xlane.f32.xlu1 %v5404_v30  ;;  %v2282_v30 = vadd.f32 %v11143_v63, %v9324_v60  ;;  %v4006_v60 = vadd.f32 %v11007_v17, %v11058_v37 }
 0x5e9   : > { %v2818_v22 = vmax.f32 %v2282_v30, 0.0  ;;  %v4648_v30 = vmax.f32 %v4006_v60, 0.0 }
 0x5f8   : > { %6491 = vperm.xlu1 %9724, %v5870_v25   ;;  %v9325_v25 = vpop.f32.mrb[162].mxu0 }
 0x5f9   : > { %v2285_v62 = vadd.f32 %v11143_v63, %v9325_v25 }
 0x5fc   : > { %6485 = vperm.xlu1 %9724, %v5868_v41   ;;  %v2276_v41 = vpop.f32.mrb[163].mxu0 }
 0x5fd   : > { %v2277_v40 = vadd.f32 %v11143_v63, %v2276_v41  ;;  %v11342_v41 = vpop.permute.xlu0 %6386 }
 0x5fe   : > { %14240 = vst [vmem:[#allocation13_spill] sm:$0xff] %v11342_v41 }
 0x5ff   : > { %v2817_v54 = vmax.f32 %v2277_v40, 0.0 }
 0x601   : > { %v2992_v24 = vpack.c.bf16 %v2817_v54, %v2816_v0  ;;  %v4911_v54 = vmul.f32 %v11024_v34, %v4648_v30  ;;  %v5874_v30 = vadd.f32 %v10984_v21, %v11029_v58 }
 0x602   : > { %5456 = vadd.xlane.f32.xlu0 %v5455_v45  ;;  %v2819_v45 = vmax.f32 %v2285_v62, 0.0  ;;  %v11340_v62 = vpop.permute.xlu1 %6350 }
 0x603   : > { %9586 = vmatprep.mubr.msk.bf16.mxu1 %vm14218_vm1, %v2992_v24  ;;  %v5422_v37 = vsel %vm14217_vm2, %v4911_v54, 0.0  ;;  %14239 = vst [vmem:[#allocation12_spill] sm:$0xff] %v11340_v62  ;;  %v4067_v24 = vadd.f32 %v11007_v17, %v11241_v46 }
 0x604   : > { %v2993_v16 = vpack.c.bf16 %v2819_v45, %v2818_v22 }
 0x605   : > { %v4663_v54 = vmax.f32 %v4067_v24, 0.0 }
 0x606   : > { %5450 = vadd.xlane.f32.xlu0 %v5449_v15  ;;  %9587 = vmatmul.mubr.msk.bf16.gmra.mrb[160].mxu1 %vm14218_vm1, %v2993_v16  ;;  %v3998_v15 = vadd.f32 %v11007_v17, %v11060_v44  ;;  %v5881_v16 = vadd.f32 %v10984_v21, %v11175_v57  ;;  %v9819_v44 = vld [vmem:[%s10048_s21 + $0x2c0] sm:$0xff]   ;;  %v11349_v40 = vpop.xlane.xlu1 %5273  ;;  %v11351_v57 = vpop.f32.mrb[146].mxu1 }
 0x607   : > { %9338 = vmatprep.mubr.msk.bf16.mxu0 %vm14216_vm0, %v9819_v44  ;;  %v11353_v45 = vpop.f32.mrb[147].mxu1 }
 0x608   : > { %v4646_v25 = vmax.f32 %v3998_v15, 0.0  ;;  %9339 = vmatmul.mubr.msk.bf16.gmra.mrb[176].mxu0 %vm14216_vm0, %v9820_v47  ;;  %v11357_v60 = vpop.f32.mrb[148].mxu1  ;;  %v11374_v47 = vpop.permute.xlu0 %6380 }
 0x60a   : > { %v4909_v22 = vmul.f32 %v11024_v34, %v4646_v25  ;;  %v11361_v15 = vpop.permute.xlu1 %6344  ;;  %v4059_v25 = vadd.f32 %v11007_v17, %v11245_v2 }
 0x60b   : > { %14241 = vst [vmem:[#allocation14_spill] sm:$0xff] %v11361_v15 }
 0x60c   : > { %v5416_v0 = vsel %vm14217_vm2, %v4909_v22, 0.0  ;;  %v4926_v22 = vmul.f32 %v11024_v34, %v4663_v54  ;;  %v4661_v46 = vmax.f32 %v4059_v25, 0.0  ;;  %v11380_v43 = vpop.xlane.xlu0 %5324 }
 0x60e   : > { %v4924_v58 = vmul.f32 %v11024_v34, %v4661_v46  ;;  %v5467_v44 = vsel %vm14217_vm2, %v4926_v22, 0.0 }
 0x610   : > { %v5461_v2 = vsel %vm14217_vm2, %v4924_v58, 0.0 }
 0x61c   : > { %6530 = vperm.xlu0 %9725, %v5883_v42   ;;  %v11363_v42 = vpop.f32.mrb[149].mxu1 }
 0x620   : > { %5423 = vadd.xlane.f32.xlu1 %v5422_v37  ;;  %6524 = vperm.xlu0 %9725, %v5881_v16   ;;  %v5872_v16 = vadd.f32 %v10984_v21, %v11035_v8  ;;  %v11370_v37 = vpop.permute.xlu1 %6359 }
 0x621   : > { %14242 = vst [vmem:[#allocation15_spill] sm:$0xff] %v11370_v37 }
 0x624   : > { %5417 = vadd.xlane.f32.xlu1 %v5416_v0  ;;  %v9328_v0 = vpop.f32.mrb[164].mxu0 }
 0x625   : > { %v2298_v24 = vadd.f32 %v11143_v63, %v9328_v0  ;;  %v4022_v0 = vadd.f32 %v11007_v17, %v11114_v56 }
 0x627   : > { %v2822_v25 = vmax.f32 %v2298_v24, 0.0  ;;  %v4652_v24 = vmax.f32 %v4022_v0, 0.0 }
 0x635   : > { %6503 = vperm.xlu1 %9724, %v5874_v30   ;;  %v2289_v30 = vpop.f32.mrb[165].mxu0 }
 0x636   : > { %v2290_v8 = vadd.f32 %v11143_v63, %v2289_v30  ;;  %v9329_v54 = vpop.f32.mrb[166].mxu0  ;;  %v5887_v30 = vadd.f32 %v10984_v21, %v11187_v51  ;;  %v9822_v51 = vld [vmem:[%s10048_s21 + $0x2d8] sm:$0xff]  }
 0x637   : > { %v2301_v37 = vadd.f32 %v11143_v63, %v9329_v54 }
 0x638   : > { %v2820_v22 = vmax.f32 %v2290_v8, 0.0 }
 0x639   : > { %6497 = vperm.xlu1 %9724, %v5872_v16   ;;  %v2292_v16 = vpop.f32.mrb[167].mxu0 }
 0x63a   : > { %v2293_v46 = vadd.f32 %v11143_v63, %v2292_v16 }
 0x63c   : > { %v2821_v62 = vmax.f32 %v2293_v46, 0.0 }
 0x63e   : > { %v2994_v58 = vpack.c.bf16 %v2821_v62, %v2820_v22  ;;  %v4915_v62 = vmul.f32 %v11024_v34, %v4652_v24  ;;  %v5878_v24 = vadd.f32 %v10984_v21, %v11045_v28 }
 0x63f   : > { %5468 = vadd.xlane.f32.xlu0 %v5467_v44  ;;  %v2823_v44 = vmax.f32 %v2301_v37, 0.0  ;;  %v11391_v37 = vpop.xlane.xlu0 %5318 }
 0x640   : > { %9590 = vmatprep.mubr.msk.bf16.mxu1 %vm14218_vm1, %v2994_v58  ;;  %v5434_v56 = vsel %vm14217_vm2, %v4915_v62, 0.0  ;;  %v4083_v58 = vadd.f32 %v11007_v17, %v11299_v3 }
 0x641   : > { %v2995_v36 = vpack.c.bf16 %v2823_v44, %v2822_v25  ;;  %v11398_v25 = vpop.permute.xlu1 %6353 }
 0x642   : > { %14243 = vst [vmem:[#allocation16_spill] sm:$0xff] %v11398_v25  ;;  %v4667_v62 = vmax.f32 %v4083_v58, 0.0 }
 0x643   : > { %5462 = vadd.xlane.f32.xlu0 %v5461_v2  ;;  %9591 = vmatmul.mubr.msk.bf16.gmra.mrb[164].mxu1 %vm14218_vm1, %v2995_v36  ;;  %v4014_v2 = vadd.f32 %v11007_v17, %v11116_v18  ;;  %v5885_v36 = vadd.f32 %v10984_v21, %v11196_v49  ;;  %v11400_v16 = vpop.permute.xlu0 %6398  ;;  %v9821_v18 = vld [vmem:[%s10048_s21 + $0x2d0] sm:$0xff]   ;;  %v11409_v49 = vpop.f32.mrb[150].mxu1 }
 0x644   : > { %14244 = vst [vmem:[#allocation17_spill] sm:$0xff] %v11400_v16  ;;  %9342 = vmatprep.mubr.msk.bf16.mxu0 %vm14216_vm0, %v9821_v18  ;;  %v11411_v44 = vpop.f32.mrb[151].mxu1 }
 0x645   : > { %v4650_v8 = vmax.f32 %v4014_v2, 0.0  ;;  %9343 = vmatmul.mubr.msk.bf16.gmra.mrb[180].mxu0 %vm14216_vm0, %v9822_v51  ;;  %v11407_v46 = vpop.xlane.xlu1 %5291 }
 0x647   : > { %v4913_v54 = vmul.f32 %v11024_v34, %v4650_v8  ;;  %v4075_v8 = vadd.f32 %v11007_v17, %v11303_v10  ;;  %v11432_v51 = vpop.permute.xlu0 %6392  ;;  %v9332_v10 = vpop.f32.mrb[168].mxu0 }
 0x648   : > { %14246 = vst [vmem:[#allocation19_spill] sm:$0xff] %v11432_v51  ;;  %v2314_v58 = vadd.f32 %v11143_v63, %v9332_v10  ;;  %v4038_v10 = vadd.f32 %v11007_v17, %v11177_v6 }
 0x649   : > { %v5428_v22 = vsel %vm14217_vm2, %v4913_v54, 0.0  ;;  %v11419_v2 = vpop.xlane.xlu1 %5285  ;;  %v4930_v54 = vmul.f32 %v11024_v34, %v4667_v62  ;;  %v4665_v3 = vmax.f32 %v4075_v8, 0.0 }
 0x64b   : > { %v4928_v28 = vmul.f32 %v11024_v34, %v4665_v3  ;;  %v5479_v18 = vsel %vm14217_vm2, %v4930_v54, 0.0  ;;  %v11437_v8 = vpop.xlane.xlu0 %5336 }
 0x656   : > { %v11415_v0 = vpop.f32.mrb[152].mxu1 }
 0x659   : > { %6542 = vperm.xlu0 %9725, %v5887_v30   ;;  %v11421_v30 = vpop.f32.mrb[153].mxu1 }
 0x65d   : > { %5435 = vadd.xlane.f32.xlu1 %v5434_v56  ;;  %6536 = vperm.xlu0 %9725, %v5885_v36   ;;  %v5876_v36 = vadd.f32 %v10984_v21, %v11051_v7  ;;  %v11428_v56 = vpop.permute.xlu1 %6371 }
 0x65e   : > { %14245 = vst [vmem:[#allocation18_spill] sm:$0xff] %v11428_v56 }
 0x661   : > { %5429 = vadd.xlane.f32.xlu1 %v5428_v22  ;;  %v5473_v22 = vsel %vm14217_vm2, %v4928_v28, 0.0 }
 0x672   : > { %6515 = vperm.xlu1 %9724, %v5878_v24   ;;  %v2305_v24 = vpop.f32.mrb[169].mxu0 }
 0x673   : > { %v2306_v7 = vadd.f32 %v11143_v63, %v2305_v24  ;;  %v9333_v62 = vpop.f32.mrb[170].mxu0  ;;  %v11449_v24 = vpop.xlane.xlu0 %5330 }
 0x674   : > { %v2317_v3 = vadd.f32 %v11143_v63, %v9333_v62  ;;  %v2308_v56 = vpop.f32.mrb[171].mxu0  ;;  %v11456_v62 = vpop.permute.xlu1 %6365 }
 0x675   : > { %v2824_v54 = vmax.f32 %v2306_v7, 0.0  ;;  %v2309_v16 = vadd.f32 %v11143_v63, %v2308_v56  ;;  %v5891_v56 = vadd.f32 %v10984_v21, %v11233_v39  ;;  %14247 = vst [vmem:[#allocation20_spill] sm:$0xff] %v11456_v62  ;;  %v9824_v39 = vld [vmem:[%s10048_s21 + $0x2e8] sm:$0xff]  }
 0x676   : > { %6509 = vperm.xlu1 %9724, %v5876_v36   ;;  %v2826_v36 = vmax.f32 %v2314_v58, 0.0  ;;  %v4030_v58 = vadd.f32 %v11007_v17, %v11179_v33  ;;  %v9823_v33 = vld [vmem:[%s10048_s21 + $0x2e0] sm:$0xff]  }
 0x677   : > { %v2825_v25 = vmax.f32 %v2309_v16, 0.0  ;;  %9346 = vmatprep.mubr.msk.bf16.mxu0 %vm14216_vm0, %v9823_v33 }
 0x678   : > { %v4654_v16 = vmax.f32 %v4030_v58, 0.0  ;;  %9347 = vmatmul.mubr.msk.bf16.gmra.mrb[184].mxu0 %vm14216_vm0, %v9824_v39 }
 0x679   : > { %v2996_v51 = vpack.c.bf16 %v2825_v25, %v2824_v54  ;;  %v11465_v54 = vpop.xlane.xlu1 %5303 }
 0x67a   : > { %v4917_v7 = vmul.f32 %v11024_v34, %v4654_v16  ;;  %v4091_v16 = vadd.f32 %v11007_v17, %v11363_v42 }
 0x67b   : > { %9594 = vmatprep.mubr.msk.bf16.mxu1 %vm14218_vm1, %v2996_v51  ;;  %v5889_v51 = vadd.f32 %v10984_v21, %v11254_v20  ;;  %v11467_v20 = vpop.f32.mrb[154].mxu1 }
 0x67c   : > { %5480 = vadd.xlane.f32.xlu0 %v5479_v18  ;;  %v2827_v18 = vmax.f32 %v2317_v3, 0.0  ;;  %v5440_v3 = vsel %vm14217_vm2, %v4917_v7, 0.0 }
 0x67d   : > { %v11477_v58 = vpop.xlane.xlu1 %5297 }
 0x67e   : > { %v2997_v28 = vpack.c.bf16 %v2827_v18, %v2826_v36  ;;  %v11458_v36 = vpop.permute.xlu0 %6410  ;;  %v11469_v18 = vpop.f32.mrb[155].mxu1 }
 0x67f   : > { %14248 = vst [vmem:[#allocation21_spill] sm:$0xff] %v11458_v36 }
 0x680   : > { %5474 = vadd.xlane.f32.xlu0 %v5473_v22  ;;  %9595 = vmatmul.mubr.msk.bf16.gmra.mrb[168].mxu1 %vm14218_vm1, %v2997_v28  ;;  %v4656_v22 = vmax.f32 %v4038_v10, 0.0  ;;  %v4099_v28 = vadd.f32 %v11007_v17, %v11357_v60  ;;  %v4669_v60 = vmax.f32 %v4091_v16, 0.0 }
 0x682   : > { %v4919_v25 = vmul.f32 %v11024_v34, %v4656_v22  ;;  %v5882_v22 = vadd.f32 %v10984_v21, %v11081_v52  ;;  %v4932_v52 = vmul.f32 %v11024_v34, %v4669_v60  ;;  %v11490_v39 = vpop.permute.xlu0 %6404 }
 0x683   : > { %14249 = vst [vmem:[#allocation22_spill] sm:$0xff] %v11490_v39 }
 0x684   : > { %v5446_v6 = vsel %vm14217_vm2, %v4919_v25, 0.0  ;;  %v4671_v25 = vmax.f32 %v4099_v28, 0.0  ;;  %v5485_v17 = vsel %vm14217_vm2, %v4932_v52, 0.0 }
 0x686   : > { %v4934_v7 = vmul.f32 %v11024_v34, %v4671_v25 }
 0x688   : > { %v5491_v33 = vsel %vm14217_vm2, %v4934_v7, 0.0 }
 0x696   : > { %6554 = vperm.xlu0 %9725, %v5891_v56   ;;  %v11473_v10 = vpop.f32.mrb[156].mxu1 }
 0x697   : > { %v11479_v56 = vpop.f32.mrb[157].mxu1 }
 0x69a   : > { %5447 = vadd.xlane.f32.xlu1 %v5446_v6  ;;  %6548 = vperm.xlu0 %9725, %v5889_v51   ;;  %v5880_v51 = vadd.f32 %v10984_v21, %v11087_v27  ;;  %v11486_v6 = vpop.permute.xlu1 %6383 }
 0x69e   : > { %5441 = vadd.xlane.f32.xlu1 %v5440_v3  ;;  %v9336_v3 = vpop.f32.mrb[172].mxu0 }
 0x69f   : > { %v2330_v42 = vadd.f32 %v11143_v63, %v9336_v3  ;;  %v2321_v28 = vpop.f32.mrb[173].mxu0  ;;  %v11504_v3 = vld [vmem:[%s14212_s4] ss:$0 sm:$0xff] }
 0x6a0   : > { %v2322_v21 = vadd.f32 %v11143_v63, %v2321_v28  ;;  %v9337_v27 = vpop.f32.mrb[174].mxu0  ;;  %v4046_v28 = vadd.f32 %v11504_v3, %v11237_v11 }
 0x6a1   : > { %v2333_v25 = vadd.f32 %v11143_v63, %v9337_v27  ;;  %v2324_v16 = vpop.f32.mrb[175].mxu0 }
 0x6a2   : > { %v2828_v34 = vmax.f32 %v2322_v21, 0.0  ;;  %v2325_v7 = vadd.f32 %v11143_v63, %v2324_v16  ;;  %v11510_v21 = vld [vmem:[#allocation2] ss:$0 sm:$0xff] }
 0x6a3   : > { %v2831_v60 = vmax.f32 %v2333_v25, 0.0  ;;  %v5895_v27 = vadd.f32 %v11510_v21, %v11312_v53  ;;  %v4658_v25 = vmax.f32 %v4046_v28, 0.0  ;;  %v5893_v11 = vadd.f32 %v11510_v21, %v11349_v40  ;;  %v11537_v40 = vpop.f32.mrb[158].mxu1 }
 0x6a4   : > { %v4115_v28 = vadd.f32 %v11504_v3, %v11415_v0 }
 0x6af   : > { %6527 = vperm.xlu1 %9724, %v5882_v22   ;;  %v2830_v22 = vmax.f32 %v2330_v42, 0.0  ;;  %v4054_v42 = vadd.f32 %v11504_v3, %v11235_v19 }
 0x6b1   : > { %v2999_v36 = vpack.c.bf16 %v2831_v60, %v2830_v22  ;;  %v11519_v22 = vld [vmem:[%s14213_s5] ss:$0 sm:$0xff]  ;;  %v9825_v60 = vld [vmem:[%s10048_s21 + $0x2f0] sm:$0xff]  }
 0x6b2   : > { %v4921_v16 = vmul.f32 %v11519_v22, %v4658_v25  ;;  %9350 = vmatprep.mubr.msk.bf16.mxu0 %vm14216_vm0, %v9825_v60  ;;  %v5884_v60 = vadd.f32 %v11510_v21, %v11105_v5 }
 0x6b3   : > { %6521 = vperm.xlu1 %9724, %v5880_v51   ;;  %v11496_v51 = vpop.xlane.xlu0 %5348 }
 0x6b9   : > { %5492 = vadd.xlane.f32.xlu0 %v5491_v33  ;;  %v2829_v33 = vmax.f32 %v2325_v7, 0.0  ;;  %v11526_v7 = vpop.permute.xlu1 %6377 }
 0x6bb   : > { %v2998_v52 = vpack.c.bf16 %v2829_v33, %v2828_v34  ;;  %v9826_v33 = vld [vmem:[%s10048_s21 + $0x2f8] sm:$0xff]  }
 0x6bc   : > { %9351 = vmatmul.mubr.msk.bf16.gmra.mrb[188].mxu0 %vm14216_vm0, %v9826_v33 }
 0x6bd   : > { %5486 = vadd.xlane.f32.xlu0 %v5485_v17  ;;  %9598 = vmatprep.mubr.msk.bf16.mxu1 %vm14218_vm1, %v2998_v52  ;;  %v4660_v17 = vmax.f32 %v4054_v42, 0.0  ;;  %v5452_v52 = vsel %vm14217_vm2, %v4921_v16, 0.0  ;;  %v11535_v42 = vpop.xlane.xlu1 %5315  ;;  %v4675_v16 = vmax.f32 %v4115_v28, 0.0 }
 0x6be   : > { %9599 = vmatmul.mubr.msk.bf16.gmra.mrb[172].mxu1 %vm14218_vm1, %v2999_v36  ;;  %v11514_v36 = vpop.xlane.xlu0 %5342 }
 0x6bf   : > { %v4923_v19 = vmul.f32 %v11519_v22, %v4660_v17  ;;  %v11539_v17 = vpop.f32.mrb[159].mxu1  ;;  %v4938_v33 = vmul.f32 %v11519_v22, %v4675_v16 }
 0x6c1   : > { %v5458_v34 = vsel %vm14217_vm2, %v4923_v19, 0.0  ;;  %v5886_v19 = vadd.f32 %v11510_v21, %v11097_v26  ;;  %v11547_v25 = vpop.xlane.xlu1 %5309 }
 0x6c2   : > { %v11528_v53 = vpop.permute.xlu0 %6422 }
 0x6c3   : > { %14250 = vst [vmem:[#allocation23_spill] sm:$0xff] %v11528_v53  ;;  %v5503_v53 = vsel %vm14217_vm2, %v4938_v33, 0.0 }
 0x6c6   : > { %v11560_v62 = vpop.permute.xlu0 %6416 }
 0x6c7   : > { %14252 = vst [vmem:[#allocation25_spill] sm:$0xff] %v11560_v62 }
 0x6ca   : > { %v11566_v15 = vpop.xlane.xlu0 %5360 }
 0x6d3   : > { %6566 = vperm.xlu0 %9725, %v5895_v27  }
 0x6d7   : > { %5459 = vadd.xlane.f32.xlu1 %v5458_v34  ;;  %6560 = vperm.xlu0 %9725, %v5893_v11   ;;  %v4107_v34 = vadd.f32 %v11504_v3, %v11421_v30 }
 0x6d9   : > { %v11543_v27 = vpop.f32.mrb[160].mxu1  ;;  %v4673_v0 = vmax.f32 %v4107_v34, 0.0 }
 0x6da   : > { %v11549_v11 = vpop.f32.mrb[161].mxu1 }
 0x6db   : > { %5453 = vadd.xlane.f32.xlu1 %v5452_v52  ;;  %v11556_v52 = vpop.permute.xlu1 %6395  ;;  %v4936_v26 = vmul.f32 %v11519_v22, %v4673_v0  ;;  %v9340_v28 = vpop.f32.mrb[176].mxu0 }
 0x6dc   : > { %14251 = vst [vmem:[#allocation24_spill] sm:$0xff] %v11556_v52  ;;  %v2337_v39 = vpop.f32.mrb[177].mxu0 }
 0x6dd   : > { %v5497_v30 = vsel %vm14217_vm2, %v4936_v26, 0.0  ;;  %v2338_v5 = vadd.f32 %v11143_v63, %v2337_v39  ;;  %v9341_v16 = vpop.f32.mrb[178].mxu0  ;;  %v4070_v39 = vadd.f32 %v11504_v3, %v11293_v38 }
 0x6de   : > { %v2349_v52 = vadd.f32 %v11143_v63, %v9341_v16 }
 0x6df   : > { %v2832_v33 = vmax.f32 %v2338_v5, 0.0 }
 0x6ec   : > { %6539 = vperm.xlu1 %9724, %v5886_v19   ;;  %v2346_v19 = vadd.f32 %v11143_v63, %v9340_v28  ;;  %v4664_v28 = vmax.f32 %v4070_v39, 0.0 }
 0x6ee   : > { %v2834_v34 = vmax.f32 %v2346_v19, 0.0  ;;  %v5899_v19 = vadd.f32 %v11510_v21, %v11407_v46  ;;  %v9828_v46 = vld [vmem:[%s10048_s21 + $0x308] sm:$0xff]  }
 0x6f0   : > { %6533 = vperm.xlu1 %9724, %v5884_v60   ;;  %v2340_v60 = vpop.f32.mrb[179].mxu0 }
 0x6f1   : > { %v2341_v0 = vadd.f32 %v11143_v63, %v2340_v60 }
 0x6f3   : > { %v2833_v62 = vmax.f32 %v2341_v0, 0.0 }
 0x6f5   : > { %v3000_v26 = vpack.c.bf16 %v2833_v62, %v2832_v33  ;;  %v4927_v62 = vmul.f32 %v11519_v22, %v4664_v28  ;;  %v5890_v28 = vadd.f32 %v11510_v21, %v11137_v12 }
 0x6f6   : > { %5504 = vadd.xlane.f32.xlu0 %v5503_v53  ;;  %v2835_v53 = vmax.f32 %v2349_v52, 0.0  ;;  %v11577_v52 = vpop.xlane.xlu0 %5354 }
 0x6f7   : > { %9602 = vmatprep.mubr.msk.bf16.mxu1 %vm14218_vm1, %v3000_v26  ;;  %v5470_v38 = vsel %vm14217_vm2, %v4927_v62, 0.0  ;;  %v4131_v26 = vadd.f32 %v11504_v3, %v11473_v10 }
 0x6f8   : > { %v3001_v14 = vpack.c.bf16 %v2835_v53, %v2834_v34  ;;  %v11584_v34 = vpop.permute.xlu1 %6389 }
 0x6f9   : > { %v4679_v62 = vmax.f32 %v4131_v26, 0.0 }
 0x6fa   : > { %5498 = vadd.xlane.f32.xlu0 %v5497_v30  ;;  %9603 = vmatmul.mubr.msk.bf16.gmra.mrb[176].mxu1 %vm14218_vm1, %v3001_v14  ;;  %v4062_v30 = vadd.f32 %v11504_v3, %v11295_v61  ;;  %v5897_v14 = vadd.f32 %v11510_v21, %v11419_v2  ;;  %v11586_v60 = vpop.permute.xlu0 %6434  ;;  %v9827_v61 = vld [vmem:[%s10048_s21 + $0x300] sm:$0xff]   ;;  %v11595_v2 = vpop.f32.mrb[162].mxu1 }
 0x6fb   : > { %14253 = vst [vmem:[#allocation26_spill] sm:$0xff] %v11586_v60  ;;  %9354 = vmatprep.mubr.msk.bf16.mxu0 %vm14216_vm0, %v9827_v61  ;;  %v11597_v53 = vpop.f32.mrb[163].mxu1 }
 0x6fc   : > { %v4662_v5 = vmax.f32 %v4062_v30, 0.0  ;;  %9355 = vmatmul.mubr.msk.bf16.gmra.mrb[192].mxu0 %vm14216_vm0, %v9828_v46  ;;  %v11593_v0 = vpop.xlane.xlu1 %5327 }
 0x6fe   : > { %v4925_v16 = vmul.f32 %v11519_v22, %v4662_v5  ;;  %v4123_v5 = vadd.f32 %v11504_v3, %v11479_v56  ;;  %v11618_v46 = vpop.permute.xlu0 %6428 }
 0x6ff   : > { %14255 = vst [vmem:[#allocation28_spill] sm:$0xff] %v11618_v46 }
 0x700   : > { %v5464_v33 = vsel %vm14217_vm2, %v4925_v16, 0.0  ;;  %v11605_v30 = vpop.xlane.xlu1 %5321  ;;  %v4942_v16 = vmul.f32 %v11519_v22, %v4679_v62  ;;  %v4677_v10 = vmax.f32 %v4123_v5, 0.0 }
 0x702   : > { %v4940_v12 = vmul.f32 %v11519_v22, %v4677_v10  ;;  %v5515_v61 = vsel %vm14217_vm2, %v4942_v16, 0.0  ;;  %v11624_v60 = vpop.xlane.xlu0 %5372 }
 0x704   : > { %v5509_v56 = vsel %vm14217_vm2, %v4940_v12, 0.0 }
 0x710   : > { %6578 = vperm.xlu0 %9725, %v5899_v19  }
 0x714   : > { %5471 = vadd.xlane.f32.xlu1 %v5470_v38  ;;  %6572 = vperm.xlu0 %9725, %v5897_v14   ;;  %v5888_v14 = vadd.f32 %v11510_v21, %v11148_v48  ;;  %v11614_v38 = vpop.permute.xlu1 %6407 }
 0x715   : > { %14254 = vst [vmem:[#allocation27_spill] sm:$0xff] %v11614_v38 }
 0x716   : > { %v11601_v39 = vpop.f32.mrb[164].mxu1 }
 0x717   : > { %v11607_v19 = vpop.f32.mrb[165].mxu1 }
 0x718   : > { %5465 = vadd.xlane.f32.xlu1 %v5464_v33  ;;  %v9344_v33 = vpop.f32.mrb[180].mxu0 }
 0x719   : > { %v2362_v26 = vadd.f32 %v11143_v63, %v9344_v33  ;;  %v4086_v33 = vadd.f32 %v11504_v3, %v11351_v57 }
 0x71b   : > { %v2838_v5 = vmax.f32 %v2362_v26, 0.0  ;;  %v4668_v26 = vmax.f32 %v4086_v33, 0.0  ;;  %v5894_v33 = vadd.f32 %v11510_v21, %v11168_v32 }
 0x729   : > { %6551 = vperm.xlu1 %9724, %v5890_v28   ;;  %v2353_v28 = vpop.f32.mrb[181].mxu0 }
 0x72a   : > { %v2354_v48 = vadd.f32 %v11143_v63, %v2353_v28  ;;  %v9345_v62 = vpop.f32.mrb[182].mxu0 }
 0x72b   : > { %v2365_v38 = vadd.f32 %v11143_v63, %v9345_v62  ;;  %v11642_v62 = vpop.permute.xlu1 %6401 }
 0x72c   : > { %v2836_v16 = vmax.f32 %v2354_v48, 0.0  ;;  %14256 = vst [vmem:[#allocation29_spill] sm:$0xff] %v11642_v62 }
 0x72d   : > { %6545 = vperm.xlu1 %9724, %v5888_v14   ;;  %v2356_v14 = vpop.f32.mrb[183].mxu0 }
 0x72e   : > { %v2357_v10 = vadd.f32 %v11143_v63, %v2356_v14  ;;  %v5903_v63 = vadd.f32 %v11510_v21, %v11465_v54  ;;  %v9830_v54 = vld [vmem:[%s10048_s21 + $0x318] sm:$0xff]  }
 0x730   : > { %v2837_v46 = vmax.f32 %v2357_v10, 0.0 }
 0x732   : > { %v3002_v12 = vpack.c.bf16 %v2837_v46, %v2836_v16  ;;  %v4931_v46 = vmul.f32 %v11519_v22, %v4668_v26  ;;  %v11651_v16 = vpop.xlane.xlu1 %5339 }
 0x733   : > { %5516 = vadd.xlane.f32.xlu0 %v5515_v61  ;;  %v2839_v61 = vmax.f32 %v2365_v38, 0.0  ;;  %v11635_v38 = vpop.xlane.xlu0 %5366 }
 0x734   : > { %9606 = vmatprep.mubr.msk.bf16.mxu1 %vm14218_vm1, %v3002_v12  ;;  %v5482_v57 = vsel %vm14217_vm2, %v4931_v46, 0.0  ;;  %v4139_v46 = vadd.f32 %v11504_v3, %v11549_v11 }
 0x735   : > { %v3003_v41 = vpack.c.bf16 %v2839_v61, %v2838_v5  ;;  %v4147_v61 = vadd.f32 %v11504_v3, %v11543_v27 }
 0x736   : > { %v11663_v26 = vpop.xlane.xlu1 %5333  ;;  %v4681_v27 = vmax.f32 %v4139_v46, 0.0 }
 0x737   : > { %5510 = vadd.xlane.f32.xlu0 %v5509_v56  ;;  %9607 = vmatmul.mubr.msk.bf16.gmra.mrb[180].mxu1 %vm14218_vm1, %v3003_v41  ;;  %v4078_v56 = vadd.f32 %v11504_v3, %v11353_v45  ;;  %v5901_v41 = vadd.f32 %v11510_v21, %v11477_v58  ;;  %v11644_v5 = vpop.permute.xlu0 %6446  ;;  %v9829_v45 = vld [vmem:[%s10048_s21 + $0x310] sm:$0xff]   ;;  %v11653_v58 = vpop.f32.mrb[166].mxu1 }
 0x738   : > { %14257 = vst [vmem:[#allocation30_spill] sm:$0xff] %v11644_v5  ;;  %9358 = vmatprep.mubr.msk.bf16.mxu0 %vm14216_vm0, %v9829_v45  ;;  %v11655_v10 = vpop.f32.mrb[167].mxu1  ;;  %v4944_v32 = vmul.f32 %v11519_v22, %v4681_v27 }
 0x739   : > { %v4666_v28 = vmax.f32 %v4078_v56, 0.0  ;;  %9359 = vmatmul.mubr.msk.bf16.gmra.mrb[196].mxu0 %vm14216_vm0, %v9830_v54 }
 0x73a   : > { %v5521_v54 = vsel %vm14217_vm2, %v4944_v32, 0.0 }
 0x73b   : > { %v4929_v48 = vmul.f32 %v11519_v22, %v4666_v28  ;;  %v5892_v28 = vadd.f32 %v11510_v21, %v11200_v35  ;;  %v11676_v45 = vpop.permute.xlu0 %6440  ;;  %v11682_v35 = vld [vmem:[%s14210_s2] ss:$0 sm:$0xff] }
 0x73c   : > { %14259 = vst [vmem:[#allocation32_spill] sm:$0xff] %v11676_v45 }
 0x73d   : > { %v5476_v14 = vsel %vm14217_vm2, %v4929_v48, 0.0  ;;  %v11672_v48 = vpop.permute.xlu1 %6419 }
 0x73e   : > { %14258 = vst [vmem:[#allocation31_spill] sm:$0xff] %v11672_v48 }
 0x73f   : > { %v11686_v46 = vpop.xlane.xlu0 %5384 }
 0x74b   : > { %v9348_v11 = vpop.f32.mrb[184].mxu0 }
 0x74d   : > { %6590 = vperm.xlu0 %9725, %v5903_v63   ;;  %v4683_v63 = vmax.f32 %v4147_v61, 0.0  ;;  %v2369_v61 = vpop.f32.mrb[185].mxu0 }
 0x751   : > { %5483 = vadd.xlane.f32.xlu1 %v5482_v57  ;;  %6584 = vperm.xlu0 %9725, %v5901_v41   ;;  %v4946_v41 = vmul.f32 %v11519_v22, %v4683_v63  ;;  %v9349_v63 = vpop.f32.mrb[186].mxu0 }
 0x752   : > { %v2372_v27 = vpop.f32.mrb[187].mxu0 }
 0x753   : > { %v11659_v12 = vpop.f32.mrb[168].mxu1  ;;  %v5527_v57 = vsel %vm14217_vm2, %v4946_v41, 0.0  ;;  %v2381_v41 = vadd.f32 %v11682_v35, %v9349_v63  ;;  %v11705_v63 = vpop.permute.xlu1 %6413 }
 0x754   : > { %v11665_v56 = vpop.f32.mrb[169].mxu1  ;;  %14260 = vst [vmem:[#allocation33_spill] sm:$0xff] %v11705_v63 }
 0x755   : > { %5477 = vadd.xlane.f32.xlu1 %v5476_v14  ;;  %v2378_v14 = vadd.f32 %v11682_v35, %v9348_v11  ;;  %v2843_v48 = vmax.f32 %v2381_v41, 0.0  ;;  %v4102_v11 = vadd.f32 %v11504_v3, %v11409_v49 }
 0x766   : > { %6563 = vperm.xlu1 %9724, %v5894_v33   ;;  %v2370_v33 = vadd.f32 %v11682_v35, %v2369_v61  ;;  %v5907_v61 = vadd.f32 %v11510_v21, %v11535_v42  ;;  %v9832_v42 = vld [vmem:[%s10048_s21 + $0x328] sm:$0xff]  }
 0x768   : > { %v2840_v32 = vmax.f32 %v2370_v33, 0.0  ;;  %v11698_v33 = vpop.xlane.xlu0 %5378 }
 0x76a   : > { %6557 = vperm.xlu1 %9724, %v5892_v28   ;;  %v2842_v28 = vmax.f32 %v2378_v14, 0.0  ;;  %v4094_v14 = vadd.f32 %v11504_v3, %v11411_v44  ;;  %v9831_v44 = vld [vmem:[%s10048_s21 + $0x320] sm:$0xff]  }
 0x76b   : > { %9362 = vmatprep.mubr.msk.bf16.mxu0 %vm14216_vm0, %v9831_v44 }
 0x76c   : > { %v3005_v45 = vpack.c.bf16 %v2843_v48, %v2842_v28  ;;  %v4670_v48 = vmax.f32 %v4094_v14, 0.0  ;;  %v11707_v28 = vpop.permute.xlu0 %6458  ;;  %9363 = vmatmul.mubr.msk.bf16.gmra.mrb[200].mxu0 %vm14216_vm0, %v9832_v42 }
 0x76d   : > { %14261 = vst [vmem:[#allocation34_spill] sm:$0xff] %v11707_v28 }
 0x770   : > { %5528 = vadd.xlane.f32.xlu0 %v5527_v57  ;;  %v2373_v57 = vadd.f32 %v11682_v35, %v2372_v27  ;;  %v11714_v27 = vpop.xlane.xlu1 %5351  ;;  %v11739_v42 = vpop.permute.xlu0 %6452 }
 0x771   : > { %14263 = vst [vmem:[#allocation36_spill] sm:$0xff] %v11739_v42 }
 0x772   : > { %v2841_v5 = vmax.f32 %v2373_v57, 0.0  ;;  %v4163_v57 = vadd.f32 %v11504_v3, %v11601_v39 }
 0x774   : > { %5522 = vadd.xlane.f32.xlu0 %v5521_v54  ;;  %v3004_v62 = vpack.c.bf16 %v2841_v5, %v2840_v32  ;;  %v4672_v54 = vmax.f32 %v4102_v11, 0.0  ;;  %v11726_v14 = vpop.xlane.xlu1 %5345  ;;  %v11745_v63 = vpop.xlane.xlu0 %5396 }
 0x776   : > { %9610 = vmatprep.mubr.msk.bf16.mxu1 %vm14218_vm1, %v3004_v62  ;;  %v4935_v5 = vmul.f32 %v11519_v22, %v4672_v54  ;;  %v5905_v62 = vadd.f32 %v11510_v21, %v11547_v25  ;;  %v11716_v25 = vpop.f32.mrb[170].mxu1  ;;  %v5898_v54 = vadd.f32 %v11510_v21, %v11205_v55 }
 0x777   : > { %9611 = vmatmul.mubr.msk.bf16.gmra.mrb[184].mxu1 %vm14218_vm1, %v3005_v45  ;;  %v4933_v45 = vmul.f32 %v11519_v22, %v4670_v48  ;;  %v11718_v32 = vpop.f32.mrb[171].mxu1  ;;  %v4155_v48 = vadd.f32 %v11504_v3, %v11607_v19 }
 0x778   : > { %v5494_v49 = vsel %vm14217_vm2, %v4935_v5, 0.0  ;;  %v4687_v5 = vmax.f32 %v4163_v57, 0.0 }
 0x779   : > { %v5488_v41 = vsel %vm14217_vm2, %v4933_v45, 0.0  ;;  %v4685_v39 = vmax.f32 %v4155_v48, 0.0 }
 0x77a   : > { %v4950_v45 = vmul.f32 %v11519_v22, %v4687_v5 }
 0x77b   : > { %v4948_v55 = vmul.f32 %v11519_v22, %v4685_v39 }
 0x77c   : > { %v5539_v44 = vsel %vm14217_vm2, %v4950_v45, 0.0 }
 0x77d   : > { %v5533_v19 = vsel %vm14217_vm2, %v4948_v55, 0.0 }
 0x78a   : > { %6602 = vperm.xlu0 %9725, %v5907_v61  }
 0x78e   : > { %5495 = vadd.xlane.f32.xlu1 %v5494_v49  ;;  %6596 = vperm.xlu0 %9725, %v5905_v62   ;;  %v5896_v62 = vadd.f32 %v11510_v21, %v11217_v9  ;;  %v11735_v49 = vpop.permute.xlu1 %6431 }
 0x78f   : > { %14262 = vst [vmem:[#allocation35_spill] sm:$0xff] %v11735_v49 }
 0x791   : > { %v11722_v11 = vpop.f32.mrb[172].mxu1 }
 0x792   : > { %5489 = vadd.xlane.f32.xlu1 %v5488_v41  ;;  %v11728_v61 = vpop.f32.mrb[173].mxu1  ;;  %v9352_v41 = vpop.f32.mrb[188].mxu0 }
 0x793   : > { %v2394_v57 = vadd.f32 %v11682_v35, %v9352_v41  ;;  %v4118_v41 = vadd.f32 %v11504_v3, %v11467_v20 }
 0x795   : > { %v2846_v48 = vmax.f32 %v2394_v57, 0.0  ;;  %v4676_v57 = vmax.f32 %v4118_v41, 0.0 }
 0x7a3   : > { %6575 = vperm.xlu1 %9724, %v5898_v54   ;;  %v2385_v54 = vpop.f32.mrb[189].mxu0 }
 0x7a4   : > { %v2386_v9 = vadd.f32 %v11682_v35, %v2385_v54  ;;  %v9353_v5 = vpop.f32.mrb[190].mxu0  ;;  %v5911_v54 = vadd.f32 %v11510_v21, %v11593_v0  ;;  %v9834_v0 = vld [vmem:[%s10048_s21 + $0x338] sm:$0xff]  }
 0x7a5   : > { %v2397_v28 = vadd.f32 %v11682_v35, %v9353_v5 }
 0x7a6   : > { %v2844_v45 = vmax.f32 %v2386_v9, 0.0 }
 0x7a7   : > { %6569 = vperm.xlu1 %9724, %v5896_v62   ;;  %v2388_v62 = vpop.f32.mrb[191].mxu0 }
 0x7a8   : > { %v2389_v39 = vadd.f32 %v11682_v35, %v2388_v62 }
 0x7aa   : > { %v2845_v42 = vmax.f32 %v2389_v39, 0.0 }
 0x7ac   : > { %v3006_v55 = vpack.c.bf16 %v2845_v42, %v2844_v45  ;;  %v4939_v42 = vmul.f32 %v11519_v22, %v4676_v57  ;;  %v5902_v57 = vadd.f32 %v11510_v21, %v11264_v50 }
 0x7ad   : > { %5540 = vadd.xlane.f32.xlu0 %v5539_v44  ;;  %v2847_v44 = vmax.f32 %v2397_v28, 0.0  ;;  %v11756_v28 = vpop.xlane.xlu0 %5390 }
 0x7ae   : > { %9614 = vmatprep.mubr.msk.bf16.mxu1 %vm14218_vm1, %v3006_v55  ;;  %v5506_v20 = vsel %vm14217_vm2, %v4939_v42, 0.0  ;;  %v4179_v55 = vadd.f32 %v11504_v3, %v11659_v12 }
 0x7af   : > { %v3007_v49 = vpack.c.bf16 %v2847_v44, %v2846_v48  ;;  %v11763_v48 = vpop.permute.xlu1 %6425 }
 0x7b0   : > { %14264 = vst [vmem:[#allocation37_spill] sm:$0xff] %v11763_v48  ;;  %v4691_v42 = vmax.f32 %v4179_v55, 0.0 }
 0x7b1   : > { %5534 = vadd.xlane.f32.xlu0 %v5533_v19  ;;  %9615 = vmatmul.mubr.msk.bf16.gmra.mrb[188].mxu1 %vm14218_vm1, %v3007_v49  ;;  %v4110_v19 = vadd.f32 %v11504_v3, %v11469_v18  ;;  %v5909_v49 = vadd.f32 %v11510_v21, %v11605_v30  ;;  %v11765_v62 = vpop.permute.xlu0 %6470  ;;  %v9833_v18 = vld [vmem:[%s10048_s21 + $0x330] sm:$0xff]   ;;  %v11774_v30 = vpop.f32.mrb[174].mxu1 }
 0x7b2   : > { %14265 = vst [vmem:[#allocation38_spill] sm:$0xff] %v11765_v62  ;;  %9366 = vmatprep.mubr.msk.bf16.mxu0 %vm14216_vm0, %v9833_v18  ;;  %v11776_v44 = vpop.f32.mrb[175].mxu1 }
 0x7b3   : > { %v4674_v9 = vmax.f32 %v4110_v19, 0.0  ;;  %9367 = vmatmul.mubr.msk.bf16.gmra.mrb[204].mxu0 %vm14216_vm0, %v9834_v0  ;;  %v11772_v39 = vpop.xlane.xlu1 %5363 }
 0x7b5   : > { %v4937_v5 = vmul.f32 %v11519_v22, %v4674_v9  ;;  %v4171_v9 = vadd.f32 %v11504_v3, %v11665_v56  ;;  %v11797_v0 = vpop.permute.xlu0 %6464 }
 0x7b6   : > { %14267 = vst [vmem:[#allocation40_spill] sm:$0xff] %v11797_v0 }
 0x7b7   : > { %v5500_v45 = vsel %vm14217_vm2, %v4937_v5, 0.0  ;;  %v11784_v19 = vpop.xlane.xlu1 %5357  ;;  %v4954_v5 = vmul.f32 %v11519_v22, %v4691_v42  ;;  %v4689_v12 = vmax.f32 %v4171_v9, 0.0 }
 0x7b9   : > { %v4952_v50 = vmul.f32 %v11519_v22, %v4689_v12  ;;  %v5551_v18 = vsel %vm14217_vm2, %v4954_v5, 0.0 }
 0x7bb   : > { %v5545_v56 = vsel %vm14217_vm2, %v4952_v50, 0.0 }
 0x7c7   : > { %6614 = vperm.xlu0 %9725, %v5911_v54  }
 0x7cb   : > { %5507 = vadd.xlane.f32.xlu1 %v5506_v20  ;;  %6608 = vperm.xlu0 %9725, %v5909_v49   ;;  %v5900_v49 = vadd.f32 %v11510_v21, %v11275_v31  ;;  %v11793_v20 = vpop.permute.xlu1 %6443 }
 0x7cc   : > { %14266 = vst [vmem:[#allocation39_spill] sm:$0xff] %v11793_v20  ;;  %v11803_v20 = vpop.xlane.xlu0 %5408 }
 0x7cd   : > { %v11780_v41 = vpop.f32.mrb[176].mxu1 }
 0x7ce   : > { %v11786_v54 = vpop.f32.mrb[177].mxu1 }
 0x7cf   : > { %5501 = vadd.xlane.f32.xlu1 %v5500_v45  ;;  %v9356_v45 = vpop.f32.mrb[192].mxu0 }
 0x7d0   : > { %v2410_v55 = vadd.f32 %v11682_v35, %v9356_v45  ;;  %v4134_v45 = vadd.f32 %v11504_v3, %v11537_v40 }
 0x7d2   : > { %v2850_v9 = vmax.f32 %v2410_v55, 0.0  ;;  %v4680_v55 = vmax.f32 %v4134_v45, 0.0 }
 0x7e0   : > { %6587 = vperm.xlu1 %9724, %v5902_v57   ;;  %v2401_v57 = vpop.f32.mrb[193].mxu0 }
 0x7e1   : > { %v2402_v31 = vadd.f32 %v11682_v35, %v2401_v57  ;;  %v9357_v42 = vpop.f32.mrb[194].mxu0  ;;  %v5915_v57 = vadd.f32 %v11510_v21, %v11651_v16  ;;  %v9836_v16 = vld [vmem:[%s10048_s21 + $0x348] sm:$0xff]  }
 0x7e2   : > { %v2413_v62 = vadd.f32 %v11682_v35, %v9357_v42 }
 0x7e3   : > { %v2848_v5 = vmax.f32 %v2402_v31, 0.0 }
 0x7e4   : > { %6581 = vperm.xlu1 %9724, %v5900_v49   ;;  %v2404_v49 = vpop.f32.mrb[195].mxu0 }
 0x7e5   : > { %v2405_v12 = vadd.f32 %v11682_v35, %v2404_v49 }
 0x7e7   : > { %v2849_v0 = vmax.f32 %v2405_v12, 0.0 }
 0x7e9   : > { %v3008_v50 = vpack.c.bf16 %v2849_v0, %v2848_v5  ;;  %v4943_v0 = vmul.f32 %v11519_v22, %v4680_v55  ;;  %v5906_v55 = vadd.f32 %v11510_v21, %v11322_v4 }
 0x7ea   : > { %5552 = vadd.xlane.f32.xlu0 %v5551_v18  ;;  %v2851_v18 = vmax.f32 %v2413_v62, 0.0  ;;  %v11814_v62 = vpop.xlane.xlu0 %5402 }
 0x7eb   : > { %9618 = vmatprep.mubr.msk.bf16.mxu1 %vm14218_vm1, %v3008_v50  ;;  %v5518_v40 = vsel %vm14217_vm2, %v4943_v0, 0.0  ;;  %v4195_v50 = vadd.f32 %v11504_v3, %v11722_v11 }
 0x7ec   : > { %v3009_v48 = vpack.c.bf16 %v2851_v18, %v2850_v9  ;;  %v11821_v9 = vpop.permute.xlu1 %6437 }
 0x7ed   : > { %14268 = vst [vmem:[#allocation41_spill] sm:$0xff] %v11821_v9  ;;  %v4695_v0 = vmax.f32 %v4195_v50, 0.0 }
 0x7ee   : > { %5546 = vadd.xlane.f32.xlu0 %v5545_v56  ;;  %9619 = vmatmul.mubr.msk.bf16.gmra.mrb[192].mxu1 %vm14218_vm1, %v3009_v48  ;;  %v4126_v56 = vadd.f32 %v11504_v3, %v11539_v17  ;;  %v5913_v48 = vadd.f32 %v11510_v21, %v11663_v26  ;;  %v11823_v49 = vpop.permute.xlu0 %6482  ;;  %v9835_v17 = vld [vmem:[%s10048_s21 + $0x340] sm:$0xff]   ;;  %v11832_v26 = vpop.f32.mrb[178].mxu1 }
 0x7ef   : > { %14269 = vst [vmem:[#allocation42_spill] sm:$0xff] %v11823_v49  ;;  %9370 = vmatprep.mubr.msk.bf16.mxu0 %vm14216_vm0, %v9835_v17  ;;  %v11834_v18 = vpop.f32.mrb[179].mxu1 }
 0x7f0   : > { %v4678_v31 = vmax.f32 %v4126_v56, 0.0  ;;  %9371 = vmatmul.mubr.msk.bf16.gmra.mrb[208].mxu0 %vm14216_vm0, %v9836_v16  ;;  %v11830_v12 = vpop.xlane.xlu1 %5375 }
 0x7f2   : > { %v4941_v42 = vmul.f32 %v11519_v22, %v4678_v31  ;;  %v4187_v31 = vadd.f32 %v11504_v3, %v11728_v61  ;;  %v11855_v16 = vpop.permute.xlu0 %6476 }
 0x7f3   : > { %14271 = vst [vmem:[#allocation44_spill] sm:$0xff] %v11855_v16 }
 0x7f4   : > { %v5512_v5 = vsel %vm14217_vm2, %v4941_v42, 0.0  ;;  %v11842_v56 = vpop.xlane.xlu1 %5369  ;;  %v4958_v42 = vmul.f32 %v11519_v22, %v4695_v0  ;;  %v4693_v11 = vmax.f32 %v4187_v31, 0.0 }
 0x7f6   : > { %v4956_v4 = vmul.f32 %v11519_v22, %v4693_v11  ;;  %v5563_v17 = vsel %vm14217_vm2, %v4958_v42, 0.0  ;;  %v11861_v49 = vpop.xlane.xlu0 %5420 }
 0x7f8   : > { %v5557_v61 = vsel %vm14217_vm2, %v4956_v4, 0.0 }
 0x804   : > { %6626 = vperm.xlu0 %9725, %v5915_v57  }
 0x808   : > { %5519 = vadd.xlane.f32.xlu1 %v5518_v40  ;;  %6620 = vperm.xlu0 %9725, %v5913_v48   ;;  %v5904_v48 = vadd.f32 %v11510_v21, %v11333_v13  ;;  %v11851_v40 = vpop.permute.xlu1 %6455 }
 0x809   : > { %14270 = vst [vmem:[#allocation43_spill] sm:$0xff] %v11851_v40 }
 0x80a   : > { %v11838_v45 = vpop.f32.mrb[180].mxu1 }
 0x80b   : > { %v11844_v57 = vpop.f32.mrb[181].mxu1 }
 0x80c   : > { %5513 = vadd.xlane.f32.xlu1 %v5512_v5  ;;  %v9360_v5 = vpop.f32.mrb[196].mxu0 }
 0x80d   : > { %v2426_v50 = vadd.f32 %v11682_v35, %v9360_v5  ;;  %v4150_v5 = vadd.f32 %v11504_v3, %v11595_v2 }
 0x80f   : > { %v2854_v31 = vmax.f32 %v2426_v50, 0.0  ;;  %v4684_v50 = vmax.f32 %v4150_v5, 0.0 }
 0x81d   : > { %6599 = vperm.xlu1 %9724, %v5906_v55   ;;  %v2417_v55 = vpop.f32.mrb[197].mxu0 }
 0x81e   : > { %v2418_v13 = vadd.f32 %v11682_v35, %v2417_v55  ;;  %v9361_v0 = vpop.f32.mrb[198].mxu0  ;;  %v5919_v55 = vadd.f32 %v11510_v21, %v11714_v27  ;;  %v9838_v27 = vld [vmem:[%s10048_s21 + $0x358] sm:$0xff]  }
 0x81f   : > { %v2429_v40 = vadd.f32 %v11682_v35, %v9361_v0 }
 0x820   : > { %v2852_v42 = vmax.f32 %v2418_v13, 0.0 }
 0x821   : > { %6593 = vperm.xlu1 %9724, %v5904_v48   ;;  %v2420_v48 = vpop.f32.mrb[199].mxu0 }
 0x822   : > { %v2421_v11 = vadd.f32 %v11682_v35, %v2420_v48 }
 0x824   : > { %v2853_v16 = vmax.f32 %v2421_v11, 0.0 }
 0x826   : > { %v3010_v4 = vpack.c.bf16 %v2853_v16, %v2852_v42  ;;  %v4947_v16 = vmul.f32 %v11519_v22, %v4684_v50  ;;  %v5910_v50 = vadd.f32 %v11510_v21, %v11380_v43 }
 0x827   : > { %5564 = vadd.xlane.f32.xlu0 %v5563_v17  ;;  %v2855_v17 = vmax.f32 %v2429_v40, 0.0  ;;  %v11872_v40 = vpop.xlane.xlu0 %5414 }
 0x828   : > { %9622 = vmatprep.mubr.msk.bf16.mxu1 %vm14218_vm1, %v3010_v4  ;;  %v5530_v2 = vsel %vm14217_vm2, %v4947_v16, 0.0  ;;  %v4211_v4 = vadd.f32 %v11504_v3, %v11780_v41 }
 0x829   : > { %v3011_v9 = vpack.c.bf16 %v2855_v17, %v2854_v31  ;;  %v11879_v31 = vpop.permute.xlu1 %6449 }
 0x82a   : > { %14272 = vst [vmem:[#allocation45_spill] sm:$0xff] %v11879_v31  ;;  %v4699_v16 = vmax.f32 %v4211_v4, 0.0 }
 0x82b   : > { %5558 = vadd.xlane.f32.xlu0 %v5557_v61  ;;  %9623 = vmatmul.mubr.msk.bf16.gmra.mrb[196].mxu1 %vm14218_vm1, %v3011_v9  ;;  %v4142_v61 = vadd.f32 %v11504_v3, %v11597_v53  ;;  %v5917_v9 = vadd.f32 %v11510_v21, %v11726_v14  ;;  %v11881_v48 = vpop.permute.xlu0 %6494  ;;  %v9837_v53 = vld [vmem:[%s10048_s21 + $0x350] sm:$0xff]   ;;  %v11890_v14 = vpop.f32.mrb[182].mxu1 }
 0x82c   : > { %14273 = vst [vmem:[#allocation46_spill] sm:$0xff] %v11881_v48  ;;  %9374 = vmatprep.mubr.msk.bf16.mxu0 %vm14216_vm0, %v9837_v53  ;;  %v11892_v17 = vpop.f32.mrb[183].mxu1 }
 0x82d   : > { %v4682_v13 = vmax.f32 %v4142_v61, 0.0  ;;  %9375 = vmatmul.mubr.msk.bf16.gmra.mrb[212].mxu0 %vm14216_vm0, %v9838_v27  ;;  %v11888_v11 = vpop.xlane.xlu1 %5387 }
 0x82f   : > { %v4945_v0 = vmul.f32 %v11519_v22, %v4682_v13  ;;  %v4203_v13 = vadd.f32 %v11504_v3, %v11786_v54  ;;  %v11913_v27 = vpop.permute.xlu0 %6488 }
 0x830   : > { %14275 = vst [vmem:[#allocation48_spill] sm:$0xff] %v11913_v27 }
 0x831   : > { %v5524_v42 = vsel %vm14217_vm2, %v4945_v0, 0.0  ;;  %v11900_v61 = vpop.xlane.xlu1 %5381  ;;  %v4962_v0 = vmul.f32 %v11519_v22, %v4699_v16  ;;  %v4697_v41 = vmax.f32 %v4203_v13, 0.0 }
 0x833   : > { %v4960_v43 = vmul.f32 %v11519_v22, %v4697_v41  ;;  %v5575_v53 = vsel %vm14217_vm2, %v4962_v0, 0.0  ;;  %v11918_v13 = vpop.xlane.xlu0 %5432 }
 0x83f   : > { %v9364_v54 = vpop.f32.mrb[200].mxu0 }
 0x840   : > { %v2442_v4 = vadd.f32 %v11682_v35, %v9364_v54  ;;  %v4166_v54 = vadd.f32 %v11504_v3, %v11653_v58 }
 0x841   : > { %6638 = vperm.xlu0 %9725, %v5919_v55  }
 0x845   : > { %5531 = vadd.xlane.f32.xlu1 %v5530_v2  ;;  %6632 = vperm.xlu0 %9725, %v5917_v9   ;;  %v5908_v9 = vadd.f32 %v11510_v21, %v11391_v37  ;;  %v11909_v2 = vpop.permute.xlu1 %6467 }
 0x846   : > { %14274 = vst [vmem:[#allocation47_spill] sm:$0xff] %v11909_v2 }
 0x849   : > { %5525 = vadd.xlane.f32.xlu1 %v5524_v42  ;;  %v5569_v42 = vsel %vm14217_vm2, %v4960_v43, 0.0 }
 0x84a   : > { %v11896_v5 = vpop.f32.mrb[184].mxu1 }
 0x84b   : > { %v11902_v55 = vpop.f32.mrb[185].mxu1 }
 0x85a   : > { %6611 = vperm.xlu1 %9724, %v5910_v50   ;;  %v2433_v50 = vpop.f32.mrb[201].mxu0 }
 0x85b   : > { %v2434_v37 = vadd.f32 %v11682_v35, %v2433_v50  ;;  %v9365_v16 = vpop.f32.mrb[202].mxu0  ;;  %v11930_v50 = vpop.xlane.xlu0 %5426 }
 0x85c   : > { %v2445_v41 = vadd.f32 %v11682_v35, %v9365_v16  ;;  %v2436_v2 = vpop.f32.mrb[203].mxu0  ;;  %v11937_v16 = vpop.permute.xlu1 %6461 }
 0x85d   : > { %v2856_v0 = vmax.f32 %v2434_v37, 0.0  ;;  %v2437_v48 = vadd.f32 %v11682_v35, %v2436_v2  ;;  %v5923_v2 = vadd.f32 %v11510_v21, %v11772_v39  ;;  %14276 = vst [vmem:[#allocation49_spill] sm:$0xff] %v11937_v16  ;;  %v9840_v39 = vld [vmem:[%s10048_s21 + $0x368] sm:$0xff]  }
 0x85e   : > { %6605 = vperm.xlu1 %9724, %v5908_v9   ;;  %v2858_v9 = vmax.f32 %v2442_v4, 0.0  ;;  %v4158_v4 = vadd.f32 %v11504_v3, %v11655_v10  ;;  %v9839_v10 = vld [vmem:[%s10048_s21 + $0x360] sm:$0xff]  }
 0x85f   : > { %v2857_v27 = vmax.f32 %v2437_v48, 0.0  ;;  %9378 = vmatprep.mubr.msk.bf16.mxu0 %vm14216_vm0, %v9839_v10 }
 0x860   : > { %9379 = vmatmul.mubr.msk.bf16.gmra.mrb[216].mxu0 %vm14216_vm0, %v9840_v39 }
 0x861   : > { %v3012_v31 = vpack.c.bf16 %v2857_v27, %v2856_v0  ;;  %v4686_v27 = vmax.f32 %v4158_v4, 0.0  ;;  %v11946_v0 = vpop.xlane.xlu1 %5399 }
 0x863   : > { %9626 = vmatprep.mubr.msk.bf16.mxu1 %vm14218_vm1, %v3012_v31  ;;  %v5921_v31 = vadd.f32 %v11510_v21, %v11784_v19  ;;  %v4949_v37 = vmul.f32 %v11519_v22, %v4686_v27  ;;  %v11948_v19 = vpop.f32.mrb[186].mxu1  ;;  %v4219_v27 = vadd.f32 %v11504_v3, %v11844_v57 }
 0x864   : > { %5576 = vadd.xlane.f32.xlu0 %v5575_v53  ;;  %v2859_v53 = vmax.f32 %v2445_v41, 0.0 }
 0x865   : > { %v5536_v41 = vsel %vm14217_vm2, %v4949_v37, 0.0  ;;  %v11958_v4 = vpop.xlane.xlu1 %5393 }
 0x866   : > { %v3013_v43 = vpack.c.bf16 %v2859_v53, %v2858_v9  ;;  %v11939_v9 = vpop.permute.xlu0 %6506  ;;  %v11950_v53 = vpop.f32.mrb[187].mxu1 }
 0x867   : > { %14277 = vst [vmem:[#allocation50_spill] sm:$0xff] %v11939_v9 }
 0x868   : > { %5570 = vadd.xlane.f32.xlu0 %v5569_v42  ;;  %9627 = vmatmul.mubr.msk.bf16.gmra.mrb[200].mxu1 %vm14218_vm1, %v3013_v43  ;;  %v4688_v42 = vmax.f32 %v4166_v54, 0.0  ;;  %v4227_v43 = vadd.f32 %v11504_v3, %v11838_v45  ;;  %v4701_v45 = vmax.f32 %v4219_v27, 0.0 }
 0x86a   : > { %v4951_v48 = vmul.f32 %v11519_v22, %v4688_v42  ;;  %v5914_v42 = vadd.f32 %v11510_v21, %v11437_v8  ;;  %v4964_v8 = vmul.f32 %v11519_v22, %v4701_v45  ;;  %v11971_v39 = vpop.permute.xlu0 %6500 }
 0x86b   : > { %14279 = vst [vmem:[#allocation52_spill] sm:$0xff] %v11971_v39 }
 0x86c   : > { %v5542_v58 = vsel %vm14217_vm2, %v4951_v48, 0.0  ;;  %v4703_v48 = vmax.f32 %v4227_v43, 0.0  ;;  %v5581_v57 = vsel %vm14217_vm2, %v4964_v8, 0.0 }
 0x86e   : > { %v4966_v37 = vmul.f32 %v11519_v22, %v4703_v48  ;;  %v11977_v16 = vpop.xlane.xlu0 %5444 }
 0x86f   : > { %14280 = vst [vmem:[#allocation53_spill] sm:$0xff] %v11977_v16 }
 0x870   : > { %v5587_v10 = vsel %vm14217_vm2, %v4966_v37, 0.0 }
 0x87e   : > { %6650 = vperm.xlu0 %9725, %v5923_v2  }
 0x882   : > { %5543 = vadd.xlane.f32.xlu1 %v5542_v58  ;;  %6644 = vperm.xlu0 %9725, %v5921_v31   ;;  %v5912_v31 = vadd.f32 %v11510_v21, %v11449_v24  ;;  %v11967_v58 = vpop.permute.xlu1 %6479 }
 0x883   : > { %14278 = vst [vmem:[#allocation51_spill] sm:$0xff] %v11967_v58 }
 0x884   : > { %v11954_v54 = vpop.f32.mrb[188].mxu1 }
 0x885   : > { %v11960_v2 = vpop.f32.mrb[189].mxu1 }
 0x886   : > { %5537 = vadd.xlane.f32.xlu1 %v5536_v41  ;;  %v9368_v41 = vpop.f32.mrb[204].mxu0 }
 0x887   : > { %v2458_v43 = vadd.f32 %v11682_v35, %v9368_v41  ;;  %v4182_v41 = vadd.f32 %v11504_v3, %v11716_v25 }
 0x889   : > { %v2862_v27 = vmax.f32 %v2458_v43, 0.0  ;;  %v4692_v43 = vmax.f32 %v4182_v41, 0.0 }
 0x897   : > { %6623 = vperm.xlu1 %9724, %v5914_v42   ;;  %v2449_v42 = vpop.f32.mrb[205].mxu0 }
 0x898   : > { %v2450_v24 = vadd.f32 %v11682_v35, %v2449_v42  ;;  %v9369_v48 = vpop.f32.mrb[206].mxu0  ;;  %v5927_v42 = vadd.f32 %v11510_v21, %v11830_v12  ;;  %v9842_v12 = vld [vmem:[%s10048_s21 + $0x378] sm:$0xff]  }
 0x899   : > { %v2461_v9 = vadd.f32 %v11682_v35, %v9369_v48 }
 0x89a   : > { %v2860_v37 = vmax.f32 %v2450_v24, 0.0 }
 0x89b   : > { %6617 = vperm.xlu1 %9724, %v5912_v31   ;;  %v2452_v31 = vpop.f32.mrb[207].mxu0 }
 0x89c   : > { %v2453_v45 = vadd.f32 %v11682_v35, %v2452_v31 }
 0x89e   : > { %v2861_v39 = vmax.f32 %v2453_v45, 0.0 }
 0x8a0   : > { %v3014_v8 = vpack.c.bf16 %v2861_v39, %v2860_v37  ;;  %v4955_v39 = vmul.f32 %v11519_v22, %v4692_v43  ;;  %v5918_v43 = vadd.f32 %v11510_v21, %v11496_v51  ;;  %v12030_v51 = vld [vmem:[%s14213_s5] ss:$0 sm:$0xff] }
 0x8a1   : > { %5588 = vadd.xlane.f32.xlu0 %v5587_v10  ;;  %v2863_v10 = vmax.f32 %v2461_v9, 0.0  ;;  %v11988_v9 = vpop.xlane.xlu0 %5438 }
 0x8a2   : > { %9630 = vmatprep.mubr.msk.bf16.mxu1 %vm14218_vm1, %v3014_v8  ;;  %14281 = vst [vmem:[#allocation54_spill] sm:$0xff] %v11988_v9  ;;  %v5554_v25 = vsel %vm14217_vm2, %v4955_v39, 0.0  ;;  %v4243_v8 = vadd.f32 %v11504_v3, %v11896_v5 }
 0x8a3   : > { %v3015_v58 = vpack.c.bf16 %v2863_v10, %v2862_v27  ;;  %v11995_v27 = vpop.permute.xlu1 %6473 }
 0x8a4   : > { %v4707_v39 = vmax.f32 %v4243_v8, 0.0 }
 0x8a5   : > { %5582 = vadd.xlane.f32.xlu0 %v5581_v57  ;;  %9631 = vmatmul.mubr.msk.bf16.gmra.mrb[204].mxu1 %vm14218_vm1, %v3015_v58  ;;  %v4174_v57 = vadd.f32 %v11504_v3, %v11718_v32  ;;  %v5925_v58 = vadd.f32 %v11510_v21, %v11842_v56  ;;  %v11997_v31 = vpop.permute.xlu0 %6518  ;;  %v9841_v32 = vld [vmem:[%s10048_s21 + $0x370] sm:$0xff]   ;;  %v12006_v56 = vpop.f32.mrb[190].mxu1 }
 0x8a6   : > { %14282 = vst [vmem:[#allocation55_spill] sm:$0xff] %v11997_v31  ;;  %9382 = vmatprep.mubr.msk.bf16.mxu0 %vm14216_vm0, %v9841_v32  ;;  %v12008_v10 = vpop.f32.mrb[191].mxu1 }
 0x8a7   : > { %v4690_v24 = vmax.f32 %v4174_v57, 0.0  ;;  %9383 = vmatmul.mubr.msk.bf16.gmra.mrb[220].mxu0 %vm14216_vm0, %v9842_v12  ;;  %v12004_v45 = vpop.xlane.xlu1 %5411 }
 0x8a9   : > { %v4953_v48 = vmul.f32 %v11519_v22, %v4690_v24  ;;  %v4235_v24 = vadd.f32 %v11504_v3, %v11902_v55  ;;  %v12034_v3 = vpop.permute.xlu0 %6512 }
 0x8aa   : > { %14284 = vst [vmem:[#allocation57_spill] sm:$0xff] %v12034_v3 }
 0x8ab   : > { %v5548_v37 = vsel %vm14217_vm2, %v4953_v48, 0.0  ;;  %v12016_v57 = vpop.xlane.xlu1 %5405  ;;  %v4970_v48 = vmul.f32 %v11519_v22, %v4707_v39  ;;  %v4705_v5 = vmax.f32 %v4235_v24, 0.0 }
 0x8ad   : > { %v4968_v32 = vmul.f32 %v12030_v51, %v4705_v5  ;;  %v5599_v12 = vsel %vm14217_vm2, %v4970_v48, 0.0 }
 0x8bb   : > { %6662 = vperm.xlu0 %9725, %v5927_v42  }
 0x8bf   : > { %5555 = vadd.xlane.f32.xlu1 %v5554_v25  ;;  %6656 = vperm.xlu0 %9725, %v5925_v58   ;;  %v5916_v58 = vadd.f32 %v11510_v21, %v11514_v36  ;;  %v12025_v25 = vpop.permute.xlu1 %6491  ;;  %v5593_v21 = vsel %vm14217_vm2, %v4968_v32, 0.0 }
 0x8c0   : > { %14283 = vst [vmem:[#allocation56_spill] sm:$0xff] %v12025_v25 }
 0x8c1   : > { %v12012_v41 = vpop.f32.mrb[192].mxu1 }
 0x8c2   : > { %v12018_v42 = vpop.f32.mrb[193].mxu1 }
 0x8c3   : > { %5549 = vadd.xlane.f32.xlu1 %v5548_v37  ;;  %v9372_v55 = vpop.f32.mrb[208].mxu0 }
 0x8c4   : > { %v2474_v36 = vadd.f32 %v11682_v35, %v9372_v55  ;;  %v2465_v22 = vpop.f32.mrb[209].mxu0  ;;  %v12048_v55 = vld [vmem:[%s14212_s4] ss:$0 sm:$0xff] }
 0x8c5   : > { %v2466_v37 = vadd.f32 %v11682_v35, %v2465_v22  ;;  %v9373_v8 = vpop.f32.mrb[210].mxu0  ;;  %v4190_v22 = vadd.f32 %v12048_v55, %v11776_v44 }
 0x8c6   : > { %v2477_v39 = vadd.f32 %v11682_v35, %v9373_v8  ;;  %v2468_v24 = vpop.f32.mrb[211].mxu0 }
 0x8c7   : > { %v2864_v48 = vmax.f32 %v2466_v37, 0.0  ;;  %v2469_v5 = vadd.f32 %v11682_v35, %v2468_v24  ;;  %v12054_v37 = vld [vmem:[#allocation2] ss:$0 sm:$0xff] }
 0x8c9   : > { %v2865_v31 = vmax.f32 %v2469_v5, 0.0  ;;  %v9844_v5 = vld [vmem:[%s10048_s21 + $0x388] sm:$0xff]  }
 0x8cb   : > { %v3016_v32 = vpack.c.bf16 %v2865_v31, %v2864_v48  ;;  %v5931_v31 = vadd.f32 %v12054_v37, %v11888_v11  ;;  %v12065_v48 = vpop.permute.xlu1 %6485  ;;  %v9843_v11 = vld [vmem:[%s10048_s21 + $0x380] sm:$0xff]  }
 0x8cc   : > { %9386 = vmatprep.mubr.msk.bf16.mxu0 %vm14216_vm0, %v9843_v11 }
 0x8cd   : > { %9634 = vmatprep.mubr.msk.bf16.mxu1 %vm14218_vm1, %v3016_v32  ;;  %9387 = vmatmul.mubr.msk.bf16.gmra.mrb[224].mxu0 %vm14216_vm0, %v9844_v5 }
 0x8cf   : > { %v12074_v32 = vpop.xlane.xlu1 %5423 }
 0x8d4   : > { %6635 = vperm.xlu1 %9724, %v5918_v43   ;;  %v2866_v43 = vmax.f32 %v2474_v36, 0.0  ;;  %v4198_v36 = vadd.f32 %v12048_v55, %v11774_v30  ;;  %v5929_v30 = vadd.f32 %v12054_v37, %v11900_v61  ;;  %v12076_v61 = vpop.f32.mrb[194].mxu1 }
 0x8d8   : > { %6629 = vperm.xlu1 %9724, %v5916_v58   ;;  %v12040_v58 = vpop.xlane.xlu0 %5456 }
 0x8d9   : > { %14285 = vst [vmem:[#allocation58_spill] sm:$0xff] %v12040_v58 }
 0x8de   : > { %5600 = vadd.xlane.f32.xlu0 %v5599_v12  ;;  %v2867_v12 = vmax.f32 %v2477_v39, 0.0 }
 0x8e0   : > { %v3017_v9 = vpack.c.bf16 %v2867_v12, %v2866_v43  ;;  %v4694_v43 = vmax.f32 %v4190_v22, 0.0 }
 0x8e2   : > { %5594 = vadd.xlane.f32.xlu0 %v5593_v21  ;;  %9635 = vmatmul.mubr.msk.bf16.gmra.mrb[208].mxu1 %vm14218_vm1, %v3017_v9  ;;  %v4696_v21 = vmax.f32 %v4198_v36, 0.0  ;;  %v12058_v9 = vpop.xlane.xlu0 %5450  ;;  %v4957_v39 = vmul.f32 %v12030_v51, %v4694_v43  ;;  %v12078_v36 = vpop.f32.mrb[195].mxu1 }
 0x8e3   : > { %14286 = vst [vmem:[#allocation59_spill] sm:$0xff] %v12058_v9 }
 0x8e4   : > { %v4959_v8 = vmul.f32 %v12030_v51, %v4696_v21  ;;  %v5560_v12 = vsel %vm14217_vm2, %v4957_v39, 0.0  ;;  %v4259_v21 = vadd.f32 %v12048_v55, %v11954_v54  ;;  %v4251_v39 = vadd.f32 %v12048_v55, %v11960_v2 }
 0x8e6   : > { %v5566_v24 = vsel %vm14217_vm2, %v4959_v8, 0.0  ;;  %v12067_v44 = vpop.permute.xlu0 %6530  ;;  %v12086_v8 = vpop.xlane.xlu1 %5417  ;;  %v4709_v54 = vmax.f32 %v4251_v39, 0.0 }
 0x8ea   : > { %v12095_v5 = vpop.permute.xlu1 %6503  ;;  %v12099_v9 = vpop.permute.xlu0 %6524 }
 0x8eb   : > { %14287 = vst [vmem:[#allocation60_spill] sm:$0xff] %v12095_v5 }
 0x8ee   : > { %v12105_v16 = vpop.xlane.xlu0 %5468 }
 0x8ef   : > { %14288 = vst [vmem:[#allocation61_spill] sm:$0xff] %v12105_v16 }
 0x8f8   : > { %6674 = vperm.xlu0 %9725, %v5931_v31   ;;  %v5922_v31 = vadd.f32 %v12054_v37, %v11566_v15  ;;  %v4972_v15 = vmul.f32 %v12030_v51, %v4709_v54 }
 0x8fa   : > { %v5605_v2 = vsel %vm14217_vm2, %v4972_v15, 0.0 }
 0x8fc   : > { %5567 = vadd.xlane.f32.xlu1 %v5566_v24  ;;  %6668 = vperm.xlu0 %9725, %v5929_v30   ;;  %v4711_v30 = vmax.f32 %v4259_v21, 0.0  ;;  %v5920_v24 = vadd.f32 %v12054_v37, %v11577_v52 }
 0x8fe   : > { %v12082_v22 = vpop.f32.mrb[196].mxu1  ;;  %v4974_v11 = vmul.f32 %v12030_v51, %v4711_v30 }
 0x8ff   : > { %v12088_v43 = vpop.f32.mrb[197].mxu1 }
 0x900   : > { %5561 = vadd.xlane.f32.xlu1 %v5560_v12  ;;  %v5611_v12 = vsel %vm14217_vm2, %v4974_v11, 0.0  ;;  %v9376_v21 = vpop.f32.mrb[212].mxu0 }
 0x901   : > { %v2481_v58 = vpop.f32.mrb[213].mxu0 }
 0x902   : > { %v2482_v52 = vadd.f32 %v11682_v35, %v2481_v58  ;;  %v9377_v30 = vpop.f32.mrb[214].mxu0  ;;  %v4214_v58 = vadd.f32 %v12048_v55, %v11832_v26 }
 0x903   : > { %v2493_v3 = vadd.f32 %v11682_v35, %v9377_v30 }
 0x904   : > { %v2868_v11 = vmax.f32 %v2482_v52, 0.0 }
 0x911   : > { %6647 = vperm.xlu1 %9724, %v5922_v31   ;;  %v2490_v31 = vadd.f32 %v11682_v35, %v9376_v21  ;;  %v4700_v21 = vmax.f32 %v4214_v58, 0.0 }
 0x913   : > { %v2870_v39 = vmax.f32 %v2490_v31, 0.0  ;;  %v5935_v31 = vadd.f32 %v12054_v37, %v11946_v0  ;;  %v9846_v0 = vld [vmem:[%s10048_s21 + $0x398] sm:$0xff]  }
 0x915   : > { %6641 = vperm.xlu1 %9724, %v5920_v24   ;;  %v2484_v24 = vpop.f32.mrb[215].mxu0 }
 0x916   : > { %v2485_v54 = vadd.f32 %v11682_v35, %v2484_v24 }
 0x918   : > { %v2869_v5 = vmax.f32 %v2485_v54, 0.0 }
 0x91a   : > { %v3018_v15 = vpack.c.bf16 %v2869_v5, %v2868_v11  ;;  %v4963_v5 = vmul.f32 %v12030_v51, %v4700_v21  ;;  %v5926_v21 = vadd.f32 %v12054_v37, %v11624_v60 }
 0x91b   : > { %5612 = vadd.xlane.f32.xlu0 %v5611_v12  ;;  %v2871_v12 = vmax.f32 %v2493_v3, 0.0  ;;  %v12116_v3 = vpop.xlane.xlu0 %5462 }
 0x91c   : > { %9638 = vmatprep.mubr.msk.bf16.mxu1 %vm14218_vm1, %v3018_v15  ;;  %14289 = vst [vmem:[#allocation62_spill] sm:$0xff] %v12116_v3  ;;  %v5578_v26 = vsel %vm14217_vm2, %v4963_v5, 0.0  ;;  %v4275_v15 = vadd.f32 %v12048_v55, %v12012_v41 }
 0x91d   : > { %v3019_v25 = vpack.c.bf16 %v2871_v12, %v2870_v39  ;;  %v12123_v39 = vpop.permute.xlu1 %6497 }
 0x91e   : > { %14290 = vst [vmem:[#allocation63_spill] sm:$0xff] %v12123_v39  ;;  %v4715_v5 = vmax.f32 %v4275_v15, 0.0 }
 0x91f   : > { %5606 = vadd.xlane.f32.xlu0 %v5605_v2  ;;  %9639 = vmatmul.mubr.msk.bf16.gmra.mrb[212].mxu1 %vm14218_vm1, %v3019_v25  ;;  %v4206_v2 = vadd.f32 %v12048_v55, %v11834_v18  ;;  %v5933_v25 = vadd.f32 %v12054_v37, %v11958_v4  ;;  %v12125_v24 = vpop.permute.xlu0 %6542  ;;  %v9845_v18 = vld [vmem:[%s10048_s21 + $0x390] sm:$0xff]   ;;  %v12134_v4 = vpop.f32.mrb[198].mxu1 }
 0x920   : > { %14291 = vst [vmem:[#allocation64_spill] sm:$0xff] %v12125_v24  ;;  %9390 = vmatprep.mubr.msk.bf16.mxu0 %vm14216_vm0, %v9845_v18  ;;  %v12136_v12 = vpop.f32.mrb[199].mxu1 }
 0x921   : > { %v4698_v52 = vmax.f32 %v4206_v2, 0.0  ;;  %9391 = vmatmul.mubr.msk.bf16.gmra.mrb[228].mxu0 %vm14216_vm0, %v9846_v0  ;;  %v12132_v54 = vpop.xlane.xlu1 %5435 }
 0x923   : > { %v4961_v30 = vmul.f32 %v12030_v51, %v4698_v52  ;;  %v4267_v52 = vadd.f32 %v12048_v55, %v12018_v42  ;;  %v12157_v0 = vpop.permute.xlu0 %6536 }
 0x924   : > { %14293 = vst [vmem:[#allocation66_spill] sm:$0xff] %v12157_v0 }
 0x925   : > { %v5572_v11 = vsel %vm14217_vm2, %v4961_v30, 0.0  ;;  %v12144_v2 = vpop.xlane.xlu1 %5429  ;;  %v4978_v30 = vmul.f32 %v12030_v51, %v4715_v5  ;;  %v4713_v41 = vmax.f32 %v4267_v52, 0.0 }
 0x927   : > { %v4976_v60 = vmul.f32 %v12030_v51, %v4713_v41  ;;  %v5623_v18 = vsel %vm14217_vm2, %v4978_v30, 0.0  ;;  %v12163_v16 = vpop.xlane.xlu0 %5480 }
 0x928   : > { %14294 = vst [vmem:[#allocation67_spill] sm:$0xff] %v12163_v16 }
 0x929   : > { %v5617_v42 = vsel %vm14217_vm2, %v4976_v60, 0.0 }
 0x935   : > { %6686 = vperm.xlu0 %9725, %v5935_v31  }
 0x939   : > { %5579 = vadd.xlane.f32.xlu1 %v5578_v26  ;;  %6680 = vperm.xlu0 %9725, %v5933_v25   ;;  %v5924_v25 = vadd.f32 %v12054_v37, %v11635_v38  ;;  %v12153_v26 = vpop.permute.xlu1 %6515 }
 0x93a   : > { %14292 = vst [vmem:[#allocation65_spill] sm:$0xff] %v12153_v26 }
 0x93b   : > { %v12140_v58 = vpop.f32.mrb[200].mxu1 }
 0x93c   : > { %v12146_v31 = vpop.f32.mrb[201].mxu1 }
 0x93d   : > { %5573 = vadd.xlane.f32.xlu1 %v5572_v11  ;;  %v9380_v11 = vpop.f32.mrb[216].mxu0 }
 0x93e   : > { %v2506_v15 = vadd.f32 %v11682_v35, %v9380_v11  ;;  %v4230_v11 = vadd.f32 %v12048_v55, %v11890_v14  ;;  %v5937_v14 = vadd.f32 %v12054_v37, %v12016_v57 }
 0x940   : > { %v2874_v52 = vmax.f32 %v2506_v15, 0.0  ;;  %v12170_v15 = vpop.permute.xlu1 %6509 }
 0x941   : > { %14295 = vst [vmem:[#allocation68_spill] sm:$0xff] %v12170_v15 }
 0x94e   : > { %6659 = vperm.xlu1 %9724, %v5926_v21   ;;  %v2497_v21 = vpop.f32.mrb[217].mxu0 }
 0x94f   : > { %v2498_v38 = vadd.f32 %v11682_v35, %v2497_v21  ;;  %v9381_v5 = vpop.f32.mrb[218].mxu0  ;;  %v4704_v21 = vmax.f32 %v4230_v11, 0.0 }
 0x950   : > { %v2509_v3 = vadd.f32 %v11682_v35, %v9381_v5 }
 0x951   : > { %v2872_v30 = vmax.f32 %v2498_v38, 0.0 }
 0x952   : > { %6653 = vperm.xlu1 %9724, %v5924_v25   ;;  %v2500_v25 = vpop.f32.mrb[219].mxu0 }
 0x953   : > { %v2501_v41 = vadd.f32 %v11682_v35, %v2500_v25  ;;  %v5939_v35 = vadd.f32 %v12054_v37, %v12004_v45  ;;  %v9847_v45 = vld [vmem:[%s10048_s21 + $0x3a0] sm:$0xff]  }
 0x954   : > { %9394 = vmatprep.mubr.msk.bf16.mxu0 %vm14216_vm0, %v9847_v45  ;;  %v5928_v45 = vadd.f32 %v12054_v37, %v11698_v33  ;;  %v12229_v33 = vld [vmem:[%s14210_s2] ss:$0 sm:$0xff] }
 0x955   : > { %v2873_v26 = vmax.f32 %v2501_v41, 0.0 }
 0x957   : > { %v3020_v60 = vpack.c.bf16 %v2873_v26, %v2872_v30  ;;  %v12178_v26 = vpop.xlane.xlu1 %5447  ;;  %v9848_v30 = vld [vmem:[%s10048_s21 + $0x3a8] sm:$0xff]  }
 0x958   : > { %5624 = vadd.xlane.f32.xlu0 %v5623_v18  ;;  %v2875_v18 = vmax.f32 %v2509_v3, 0.0  ;;  %v12176_v3 = vpop.xlane.xlu0 %5474  ;;  %9395 = vmatmul.mubr.msk.bf16.gmra.mrb[232].mxu0 %vm14216_vm0, %v9848_v30 }
 0x959   : > { %9642 = vmatprep.mubr.msk.bf16.mxu1 %vm14218_vm1, %v3020_v60  ;;  %14296 = vst [vmem:[#allocation69_spill] sm:$0xff] %v12176_v3  ;;  %v12198_v60 = vpop.f32.mrb[202].mxu1 }
 0x95a   : > { %v3021_v24 = vpack.c.bf16 %v2875_v18, %v2874_v52  ;;  %v12200_v11 = vpop.f32.mrb[203].mxu1 }
 0x95b   : > { %14298 = vst [vmem:[#allocation71_spill] sm:$0xff] %v12200_v11 }
 0x95c   : > { %5618 = vadd.xlane.f32.xlu0 %v5617_v42  ;;  %9643 = vmatmul.mubr.msk.bf16.gmra.mrb[216].mxu1 %vm14218_vm1, %v3021_v24  ;;  %v4222_v42 = vadd.f32 %v12048_v55, %v11892_v17  ;;  %v4967_v24 = vmul.f32 %v12030_v51, %v4704_v21  ;;  %v12185_v25 = vpop.permute.xlu0 %6554  ;;  %v12187_v17 = vpop.xlane.xlu1 %5441 }
 0x95d   : > { %14297 = vst [vmem:[#allocation70_spill] sm:$0xff] %v12185_v25 }
 0x95e   : > { %v4702_v38 = vmax.f32 %v4222_v42, 0.0  ;;  %v5590_v52 = vsel %vm14217_vm2, %v4967_v24, 0.0  ;;  %v4291_v42 = vadd.f32 %v12048_v55, %v12082_v22  ;;  %v5930_v24 = vadd.f32 %v12054_v37, %v11686_v46 }
 0x960   : > { %v4965_v5 = vmul.f32 %v12030_v51, %v4702_v38  ;;  %v12194_v57 = vpop.permute.xlu1 %6527 }
 0x962   : > { %v5584_v41 = vsel %vm14217_vm2, %v4965_v5, 0.0  ;;  %v4283_v5 = vadd.f32 %v12048_v55, %v12088_v43 }
 0x964   : > { %v12196_v18 = vpop.permute.xlu1 %6521  ;;  %v4717_v22 = vmax.f32 %v4283_v5, 0.0 }
 0x966   : > { %v4980_v46 = vmul.f32 %v12030_v51, %v4717_v22 }
 0x968   : > { %v12202_v21 = vpop.xlane.xlu1 %5459 }
 0x972   : > { %6698 = vperm.xlu0 %9725, %v5939_v35  }
 0x976   : > { %5591 = vadd.xlane.f32.xlu1 %v5590_v52  ;;  %6692 = vperm.xlu0 %9725, %v5937_v14   ;;  %v4719_v14 = vmax.f32 %v4291_v42, 0.0  ;;  %v12214_v52 = vpop.xlane.xlu1 %5453  ;;  %v12223_v42 = vpop.permute.xlu0 %6548 }
 0x977   : > { %14300 = vst [vmem:[#allocation73_spill] sm:$0xff] %v12223_v42 }
 0x978   : > { %v12206_v35 = vpop.f32.mrb[204].mxu1  ;;  %v4982_v30 = vmul.f32 %v12030_v51, %v4719_v14 }
 0x979   : > { %v12210_v38 = vpop.f32.mrb[205].mxu1 }
 0x97a   : > { %5585 = vadd.xlane.f32.xlu1 %v5584_v41  ;;  %v12219_v41 = vpop.permute.xlu1 %6539  ;;  %v5635_v3 = vsel %vm14217_vm2, %v4982_v30, 0.0  ;;  %v9384_v43 = vpop.f32.mrb[220].mxu0 }
 0x97b   : > { %14299 = vst [vmem:[#allocation72_spill] sm:$0xff] %v12219_v41  ;;  %v2522_v14 = vadd.f32 %v12229_v33, %v9384_v43  ;;  %v2513_v5 = vpop.f32.mrb[221].mxu0  ;;  %v12236_v15 = vpop.xlane.xlu0 %5492 }
 0x97c   : > { %v9385_v16 = vpop.f32.mrb[222].mxu0  ;;  %14301 = vst [vmem:[#allocation74_spill] sm:$0xff] %v12236_v15 }
 0x97d   : > { %v2878_v30 = vmax.f32 %v2522_v14, 0.0  ;;  %v2525_v25 = vadd.f32 %v12229_v33, %v9385_v16  ;;  %v4246_v16 = vadd.f32 %v12048_v55, %v11948_v19  ;;  %v5941_v19 = vadd.f32 %v12054_v37, %v12086_v8 }
 0x97e   : > { %v12233_v22 = vpop.permute.xlu1 %6533 }
 0x97f   : > { %v2879_v41 = vmax.f32 %v2525_v25, 0.0  ;;  %v4238_v25 = vadd.f32 %v12048_v55, %v11950_v53 }
 0x981   : > { %v3023_v43 = vpack.c.bf16 %v2879_v41, %v2878_v30  ;;  %v12253_v41 = vpop.xlane.xlu0 %5486 }
 0x982   : > { %v12239_v0 = vpop.xlane.xlu1 %5471  ;;  %14303 = vst [vmem:[#allocation76_spill] sm:$0xff] %v12253_v41 }
 0x986   : > { %v12243_v14 = vpop.xlane.xlu1 %5465 }
 0x98b   : > { %6671 = vperm.xlu1 %9724, %v5930_v24   ;;  %v5629_v24 = vsel %vm14217_vm2, %v4980_v46, 0.0 }
 0x98f   : > { %6665 = vperm.xlu1 %9724, %v5928_v45   ;;  %v2514_v45 = vadd.f32 %v12229_v33, %v2513_v5  ;;  %v12247_v5 = vpop.permute.xlu1 %6551 }
 0x990   : > { %14302 = vst [vmem:[#allocation75_spill] sm:$0xff] %v12247_v5 }
 0x991   : > { %v2876_v46 = vmax.f32 %v2514_v45, 0.0  ;;  %v4706_v45 = vmax.f32 %v4238_v25, 0.0 }
 0x995   : > { %5636 = vadd.xlane.f32.xlu0 %v5635_v3  ;;  %v2516_v3 = vpop.f32.mrb[223].mxu0 }
 0x996   : > { %v2517_v42 = vadd.f32 %v12229_v33, %v2516_v3  ;;  %v4969_v3 = vmul.f32 %v12030_v51, %v4706_v45 }
 0x998   : > { %v2877_v39 = vmax.f32 %v2517_v42, 0.0 }
 0x999   : > { %5630 = vadd.xlane.f32.xlu0 %v5629_v24  ;;  %v4708_v24 = vmax.f32 %v4246_v16, 0.0  ;;  %v5596_v16 = vsel %vm14217_vm2, %v4969_v3, 0.0 }
 0x99a   : > { %v3022_v11 = vpack.c.bf16 %v2877_v39, %v2876_v46  ;;  %v5943_v39 = vadd.f32 %v12054_v37, %v12074_v32  ;;  %v12264_v46 = vpop.permute.xlu0 %6566  ;;  %v9849_v32 = vld [vmem:[%s10048_s21 + $0x3b0] sm:$0xff]  }
 0x99b   : > { %v4971_v42 = vmul.f32 %v12030_v51, %v4708_v24  ;;  %14306 = vst [vmem:[#allocation79_spill] sm:$0xff] %v12264_v46  ;;  %9398 = vmatprep.mubr.msk.bf16.mxu0 %vm14216_vm0, %v9849_v32  ;;  %v5934_v32 = vadd.f32 %v12054_v37, %v11745_v63 }
 0x99c   : > { %9646 = vmatprep.mubr.msk.bf16.mxu1 %vm14218_vm1, %v3022_v11  ;;  %v12255_v11 = vpop.permute.xlu1 %6545 }
 0x99d   : > { %9647 = vmatmul.mubr.msk.bf16.gmra.mrb[220].mxu1 %vm14218_vm1, %v3023_v43  ;;  %14304 = vst [vmem:[#allocation77_spill] sm:$0xff] %v12255_v11  ;;  %v5602_v53 = vsel %vm14217_vm2, %v4971_v42, 0.0  ;;  %v9850_v43 = vld [vmem:[%s10048_s21 + $0x3b8] sm:$0xff]   ;;  %v12279_v42 = vpop.f32.mrb[206].mxu1 }
 0x99e   : > { %9399 = vmatmul.mubr.msk.bf16.gmra.mrb[236].mxu0 %vm14216_vm0, %v9850_v43  ;;  %v12273_v24 = vpop.permute.xlu0 %6560  ;;  %14311 = vst [vmem:[#allocation84_spill] sm:$0xff] %v12279_v42  ;;  %v12281_v45 = vpop.f32.mrb[207].mxu1 }
 0x99f   : > { %14308 = vst [vmem:[#allocation81_spill] sm:$0xff] %v12273_v24  ;;  %14312 = vst [vmem:[#allocation85_spill] sm:$0xff] %v12281_v45 }
 0x9a0   : > { %v12260_v30 = vpop.xlane.xlu1 %5483 }
 0x9a1   : > { %14305 = vst [vmem:[#allocation78_spill] sm:$0xff] %v12260_v30 }
 0x9a4   : > { %v12271_v8 = vpop.xlane.xlu1 %5477 }
 0x9a5   : > { %14307 = vst [vmem:[#allocation80_spill] sm:$0xff] %v12271_v8 }
 0x9a8   : > { %v12275_v25 = vpop.permute.xlu1 %6563 }
 0x9a9   : > { %14309 = vst [vmem:[#allocation82_spill] sm:$0xff] %v12275_v25 }
 0x9ac   : > { %v12287_v3 = vpop.permute.xlu1 %6557 }
 0x9ad   : > { %14313 = vst [vmem:[#allocation86_spill] sm:$0xff] %v12287_v3 }
 0x9af   : > { %6710 = vperm.xlu0 %9725, %v5943_v39   ;;  %v12277_v39 = vpop.xlane.xlu0 %5504 }
 0x9b0   : > { %14310 = vst [vmem:[#allocation83_spill] sm:$0xff] %v12277_v39  ;;  %v4299_v39 = vadd.f32 %v12048_v55, %v12146_v31  ;;  %v12297_v15 = vpop.xlane.xlu1 %5495  ;;  %v9388_v31 = vpop.f32.mrb[224].mxu0 }
 0x9b1   : > { %14315 = vst [vmem:[#allocation88_spill] sm:$0xff] %v12297_v15  ;;  %v2529_v15 = vpop.f32.mrb[225].mxu0 }
 0x9b2   : > { %v4721_v30 = vmax.f32 %v4299_v39, 0.0  ;;  %v2530_v39 = vadd.f32 %v12229_v33, %v2529_v15 }
 0x9b3   : > { %5603 = vadd.xlane.f32.xlu1 %v5602_v53  ;;  %6704 = vperm.xlu0 %9725, %v5941_v19   ;;  %v4307_v19 = vadd.f32 %v12048_v55, %v12140_v58  ;;  %v5932_v58 = vadd.f32 %v12054_v37, %v11756_v28  ;;  %v2538_v28 = vadd.f32 %v12229_v33, %v9388_v31 }
 0x9b4   : > { %v12304_v63 = vpop.xlane.xlu1 %5489 }
 0x9b5   : > { %v12285_v53 = vpop.f32.mrb[208].mxu1  ;;  %v4723_v41 = vmax.f32 %v4307_v19, 0.0  ;;  %14316 = vst [vmem:[#allocation89_spill] sm:$0xff] %v12304_v63  ;;  %v2882_v46 = vmax.f32 %v2538_v28, 0.0 }
 0x9b6   : > { %v12291_v43 = vpop.f32.mrb[209].mxu1 }
 0x9b7   : > { %5597 = vadd.xlane.f32.xlu1 %v5596_v16  ;;  %v12293_v16 = vpop.xlane.xlu0 %5498  ;;  %v4986_v8 = vmul.f32 %v12030_v51, %v4723_v41 }
 0x9b8   : > { %14314 = vst [vmem:[#allocation87_spill] sm:$0xff] %v12293_v16  ;;  %v4984_v16 = vmul.f32 %v12030_v51, %v4721_v30  ;;  %v12312_v41 = vpop.permute.xlu1 %6575 }
 0x9b9   : > { %v5647_v19 = vsel %vm14217_vm2, %v4986_v8, 0.0  ;;  %v2880_v8 = vmax.f32 %v2530_v39, 0.0  ;;  %v4262_v39 = vadd.f32 %v12048_v55, %v12006_v56 }
 0x9bb   : > { %v12302_v45 = vpop.permute.xlu0 %6578 }
 0x9bc   : > { %v12319_v31 = vpop.permute.xlu1 %6569 }
 0x9bf   : > { %v12308_v42 = vpop.permute.xlu0 %6572 }
 0x9c0   : > { %v12325_v28 = vpop.xlane.xlu1 %5507 }
 0x9c1   : > { %14319 = vst [vmem:[#allocation92_spill] sm:$0xff] %v12325_v28 }
 0x9c3   : > { %v12317_v25 = vpop.xlane.xlu0 %5516 }
 0x9c4   : > { %14317 = vst [vmem:[#allocation90_spill] sm:$0xff] %v12317_v25 }
 0x9c7   : > { %v12322_v15 = vpop.xlane.xlu0 %5510 }
 0x9c8   : > { %6683 = vperm.xlu1 %9724, %v5934_v32   ;;  %v5641_v32 = vsel %vm14217_vm2, %v4984_v16, 0.0  ;;  %14318 = vst [vmem:[#allocation91_spill] sm:$0xff] %v12322_v15  ;;  %v9852_v15 = vld [vmem:[%s10048_s21 + $0x3c8] sm:$0xff]  }
 0x9cc   : > { %6677 = vperm.xlu1 %9724, %v5932_v58   ;;  %v9389_v58 = vpop.f32.mrb[226].mxu0 }
 0x9cd   : > { %v2541_v63 = vadd.f32 %v12229_v33, %v9389_v58  ;;  %v2532_v30 = vpop.f32.mrb[227].mxu0  ;;  %v12331_v58 = vpop.xlane.xlu1 %5501 }
 0x9ce   : > { %14321 = vst [vmem:[#allocation94_spill] sm:$0xff] %v12331_v58  ;;  %v5936_v58 = vadd.f32 %v12054_v37, %v11814_v62 }
 0x9cf   : > { %v2883_v24 = vmax.f32 %v2541_v63, 0.0 }
 0x9d1   : > { %v3025_v3 = vpack.c.bf16 %v2883_v24, %v2882_v46  ;;  %v4712_v46 = vmax.f32 %v4262_v39, 0.0  ;;  %v4254_v24 = vadd.f32 %v12048_v55, %v12008_v10  ;;  %v12339_v63 = vpop.permute.xlu1 %6587 }
 0x9d2   : > { %5648 = vadd.xlane.f32.xlu0 %v5647_v19  ;;  %v2533_v19 = vadd.f32 %v12229_v33, %v2532_v30  ;;  %14323 = vst [vmem:[#allocation96_spill] sm:$0xff] %v12339_v63  ;;  %v14399_v63 = vld [vmem:[#allocation35_spill] sm:$0xff] }
 0x9d3   : > { %v4975_v30 = vmul.f32 %v12030_v51, %v4712_v46 }
 0x9d4   : > { %v2881_v16 = vmax.f32 %v2533_v19, 0.0  ;;  %v5945_v19 = vadd.f32 %v12054_v37, %v12144_v2 }
 0x9d5   : > { %v5614_v10 = vsel %vm14217_vm2, %v4975_v30, 0.0  ;;  %v12348_v39 = vpop.permute.xlu1 %6581 }
 0x9d6   : > { %5642 = vadd.xlane.f32.xlu0 %v5641_v32  ;;  %v3024_v5 = vpack.c.bf16 %v2881_v16, %v2880_v8  ;;  %v12327_v32 = vpop.permute.xlu0 %6590  ;;  %v4710_v8 = vmax.f32 %v4254_v24, 0.0 }
 0x9d7   : > { %14320 = vst [vmem:[#allocation93_spill] sm:$0xff] %v12327_v32 }
 0x9d8   : > { %9650 = vmatprep.mubr.msk.bf16.mxu1 %vm14218_vm1, %v3024_v5  ;;  %v4973_v16 = vmul.f32 %v12030_v51, %v4710_v8  ;;  %v12363_v8 = vpop.f32.mrb[210].mxu1 }
 0x9d9   : > { %9651 = vmatmul.mubr.msk.bf16.gmra.mrb[224].mxu1 %vm14218_vm1, %v3025_v3  ;;  %v5947_v3 = vadd.f32 %v12054_v37, %v12132_v54  ;;  %v9851_v54 = vld [vmem:[%s10048_s21 + $0x3c0] sm:$0xff]   ;;  %14329 = vst [vmem:[#allocation102_spill] sm:$0xff] %v12363_v8 }
 0x9da   : > { %v12335_v5 = vpop.permute.xlu0 %6584  ;;  %9402 = vmatprep.mubr.msk.bf16.mxu0 %vm14216_vm0, %v9851_v54  ;;  %v5608_v24 = vsel %vm14217_vm2, %v4973_v16, 0.0  ;;  %v4323_v16 = vadd.f32 %v12048_v55, %v12206_v35 }
 0x9db   : > { %14322 = vst [vmem:[#allocation95_spill] sm:$0xff] %v12335_v5  ;;  %9403 = vmatmul.mubr.msk.bf16.gmra.mrb[240].mxu0 %vm14216_vm0, %v9852_v15  ;;  %v5938_v15 = vadd.f32 %v12054_v37, %v11803_v20 }
 0x9dc   : > { %v4727_v25 = vmax.f32 %v4323_v16, 0.0 }
 0x9de   : > { %v12342_v56 = vpop.xlane.xlu0 %5528  ;;  %v4990_v35 = vmul.f32 %v12030_v51, %v4727_v25 }
 0x9df   : > { %14324 = vst [vmem:[#allocation97_spill] sm:$0xff] %v12342_v56 }
 0x9e0   : > { %v5659_v16 = vsel %vm14217_vm2, %v4990_v35, 0.0 }
 0x9e2   : > { %v12353_v46 = vpop.xlane.xlu0 %5522 }
 0x9e3   : > { %14325 = vst [vmem:[#allocation98_spill] sm:$0xff] %v12353_v46 }
 0x9e6   : > { %v12359_v2 = vpop.permute.xlu0 %6602 }
 0x9e7   : > { %14327 = vst [vmem:[#allocation100_spill] sm:$0xff] %v12359_v2 }
 0x9ec   : > { %6722 = vperm.xlu0 %9725, %v5947_v3   ;;  %v12357_v3 = vpop.xlane.xlu1 %5519 }
 0x9ed   : > { %14326 = vst [vmem:[#allocation99_spill] sm:$0xff] %v12357_v3 }
 0x9f0   : > { %5615 = vadd.xlane.f32.xlu1 %v5614_v10  ;;  %6716 = vperm.xlu0 %9725, %v5945_v19   ;;  %v12361_v30 = vpop.xlane.xlu1 %5513  ;;  %v12365_v19 = vpop.permute.xlu0 %6596 }
 0x9f1   : > { %14328 = vst [vmem:[#allocation101_spill] sm:$0xff] %v12361_v30  ;;  %14330 = vst [vmem:[#allocation103_spill] sm:$0xff] %v12365_v19  ;;  %v12367_v10 = vpop.f32.mrb[211].mxu1  ;;  %v4315_v30 = vadd.f32 %v12048_v55, %v12210_v38 }
 0x9f2   : > { %14331 = vst [vmem:[#allocation104_spill] sm:$0xff] %v12367_v10  ;;  %v12373_v46 = vpop.f32.mrb[212].mxu1 }
 0x9f3   : > { %v12379_v56 = vpop.f32.mrb[213].mxu1  ;;  %v4725_v28 = vmax.f32 %v4315_v30, 0.0 }
 0x9f4   : > { %5609 = vadd.xlane.f32.xlu1 %v5608_v24  ;;  %v12369_v54 = vpop.permute.xlu1 %6599  ;;  %v12377_v24 = vpop.xlane.xlu0 %5540 }
 0x9f5   : > { %14332 = vst [vmem:[#allocation105_spill] sm:$0xff] %v12369_v54  ;;  %14333 = vst [vmem:[#allocation106_spill] sm:$0xff] %v12377_v24  ;;  %v4988_v24 = vmul.f32 %v12030_v51, %v4725_v28  ;;  %v9392_v38 = vpop.f32.mrb[228].mxu0 }
 0x9f6   : > { %v2554_v25 = vadd.f32 %v12229_v33, %v9392_v38  ;;  %v2545_v30 = vpop.f32.mrb[229].mxu0 }
 0x9f7   : > { %v5653_v62 = vsel %vm14217_vm2, %v4988_v24, 0.0 }
 0x9f8   : > { %v12383_v3 = vpop.permute.xlu1 %6593  ;;  %v12388_v10 = vpop.xlane.xlu0 %5534  ;;  %v2886_v2 = vmax.f32 %v2554_v25, 0.0 }
 0x9f9   : > { %14334 = vst [vmem:[#allocation107_spill] sm:$0xff] %v12383_v3  ;;  %14335 = vst [vmem:[#allocation108_spill] sm:$0xff] %v12388_v10  ;;  %v2546_v10 = vadd.f32 %v12229_v33, %v2545_v30 }
 0x9fb   : > { %v2884_v35 = vmax.f32 %v2546_v10, 0.0 }
 0x9fc   : > { %v12390_v20 = vpop.xlane.xlu1 %5531  ;;  %v12394_v8 = vpop.permute.xlu0 %6614 }
 0x9fd   : > { %14336 = vst [vmem:[#allocation109_spill] sm:$0xff] %v12390_v20  ;;  %14337 = vst [vmem:[#allocation110_spill] sm:$0xff] %v12394_v8 }
 0xa00   : > { %v12403_v54 = vpop.permute.xlu0 %6608 }
 0xa01   : > { %14339 = vst [vmem:[#allocation112_spill] sm:$0xff] %v12403_v54 }
 0xa04   : > { %v12407_v32 = vpop.xlane.xlu0 %5552 }
 0xa05   : > { %6695 = vperm.xlu1 %9724, %v5938_v15   ;;  %v12396_v15 = vpop.xlane.xlu1 %5525  ;;  %14341 = vst [vmem:[#allocation114_spill] sm:$0xff] %v12407_v32  ;;  %v4331_v32 = vadd.f32 %v12048_v55, %v12291_v43 }
 0xa06   : > { %14338 = vst [vmem:[#allocation111_spill] sm:$0xff] %v12396_v15 }
 0xa09   : > { %6689 = vperm.xlu1 %9724, %v5936_v58   ;;  %v9393_v58 = vpop.f32.mrb[230].mxu0  ;;  %v12405_v19 = vpop.permute.xlu1 %6611 }
 0xa0a   : > { %v2557_v20 = vadd.f32 %v12229_v33, %v9393_v58  ;;  %v2548_v28 = vpop.f32.mrb[231].mxu0  ;;  %14340 = vst [vmem:[#allocation113_spill] sm:$0xff] %v12405_v19  ;;  %v5951_v58 = vadd.f32 %v12054_v37, %v12178_v26 }
 0xa0b   : > { %v2549_v8 = vadd.f32 %v12229_v33, %v2548_v28 }
 0xa0d   : > { %v2885_v15 = vmax.f32 %v2549_v8, 0.0  ;;  %v12411_v25 = vpop.permute.xlu1 %6605 }
 0xa0e   : > { %14342 = vst [vmem:[#allocation115_spill] sm:$0xff] %v12411_v25 }
 0xa0f   : > { %5660 = vadd.xlane.f32.xlu0 %v5659_v16  ;;  %v2887_v16 = vmax.f32 %v2557_v20, 0.0  ;;  %v3026_v38 = vpack.c.bf16 %v2885_v15, %v2884_v35  ;;  %v4278_v20 = vadd.f32 %v12048_v55, %v12076_v61  ;;  %v5949_v61 = vadd.f32 %v12054_v37, %v12187_v17 }
 0xa11   : > { %v3027_v24 = vpack.c.bf16 %v2887_v16, %v2886_v2  ;;  %9654 = vmatprep.mubr.msk.bf16.mxu1 %vm14218_vm1, %v3026_v38  ;;  %v12415_v10 = vpop.xlane.xlu1 %5543  ;;  %v4716_v8 = vmax.f32 %v4278_v20, 0.0  ;;  %v4270_v2 = vadd.f32 %v12048_v55, %v12078_v36  ;;  %v9853_v20 = vld [vmem:[%s10048_s21 + $0x3d0] sm:$0xff]  }
 0xa12   : > { %14344 = vst [vmem:[#allocation117_spill] sm:$0xff] %v12415_v10  ;;  %9406 = vmatprep.mubr.msk.bf16.mxu0 %vm14216_vm0, %v9853_v20  ;;  %v4729_v10 = vmax.f32 %v4331_v32, 0.0 }
 0xa13   : > { %5654 = vadd.xlane.f32.xlu0 %v5653_v62  ;;  %9655 = vmatmul.mubr.msk.bf16.gmra.mrb[228].mxu1 %vm14218_vm1, %v3027_v24  ;;  %v12413_v62 = vpop.xlane.xlu0 %5546  ;;  %v4979_v28 = vmul.f32 %v12030_v51, %v4716_v8  ;;  %v4714_v35 = vmax.f32 %v4270_v2, 0.0 }
 0xa14   : > { %14343 = vst [vmem:[#allocation116_spill] sm:$0xff] %v12413_v62  ;;  %v9854_v62 = vld [vmem:[%s10048_s21 + $0x3d8] sm:$0xff]  }
 0xa15   : > { %v12423_v30 = vpop.xlane.xlu1 %5537  ;;  %v4977_v36 = vmul.f32 %v12030_v51, %v4714_v35  ;;  %v5626_v38 = vsel %vm14217_vm2, %v4979_v28, 0.0  ;;  %9407 = vmatmul.mubr.msk.bf16.gmra.mrb[244].mxu0 %vm14216_vm0, %v9854_v62  ;;  %v12451_v35 = vpop.f32.mrb[214].mxu1  ;;  %v5942_v62 = vadd.f32 %v12054_v37, %v11861_v49 }
 0xa16   : > { %14345 = vst [vmem:[#allocation118_spill] sm:$0xff] %v12423_v30  ;;  %14350 = vst [vmem:[#allocation123_spill] sm:$0xff] %v12451_v35 }
 0xa17   : > { %v12421_v15 = vpop.permute.xlu0 %6626  ;;  %v5620_v8 = vsel %vm14217_vm2, %v4977_v36, 0.0  ;;  %v4339_v36 = vadd.f32 %v12048_v55, %v12285_v53 }
 0xa19   : > { %v12432_v24 = vpop.permute.xlu1 %6623 }
 0xa1b   : > { %v12430_v16 = vpop.permute.xlu0 %6620 }
 0xa1d   : > { %v12443_v17 = vpop.permute.xlu1 %6617 }
 0xa1f   : > { %v12438_v26 = vpop.xlane.xlu0 %5564 }
 0xa20   : > { %14346 = vst [vmem:[#allocation119_spill] sm:$0xff] %v12438_v26  ;;  %v4731_v26 = vmax.f32 %v4339_v36, 0.0 }
 0xa22   : > { %v4994_v30 = vmul.f32 %v12030_v51, %v4731_v26 }
 0xa23   : > { %v12445_v2 = vpop.xlane.xlu0 %5558 }
 0xa24   : > { %14347 = vst [vmem:[#allocation120_spill] sm:$0xff] %v12445_v2  ;;  %v5671_v36 = vsel %vm14217_vm2, %v4994_v30, 0.0 }
 0xa27   : > { %v12449_v28 = vpop.permute.xlu0 %6638 }
 0xa28   : > { %14349 = vst [vmem:[#allocation122_spill] sm:$0xff] %v12449_v28 }
 0xa29   : > { %6734 = vperm.xlu0 %9725, %v5951_v58   ;;  %v12447_v58 = vpop.xlane.xlu1 %5555 }
 0xa2a   : > { %14348 = vst [vmem:[#allocation121_spill] sm:$0xff] %v12447_v58 }
 0xa2b   : > { %v12465_v2 = vpop.permute.xlu0 %6632 }
 0xa2c   : > { %14355 = vst [vmem:[#allocation128_spill] sm:$0xff] %v12465_v2 }
 0xa2d   : > { %5627 = vadd.xlane.f32.xlu1 %v5626_v38  ;;  %6728 = vperm.xlu0 %9725, %v5949_v61   ;;  %v12453_v61 = vpop.xlane.xlu1 %5549  ;;  %v12455_v38 = vpop.f32.mrb[215].mxu1 }
 0xa2e   : > { %14351 = vst [vmem:[#allocation124_spill] sm:$0xff] %v12453_v61  ;;  %14352 = vst [vmem:[#allocation125_spill] sm:$0xff] %v12455_v38  ;;  %v5940_v61 = vadd.f32 %v12054_v37, %v11872_v40  ;;  %v4992_v38 = vmul.f32 %v12030_v51, %v4729_v10 }
 0xa2f   : > { %v12459_v20 = vpop.f32.mrb[216].mxu1  ;;  %v12473_v53 = vpop.xlane.xlu0 %5576 }
 0xa30   : > { %14353 = vst [vmem:[#allocation126_spill] sm:$0xff] %v12459_v20  ;;  %14357 = vst [vmem:[#allocation130_spill] sm:$0xff] %v12473_v53  ;;  %v5665_v40 = vsel %vm14217_vm2, %v4992_v38, 0.0 }
 0xa31   : > { %5621 = vadd.xlane.f32.xlu1 %v5620_v8  ;;  %v12463_v8 = vpop.f32.mrb[217].mxu1  ;;  %v12469_v58 = vpop.permute.xlu1 %6635 }
 0xa32   : > { %14354 = vst [vmem:[#allocation127_spill] sm:$0xff] %v12463_v8  ;;  %14356 = vst [vmem:[#allocation129_spill] sm:$0xff] %v12469_v58  ;;  %v12594_v20 = vpop.f32.mrb[218].mxu1 }
 0xa33   : > { %v12480_v35 = vpop.xlane.xlu0 %5570  ;;  %14377 = vst [vmem:[#allocation148_spill] sm:$0xff] %v12594_v20 }
 0xa34   : > { %14358 = vst [vmem:[#allocation131_spill] sm:$0xff] %v12480_v35 }
 0xa35   : > { %v12476_v49 = vpop.permute.xlu1 %6629 }
 0xa37   : > { %v12489_v8 = vpop.permute.xlu0 %6650 }
 0xa38   : > { %14360 = vst [vmem:[#allocation133_spill] sm:$0xff] %v12489_v8 }
 0xa39   : > { %v12482_v43 = vpop.xlane.xlu1 %5567 }
 0xa3a   : > { %14359 = vst [vmem:[#allocation132_spill] sm:$0xff] %v12482_v43 }
 0xa3d   : > { %v12491_v43 = vpop.xlane.xlu1 %5561 }
 0xa3e   : > { %14361 = vst [vmem:[#allocation134_spill] sm:$0xff] %v12491_v43 }
 0xa42   : > { %6707 = vperm.xlu1 %9724, %v5942_v62   ;;  %v9396_v62 = vpop.f32.mrb[232].mxu0 }
 0xa43   : > { %v2570_v53 = vadd.f32 %v12229_v33, %v9396_v62  ;;  %v2561_v19 = vpop.f32.mrb[233].mxu0 }
 0xa44   : > { %v2562_v32 = vadd.f32 %v12229_v33, %v2561_v19  ;;  %v9397_v26 = vpop.f32.mrb[234].mxu0  ;;  %v12494_v19 = vpop.permute.xlu0 %6644 }
 0xa45   : > { %v2573_v54 = vadd.f32 %v12229_v33, %v9397_v26  ;;  %v2564_v10 = vpop.f32.mrb[235].mxu0  ;;  %14362 = vst [vmem:[#allocation135_spill] sm:$0xff] %v12494_v19 }
 0xa46   : > { %6701 = vperm.xlu1 %9724, %v5940_v61   ;;  %v2890_v61 = vmax.f32 %v2570_v53, 0.0  ;;  %v2888_v30 = vmax.f32 %v2562_v32, 0.0  ;;  %v2565_v35 = vadd.f32 %v12229_v33, %v2564_v10  ;;  %v12497_v53 = vpop.permute.xlu1 %6647  ;;  %v4294_v32 = vadd.f32 %v12048_v55, %v12134_v4 }
 0xa47   : > { %14363 = vst [vmem:[#allocation136_spill] sm:$0xff] %v12497_v53 }
 0xa48   : > { %v2889_v38 = vmax.f32 %v2565_v35, 0.0  ;;  %v4720_v35 = vmax.f32 %v4294_v32, 0.0  ;;  %v5953_v32 = vadd.f32 %v12054_v37, %v12214_v52 }
 0xa4a   : > { %v3028_v62 = vpack.c.bf16 %v2889_v38, %v2888_v30  ;;  %v12503_v26 = vpop.permute.xlu1 %6641  ;;  %v5955_v30 = vadd.f32 %v12054_v37, %v12202_v21  ;;  %v9855_v21 = vld [vmem:[%s10048_s21 + $0x3e0] sm:$0xff]  }
 0xa4b   : > { %14365 = vst [vmem:[#allocation138_spill] sm:$0xff] %v12503_v26  ;;  %9410 = vmatprep.mubr.msk.bf16.mxu0 %vm14216_vm0, %v9855_v21 }
 0xa4c   : > { %5672 = vadd.xlane.f32.xlu0 %v5671_v36  ;;  %v2891_v36 = vmax.f32 %v2573_v54, 0.0  ;;  %9658 = vmatprep.mubr.msk.bf16.mxu1 %vm14218_vm1, %v3028_v62 }
 0xa4e   : > { %v3029_v25 = vpack.c.bf16 %v2891_v36, %v2890_v61  ;;  %v4286_v61 = vadd.f32 %v12048_v55, %v12136_v12  ;;  %v12509_v10 = vpop.xlane.xlu1 %5579  ;;  %v4983_v36 = vmul.f32 %v12030_v51, %v4720_v35  ;;  %v9856_v35 = vld [vmem:[%s10048_s21 + $0x3e8] sm:$0xff]  }
 0xa4f   : > { %14367 = vst [vmem:[#allocation140_spill] sm:$0xff] %v12509_v10  ;;  %9411 = vmatmul.mubr.msk.bf16.gmra.mrb[248].mxu0 %vm14216_vm0, %v9856_v35  ;;  %vm14220_vm0 = vcmask 982912  }
 0xa50   : > { %5666 = vadd.xlane.f32.xlu0 %v5665_v40  ;;  %9659 = vmatmul.mubr.msk.bf16.gmra.mrb[232].mxu1 %vm14218_vm1, %v3029_v25  ;;  %v12499_v40 = vpop.xlane.xlu0 %5588  ;;  %v7096_v25 = vlaneseq  ;;  %v4718_v38 = vmax.f32 %v4286_v61, 0.0  ;;  %v5638_v10 = vsel %vm14217_vm2, %v4983_v36, 0.0 }
 0xa51   : > { %14364 = vst [vmem:[#allocation137_spill] sm:$0xff] %v12499_v40 }
 0xa52   : > { %v12514_v4 = vand.u32 127, %v7096_v25  ;;  %v12520_v12 = vpop.xlane.xlu1 %5573  ;;  %v4981_v40 = vmul.f32 %v12030_v51, %v4718_v38  ;;  %v12527_v61 = vshrl.u32 %v7096_v25, 7 }
 0xa53   : > { %14369 = vst [vmem:[#allocation142_spill] sm:$0xff] %v12520_v12 }
 0xa54   : > { %v12505_v54 = vpop.xlane.xlu0 %5582  ;;  %v5632_v12 = vsel %vm14217_vm2, %v4981_v40, 0.0  ;;  %v7109_v51 = vadd.s32 4294967280, %v12514_v4  ;;  %v7116_v25 = vadd.s32 4294967272, %v12514_v4  ;;  %v7151_v8 = vadd.s32 4294967232, %v12514_v4 }
 0xa55   : > { %14366 = vst [vmem:[#allocation139_spill] sm:$0xff] %v12505_v54  ;;  %v7102_v54 = vadd.s32 4294967288, %v12514_v4 }
 0xa56   : > { %v12542_v36 = vpop.permute.xlu1 %6659  ;;  %v12554_v35 = vsub.s32 %v7109_v51, %v12527_v61 }
 0xa57   : > { %14371 = vst [vmem:[#allocation144_spill] sm:$0xff] %v12542_v36 }
 0xa58   : > { %v12516_v62 = vpop.permute.xlu0 %6662 }
 0xa59   : > { %14368 = vst [vmem:[#allocation141_spill] sm:$0xff] %v12516_v62  ;;  %v12561_v62 = vsub.s32 %v7116_v25, %v12527_v61  ;;  %v7172_v25 = vadd.s32 4294967208, %v12514_v4 }
 0xa5a   : > { %v12567_v36 = vpop.permute.xlu1 %6653 }
 0xa5b   : > { %14373 = vst [vmem:[#allocation146_spill] sm:$0xff] %v12567_v36  ;;  %v12611_v20 = vsub.s32 %v7172_v25, %v12527_v61  ;;  %v7186_v25 = vadd.s32 4294967192, %v12514_v4 }
 0xa5c   : > { %v12533_v52 = vpop.permute.xlu0 %6656 }
 0xa5d   : > { %14370 = vst [vmem:[#allocation143_spill] sm:$0xff] %v12533_v52  ;;  %v14375_v52 = vld [vmem:[#allocation13_spill] sm:$0xff] }
 0xa5e   : > { %v7224_v36 = vrot.slane %v14375_v52, %v12561_v62  ;;  %v12592_v53 = vpop.xlane.xlu1 %5591 }
 0xa5f   : > { %14376 = vst [vmem:[#allocation13_spill] sm:$0xff] %v12592_v53 }
 0xa60   : > { %v12551_v21 = vpop.xlane.xlu0 %5600 }
 0xa61   : > { %14372 = vst [vmem:[#allocation145_spill] sm:$0xff] %v12551_v21 }
 0xa66   : > { %6746 = vperm.xlu0 %9725, %v5955_v30   ;;  %v12531_v30 = vsub.s32 %v7102_v54, %v12527_v61  ;;  %v7123_v54 = vadd.s32 4294967264, %v12514_v4 }
 0xa68   : > { %v7106_v40 = vrot.slane %v11280_v29, %v12531_v30 }
 0xa6a   : > { %5639 = vadd.xlane.f32.xlu1 %v5638_v10  ;;  %6740 = vperm.xlu0 %9725, %v5953_v32   ;;  %v12540_v10 = vsub.s32 %v12514_v4, %v12527_v61  ;;  %v7130_v32 = vadd.s32 4294967256, %v12514_v4 }
 0xa6c   : > { %v7210_v38 = vrot.slane %v11526_v7, %v12540_v10  ;;  %v7101_v43 = vrot.slane %v11160_v23, %v12540_v10  ;;  %v12564_v7 = vsub.s32 %v7123_v54, %v12527_v61  ;;  %v12571_v21 = vsub.s32 %v7130_v32, %v12527_v61  ;;  %v12584_v32 = vpop.xlane.xlu0 %5594 }
 0xa6d   : > { %v7113_v23 = vrot.slane %v11224_v1, %v12554_v35  ;;  %v7158_v54 = vadd.s32 4294967224, %v12514_v4  ;;  %14374 = vst [vmem:[#allocation147_spill] sm:$0xff] %v12584_v32 }
 0xa6e   : > { %5633 = vadd.xlane.f32.xlu1 %v5632_v12  ;;  %v7214_v12 = vrot.slane %v11374_v47, %v12531_v30  ;;  %v7108_v51 = vsel %vm7107_vm3, %v7106_v40, %v7101_v43  ;;  %v7219_v47 = vrot.slane %v11486_v6, %v12554_v35  ;;  %v7229_v40 = vrot.slane %v11584_v34, %v12564_v7  ;;  %v14379_v34 = vld [vmem:[#allocation14_spill] sm:$0xff] }
 0xa6f   : > { %v7115_v6 = vsel %vm7114_vm4, %v7113_v23, %v7108_v51  ;;  %v7127_v1 = vrot.slane %v11307_v59, %v12564_v7  ;;  %v7134_v32 = vrot.slane %v14379_v34, %v12571_v21  ;;  %v12600_v51 = vpop.f32.mrb[219].mxu1  ;;  %v4355_v23 = vadd.f32 %v12048_v55, %v12373_v46  ;;  %v14382_v46 = vld [vmem:[#allocation19_spill] sm:$0xff] }
 0xa70   : > { %v7215_v29 = vsel %vm7107_vm3, %v7214_v12, %v7210_v38  ;;  %v7137_v38 = vadd.s32 4294967248, %v12514_v4  ;;  %v7144_v12 = vadd.s32 4294967240, %v12514_v4  ;;  %v12608_v53 = vpop.f32.mrb[220].mxu1 }
 0xa71   : > { %v7220_v43 = vsel %vm7114_vm4, %v7219_v47, %v7215_v29  ;;  %v14378_v29 = vld [vmem:[#allocation7_spill] sm:$0xff]  ;;  %14381 = vst [vmem:[#allocation14_spill] sm:$0xff] %v12608_v53 }
 0xa72   : > { %v7120_v47 = vrot.slane %v14378_v29, %v12561_v62  ;;  %14380 = vst [vmem:[#allocation7_spill] sm:$0xff] %v12600_v51  ;;  %v12603_v59 = vsub.s32 %v7137_v38, %v12527_v61  ;;  %v7225_v52 = vsel %vm7121_vm5, %v7224_v36, %v7220_v43  ;;  %v12614_v29 = vsub.s32 %v7158_v54, %v12527_v61 }
 0xa73   : > { %v7230_v51 = vsel %vm7128_vm6, %v7229_v40, %v7225_v52  ;;  %v12620_v19 = vsub.s32 %v7144_v12, %v12527_v61  ;;  %v12623_v36 = vsub.s32 %v7151_v8, %v12527_v61  ;;  %v7234_v43 = vrot.slane %v14382_v46, %v12571_v21  ;;  %v12631_v40 = vpop.permute.xlu0 %6674  ;;  %v14385_v12 = vld [vmem:[#allocation10_spill] sm:$0xff]  ;;  %v12638_v52 = vpop.xlane.xlu1 %5585 }
 0xa74   : > { %v7122_v34 = vsel %vm7121_vm5, %v7120_v47, %v7115_v6  ;;  %v5946_v6 = vadd.f32 %v12054_v37, %v11918_v13  ;;  %14383 = vst [vmem:[#allocation19_spill] sm:$0xff] %v12631_v40  ;;  %v7141_v47 = vrot.slane %v14385_v12, %v12603_v59  ;;  %14386 = vst [vmem:[#allocation10_spill] sm:$0xff] %v12638_v52  ;;  %v14387_v13 = vld [vmem:[#allocation24_spill] sm:$0xff]  ;;  %v14391_v40 = vld [vmem:[#allocation37_spill] sm:$0xff] }
 0xa75   : > { %v7129_v38 = vsel %vm7128_vm6, %v7127_v1, %v7122_v34  ;;  %v12633_v1 = vpop.f32.mrb[221].mxu1  ;;  %v7235_v8 = vsel %vm7135_vm7, %v7234_v43, %v7230_v51  ;;  %v4735_v34 = vmax.f32 %v4355_v23, 0.0  ;;  %v4347_v46 = vadd.f32 %v12048_v55, %v12379_v56  ;;  %v14389_v51 = vld [vmem:[#allocation16_spill] sm:$0xff]  ;;  %v14390_v56 = vld [vmem:[#allocation29_spill] sm:$0xff] }
 0xa76   : > { %v7136_v54 = vsel %vm7135_vm7, %v7134_v32, %v7129_v38  ;;  %14384 = vst [vmem:[#allocation149_spill] sm:$0xff] %v12633_v1  ;;  %v7165_v32 = vadd.s32 4294967216, %v12514_v4  ;;  %v7239_v38 = vrot.slane %v14387_v13, %v12603_v59  ;;  %v14388_v1 = vld [vmem:[#allocation12_spill] sm:$0xff]  ;;  %v7155_v43 = vrot.slane %v14389_v51, %v12623_v36  ;;  %v12666_v13 = vld [vmem:[%s14213_s5] ss:$0 sm:$0xff]  ;;  %v14393_v51 = vld [vmem:[#allocation6_spill] sm:$0xff] }
 0xa77   : > { %v7148_v53 = vrot.slane %v14388_v1, %v12620_v19  ;;  %v7143_v12 = vsel %vm7142_vm8, %v7141_v47, %v7136_v54  ;;  %v7179_v23 = vadd.s32 4294967200, %v12514_v4  ;;  %v7249_v52 = vrot.slane %v14390_v56, %v12623_v36  ;;  %v14392_v54 = vld [vmem:[#allocation17_spill] sm:$0xff] }
 0xa78   : > { %v7240_v55 = vsel %vm7142_vm8, %v7239_v38, %v7235_v8  ;;  %v7289_v28 = vrot.slane %v14391_v40, %v12540_v10  ;;  %v12659_v1 = vadd.s32 4294967176, %v12514_v4  ;;  %v7244_v47 = vrot.slane %v14392_v54, %v12620_v19  ;;  %v12677_v54 = vpop.permute.xlu0 %6668 }
 0xa79   : > { %v4998_v8 = vmul.f32 %v12666_v13, %v4735_v34  ;;  %v4733_v38 = vmax.f32 %v4347_v46, 0.0  ;;  %v7176_v40 = vrot.slane %v14393_v51, %v12611_v20  ;;  %v12672_v56 = vsub.s32 %v7186_v25, %v12527_v61  ;;  %14395 = vst [vmem:[#allocation24_spill] sm:$0xff] %v12677_v54  ;;  %v12684_v51 = vpop.permute.xlu1 %6671  ;;  %v14397_v25 = vld [vmem:[#allocation8_spill] sm:$0xff] }
 0xa7a   : > { %v12680_v3 = vsub.s32 %v7165_v32, %v12527_v61  ;;  %v7245_v46 = vsel %vm14223_vm9, %v7244_v47, %v7240_v55  ;;  %14396 = vst [vmem:[#allocation12_spill] sm:$0xff] %v12684_v51  ;;  %v7162_v58 = vrot.slane %v14397_v25, %v12614_v29  ;;  %v14398_v32 = vld [vmem:[#allocation22_spill] sm:$0xff] }
 0xa7b   : > { %v4996_v55 = vmul.f32 %v12666_v13, %v4733_v38  ;;  %v5683_v47 = vsel %vm14217_vm2, %v4998_v8, 0.0  ;;  %v14403_v38 = vld [vmem:[#allocation41_spill] sm:$0xff]  ;;  %v7193_v8 = vadd.s32 4294967184, %v12514_v4 }
 0xa7f   : > { %6719 = vperm.xlu1 %9724, %v5946_v6   ;;  %v5944_v6 = vadd.f32 %v12054_v37, %v11930_v50  ;;  %v7150_v50 = vsel %vm14223_vm9, %v7148_v53, %v7143_v12  ;;  %v14394_v37 = vld [vmem:[#allocation28_spill] sm:$0xff]  ;;  %v12689_v53 = vsub.s32 %v7179_v23, %v12527_v61  ;;  %v7250_v12 = vsel %vm14222_vm10, %v7249_v52, %v7245_v46  ;;  %v12702_v52 = vpop.xlane.xlu0 %5612 }
 0xa80   : > { %v7293_v26 = vrot.slane %v14394_v37, %v12531_v30  ;;  %v7157_v34 = vsel %vm14222_vm10, %v7155_v43, %v7150_v50  ;;  %v7254_v37 = vrot.slane %v14398_v32, %v12614_v29  ;;  %v7298_v43 = vrot.slane %v14399_v63, %v12554_v35  ;;  %v14400_v50 = vld [vmem:[#allocation11_spill] sm:$0xff]  ;;  %14401 = vst [vmem:[#allocation16_spill] sm:$0xff] %v12702_v52  ;;  %v9400_v52 = vpop.f32.mrb[236].mxu0 }
 0xa81   : > { %v7190_v25 = vrot.slane %v14400_v50, %v12672_v56  ;;  %v7164_v23 = vsel %vm7163_vm11, %v7162_v58, %v7157_v34  ;;  %v7308_v32 = vrot.slane %v14403_v38, %v12564_v7  ;;  %v14404_v50 = vld [vmem:[#allocation26_spill] sm:$0xff]  ;;  %v14405_v34 = vld [vmem:[#allocation27_spill] sm:$0xff]  ;;  %v2586_v4 = vadd.f32 %v12229_v33, %v9400_v52  ;;  %v2577_v38 = vpop.f32.mrb[237].mxu0 }
 0xa82   : > { %v7255_v46 = vsel %vm7163_vm11, %v7254_v37, %v7250_v12  ;;  %v7303_v58 = vrot.slane %v14404_v50, %v12561_v62  ;;  %v7259_v51 = vrot.slane %v14405_v34, %v12680_v3  ;;  %v14406_v12 = vld [vmem:[#allocation20_spill] sm:$0xff]  ;;  %v14408_v50 = vld [vmem:[#allocation33_spill] sm:$0xff]  ;;  %v2578_v34 = vadd.f32 %v12229_v33, %v2577_v38 }
 0xa83   : > { %6713 = vperm.xlu1 %9724, %v5944_v6   ;;  %v7294_v6 = vsel %vm7107_vm3, %v7293_v26, %v7289_v28  ;;  %v14402_v28 = vld [vmem:[#allocation15_spill] sm:$0xff]  ;;  %v7183_v37 = vrot.slane %v14406_v12, %v12689_v53  ;;  %v7269_v2 = vrot.slane %v14408_v50, %v12689_v53  ;;  %v2894_v5 = vmax.f32 %v2586_v4, 0.0  ;;  %v12734_v50 = vpop.xlane.xlu0 %5606 }
 0xa84   : > { %v7169_v26 = vrot.slane %v14402_v28, %v12680_v3  ;;  %v7299_v63 = vsel %vm7114_vm4, %v7298_v43, %v7294_v6  ;;  %v12718_v6 = vpop.permute.xlu1 %6665  ;;  %v5677_v43 = vsel %vm14217_vm2, %v4996_v55, 0.0  ;;  %v7260_v54 = vsel %vm7170_vm12, %v7259_v51, %v7255_v46  ;;  %v14410_v51 = vld [vmem:[#allocation32_spill] sm:$0xff] }
 0xa85   : > { %14407 = vst [vmem:[#allocation29_spill] sm:$0xff] %v12718_v6  ;;  %v7313_v46 = vrot.slane %v14410_v51, %v12571_v21  ;;  %v12759_v51 = vsub.s32 %v12659_v1, %v12527_v61  ;;  %vm7205_vm2 = vcmask 1048512  }
 0xa86   : > { %v7171_v28 = vsel %vm7170_vm12, %v7169_v26, %v7164_v23  ;;  %v9401_v23 = vpop.f32.mrb[238].mxu0  ;;  %v14409_v26 = vld [vmem:[#allocation21_spill] sm:$0xff] }
 0xa87   : > { %v7264_v12 = vrot.slane %v14409_v26, %v12611_v20  ;;  %v2589_v55 = vadd.f32 %v12229_v33, %v9401_v23  ;;  %v2580_v52 = vpop.f32.mrb[239].mxu0  ;;  %v7178_v11 = vsel %vm7177_vm13, %v7176_v40, %v7171_v28  ;;  %v12742_v23 = vsub.s32 %v7193_v8, %v12527_v61 }
 0xa88   : > { %v7185_v38 = vsel %vm14227_vm14, %v7183_v37, %v7178_v11  ;;  %v12739_v4 = vpop.xlane.xlu1 %5603 }
 0xa89   : > { %5684 = vadd.xlane.f32.xlu0 %v5683_v47  ;;  %v7304_v47 = vsel %vm7121_vm5, %v7303_v58, %v7299_v63  ;;  %v2892_v63 = vmax.f32 %v2578_v34, 0.0  ;;  %v2581_v58 = vadd.f32 %v12229_v33, %v2580_v52  ;;  %v14412_v33 = vld [vmem:[#allocation39_spill] sm:$0xff] }
 0xa8a   : > { %v7309_v6 = vsel %vm7128_vm6, %v7308_v32, %v7304_v47  ;;  %v7265_v32 = vsel %vm7177_vm13, %v7264_v12, %v7260_v54  ;;  %v2895_v47 = vmax.f32 %v2589_v55, 0.0  ;;  %v7318_v52 = vrot.slane %v14412_v33, %v12603_v59 }
 0xa8b   : > { %v7270_v40 = vsel %vm14227_vm14, %v7269_v2, %v7265_v32  ;;  %v7314_v28 = vsel %vm7135_vm7, %v7313_v46, %v7309_v6  ;;  %v2893_v26 = vmax.f32 %v2581_v58, 0.0  ;;  %v7192_v54 = vsel %vm14221_vm15, %v7190_v25, %v7185_v38  ;;  %v14413_v2 = vld [vmem:[#allocation45_spill] sm:$0xff]  ;;  %v14415_v25 = vld [vmem:[#allocation30_spill] sm:$0xff]  ;;  %v14416_v58 = vld [vmem:[#allocation31_spill] sm:$0xff]  ;;  %v12767_v32 = vpop.permute.xlu0 %6686 }
 0xa8c   : > { %v3031_v11 = vpack.c.bf16 %v2895_v47, %v2894_v5  ;;  %v7319_v8 = vsel %vm7142_vm8, %v7318_v52, %v7314_v28  ;;  %v7328_v55 = vrot.slane %v14413_v2, %v12623_v36  ;;  %v7368_v6 = vrot.slane %v11995_v27, %v12540_v10  ;;  %v14414_v5 = vld [vmem:[#allocation18_spill] sm:$0xff]  ;;  %v14417_v47 = vld [vmem:[#allocation44_spill] sm:$0xff] }
 0xa8d   : > { %5678 = vadd.xlane.f32.xlu0 %v5677_v43  ;;  %v14411_v43 = vld [vmem:[#allocation25_spill] sm:$0xff]  ;;  %v3030_v37 = vpack.c.bf16 %v2893_v26, %v2892_v63  ;;  %v7197_v46 = vrot.slane %v14414_v5, %v12742_v23  ;;  %v7323_v63 = vrot.slane %v14415_v25, %v12620_v19  ;;  %v7279_v38 = vrot.slane %v14416_v58, %v12742_v23  ;;  %v14418_v26 = vld [vmem:[#allocation23_spill] sm:$0xff]  ;;  %v14420_v2 = vld [vmem:[#allocation36_spill] sm:$0xff] }
 0xa8e   : > { %v7274_v34 = vrot.slane %v14411_v43, %v12672_v56  ;;  %v7372_v27 = vrot.slane %v14417_v47, %v12531_v30  ;;  %v7284_v43 = vrot.slane %v14418_v26, %v12759_v51  ;;  %v7447_v52 = vrot.slane %v12196_v18, %v12540_v10  ;;  %v14422_v58 = vld [vmem:[#allocation42_spill] sm:$0xff]  ;;  %v14423_v47 = vld [vmem:[#allocation43_spill] sm:$0xff] }
 0xa8f   : > { %9662 = vmatprep.mubr.msk.bf16.mxu1 %vm14218_vm1, %v3030_v37  ;;  %v7199_v61 = vsel %vm14220_vm0, %v7197_v46, %v7192_v54  ;;  %v7324_v28 = vsel %vm14223_vm9, %v7323_v63, %v7319_v8  ;;  %v14419_v37 = vld [vmem:[#allocation9_spill] sm:$0xff]  ;;  %v7333_v54 = vrot.slane %v14420_v2, %v12614_v29  ;;  %v7387_v25 = vrot.slane %v12065_v48, %v12564_v7  ;;  %v12798_v63 = vpop.permute.xlu0 %6680  ;;  %v14424_v26 = vld [vmem:[#allocation34_spill] sm:$0xff] }
 0xa90   : > { %v7275_v12 = vsel %vm14221_vm15, %v7274_v34, %v7270_v40  ;;  %v12772_v40 = vpop.xlane.xlu1 %5597  ;;  %9663 = vmatmul.mubr.msk.bf16.gmra.mrb[236].mxu1 %vm14218_vm1, %v3031_v11  ;;  %v7329_v34 = vsel %vm14222_vm10, %v7328_v55, %v7324_v28  ;;  %v7373_v33 = vsel %vm7107_vm3, %v7372_v27, %v7368_v6  ;;  %v7204_v11 = vrot.slane %v14419_v37, %v12759_v51 }
 0xa91   : > { %v7280_v1 = vsel %vm14220_vm0, %v7279_v38, %v7275_v12  ;;  %v14421_v12 = vld [vmem:[#allocation51_spill] sm:$0xff]  ;;  %vm14219_vm1 = vcmask 1041409   ;;  %v7451_v55 = vrot.slane %v12099_v9, %v12531_v30  ;;  %v7334_v46 = vsel %vm7163_vm11, %v7333_v54, %v7329_v34  ;;  %v12808_v9 = vld [vmem:[%s14212_s4] ss:$0 sm:$0xff]  ;;  %v14427_v54 = vld [vmem:[#allocation48_spill] sm:$0xff] }
 0xa92   : > { %v7377_v5 = vrot.slane %v14421_v12, %v12554_v35  ;;  %v7285_v8 = vsel %vm7205_vm2, %v7284_v43, %v7280_v1  ;;  %v7206_v6 = vsel %vm7205_vm2, %v7204_v11, %v7199_v61  ;;  %v7382_v38 = vrot.slane %v14422_v58, %v12561_v62  ;;  %v14426_v11 = vld [vmem:[#allocation49_spill] sm:$0xff] }
 0xa93   : > { %v7338_v27 = vrot.slane %v14423_v47, %v12680_v3  ;;  %v7452_v1 = vsel %vm7107_vm3, %v7451_v55, %v7447_v52  ;;  %v4310_v61 = vadd.f32 %v12808_v9, %v12198_v60  ;;  %v12815_v48 = vsel %vm14219_vm1, %v7285_v8, %v7206_v6  ;;  %v12833_v55 = vpop.xlane.xlu0 %5624  ;;  %v14429_v47 = vld [vmem:[#allocation46_spill] sm:$0xff] }
 0xa94   : > { %v7378_v18 = vsel %vm7114_vm4, %v7377_v5, %v7373_v33  ;;  %v12812_v28 = vpop.permute.xlu1 %6683  ;;  %v7343_v43 = vrot.slane %v14424_v26, %v12611_v20  ;;  %v7456_v34 = vrot.slane %v12194_v57, %v12554_v35  ;;  %v14425_v33 = vld [vmem:[#allocation40_spill] sm:$0xff]  ;;  %v7348_v2 = vrot.slane %v14426_v11, %v12689_v53 }
 0xa95   : > { %v7353_v52 = vrot.slane %v14425_v33, %v12672_v56  ;;  %v7339_v37 = vsel %vm7170_vm12, %v7338_v27, %v7334_v46  ;;  %v7383_v60 = vsel %vm7121_vm5, %v7382_v38, %v7378_v18  ;;  %v7392_v12 = vrot.slane %v14427_v54, %v12571_v21  ;;  %v14428_v18 = vld [vmem:[#allocation71_spill] sm:$0xff]  ;;  %v14431_v11 = vld [vmem:[#allocation56_spill] sm:$0xff] }
 0xa96   : > { %v7388_v5 = vsel %vm7128_vm6, %v7387_v25, %v7383_v60  ;;  %v7457_v8 = vsel %vm7114_vm4, %v7456_v34, %v7452_v1  ;;  %v7466_v57 = vrot.slane %v12233_v22, %v12564_v7  ;;  %v7461_v6 = vrot.slane %v12067_v44, %v12561_v62  ;;  %v14430_v27 = vld [vmem:[#allocation47_spill] sm:$0xff] }
 0xa97   : > { %v7526_v46 = vrot.slane %v12319_v31, %v12540_v10  ;;  %v4724_v58 = vmax.f32 %v4310_v61, 0.0  ;;  %v4302_v38 = vadd.f32 %v12808_v9, %v14428_v18  ;;  %v7402_v25 = vrot.slane %v14429_v47, %v12620_v19  ;;  %v12873_v47 = vpop.xlane.xlu0 %5618 }
 0xa98   : > { %v7358_v1 = vrot.slane %v14430_v27, %v12742_v23  ;;  %v7344_v22 = vsel %vm7177_vm13, %v7343_v43, %v7339_v37  ;;  %v7605_v26 = vrot.slane %v12443_v17, %v12540_v10  ;;  %v7393_v34 = vsel %vm7135_vm7, %v7392_v12, %v7388_v5  ;;  %v12853_v33 = vpop.permute.xlu1 %6677  ;;  %v12858_v43 = vld [vmem:[#allocation2] ss:$0 sm:$0xff] }
 0xa99   : > { %v7349_v44 = vsel %vm14227_vm14, %v7348_v2, %v7344_v22  ;;  %v7462_v31 = vsel %vm7121_vm5, %v7461_v6, %v7457_v8  ;;  %v7530_v61 = vrot.slane %v12308_v42, %v12531_v30  ;;  %v7397_v60 = vrot.slane %v14431_v11, %v12603_v59  ;;  %v14432_v2 = vld [vmem:[#allocation66_spill] sm:$0xff] }
 0xa9a   : > { %v7467_v54 = vsel %vm7128_vm6, %v7466_v57, %v7462_v31  ;;  %v5959_v17 = vadd.f32 %v12858_v43, %v12239_v0  ;;  %v7609_v37 = vrot.slane %v12430_v16, %v12531_v30  ;;  %v7471_v12 = vrot.slane %v14432_v2, %v12571_v21  ;;  %v14433_v16 = vld [vmem:[#allocation63_spill] sm:$0xff] }
 0xa9b   : > { %v7531_v42 = vsel %vm7107_vm3, %v7530_v61, %v7526_v46  ;;  %v4987_v5 = vmul.f32 %v12666_v13, %v4724_v58  ;;  %v4722_v8 = vmax.f32 %v4302_v38, 0.0  ;;  %v7354_v6 = vsel %vm14221_vm15, %v7353_v52, %v7349_v44  ;;  %v14434_v46 = vld [vmem:[#allocation72_spill] sm:$0xff] }
 0xa9c   : > { %v7398_v57 = vsel %vm7142_vm8, %v7397_v60, %v7393_v34  ;;  %v7535_v18 = vrot.slane %v12312_v41, %v12554_v35  ;;  %v7610_v0 = vsel %vm7107_vm3, %v7609_v37, %v7605_v26  ;;  %v7407_v27 = vrot.slane %v14433_v16, %v12623_v36  ;;  %v12882_v38 = vpop.xlane.xlu1 %5615  ;;  %v14441_v16 = vld [vmem:[#allocation29_spill] sm:$0xff] }
 0xa9d   : > { %v7476_v22 = vrot.slane %v14434_v46, %v12603_v59  ;;  %v7472_v58 = vsel %vm7135_vm7, %v7471_v12, %v7467_v54  ;;  %v7614_v52 = vrot.slane %v12432_v24, %v12554_v35  ;;  %v7540_v41 = vrot.slane %v12302_v45, %v12561_v62  ;;  %v9857_v54 = vld [vmem:[%s10048_s21 + $0x3f0] sm:$0xff]  }
 0xa9e   : > { %v5957_v26 = vadd.f32 %v12858_v43, %v12243_v14  ;;  %v7536_v44 = vsel %vm7114_vm4, %v7535_v18, %v7531_v42  ;;  %v7545_v34 = vrot.slane %v12348_v39, %v12564_v7  ;;  %v7624_v61 = vrot.slane %v12476_v49, %v12564_v7  ;;  %v9858_v39 = vld [vmem:[%s10048_s21 + $0x3f8] sm:$0xff]   ;;  %s284_s21 = sand.u32 1, %s9936_s27  }
 0xa9f   : > { %v7615_v31 = vsel %vm7114_vm4, %v7614_v52, %v7610_v0  ;;  %v4985_v24 = vmul.f32 %v12666_v13, %v4722_v8  ;;  %vm14435_vm1 = vcmask 261120   ;;  %v7359_v60 = vsel %vm14220_vm0, %v7358_v1, %v7354_v6  ;;  %v14436_v49 = vld [vmem:[#allocation77_spill] sm:$0xff]  ;;  %v14437_v1 = vld [vmem:[#allocation52_spill] sm:$0xff]  ;;  %v12913_v6 = vpop.permute.xlu0 %6698  ;;  %s8497_s6 = sshll.u32 %s284_s21, 4  ;;  %s14167_s22 = scalar_lea.sflag [#allocation4], %s284_s21 }
 0xaa0   : > { %v5650_v11 = vsel %vm14435_vm1, %v4987_v5, 0.0  ;;  %v7403_v45 = vsel %vm14223_vm9, %v7402_v25, %v7398_v57  ;;  %v7619_v14 = vrot.slane %v12421_v15, %v12561_v62  ;;  %v7477_v37 = vsel %vm7142_vm8, %v7476_v22, %v7472_v58  ;;  %v14438_v25 = vld [vmem:[#allocation64_spill] sm:$0xff]  ;;  %v14440_v57 = vld [vmem:[#allocation95_spill] sm:$0xff]  ;;  %v12921_v46 = vpop.xlane.xlu1 %5609  ;;  %v14444_v58 = vld [vmem:[#allocation38_spill] sm:$0xff]  ;;  %s13131_s30 = scalar_lea.vmem [#allocation3], %s8497_s6 }
 0xaa1   : > { %v7486_v2 = vrot.slane %v14436_v49, %v12623_v36  ;;  %v7541_v12 = vsel %vm7121_vm5, %v7540_v41, %v7536_v44  ;;  %v7412_v42 = vrot.slane %v14437_v1, %v12614_v29  ;;  %v7481_v5 = vrot.slane %v14438_v25, %v12620_v19  ;;  %v14445_v44 = vld [vmem:[#allocation128_spill] sm:$0xff]  ;;  %v14450_v1 = vld [vmem:[#allocation50_spill] sm:$0xff]  ;;  %v14451_v25 = vld [vmem:[#allocation129_spill] sm:$0xff]  ;;  %s8431_s17 = sshll.u32 %s13131_s30, 4  ;;  %s14158_s17 = int_to_ptr.vmem [resolvable:$true] %s8431_s17 }
 0xaa2   : > { %v7546_v15 = vsel %vm7128_vm6, %v7545_v34, %v7541_v12  ;;  %v7620_v8 = vsel %vm7121_vm5, %v7619_v14, %v7615_v31  ;;  %vm14439_vm1 = vcmask 130048   ;;  %v7550_v18 = vrot.slane %v14440_v57, %v12571_v21  ;;  %v14446_v31 = vld [vmem:[#allocation60_spill] sm:$0xff]  ;;  %v14452_v57 = vld [vmem:[#allocation107_spill] sm:$0xff]  ;;  %s9882_s23 = scalar_lea.vmem %s14158_s17, 256  ;;  %p9889_p0 = scmp.lt.s32.totalorder %s14158_s17, %s9887_s24 }
 0xaa3   : > { %6758 = vperm.xlu0 %9725, %v5959_v17   ;;  %v7408_v17 = vsel %vm14222_vm10, %v7407_v27, %v7403_v45  ;;  %9414 = vmatprep.mubr.msk.bf16.mxu0 %vm14439_vm1, %v9857_v54  ;;  %v7625_v0 = vsel %vm7128_vm6, %v7624_v61, %v7620_v8  ;;  %v7684_v27 = vrot.slane %v14441_v16, %v12540_v10  ;;  %vm14442_vm0 = vcmask 261120   ;;  %vm14443_vm15 = vmmov %vm14439_vm1  ;;  %v14447_v45 = vld [vmem:[#allocation24_spill] sm:$0xff]  ;;  %v12955_v16 = vpop.permute.xlu0 %6692  ;;  %p9883_p11 = scmp.ne.s32.totalorder %s14158_s17, %s9882_s23  ;;  %p9890_p1 = scmp.lt.s32.totalorder %s9888_s25, %s9882_s23 }
 0xaa4   : > { %v5644_v22 = vsel %vm14442_vm0, %v4985_v24, 0.0  ;;  %9415 = vmatmul.mubr.msk.bf16.gmra.mrb[252].mxu0 %vm14443_vm15, %v9858_v39  ;;  %v7363_v52 = vrot.slane %v14444_v58, %v12759_v51  ;;  %v7413_v41 = vsel %vm7163_vm11, %v7412_v42, %v7408_v17  ;;  %v7629_v34 = vrot.slane %v14445_v44, %v12571_v21  ;;  %v14448_v39 = vld [vmem:[#allocation73_spill] sm:$0xff]  ;;  %v14454_v58 = vld [vmem:[#allocation75_spill] sm:$0xff]  ;;  %v14456_v44 = vld [vmem:[#allocation138_spill] sm:$0xff] }
 0xaa5   : > { %v7417_v61 = vrot.slane %v14446_v31, %v12680_v3  ;;  %v7551_v24 = vsel %vm7135_vm7, %v7550_v18, %v7546_v15  ;;  %v7688_v14 = vrot.slane %v14447_v45, %v12531_v30  ;;  %v7491_v17 = vrot.slane %v14448_v39, %v12614_v29  ;;  %v12966_v31 = vpop.permute.xlu1 %6695  ;;  %p9884_p12 = pnand %p9883_p11, %p10028_p5  ;;  %p9891_p2 = por %p9890_p1, %p9889_p0 }
 0xaa6   : > { %v12938_v54 = vsel %vm7205_vm2, %v7363_v52, %v7359_v60  ;;  %v7630_v12 = vsel %vm7135_vm7, %v7629_v34, %v7625_v0  ;;  %v7422_v42 = vrot.slane %v14450_v1, %v12611_v20  ;;  %v7565_v18 = vrot.slane %v14452_v57, %v12623_v36  ;;  %v14453_v0 = vld [vmem:[#allocation12_spill] sm:$0xff]  ;;  %v14460_v1 = vld [vmem:[#allocation19_spill] sm:$0xff] }
 0xaa7   : > { %5651 = vadd.xlane.f32.xlu1 %v5650_v11  ;;  %6752 = vperm.xlu0 %9725, %v5957_v26   ;;  %v7482_v26 = vsel %vm14223_vm9, %v7481_v5, %v7477_v37  ;;  %v14449_v37 = vld [vmem:[#allocation96_spill] sm:$0xff]  ;;  %v7634_v5 = vrot.slane %v14451_v25, %v12603_v59  ;;  %v7689_v15 = vsel %vm7107_vm3, %v7688_v14, %v7684_v27  ;;  %vm14224_vm0 = vcmask 1042434   ;;  %p9885_p13 = pneg %p9884_p12 }
 0xaa8   : > { %v7487_v11 = vsel %vm14222_vm10, %v7486_v2, %v7482_v26  ;;  %v7555_v49 = vrot.slane %v14449_v37, %v12603_v59  ;;  %v7418_v2 = vsel %vm7170_vm12, %v7417_v61, %v7413_v41  ;;  %v7496_v52 = vrot.slane %v14454_v58, %v12680_v3  ;;  %v14455_v41 = vld [vmem:[#allocation93_spill] sm:$0xff]  ;;  %v14457_v61 = vld [vmem:[#allocation68_spill] sm:$0xff]  ;;  %v14459_v37 = vld [vmem:[#allocation86_spill] sm:$0xff] }
 0xaa9   : > { %v7492_v60 = vsel %vm7163_vm11, %v7491_v17, %v7487_v11  ;;  %v7560_v26 = vrot.slane %v14455_v41, %v12620_v19  ;;  %v7635_v27 = vsel %vm7142_vm8, %v7634_v5, %v7630_v12  ;;  %v7644_v34 = vrot.slane %v14456_v44, %v12623_v36  ;;  %v14461_v5 = vld [vmem:[#allocation53_spill] sm:$0xff]  ;;  %p9892_p3 = pnand %p9891_p2, %p9885_p13 }
 0xaaa   : > { %v7556_v8 = vsel %vm7142_vm8, %v7555_v49, %v7551_v24  ;;  %v7427_v11 = vrot.slane %v14457_v61, %v12689_v53  ;;  %v14458_v24 = vld [vmem:[#allocation122_spill] sm:$0xff]  ;;  %v7703_v39 = vrot.slane %v12853_v33, %v12564_v7  ;;  %v7497_v17 = vsel %vm7170_vm12, %v7496_v52, %v7492_v60  ;;  %v14464_v52 = vld [vmem:[#allocation103_spill] sm:$0xff] }
 0xaab   : > { %5645 = vadd.xlane.f32.xlu1 %v5644_v22  ;;  %v7693_v22 = vrot.slane %v14453_v0, %v12554_v35  ;;  %v7639_v45 = vrot.slane %v14458_v24, %v12620_v19  ;;  %v7506_v49 = vrot.slane %v14459_v37, %v12689_v53  ;;  %v7561_v12 = vsel %vm14223_vm9, %v7560_v26, %v7556_v8  ;;  %v14462_v0 = vld [vmem:[#allocation70_spill] sm:$0xff] }
 0xaac   : > { %v7698_v25 = vrot.slane %v14460_v1, %v12561_v62  ;;  %v5950_v57 = vadd.f32 %v12858_v43, %v14461_v5  ;;  %v7501_v58 = vrot.slane %v14462_v0, %v12611_v20  ;;  %v7423_v60 = vsel %vm7177_vm13, %v7422_v42, %v7418_v2  ;;  %v14466_v42 = vld [vmem:[#allocation57_spill] sm:$0xff]  ;;  %v14469_v0 = vld [vmem:[#allocation126_spill] sm:$0xff] }
 0xaad   : > { %v7694_v14 = vsel %vm7114_vm4, %v7693_v22, %v7689_v15  ;;  %v7566_v15 = vsel %vm14222_vm10, %v7565_v18, %v7561_v12  ;;  %v7640_v33 = vsel %vm14223_vm9, %v7639_v45, %v7635_v27  ;;  %v12987_v22 = vpop.xlane.xlu0 %5636  ;;  %v7570_v8 = vrot.slane %v14464_v52, %v12614_v29  ;;  %v14465_v18 = vld [vmem:[#allocation135_spill] sm:$0xff]  ;;  %v12999_v45 = vpop.f32.mrb[222].mxu1 }
 0xaae   : > { %14463 = vst [vmem:[#allocation37_spill] sm:$0xff] %v12987_v22  ;;  %v7645_v41 = vsel %vm14222_vm10, %v7644_v34, %v7640_v33  ;;  %v7699_v26 = vsel %vm7121_vm5, %v7698_v25, %v7694_v14  ;;  %v7428_v44 = vsel %vm14227_vm14, %v7427_v11, %v7423_v60  ;;  %v7502_v61 = vsel %vm7177_vm13, %v7501_v58, %v7497_v17  ;;  %v6690_v11 = vpop.permute.xlu1 %6689  ;;  %v13007_v12 = vpop.f32.mrb[223].mxu1  ;;  %v14467_v17 = vld [vmem:[#allocation81_spill] sm:$0xff]  ;;  %v14472_v60 = vld [vmem:[#allocation136_spill] sm:$0xff] }
 0xaaf   : > { %v7649_v24 = vrot.slane %v14465_v18, %v12614_v29  ;;  %v7704_v27 = vsel %vm7128_vm6, %v7703_v39, %v7699_v26  ;;  %v7432_v2 = vrot.slane %v14466_v42, %v12672_v56  ;;  %v7507_v37 = vsel %vm14227_vm14, %v7506_v49, %v7502_v61  ;;  %v14468_v39 = vld [vmem:[#allocation105_spill] sm:$0xff]  ;;  %v13016_v49 = vpop.f32.mrb[224].mxu1 }
 0xab0   : > { %v7571_v34 = vsel %vm7163_vm11, %v7570_v8, %v7566_v15  ;;  %v7708_v14 = vrot.slane %v12798_v63, %v12571_v21  ;;  %v7511_v1 = vrot.slane %v14467_v17, %v12672_v56  ;;  %v7575_v25 = vrot.slane %v14468_v39, %v12680_v3  ;;  %v14470_v15 = vld [vmem:[#allocation65_spill] sm:$0xff]  ;;  %v14476_v17 = vld [vmem:[#allocation100_spill] sm:$0xff] }
 0xab1   : > { %v7650_v5 = vsel %vm7163_vm11, %v7649_v24, %v7645_v41  ;;  %v4371_v58 = vadd.f32 %v12808_v9, %v14469_v0  ;;  %v7437_v33 = vrot.slane %v14470_v15, %v12742_v23  ;;  %vm14471_vm15 = vcmask 917312   ;;  %v14474_v41 = vld [vmem:[#allocation115_spill] sm:$0xff]  ;;  %v13028_v24 = vpop.xlane.xlu0 %5630 }
 0xab2   : > { %v7433_v63 = vsel %vm14471_vm15, %v7432_v2, %v7428_v44  ;;  %v7654_v52 = vrot.slane %v14472_v60, %v12680_v3  ;;  %v7709_v8 = vsel %vm7135_vm7, %v7708_v14, %v7704_v27  ;;  %vm14473_vm1 = vmmov %vm14471_vm15  ;;  %v7576_v61 = vsel %vm7170_vm12, %v7575_v25, %v7571_v34  ;;  %14475 = vst [vmem:[#allocation17_spill] sm:$0xff] %v13028_v24  ;;  %v14477_v2 = vld [vmem:[#allocation133_spill] sm:$0xff]  ;;  %v14479_v15 = vld [vmem:[#allocation127_spill] sm:$0xff] }
 0xab3   : > { %v7512_v26 = vsel %vm14473_vm1, %v7511_v1, %v7507_v37  ;;  %v7585_v18 = vrot.slane %v14474_v41, %v12689_v53  ;;  %v7713_v42 = vrot.slane %v12812_v28, %v12603_v59  ;;  %v7580_v44 = vrot.slane %v14476_v17, %v12611_v20  ;;  %v14478_v37 = vld [vmem:[#allocation146_spill] sm:$0xff]  ;;  %v13041_v1 = vpop.f32.mrb[225].mxu1  ;;  %v14485_v24 = vld [vmem:[#allocation112_spill] sm:$0xff] }
 0xab4   : > { %v7659_v39 = vrot.slane %v14477_v2, %v12611_v20  ;;  %v7655_v27 = vsel %vm7170_vm12, %v7654_v52, %v7650_v5  ;;  %v7664_v14 = vrot.slane %v14478_v37, %v12689_v53  ;;  %v7723_v0 = vrot.slane %v6690_v11, %v12623_v36  ;;  %v14480_v41 = vld [vmem:[#allocation54_spill] sm:$0xff] }
 0xab5   : > { %v7714_v25 = vsel %vm7142_vm8, %v7713_v42, %v7709_v8  ;;  %v4739_v28 = vmax.f32 %v4371_v58, 0.0  ;;  %v4363_v60 = vadd.f32 %v12808_v9, %v14479_v15  ;;  %v5948_v17 = vadd.f32 %v12858_v43, %v14480_v41  ;;  %v14481_v5 = vld [vmem:[#allocation82_spill] sm:$0xff]  ;;  %v14482_v8 = vld [vmem:[#allocation55_spill] sm:$0xff]  ;;  %v13068_v22 = vpop.permute.xlu0 %6710 }
 0xab6   : > { %v7516_v52 = vrot.slane %v14481_v5, %v12742_v23  ;;  %v7581_v2 = vsel %vm7177_vm13, %v7580_v44, %v7576_v61  ;;  %v7718_v37 = vrot.slane %v12767_v32, %v12620_v19  ;;  %v7442_v42 = vrot.slane %v14482_v8, %v12759_v51 }
 0xab7   : > { %vm14483_vm15 = vcmask 982912   ;;  %v7586_v58 = vsel %vm14227_vm14, %v7585_v18, %v7581_v2  ;;  %v7660_v15 = vsel %vm7177_vm13, %v7659_v39, %v7655_v27  ;;  %v7590_v5 = vrot.slane %v14485_v24, %v12672_v56  ;;  %v14487_v24 = vld [vmem:[#allocation79_spill] sm:$0xff] }
 0xab8   : > { %v7438_v11 = vsel %vm14483_vm15, %v7437_v33, %v7433_v63  ;;  %vm14484_vm1 = vmmov %vm14483_vm15  ;;  %v7665_v61 = vsel %vm14227_vm14, %v7664_v14, %v7660_v15  ;;  %v7719_v44 = vsel %vm14223_vm9, %v7718_v37, %v7714_v25  ;;  %v5002_v63 = vmul.f32 %v12666_v13, %v4739_v28  ;;  %v14494_v15 = vld [vmem:[#allocation110_spill] sm:$0xff] }
 0xab9   : > { %v7517_v41 = vsel %vm14484_vm1, %v7516_v52, %v7512_v26  ;;  %v7724_v33 = vsel %vm14222_vm10, %v7723_v0, %v7719_v44  ;;  %v4737_v18 = vmax.f32 %v4363_v60, 0.0  ;;  %v8395_v26 = vsel %vm14224_vm0, %v12938_v54, %v12815_v48  ;;  %v14489_v0 = vld [vmem:[#allocation113_spill] sm:$0xff]  ;;  %v14491_v54 = vld [vmem:[#allocation144_spill] sm:$0xff] }
 0xaba   : > { %v13039_v34 = vpop.xlane.xlu1 %5627  ;;  %v7521_v39 = vrot.slane %v14487_v24, %v12759_v51  ;;  %vm14488_vm15 = vcmask 917312   ;;  %v7728_v14 = vrot.slane %v12955_v16, %v12614_v29  ;;  %vm14226_vm1 = vcmask 1043459   ;;  %v14496_v44 = vld [vmem:[#allocation141_spill] sm:$0xff] }
 0xabb   : > { %v7591_v27 = vsel %vm14488_vm15, %v7590_v5, %v7586_v58  ;;  %v7443_v25 = vsel %vm7205_vm2, %v7442_v42, %v7438_v11  ;;  %v7595_v28 = vrot.slane %v14489_v0, %v12742_v23  ;;  %vm14490_vm10 = vmmov %vm14488_vm15  ;;  %vm14225_vm9 = vcmask 1044484  }
 0xabc   : > { %6731 = vperm.xlu1 %9724, %v5950_v57   ;;  %v14486_v57 = vld [vmem:[#allocation143_spill] sm:$0xff]  ;;  %v7522_v48 = vsel %vm7205_vm2, %v7521_v39, %v7517_v41  ;;  %v7674_v52 = vrot.slane %v14491_v54, %v12742_v23  ;;  %v7729_v2 = vsel %vm7163_vm11, %v7728_v14, %v7724_v33  ;;  %vm14492_vm15 = vcmask 982912   ;;  %v13111_v14 = vld [vmem:[%s14210_s2] ss:$0 sm:$0xff] }
 0xabd   : > { %v7669_v8 = vrot.slane %v14486_v57, %v12672_v56  ;;  %v7596_v16 = vsel %vm14492_vm15, %v7595_v28, %v7591_v27  ;;  %v5000_v42 = vmul.f32 %v12666_v13, %v4737_v18  ;;  %vm14493_vm0 = vcmask 261120  }
 0xabe   : > { %v13064_v32 = vpop.xlane.xlu1 %5621  ;;  %v5695_v11 = vsel %vm14493_vm0, %v5002_v63, 0.0  ;;  %v8397_v58 = vsel %vm14226_vm1, %v7443_v25, %v8395_v26  ;;  %v7600_v41 = vrot.slane %v14494_v15, %v12759_v51  ;;  %v7679_v57 = vrot.slane %v14496_v44, %v12759_v51  ;;  %v9404_v26 = vpop.f32.mrb[240].mxu0 }
 0xabf   : > { %v7670_v60 = vsel %vm14490_vm10, %v7669_v8, %v7665_v61  ;;  %vm14495_vm10 = vmmov %vm14492_vm15  ;;  %v8399_v61 = vsel %vm14225_vm9, %v7522_v48, %v8397_v58  ;;  %v6705_v8 = vpop.permute.xlu0 %6704  ;;  %vm14230_vm15 = vcmask 1045509   ;;  %v7738_v63 = vrot.slane %v12913_v6, %v12611_v20  ;;  %v2593_v0 = vpop.f32.mrb[241].mxu0 }
 0xac0   : > { %6725 = vperm.xlu1 %9724, %v5948_v17   ;;  %v7733_v17 = vrot.slane %v12966_v31, %v12680_v3  ;;  %v7675_v5 = vsel %vm14495_vm10, %v7674_v52, %v7670_v60  ;;  %v7601_v31 = vsel %vm7205_vm2, %v7600_v41, %v7596_v16  ;;  %vm14229_vm0 = vcmask 1046534   ;;  %v9405_v54 = vpop.f32.mrb[242].mxu0 }
 0xac1   : > { %v7680_v24 = vsel %vm7205_vm2, %v7679_v57, %v7675_v5  ;;  %vm14497_vm10 = vcmask 261120   ;;  %v2602_v25 = vadd.f32 %v13111_v14, %v9404_v26  ;;  %v7758_v6 = vrot.slane %v13068_v22, %v12759_v51  ;;  %v14503_v26 = vld [vmem:[#allocation85_spill] sm:$0xff] }
 0xac2   : > { %v6708_v37 = vpop.permute.xlu1 %6707  ;;  %v7734_v33 = vsel %vm7170_vm12, %v7733_v17, %v7729_v2  ;;  %v5689_v27 = vsel %vm14497_vm10, %v5000_v42, 0.0  ;;  %v7748_v28 = vrot.slane %v6705_v8, %v12672_v56  ;;  %v2594_v48 = vadd.f32 %v13111_v14, %v2593_v0  ;;  %v2596_v42 = vpop.f32.mrb[243].mxu0 }
 0xac3   : > { %v7739_v60 = vsel %vm7177_vm13, %v7738_v63, %v7734_v33  ;;  %v7753_v52 = vrot.slane %v6708_v37, %v12742_v23  ;;  %v2898_v16 = vmax.f32 %v2602_v25, 0.0  ;;  %v2605_v17 = vadd.f32 %v13111_v14, %v9405_v54 }
 0xac4   : > { %vm14498_vm10 = vcmask 917312   ;;  %v2896_v22 = vmax.f32 %v2594_v48, 0.0  ;;  %v2597_v58 = vadd.f32 %v13111_v14, %v2596_v42  ;;  %vm14228_vm9 = vcmask 1047559  }
 0xac5   : > { %v8401_v15 = vsel %vm14230_vm15, %v7601_v31, %v8399_v61  ;;  %vm14499_vm1 = vcmask 982912   ;;  %v2899_v5 = vmax.f32 %v2605_v17, 0.0  ;;  %v14502_v61 = vld [vmem:[#allocation84_spill] sm:$0xff]  ;;  %vm14695_vm15 = vcmask 1043459  }
 0xac6   : > { %v6702_v18 = vpop.permute.xlu1 %6701  ;;  %5696 = vadd.xlane.f32.xlu0 %v5695_v11  ;;  %v2897_v44 = vmax.f32 %v2597_v58, 0.0  ;;  %v8403_v57 = vsel %vm14229_vm0, %v7680_v24, %v8401_v15  ;;  %v4326_v31 = vadd.f32 %v12808_v9, %v14502_v61  ;;  %v14504_v24 = vld [vmem:[#allocation78_spill] sm:$0xff]  ;;  %vm14694_vm0 = vcmask 1042434  }
 0xac7   : > { %v7743_v39 = vrot.slane %v6702_v18, %v12689_v53  ;;  %v3033_v8 = vpack.c.bf16 %v2899_v5, %v2898_v16  ;;  %v14508_v16 = vld [vmem:[#allocation14_spill] sm:$0xff] }
 0xac8   : > { %v3032_v63 = vpack.c.bf16 %v2897_v44, %v2896_v22  ;;  %v4728_v18 = vmax.f32 %v4326_v31, 0.0  ;;  %v4387_v17 = vadd.f32 %v12808_v9, %v14508_v16 }
 0xac9   : > { %v7744_v2 = vsel %vm14227_vm14, %v7743_v39, %v7739_v60  ;;  %v4318_v39 = vadd.f32 %v12808_v9, %v14503_v26 }
 0xaca   : > { %v7749_v11 = vsel %vm14498_vm10, %v7748_v28, %v7744_v2  ;;  %5690 = vadd.xlane.f32.xlu0 %v5689_v27  ;;  %vm14500_vm10 = vcmask 523264   ;;  %v5963_v27 = vadd.f32 %v12858_v43, %v14504_v24  ;;  %v4991_v25 = vmul.f32 %v12666_v13, %v4728_v18 }
 0xacb   : > { %v7754_v41 = vsel %vm14499_vm1, %v7753_v52, %v7749_v11  ;;  %9666 = vmatprep.mubr.msk.bf16.mxu1 %vm14500_vm10, %v3032_v63  ;;  %vm14501_vm14 = vmmov %vm14500_vm10  ;;  %v4726_v0 = vmax.f32 %v4318_v39, 0.0  ;;  %v13148_v52 = vpop.f32.mrb[226].mxu1  ;;  %v14509_v11 = vld [vmem:[#allocation58_spill] sm:$0xff]  ;;  %v4743_v15 = vmax.f32 %v4387_v17, 0.0 }
 0xacc   : > { %v7759_v37 = vsel %vm7205_vm2, %v7758_v6, %v7754_v41  ;;  %9667 = vmatmul.mubr.msk.bf16.gmra.mrb[240].mxu1 %vm14501_vm14, %v3033_v8  ;;  %v14505_v6 = vld [vmem:[#allocation80_spill] sm:$0xff]  ;;  %vm14506_vm14 = vcmask 261120   ;;  %v13150_v2 = vpop.f32.mrb[227].mxu1  ;;  %v5954_v22 = vadd.f32 %v12858_v43, %v14509_v11  ;;  %v14510_v41 = vld [vmem:[#allocation149_spill] sm:$0xff]  ;;  %v14516_v17 = vld [vmem:[#allocation102_spill] sm:$0xff] }
 0xacd   : > { %v8405_v33 = vsel %vm14228_vm9, %v7759_v37, %v8403_v57  ;;  %v5961_v28 = vadd.f32 %v12858_v43, %v14505_v6  ;;  %v4989_v60 = vmul.f32 %v12666_v13, %v4726_v0  ;;  %v5662_v48 = vsel %vm14506_vm14, %v4991_v25, 0.0  ;;  %vm14507_vm1 = vmmov %vm14506_vm14  ;;  %v14511_v37 = vld [vmem:[#allocation59_spill] sm:$0xff] }
 0xace   : > { %8415 = vst [vmem:[%s13131_s30] sm:$0xff] %v8405_v33  ;;  %v4379_v5 = vadd.f32 %v12808_v9, %v14510_v41  ;;  %v5952_v44 = vadd.f32 %v12858_v43, %v14511_v37  ;;  %v5006_v57 = vmul.f32 %v12666_v13, %v4743_v15  ;;  %vm14512_vm10 = vmmov %vm14507_vm1  ;;  %v4342_v11 = vadd.f32 %v12808_v9, %v14516_v17  ;;  %v14517_v15 = vld [vmem:[#allocation104_spill] sm:$0xff] }
 0xacf   : > { %v5656_v54 = vsel %vm14507_vm1, %v4989_v60, 0.0  ;;  %vm14513_vm14 = vmmov %vm14507_vm1  ;;  %vm14514_vm1 = vcmask 523264   ;;  %v4334_v41 = vadd.f32 %v12808_v9, %v14517_v15 }
 0xad0   : > { %v4741_v8 = vmax.f32 %v4379_v5, 0.0  ;;  %v5707_v63 = vsel %vm14512_vm10, %v5006_v57, 0.0  ;;  %vm14515_vm10 = vmmov %vm14514_vm1  ;;  %v14518_v5 = vld [vmem:[#allocation88_spill] sm:$0xff] }
 0xad1   : > { %v5967_v37 = vadd.f32 %v12858_v43, %v14518_v5  ;;  %v4730_v57 = vmax.f32 %v4334_v41, 0.0 }
 0xad2   : > { %v5004_v33 = vmul.f32 %v12666_v13, %v4741_v8  ;;  %v14519_v8 = vld [vmem:[#allocation89_spill] sm:$0xff] }
 0xad4   : > { %v5701_v31 = vsel %vm14513_vm14, %v5004_v33, 0.0  ;;  %v5965_v33 = vadd.f32 %v12858_v43, %v14519_v8 }
 0xae0   : > { %6770 = vperm.xlu0 %9725, %v5963_v27  }
 0xae4   : > { %5663 = vadd.xlane.f32.xlu1 %v5662_v48  ;;  %6764 = vperm.xlu0 %9725, %v5961_v28  }
 0xae6   : > { %v13154_v42 = vpop.f32.mrb[228].mxu1 }
 0xae7   : > { %v13158_v58 = vpop.f32.mrb[229].mxu1 }
 0xae8   : > { %5657 = vadd.xlane.f32.xlu1 %v5656_v54  ;;  %v9408_v61 = vpop.f32.mrb[244].mxu0 }
 0xae9   : > { %v2618_v18 = vadd.f32 %v13111_v14, %v9408_v61  ;;  %v2609_v26 = vpop.f32.mrb[245].mxu0 }
 0xaea   : > { %v2610_v39 = vadd.f32 %v13111_v14, %v2609_v26  ;;  %v9409_v24 = vpop.f32.mrb[246].mxu0 }
 0xaeb   : > { %v2902_v27 = vmax.f32 %v2618_v18, 0.0  ;;  %v2621_v25 = vadd.f32 %v13111_v14, %v9409_v24  ;;  %v2612_v0 = vpop.f32.mrb[247].mxu0  ;;  %v13186_v18 = vpop.f32.mrb[230].mxu1 }
 0xaec   : > { %v2900_v6 = vmax.f32 %v2610_v39, 0.0  ;;  %v2613_v28 = vadd.f32 %v13111_v14, %v2612_v0  ;;  %v13188_v26 = vpop.f32.mrb[231].mxu1  ;;  %v4403_v39 = vadd.f32 %v12808_v9, %v13016_v49 }
 0xaed   : > { %v2903_v60 = vmax.f32 %v2621_v25, 0.0 }
 0xaee   : > { %v2901_v48 = vmax.f32 %v2613_v28, 0.0  ;;  %v4395_v28 = vadd.f32 %v12808_v9, %v13041_v1 }
 0xaef   : > { %v3035_v54 = vpack.c.bf16 %v2903_v60, %v2902_v27  ;;  %v14521_v27 = vld [vmem:[#allocation61_spill] sm:$0xff]  ;;  %v14522_v60 = vld [vmem:[#allocation62_spill] sm:$0xff] }
 0xaf0   : > { %v3034_v16 = vpack.c.bf16 %v2901_v48, %v2900_v6  ;;  %v5958_v25 = vadd.f32 %v12858_v43, %v14521_v27  ;;  %v4747_v6 = vmax.f32 %v4403_v39, 0.0  ;;  %v5956_v48 = vadd.f32 %v12858_v43, %v14522_v60  ;;  %v14527_v27 = vld [vmem:[#allocation123_spill] sm:$0xff] }
 0xaf2   : > { %9670 = vmatprep.mubr.msk.bf16.mxu1 %vm14514_vm1, %v3034_v16  ;;  %vm14520_vm1 = vmmov %vm14513_vm14  ;;  %v4745_v16 = vmax.f32 %v4395_v28, 0.0  ;;  %v14528_v28 = vld [vmem:[#allocation125_spill] sm:$0xff] }
 0xaf3   : > { %9671 = vmatmul.mubr.msk.bf16.gmra.mrb[244].mxu1 %vm14515_vm10, %v3035_v54  ;;  %v5010_v54 = vmul.f32 %v12666_v13, %v4747_v6  ;;  %vm14523_vm10 = vmmov %vm14520_vm1  ;;  %v4350_v60 = vadd.f32 %v12808_v9, %v14528_v28 }
 0xaf4   : > { %v5008_v49 = vmul.f32 %v12666_v13, %v4745_v16 }
 0xaf5   : > { %v5719_v17 = vsel %vm14523_vm10, %v5010_v54, 0.0 }
 0xaf9   : > { %6743 = vperm.xlu1 %9724, %v5954_v22   ;;  %v4732_v22 = vmax.f32 %v4342_v11, 0.0 }
 0xafd   : > { %6737 = vperm.xlu1 %9724, %v5952_v44   ;;  %v4995_v44 = vmul.f32 %v12666_v13, %v4732_v22 }
 0xaff   : > { %v5674_v61 = vsel %vm14513_vm14, %v4995_v44, 0.0  ;;  %vm14524_vm14 = vmmov %vm14520_vm1 }
 0xb00   : > { %v5713_v22 = vsel %vm14524_vm14, %v5008_v49, 0.0  ;;  %v4734_v49 = vmax.f32 %v4350_v60, 0.0 }
 0xb03   : > { %5708 = vadd.xlane.f32.xlu0 %v5707_v63  ;;  %v4993_v63 = vmul.f32 %v12666_v13, %v4730_v57 }
 0xb07   : > { %5702 = vadd.xlane.f32.xlu0 %v5701_v31  ;;  %v5668_v31 = vsel %vm14520_vm1, %v4993_v63, 0.0  ;;  %vm14525_vm1 = vcmask 523264  }
 0xb08   : > { %vm14526_vm10 = vmmov %vm14525_vm1 }
 0xb1d   : > { %6782 = vperm.xlu0 %9725, %v5967_v37  }
 0xb21   : > { %5675 = vadd.xlane.f32.xlu1 %v5674_v61  ;;  %6776 = vperm.xlu0 %9725, %v5965_v33  }
 0xb22   : > { %v9412_v11 = vpop.f32.mrb[248].mxu0 }
 0xb23   : > { %v13192_v24 = vpop.f32.mrb[232].mxu1  ;;  %v2634_v15 = vadd.f32 %v13111_v14, %v9412_v11  ;;  %v2625_v41 = vpop.f32.mrb[249].mxu0 }
 0xb24   : > { %v13196_v0 = vpop.f32.mrb[233].mxu1  ;;  %v2626_v1 = vadd.f32 %v13111_v14, %v2625_v41  ;;  %v9413_v5 = vpop.f32.mrb[250].mxu0 }
 0xb25   : > { %5669 = vadd.xlane.f32.xlu1 %v5668_v31  ;;  %v2906_v37 = vmax.f32 %v2634_v15, 0.0  ;;  %v2637_v44 = vadd.f32 %v13111_v14, %v9413_v5  ;;  %v2628_v57 = vpop.f32.mrb[251].mxu0 }
 0xb26   : > { %v2904_v8 = vmax.f32 %v2626_v1, 0.0  ;;  %v2629_v33 = vadd.f32 %v13111_v14, %v2628_v57  ;;  %v13224_v1 = vpop.f32.mrb[234].mxu1  ;;  %v14532_v57 = vld [vmem:[#allocation67_spill] sm:$0xff] }
 0xb27   : > { %v2907_v63 = vmax.f32 %v2637_v44, 0.0  ;;  %v13226_v5 = vpop.f32.mrb[235].mxu1 }
 0xb28   : > { %v2905_v61 = vmax.f32 %v2629_v33, 0.0 }
 0xb29   : > { %v3037_v31 = vpack.c.bf16 %v2907_v63, %v2906_v37  ;;  %v4419_v37 = vadd.f32 %v12808_v9, %v13154_v42 }
 0xb2a   : > { %v3036_v39 = vpack.c.bf16 %v2905_v61, %v2904_v8  ;;  %v5962_v8 = vadd.f32 %v12858_v43, %v14532_v57  ;;  %v4411_v61 = vadd.f32 %v12808_v9, %v13158_v58 }
 0xb2b   : > { %v4751_v63 = vmax.f32 %v4419_v37, 0.0 }
 0xb2c   : > { %9674 = vmatprep.mubr.msk.bf16.mxu1 %vm14525_vm1, %v3036_v39  ;;  %vm14531_vm1 = vmmov %vm14524_vm14 }
 0xb2d   : > { %9675 = vmatmul.mubr.msk.bf16.gmra.mrb[248].mxu1 %vm14526_vm10, %v3037_v31  ;;  %v14533_v31 = vld [vmem:[#allocation69_spill] sm:$0xff]  ;;  %vm14534_vm10 = vmmov %vm14531_vm1 }
 0xb2e   : > { %v5960_v39 = vadd.f32 %v12858_v43, %v14533_v31 }
 0xb36   : > { %6755 = vperm.xlu1 %9724, %v5958_v25   ;;  %v4358_v25 = vadd.f32 %v12808_v9, %v14527_v27  ;;  %v5014_v27 = vmul.f32 %v12666_v13, %v4751_v63  ;;  %v14538_v63 = vld [vmem:[#allocation148_spill] sm:$0xff] }
 0xb38   : > { %v4736_v6 = vmax.f32 %v4358_v25, 0.0  ;;  %v4749_v25 = vmax.f32 %v4411_v61, 0.0  ;;  %v4374_v61 = vadd.f32 %v12808_v9, %v14538_v63  ;;  %v13281_v63 = vld [vmem:[%s14213_s5] ss:$0 sm:$0xff] }
 0xb3a   : > { %6749 = vperm.xlu1 %9724, %v5956_v48   ;;  %v14529_v48 = vld [vmem:[#allocation92_spill] sm:$0xff]  ;;  %v4999_v16 = vmul.f32 %v12666_v13, %v4736_v6  ;;  %v5012_v42 = vmul.f32 %v12666_v13, %v4749_v25  ;;  %v5731_v6 = vsel %vm14534_vm10, %v5014_v27, 0.0  ;;  %v4740_v31 = vmax.f32 %v4374_v61, 0.0  ;;  %v14540_v25 = vld [vmem:[#allocation99_spill] sm:$0xff] }
 0xb3b   : > { %v5971_v54 = vadd.f32 %v12858_v43, %v14529_v48 }
 0xb3c   : > { %v5686_v15 = vsel %vm14524_vm14, %v4999_v16, 0.0  ;;  %vm14535_vm14 = vmmov %vm14531_vm1 }
 0xb3d   : > { %v5725_v60 = vsel %vm14535_vm14, %v5012_v42, 0.0  ;;  %v5975_v42 = vadd.f32 %v12858_v43, %v14540_v25 }
 0xb40   : > { %5720 = vadd.xlane.f32.xlu0 %v5719_v17  ;;  %v14530_v17 = vld [vmem:[#allocation94_spill] sm:$0xff] }
 0xb41   : > { %v5969_v11 = vadd.f32 %v12858_v43, %v14530_v17 }
 0xb44   : > { %5714 = vadd.xlane.f32.xlu0 %v5713_v22  ;;  %v4997_v22 = vmul.f32 %v12666_v13, %v4734_v49 }
 0xb46   : > { %v5680_v41 = vsel %vm14531_vm1, %v4997_v22, 0.0  ;;  %vm14536_vm1 = vcmask 523264  }
 0xb47   : > { %vm14537_vm10 = vmmov %vm14536_vm1 }
 0xb5a   : > { %6794 = vperm.xlu0 %9725, %v5971_v54  }
 0xb5e   : > { %5687 = vadd.xlane.f32.xlu1 %v5686_v15  ;;  %6788 = vperm.xlu0 %9725, %v5969_v11  }
 0xb62   : > { %5681 = vadd.xlane.f32.xlu1 %v5680_v41 }
 0xb63   : > { %v13230_v44 = vpop.f32.mrb[236].mxu1 }
 0xb64   : > { %v13234_v33 = vpop.f32.mrb[237].mxu1 }
 0xb73   : > { %6767 = vperm.xlu1 %9724, %v5962_v8  }
 0xb77   : > { %6761 = vperm.xlu1 %9724, %v5960_v39   ;;  %v9416_v28 = vpop.f32.mrb[252].mxu0  ;;  %v14539_v39 = vld [vmem:[#allocation7_spill] sm:$0xff] }
 0xb78   : > { %v2650_v48 = vadd.f32 %v13111_v14, %v9416_v28  ;;  %v2641_v54 = vpop.f32.mrb[253].mxu0  ;;  %v4366_v27 = vadd.f32 %v12808_v9, %v14539_v39  ;;  %v14541_v28 = vld [vmem:[#allocation101_spill] sm:$0xff] }
 0xb79   : > { %v2642_v58 = vadd.f32 %v13111_v14, %v2641_v54  ;;  %v9417_v16 = vpop.f32.mrb[254].mxu0 }
 0xb7a   : > { %v2910_v49 = vmax.f32 %v2650_v48, 0.0  ;;  %v2653_v17 = vadd.f32 %v13111_v14, %v9417_v16  ;;  %v2644_v11 = vpop.f32.mrb[255].mxu0  ;;  %v13262_v16 = vpop.f32.mrb[238].mxu1 }
 0xb7b   : > { %v2908_v22 = vmax.f32 %v2642_v58, 0.0  ;;  %v2645_v15 = vadd.f32 %v13111_v14, %v2644_v11  ;;  %v5003_v14 = vmul.f32 %v12666_v13, %v4740_v31 }
 0xb7c   : > { %v2911_v41 = vmax.f32 %v2653_v17, 0.0  ;;  %v4435_v17 = vadd.f32 %v12808_v9, %v13192_v24 }
 0xb7d   : > { %5732 = vadd.xlane.f32.xlu0 %v5731_v6  ;;  %v2909_v37 = vmax.f32 %v2645_v15, 0.0  ;;  %v4738_v6 = vmax.f32 %v4366_v27, 0.0  ;;  %v5698_v54 = vsel %vm14535_vm14, %v5003_v14, 0.0  ;;  %v4390_v27 = vadd.f32 %v12808_v9, %v12999_v45  ;;  %v14547_v14 = vld [vmem:[#allocation109_spill] sm:$0xff] }
 0xb7e   : > { %v3039_v57 = vpack.c.bf16 %v2911_v41, %v2910_v49  ;;  %v13264_v49 = vpop.f32.mrb[239].mxu1  ;;  %v4755_v41 = vmax.f32 %v4435_v17, 0.0 }
 0xb7f   : > { %v3038_v8 = vpack.c.bf16 %v2909_v37, %v2908_v22  ;;  %v5001_v48 = vmul.f32 %v12666_v13, %v4738_v6  ;;  %v14543_v22 = vld [vmem:[#allocation74_spill] sm:$0xff]  ;;  %v4427_v37 = vadd.f32 %v12808_v9, %v13196_v0  ;;  %v4744_v25 = vmax.f32 %v4390_v27, 0.0 }
 0xb80   : > { %v5966_v15 = vadd.f32 %v12858_v43, %v14543_v22  ;;  %v5018_v24 = vmul.f32 %v13281_v63, %v4755_v41  ;;  %v5979_v6 = vadd.f32 %v12858_v43, %v14547_v14  ;;  %v4406_v14 = vadd.f32 %v12808_v9, %v13148_v52 }
 0xb81   : > { %5726 = vadd.xlane.f32.xlu0 %v5725_v60  ;;  %9678 = vmatprep.mubr.msk.bf16.mxu1 %vm14536_vm1, %v3038_v8  ;;  %v5973_v60 = vadd.f32 %v12858_v43, %v14541_v28  ;;  %vm14542_vm1 = vmmov %vm14535_vm14  ;;  %v4753_v61 = vmax.f32 %v4427_v37, 0.0  ;;  %v5007_v28 = vmul.f32 %v13281_v63, %v4744_v25  ;;  %v14550_v37 = vld [vmem:[#allocation83_spill] sm:$0xff] }
 0xb82   : > { %9679 = vmatmul.mubr.msk.bf16.gmra.mrb[252].mxu1 %vm14537_vm10, %v3039_v57  ;;  %v5692_v58 = vsel %vm14542_vm1, %v5001_v48, 0.0  ;;  %v14544_v57 = vld [vmem:[#allocation76_spill] sm:$0xff]  ;;  %vm14545_vm10 = vmmov %vm14542_vm1  ;;  %v14548_v48 = vld [vmem:[#allocation111_spill] sm:$0xff] }
 0xb83   : > { %v5964_v8 = vadd.f32 %v12858_v43, %v14544_v57  ;;  %v5016_v31 = vmul.f32 %v13281_v63, %v4753_v61  ;;  %v5743_v39 = vsel %vm14545_vm10, %v5018_v24, 0.0  ;;  %vm14546_vm14 = vmmov %vm14542_vm1  ;;  %v5710_v17 = vsel %vm14542_vm1, %v5007_v28, 0.0  ;;  %v14553_v28 = vld [vmem:[#allocation117_spill] sm:$0xff] }
 0xb84   : > { %vm14549_vm10 = vmmov %vm14542_vm1  ;;  %v5970_v57 = vadd.f32 %v12858_v43, %v14550_v37  ;;  %v4443_v61 = vadd.f32 %v12808_v9, %v13234_v33  ;;  %v4748_v33 = vmax.f32 %v4406_v14, 0.0 }
 0xb85   : > { %v5737_v0 = vsel %vm14546_vm14, %v5016_v31, 0.0  ;;  %v14551_v31 = vld [vmem:[#allocation87_spill] sm:$0xff]  ;;  %vm14552_vm14 = vmmov %vm14542_vm1 }
 0xb86   : > { %v4757_v27 = vmax.f32 %v4443_v61, 0.0  ;;  %v14557_v61 = vld [vmem:[#allocation90_spill] sm:$0xff] }
 0xb97   : > { %6806 = vperm.xlu0 %9725, %v5975_v42   ;;  %v4382_v42 = vadd.f32 %v12808_v9, %v13007_v12 }
 0xb9b   : > { %5699 = vadd.xlane.f32.xlu1 %v5698_v54  ;;  %6800 = vperm.xlu0 %9725, %v5973_v60   ;;  %v4742_v60 = vmax.f32 %v4382_v42, 0.0  ;;  %v5977_v54 = vadd.f32 %v12858_v43, %v14548_v48  ;;  %v5011_v48 = vmul.f32 %v13281_v63, %v4748_v33 }
 0xb9f   : > { %5693 = vadd.xlane.f32.xlu1 %v5692_v58  ;;  %v13268_v11 = vpop.f32.mrb[240].mxu1  ;;  %v5005_v58 = vmul.f32 %v13281_v63, %v4742_v60  ;;  %v5983_v60 = vadd.f32 %v12858_v43, %v14553_v28  ;;  %v4422_v28 = vadd.f32 %v12808_v9, %v13186_v18 }
 0xba0   : > { %v13272_v13 = vpop.f32.mrb[241].mxu1 }
 0xba1   : > { %v5704_v45 = vsel %vm14549_vm10, %v5005_v58, 0.0  ;;  %v13299_v12 = vpop.f32.mrb[242].mxu1  ;;  %v14554_v58 = vld [vmem:[#allocation118_spill] sm:$0xff]  ;;  %vm14555_vm10 = vmmov %vm14542_vm1 }
 0xba2   : > { %v13301_v22 = vpop.f32.mrb[243].mxu1 }
 0xbb0   : > { %6779 = vperm.xlu1 %9724, %v5966_v15   ;;  %v4451_v15 = vadd.f32 %v12808_v9, %v13230_v44  ;;  %v5020_v44 = vmul.f32 %v13281_v63, %v4757_v27  ;;  %v4459_v27 = vadd.f32 %v12808_v9, %v13272_v13  ;;  %v4752_v13 = vmax.f32 %v4422_v28, 0.0 }
 0xbb2   : > { %v4759_v24 = vmax.f32 %v4451_v15, 0.0  ;;  %v5749_v42 = vsel %vm14542_vm1, %v5020_v44, 0.0  ;;  %v5722_v15 = vsel %vm14555_vm10, %v5011_v48, 0.0  ;;  %v14558_v44 = vld [vmem:[#allocation91_spill] sm:$0xff]  ;;  %v4761_v14 = vmax.f32 %v4459_v27, 0.0  ;;  %vm14559_vm10 = vmmov %vm14542_vm1  ;;  %v14560_v48 = vld [vmem:[#allocation121_spill] sm:$0xff] }
 0xbb3   : > { %v14563_v27 = vld [vmem:[#allocation97_spill] sm:$0xff] }
 0xbb4   : > { %6773 = vperm.xlu1 %9724, %v5964_v8  }
 0xbba   : > { %5744 = vadd.xlane.f32.xlu0 %v5743_v39  ;;  %v5968_v39 = vadd.f32 %v12858_v43, %v14551_v31  ;;  %v5974_v31 = vadd.f32 %v12858_v43, %v14557_v61 }
 0xbbe   : > { %5738 = vadd.xlane.f32.xlu0 %v5737_v0  ;;  %v5022_v0 = vmul.f32 %v13281_v63, %v4759_v24 }
 0xbc0   : > { %v5755_v25 = vsel %vm14552_vm14, %v5022_v0, 0.0  ;;  %vm14556_vm14 = vmmov %vm14542_vm1 }
 0xbc6   : > { %v13305_v41 = vpop.f32.mrb[244].mxu1 }
 0xbc7   : > { %v13309_v8 = vpop.f32.mrb[245].mxu1 }
 0xbd4   : > { %6818 = vperm.xlu0 %9725, %v5979_v6   ;;  %v4398_v6 = vadd.f32 %v12808_v9, %v13150_v2  ;;  %v13331_v2 = vpop.f32.mrb[246].mxu1 }
 0xbd5   : > { %v13333_v37 = vpop.f32.mrb[247].mxu1 }
 0xbd8   : > { %5711 = vadd.xlane.f32.xlu1 %v5710_v17  ;;  %6812 = vperm.xlu0 %9725, %v5977_v54   ;;  %v4746_v54 = vmax.f32 %v4398_v6, 0.0  ;;  %v5981_v17 = vadd.f32 %v12858_v43, %v14554_v58  ;;  %v5015_v58 = vmul.f32 %v13281_v63, %v4752_v13 }
 0xbdc   : > { %5705 = vadd.xlane.f32.xlu1 %v5704_v45  ;;  %v5009_v45 = vmul.f32 %v13281_v63, %v4746_v54  ;;  %v5987_v54 = vadd.f32 %v12858_v43, %v14560_v48  ;;  %v13383_v48 = vpop.xlane.xlu0 %5648 }
 0xbde   : > { %v5716_v52 = vsel %vm14556_vm14, %v5009_v45, 0.0  ;;  %v14561_v45 = vld [vmem:[#allocation124_spill] sm:$0xff]  ;;  %vm14562_vm14 = vmmov %vm14542_vm1 }
 0xbed   : > { %6791 = vperm.xlu1 %9724, %v5970_v57   ;;  %v4467_v57 = vadd.f32 %v12808_v9, %v13268_v11  ;;  %v5024_v11 = vmul.f32 %v13281_v63, %v4761_v14  ;;  %v4475_v14 = vadd.f32 %v12808_v9, %v13309_v8 }
 0xbef   : > { %v4763_v0 = vmax.f32 %v4467_v57, 0.0  ;;  %v5761_v6 = vsel %vm14559_vm10, %v5024_v11, 0.0  ;;  %v5734_v57 = vsel %vm14562_vm14, %v5015_v58, 0.0  ;;  %v14564_v11 = vld [vmem:[#allocation98_spill] sm:$0xff]  ;;  %v4765_v28 = vmax.f32 %v4475_v14, 0.0  ;;  %vm14565_vm10 = vmmov %vm14542_vm1 }
 0xbf0   : > { %vm14566_vm14 = vmmov %vm14542_vm1 }
 0xbf1   : > { %6785 = vperm.xlu1 %9724, %v5968_v39  }
 0xbf7   : > { %5756 = vadd.xlane.f32.xlu0 %v5755_v25  ;;  %v5972_v25 = vadd.f32 %v12858_v43, %v14558_v44  ;;  %v5978_v44 = vadd.f32 %v12858_v43, %v14563_v27 }
 0xbfb   : > { %5750 = vadd.xlane.f32.xlu0 %v5749_v42  ;;  %v5026_v42 = vmul.f32 %v13281_v63, %v4763_v0 }
 0xbfd   : > { %v5767_v33 = vsel %vm14542_vm1, %v5026_v42, 0.0 }
 0xc00   : > { %v13337_v24 = vpop.f32.mrb[248].mxu1 }
 0xc01   : > { %v13341_v39 = vpop.f32.mrb[249].mxu1 }
 0xc11   : > { %6830 = vperm.xlu0 %9725, %v5983_v60   ;;  %v4414_v60 = vadd.f32 %v12808_v9, %v13188_v26  ;;  %v13363_v26 = vpop.f32.mrb[250].mxu1 }
 0xc12   : > { %v13365_v61 = vpop.f32.mrb[251].mxu1 }
 0xc15   : > { %5723 = vadd.xlane.f32.xlu1 %v5722_v15  ;;  %6824 = vperm.xlu0 %9725, %v5981_v17   ;;  %v4750_v17 = vmax.f32 %v4414_v60, 0.0  ;;  %v5985_v15 = vadd.f32 %v12858_v43, %v14561_v45  ;;  %v14567_v45 = vld [vmem:[#allocation132_spill] sm:$0xff] }
 0xc19   : > { %5717 = vadd.xlane.f32.xlu1 %v5716_v52  ;;  %v5013_v52 = vmul.f32 %v13281_v63, %v4750_v17 }
 0xc1b   : > { %v5728_v18 = vsel %vm14542_vm1, %v5013_v52, 0.0 }
 0xc2a   : > { %6803 = vperm.xlu1 %9724, %v5974_v31   ;;  %v4483_v31 = vadd.f32 %v12808_v9, %v13305_v41  ;;  %v5028_v41 = vmul.f32 %v13281_v63, %v4765_v28  ;;  %v13388_v9 = vld [vmem:[%s14212_s4] ss:$0 sm:$0xff] }
 0xc2b   : > { %v4438_v8 = vadd.f32 %v13388_v9, %v13224_v1  ;;  %v4430_v17 = vadd.f32 %v13388_v9, %v13226_v5  ;;  %v4499_v28 = vadd.f32 %v13388_v9, %v13337_v24 }
 0xc2c   : > { %v4767_v42 = vmax.f32 %v4483_v31, 0.0  ;;  %v5773_v60 = vsel %vm14566_vm14, %v5028_v41, 0.0  ;;  %v14569_v31 = vld [vmem:[#allocation134_spill] sm:$0xff]  ;;  %vm14578_vm14 = vmmov %vm14542_vm1 }
 0xc2d   : > { %v4756_v58 = vmax.f32 %v4438_v8, 0.0  ;;  %v5989_v27 = vadd.f32 %v12858_v43, %v14569_v31 }
 0xc2e   : > { %6797 = vperm.xlu1 %9724, %v5972_v25  }
 0xc34   : > { %5768 = vadd.xlane.f32.xlu0 %v5767_v33  ;;  %v5976_v33 = vadd.f32 %v12858_v43, %v14564_v11  ;;  %v13410_v11 = vpop.xlane.xlu1 %5639 }
 0xc38   : > { %5762 = vadd.xlane.f32.xlu0 %v5761_v6  ;;  %v5030_v6 = vmul.f32 %v13281_v63, %v4767_v42 }
 0xc3a   : > { %v5779_v13 = vsel %vm14565_vm10, %v5030_v6, 0.0  ;;  %vm14571_vm10 = vmmov %vm14542_vm1  ;;  %v13414_v6 = vpop.xlane.xlu1 %5633 }
 0xc3e   : > { %v13422_v8 = vpop.permute.xlu1 %6719 }
 0xc3f   : > { %14574 = vst [vmem:[#allocation22_spill] sm:$0xff] %v13422_v8 }
 0xc4e   : > { %6842 = vperm.xlu0 %9725, %v5987_v54   ;;  %v13392_v54 = vpop.xlane.xlu0 %5642 }
 0xc52   : > { %5735 = vadd.xlane.f32.xlu1 %v5734_v57  ;;  %6836 = vperm.xlu0 %9725, %v5985_v15   ;;  %v5991_v15 = vadd.f32 %v12858_v43, %v14567_v45  ;;  %v13398_v52 = vpop.permute.xlu0 %6722  ;;  %v5019_v57 = vmul.f32 %v13281_v63, %v4756_v58  ;;  %v4771_v58 = vmax.f32 %v4499_v28, 0.0  ;;  %v13426_v45 = vld [vmem:[#allocation2] ss:$0 sm:$0xff] }
 0xc53   : > { %14568 = vst [vmem:[#allocation6_spill] sm:$0xff] %v13398_v52 }
 0xc54   : > { %v5034_v24 = vmul.f32 %v13281_v63, %v4771_v58 }
 0xc55   : > { %v13369_v0 = vpop.f32.mrb[252].mxu1 }
 0xc56   : > { %5729 = vadd.xlane.f32.xlu1 %v5728_v18  ;;  %v13373_v25 = vpop.f32.mrb[253].mxu1  ;;  %v4754_v18 = vmax.f32 %v4430_v17, 0.0  ;;  %v13405_v42 = vpop.permute.xlu0 %6716  ;;  %v4491_v17 = vadd.f32 %v13388_v9, %v13341_v39  ;;  %v5791_v39 = vsel %vm14578_vm14, %v5034_v24, 0.0  ;;  %vm14588_vm14 = vmmov %vm14542_vm1 }
 0xc57   : > { %14570 = vst [vmem:[#allocation28_spill] sm:$0xff] %v13405_v42 }
 0xc58   : > { %v5017_v1 = vmul.f32 %v13281_v63, %v4754_v18  ;;  %v4769_v31 = vmax.f32 %v4491_v17, 0.0 }
 0xc5a   : > { %v5740_v5 = vsel %vm14571_vm10, %v5017_v1, 0.0  ;;  %v13408_v14 = vpop.xlane.xlu0 %5660  ;;  %v5032_v1 = vmul.f32 %v13281_v63, %v4769_v31  ;;  %vm14585_vm10 = vmmov %vm14542_vm1 }
 0xc67   : > { %6815 = vperm.xlu1 %9724, %v5978_v44   ;;  %v5746_v44 = vsel %vm14542_vm1, %v5019_v57, 0.0 }
 0xc6b   : > { %6809 = vperm.xlu1 %9724, %v5976_v33   ;;  %v13412_v33 = vpop.xlane.xlu0 %5654 }
 0xc6f   : > { %v13418_v41 = vpop.permute.xlu0 %6734 }
 0xc70   : > { %14572 = vst [vmem:[#allocation8_spill] sm:$0xff] %v13418_v41 }
 0xc71   : > { %5780 = vadd.xlane.f32.xlu0 %v5779_v13  ;;  %v14573_v13 = vld [vmem:[#allocation106_spill] sm:$0xff] }
 0xc73   : > { %v13430_v18 = vpop.permute.xlu0 %6728 }
 0xc74   : > { %14576 = vst [vmem:[#allocation35_spill] sm:$0xff] %v13430_v18 }
 0xc75   : > { %5774 = vadd.xlane.f32.xlu0 %v5773_v60  ;;  %v5982_v60 = vadd.f32 %v12858_v43, %v14573_v13 }
 0xc77   : > { %v13435_v43 = vpop.xlane.xlu0 %5672 }
 0xc7b   : > { %v13442_v28 = vpop.xlane.xlu0 %5666 }
 0xc8b   : > { %6854 = vperm.xlu0 %9725, %v5991_v15   ;;  %v14575_v15 = vld [vmem:[#allocation108_spill] sm:$0xff] }
 0xc8c   : > { %v5980_v57 = vadd.f32 %v13426_v45, %v14575_v15 }
 0xc8f   : > { %5747 = vadd.xlane.f32.xlu1 %v5746_v44  ;;  %6848 = vperm.xlu0 %9725, %v5989_v27   ;;  %v13433_v27 = vpop.permute.xlu1 %6713 }
 0xc90   : > { %14577 = vst [vmem:[#allocation11_spill] sm:$0xff] %v13433_v27 }
 0xc93   : > { %5741 = vadd.xlane.f32.xlu1 %v5740_v5  ;;  %v13439_v44 = vpop.xlane.xlu1 %5651  ;;  %v5785_v5 = vsel %vm14542_vm1, %v5032_v1, 0.0 }
 0xc97   : > { %v13444_v13 = vpop.xlane.xlu1 %5645 }
 0xc9b   : > { %v13448_v58 = vpop.permute.xlu1 %6731 }
 0xc9c   : > { %14580 = vst [vmem:[#allocation41_spill] sm:$0xff] %v13448_v58 }
 0xc9f   : > { %v13452_v15 = vpop.permute.xlu1 %6725 }
 0xca0   : > { %14582 = vst [vmem:[#allocation27_spill] sm:$0xff] %v13452_v15 }
 0xca3   : > { %v13458_v31 = vpop.xlane.xlu1 %5663 }
 0xca4   : > { %6827 = vperm.xlu1 %9724, %v5982_v60   ;;  %v13446_v60 = vpop.permute.xlu0 %6746 }
 0xca5   : > { %14579 = vst [vmem:[#allocation15_spill] sm:$0xff] %v13446_v60 }
 0xca7   : > { %v13467_v18 = vpop.xlane.xlu1 %5657 }
 0xca8   : > { %6821 = vperm.xlu1 %9724, %v5980_v57   ;;  %v13450_v17 = vpop.permute.xlu0 %6740  ;;  %v4454_v57 = vadd.f32 %v13388_v9, %v13262_v16  ;;  %v14584_v16 = vld [vmem:[#allocation142_spill] sm:$0xff] }
 0xca9   : > { %14581 = vst [vmem:[#allocation26_spill] sm:$0xff] %v13450_v17  ;;  %v5993_v52 = vadd.f32 %v13426_v45, %v14584_v16 }
 0xcaa   : > { %v4760_v1 = vmax.f32 %v4454_v57, 0.0 }
 0xcac   : > { %v13456_v24 = vpop.xlane.xlu0 %5684  ;;  %v5023_v17 = vmul.f32 %v13281_v63, %v4760_v1 }
 0xcae   : > { %5792 = vadd.xlane.f32.xlu0 %v5791_v39  ;;  %v4446_v39 = vadd.f32 %v13388_v9, %v13264_v49  ;;  %v5758_v57 = vsel %vm14585_vm10, %v5023_v17, 0.0  ;;  %v13475_v49 = vpop.permute.xlu1 %6743  ;;  %v4515_v17 = vadd.f32 %v13388_v9, %v13369_v0  ;;  %vm14600_vm10 = vmmov %vm14542_vm1 }
 0xcaf   : > { %14587 = vst [vmem:[#allocation33_spill] sm:$0xff] %v13475_v49  ;;  %v14595_v49 = vld [vmem:[#allocation116_spill] sm:$0xff] }
 0xcb0   : > { %v13464_v41 = vpop.xlane.xlu0 %5678  ;;  %v4758_v58 = vmax.f32 %v4446_v39, 0.0 }
 0xcb2   : > { %5786 = vadd.xlane.f32.xlu0 %v5785_v5  ;;  %v14583_v5 = vld [vmem:[#allocation140_spill] sm:$0xff]  ;;  %v5021_v15 = vmul.f32 %v13281_v63, %v4758_v58  ;;  %v13480_v39 = vpop.permute.xlu1 %6737 }
 0xcb3   : > { %v5995_v60 = vadd.f32 %v13426_v45, %v14583_v5  ;;  %14590 = vst [vmem:[#allocation32_spill] sm:$0xff] %v13480_v39  ;;  %v5984_v39 = vadd.f32 %v13426_v45, %v14595_v49 }
 0xcb4   : > { %v13473_v8 = vpop.permute.xlu0 %6758  ;;  %v5752_v5 = vsel %vm14588_vm14, %v5021_v15, 0.0  ;;  %v4775_v15 = vmax.f32 %v4515_v17, 0.0  ;;  %vm14608_vm14 = vmmov %vm14542_vm1 }
 0xcb5   : > { %14586 = vst [vmem:[#allocation20_spill] sm:$0xff] %v13473_v8 }
 0xcb6   : > { %v13484_v16 = vpop.xlane.xlu1 %5675  ;;  %v5038_v27 = vmul.f32 %v13281_v63, %v4775_v15 }
 0xcb8   : > { %v13478_v1 = vpop.permute.xlu0 %6752  ;;  %v5803_v17 = vsel %vm14542_vm1, %v5038_v27, 0.0  ;;  %v4470_v27 = vadd.f32 %v13388_v9, %v13299_v12  ;;  %v14607_v12 = vld [vmem:[#allocation10_spill] sm:$0xff] }
 0xcb9   : > { %14589 = vst [vmem:[#allocation21_spill] sm:$0xff] %v13478_v1 }
 0xcc8   : > { %6866 = vperm.xlu0 %9725, %v5995_v60   ;;  %v13482_v60 = vpop.xlane.xlu0 %5696 }
 0xcc9   : > { %14591 = vst [vmem:[#allocation25_spill] sm:$0xff] %v13482_v60 }
 0xccc   : > { %5759 = vadd.xlane.f32.xlu1 %v5758_v57  ;;  %6860 = vperm.xlu0 %9725, %v5993_v52   ;;  %v13486_v58 = vpop.xlane.xlu0 %5690  ;;  %v13490_v57 = vpop.xlane.xlu1 %5669  ;;  %v14593_v52 = vld [vmem:[#allocation114_spill] sm:$0xff] }
 0xccd   : > { %14592 = vst [vmem:[#allocation39_spill] sm:$0xff] %v13486_v58  ;;  %v5986_v8 = vadd.f32 %v13426_v45, %v14593_v52 }
 0xcd0   : > { %5753 = vadd.xlane.f32.xlu1 %v5752_v5  ;;  %v4507_v5 = vadd.f32 %v13388_v9, %v13373_v25  ;;  %v13496_v1 = vpop.permute.xlu0 %6770  ;;  %v13500_v42 = vpop.permute.xlu1 %6755 }
 0xcd1   : > { %14594 = vst [vmem:[#allocation45_spill] sm:$0xff] %v13496_v1  ;;  %14596 = vst [vmem:[#allocation18_spill] sm:$0xff] %v13500_v42  ;;  %v14606_v1 = vld [vmem:[#allocation13_spill] sm:$0xff] }
 0xcd2   : > { %v4773_v0 = vmax.f32 %v4507_v5, 0.0 }
 0xcd4   : > { %v13503_v58 = vpop.permute.xlu0 %6764  ;;  %v5036_v52 = vmul.f32 %v13281_v63, %v4773_v0  ;;  %v13507_v60 = vpop.permute.xlu1 %6749 }
 0xcd5   : > { %14597 = vst [vmem:[#allocation30_spill] sm:$0xff] %v13503_v58  ;;  %14598 = vst [vmem:[#allocation31_spill] sm:$0xff] %v13507_v60  ;;  %v4764_v60 = vmax.f32 %v4470_v27, 0.0  ;;  %v5999_v58 = vadd.f32 %v13426_v45, %v14606_v1  ;;  %v6003_v1 = vadd.f32 %v13426_v45, %v12739_v4  ;;  %v6005_v4 = vadd.f32 %v13426_v45, %v12921_v46 }
 0xcd8   : > { %v13509_v25 = vpop.xlane.xlu0 %5708  ;;  %v13512_v49 = vpop.xlane.xlu1 %5687 }
 0xcd9   : > { %14599 = vst [vmem:[#allocation44_spill] sm:$0xff] %v13509_v25 }
 0xcdc   : > { %v13514_v42 = vpop.xlane.xlu0 %5702  ;;  %v13516_v15 = vpop.xlane.xlu1 %5681 }
 0xcdd   : > { %14601 = vst [vmem:[#allocation23_spill] sm:$0xff] %v13514_v42 }
 0xce0   : > { %v13520_v5 = vpop.permute.xlu1 %6767 }
 0xce1   : > { %6839 = vperm.xlu1 %9724, %v5986_v8   ;;  %v5797_v8 = vsel %vm14600_vm10, %v5036_v52, 0.0  ;;  %14603 = vst [vmem:[#allocation36_spill] sm:$0xff] %v13520_v5  ;;  %v4462_v52 = vadd.f32 %v13388_v9, %v13301_v22  ;;  %vm14624_vm10 = vmmov %vm14542_vm1 }
 0xce3   : > { %v4762_v5 = vmax.f32 %v4462_v52, 0.0  ;;  %v6001_v52 = vadd.f32 %v13426_v45, %v12772_v40  ;;  %v6011_v40 = vadd.f32 %v13426_v45, %v13039_v34 }
 0xce5   : > { %6833 = vperm.xlu1 %9724, %v5984_v39   ;;  %v13518_v39 = vpop.permute.xlu0 %6782  ;;  %v5025_v27 = vmul.f32 %v13281_v63, %v4762_v5 }
 0xce6   : > { %14602 = vst [vmem:[#allocation9_spill] sm:$0xff] %v13518_v39  ;;  %v5027_v39 = vmul.f32 %v13281_v63, %v4764_v60 }
 0xce7   : > { %v5764_v60 = vsel %vm14542_vm1, %v5025_v27, 0.0 }
 0xce8   : > { %v5770_v22 = vsel %vm14608_vm14, %v5027_v39, 0.0  ;;  %v6007_v39 = vadd.f32 %v13426_v45, %v12882_v38  ;;  %vm14625_vm14 = vmmov %vm14542_vm1 }
 0xce9   : > { %v13524_v0 = vpop.permute.xlu0 %6776 }
 0xcea   : > { %14604 = vst [vmem:[#allocation51_spill] sm:$0xff] %v13524_v0  ;;  %v5997_v0 = vadd.f32 %v13426_v45, %v14607_v12 }
 0xceb   : > { %5804 = vadd.xlane.f32.xlu0 %v5803_v17  ;;  %v13526_v17 = vpop.permute.xlu1 %6761 }
 0xcec   : > { %14605 = vst [vmem:[#allocation42_spill] sm:$0xff] %v13526_v17 }
 0xcef   : > { %5798 = vadd.xlane.f32.xlu0 %v5797_v8  ;;  %v13530_v8 = vpop.xlane.xlu0 %5720  ;;  %v13534_v42 = vpop.xlane.xlu1 %5699 }
 0xcf3   : > { %v13539_v25 = vpop.xlane.xlu0 %5714  ;;  %v13543_v17 = vpop.xlane.xlu1 %5693 }
 0xcf7   : > { %v13552_v12 = vpop.permute.xlu1 %6779 }
 0xcf8   : > { %14610 = vst [vmem:[#allocation34_spill] sm:$0xff] %v13552_v12 }
 0xd05   : > { %6878 = vperm.xlu0 %9725, %v5999_v58   ;;  %v13548_v58 = vpop.permute.xlu0 %6794 }
 0xd06   : > { %14609 = vst [vmem:[#allocation43_spill] sm:$0xff] %v13548_v58 }
 0xd09   : > { %5771 = vadd.xlane.f32.xlu1 %v5770_v22  ;;  %6872 = vperm.xlu0 %9725, %v5997_v0   ;;  %v13556_v5 = vpop.permute.xlu0 %6788  ;;  %v13558_v0 = vpop.permute.xlu1 %6773 }
 0xd0a   : > { %14611 = vst [vmem:[#allocation40_spill] sm:$0xff] %v13556_v5  ;;  %14612 = vst [vmem:[#allocation49_spill] sm:$0xff] %v13558_v0 }
 0xd0d   : > { %5765 = vadd.xlane.f32.xlu1 %v5764_v60  ;;  %6890 = vperm.xlu0 %9725, %v6003_v1   ;;  %v13562_v27 = vpop.xlane.xlu0 %5732  ;;  %v13564_v22 = vpop.xlane.xlu1 %5711  ;;  %v14613_v1 = vld [vmem:[#allocation119_spill] sm:$0xff] }
 0xd0e   : > { %v5990_v60 = vadd.f32 %v13426_v45, %v14613_v1 }
 0xd11   : > { %6884 = vperm.xlu0 %9725, %v6001_v52   ;;  %v13570_v38 = vpop.xlane.xlu0 %5726  ;;  %v6009_v52 = vadd.f32 %v13426_v45, %v13064_v32  ;;  %v5706_v58 = vpop.xlane.xlu1 %5705 }
 0xd12   : > { %14614 = vst [vmem:[#allocation48_spill] sm:$0xff] %v13570_v38 }
 0xd15   : > { %6902 = vperm.xlu0 %9725, %v6007_v39   ;;  %v14615_v39 = vld [vmem:[#allocation120_spill] sm:$0xff]  ;;  %v13578_v34 = vpop.permute.xlu0 %6806  ;;  %v13580_v1 = vpop.permute.xlu1 %6791 }
 0xd16   : > { %v5988_v46 = vadd.f32 %v13426_v45, %v14615_v39  ;;  %14616 = vst [vmem:[#allocation71_spill] sm:$0xff] %v13578_v34  ;;  %14617 = vst [vmem:[#allocation46_spill] sm:$0xff] %v13580_v1 }
 0xd19   : > { %6896 = vperm.xlu0 %9725, %v6005_v4   ;;  %v6015_v4 = vadd.f32 %v13426_v45, %v13410_v11  ;;  %v13588_v39 = vpop.permute.xlu0 %6800 }
 0xd1a   : > { %14618 = vst [vmem:[#allocation47_spill] sm:$0xff] %v13588_v39 }
 0xd1d   : > { %6914 = vperm.xlu0 %9725, %v6011_v40   ;;  %v6013_v40 = vadd.f32 %v13426_v45, %v13414_v6  ;;  %v13594_v11 = vpop.xlane.xlu0 %5744  ;;  %v6023_v6 = vadd.f32 %v13426_v45, %v13458_v31  ;;  %v4478_v31 = vadd.f32 %v13388_v9, %v13333_v37 }
 0xd1e   : > { %6851 = vperm.xlu1 %9724, %v5990_v60   ;;  %v13584_v60 = vpop.f32.mrb[254].mxu1  ;;  %14620 = vst [vmem:[#allocation66_spill] sm:$0xff] %v13594_v11 }
 0xd1f   : > { %v13586_v32 = vpop.f32.mrb[255].mxu1 }
 0xd21   : > { %6908 = vperm.xlu0 %9725, %v6009_v52   ;;  %v6019_v52 = vadd.f32 %v13426_v45, %v13439_v44  ;;  %v6021_v44 = vadd.f32 %v13426_v45, %v13467_v18 }
 0xd22   : > { %6845 = vperm.xlu1 %9724, %v5988_v46   ;;  %v13592_v46 = vpop.permute.xlu1 %6785 }
 0xd23   : > { %14619 = vst [vmem:[#allocation56_spill] sm:$0xff] %v13592_v46 }
 0xd25   : > { %6926 = vperm.xlu0 %9725, %v6015_v4   ;;  %v6017_v4 = vadd.f32 %v13426_v45, %v13444_v13  ;;  %v6027_v13 = vadd.f32 %v13426_v45, %v13484_v16  ;;  %v6031_v16 = vadd.f32 %v13426_v45, %v13512_v49 }
 0xd26   : > { %v5724_v34 = vpop.xlane.xlu1 %5723 }
 0xd29   : > { %6920 = vperm.xlu0 %9725, %v6013_v40   ;;  %v13600_v40 = vpop.xlane.xlu0 %5738 }
 0xd2a   : > { %14621 = vst [vmem:[#allocation63_spill] sm:$0xff] %v13600_v40  ;;  %v5718_v39 = vpop.xlane.xlu1 %5717 }
 0xd2d   : > { %6938 = vperm.xlu0 %9725, %v6019_v52   ;;  %v4486_v52 = vadd.f32 %v13388_v9, %v13331_v2  ;;  %v13606_v1 = vpop.permute.xlu0 %6818 }
 0xd2f   : > { %v4768_v5 = vmax.f32 %v4486_v52, 0.0 }
 0xd31   : > { %6932 = vperm.xlu0 %9725, %v6017_v4   ;;  %v13610_v4 = vpop.permute.xlu1 %6803  ;;  %v13616_v18 = vpop.permute.xlu0 %6812  ;;  %v5031_v2 = vmul.f32 %v13281_v63, %v4768_v5 }
 0xd32   : > { %14622 = vst [vmem:[#allocation72_spill] sm:$0xff] %v13610_v4 }
 0xd33   : > { %v5782_v37 = vsel %vm14624_vm10, %v5031_v2, 0.0  ;;  %vm14628_vm10 = vmmov %vm14542_vm1 }
 0xd35   : > { %6950 = vperm.xlu0 %9725, %v6023_v6   ;;  %v6025_v6 = vadd.f32 %v13426_v45, %v13490_v57  ;;  %v13619_v46 = vpop.permute.xlu1 %6797  ;;  %v5757_v4 = vpop.xlane.xlu0 %5756  ;;  %v6029_v57 = vadd.f32 %v13426_v45, %v13516_v15  ;;  %v6039_v15 = vadd.f32 %v13426_v45, %v13564_v22  ;;  %v6041_v22 = vadd.f32 %v13426_v45, %v5718_v39 }
 0xd36   : > { %14623 = vst [vmem:[#allocation77_spill] sm:$0xff] %v13619_v46  ;;  %v14627_v46 = vld [vmem:[#allocation131_spill] sm:$0xff] }
 0xd37   : > { %v5992_v12 = vadd.f32 %v13426_v45, %v14627_v46 }
 0xd39   : > { %6944 = vperm.xlu0 %9725, %v6021_v44   ;;  %v4766_v44 = vmax.f32 %v4478_v31, 0.0  ;;  %v5751_v31 = vpop.xlane.xlu0 %5750 }
 0xd3b   : > { %v5029_v52 = vmul.f32 %v13281_v63, %v4766_v44  ;;  %v6033_v44 = vadd.f32 %v13426_v45, %v13543_v17  ;;  %v6043_v17 = vadd.f32 %v13426_v45, %v5724_v34 }
 0xd3d   : > { %6962 = vperm.xlu0 %9725, %v6027_v13   ;;  %v5736_v13 = vpop.xlane.xlu1 %5735  ;;  %v5776_v5 = vsel %vm14625_vm14, %v5029_v52, 0.0  ;;  %vm14631_vm14 = vcmask 523712  }
 0xd3e   : > { %v6047_v0 = vadd.f32 %v13426_v45, %v5736_v13  ;;  %v6054_v13 = vadd.f32 %v13426_v45, %v5757_v4 }
 0xd41   : > { %6956 = vperm.xlu0 %9725, %v6025_v6   ;;  %v6035_v6 = vadd.f32 %v13426_v45, %v13534_v42  ;;  %v5730_v49 = vpop.xlane.xlu1 %5729  ;;  %v14626_v42 = vld [vmem:[#allocation130_spill] sm:$0xff] }
 0xd45   : > { %6974 = vperm.xlu0 %9725, %v6031_v16   ;;  %v13632_v16 = vpop.permute.xlu0 %6830  ;;  %v13634_v2 = vpop.permute.xlu1 %6815 }
 0xd46   : > { %5783 = vadd.xlane.f32.xlu1 %v5782_v37  ;;  %v6037_v37 = vadd.f32 %v13426_v45, %v5706_v58 }
 0xd49   : > { %6968 = vperm.xlu0 %9725, %v6029_v57   ;;  %v13638_v52 = vpop.permute.xlu0 %6824  ;;  %v6810_v57 = vpop.permute.xlu1 %6809 }
 0xd4a   : > { %5777 = vadd.xlane.f32.xlu1 %v5776_v5  ;;  %v5994_v5 = vadd.f32 %v13426_v45, %v14626_v42 }
 0xd4d   : > { %6986 = vperm.xlu0 %9725, %v6035_v6   ;;  %v5769_v6 = vpop.xlane.xlu0 %5768 }
 0xd51   : > { %6980 = vperm.xlu0 %9725, %v6033_v44   ;;  %v5748_v44 = vpop.xlane.xlu1 %5747 }
 0xd55   : > { %6998 = vperm.xlu0 %9725, %v6039_v15   ;;  %v5763_v15 = vpop.xlane.xlu0 %5762  ;;  %v5742_v58 = vpop.xlane.xlu1 %5741 }
 0xd59   : > { %6992 = vperm.xlu0 %9725, %v6037_v37   ;;  %v13648_v42 = vpop.permute.xlu0 %6842  ;;  %v6045_v37 = vadd.f32 %v13426_v45, %v5730_v49  ;;  %v6828_v34 = vpop.permute.xlu1 %6827 }
 0xd5b   : > { %6863 = vperm.xlu1 %9724, %v5994_v5   ;;  %v6051_v5 = vadd.f32 %v13426_v45, %v5748_v44 }
 0xd5d   : > { %7010 = vperm.xlu0 %9725, %v6043_v17   ;;  %v13652_v40 = vpop.permute.xlu0 %6836  ;;  %v6822_v46 = vpop.permute.xlu1 %6821 }
 0xd5f   : > { %6857 = vperm.xlu1 %9724, %v5992_v12   ;;  %v6049_v12 = vadd.f32 %v13426_v45, %v5742_v58 }
 0xd61   : > { %7004 = vperm.xlu0 %9725, %v6041_v22   ;;  %v5781_v39 = vpop.xlane.xlu0 %5780  ;;  %v5760_v17 = vpop.xlane.xlu1 %5759  ;;  %v6052_v22 = vadd.f32 %v13426_v45, %v5751_v31 }
 0xd65   : > { %7022 = vperm.xlu0 %9725, %v6047_v0   ;;  %v4502_v0 = vadd.f32 %v13388_v9, %v13363_v26  ;;  %v5775_v49 = vpop.xlane.xlu0 %5774  ;;  %v6056_v26 = vadd.f32 %v13426_v45, %v5763_v15  ;;  %v7925_v15 = vrot.slane %v13616_v18, %v12531_v30  ;;  %v7935_v18 = vrot.slane %v13606_v1, %v12561_v62 }
 0xd67   : > { %v4772_v44 = vmax.f32 %v4502_v0, 0.0 }
 0xd69   : > { %7016 = vperm.xlu0 %9725, %v6045_v37   ;;  %v5754_v37 = vpop.xlane.xlu1 %5753  ;;  %v13662_v11 = vpop.permute.xlu0 %6854  ;;  %v5035_v4 = vmul.f32 %v13281_v63, %v4772_v44  ;;  %v6060_v44 = vadd.f32 %v13426_v45, %v5775_v49 }
 0xd6a   : > { %v6053_v58 = vadd.f32 %v13426_v45, %v5754_v37  ;;  %v7921_v37 = vrot.slane %v6810_v57, %v12540_v10 }
 0xd6b   : > { %v5794_v0 = vsel %vm14542_vm1, %v5035_v4, 0.0  ;;  %v7940_v4 = vrot.slane %v6822_v46, %v12564_v7  ;;  %v7950_v46 = vrot.slane %v6828_v34, %v12603_v59  ;;  %vm14632_vm1 = vcmask 589312  }
 0xd6d   : > { %7034 = vperm.xlu0 %9725, %v6051_v5   ;;  %v4494_v5 = vadd.f32 %v13388_v9, %v13365_v61  ;;  %v6062_v61 = vadd.f32 %v13426_v45, %v5781_v39 }
 0xd71   : > { %7028 = vperm.xlu0 %9725, %v6049_v12   ;;  %v6058_v12 = vadd.f32 %v13426_v45, %v5769_v6 }
 0xd75   : > { %7043 = vperm.xlu0 %9725, %v6054_v13   ;;  %v4770_v13 = vmax.f32 %v4494_v5, 0.0  ;;  %v7926_v5 = vsel %vm7107_vm3, %v7925_v15, %v7921_v37  ;;  %v14629_v37 = vld [vmem:[#allocation137_spill] sm:$0xff] }
 0xd77   : > { %v5033_v31 = vmul.f32 %v13281_v63, %v4770_v13 }
 0xd79   : > { %7037 = vperm.xlu0 %9725, %v6052_v22   ;;  %v6849_v22 = vpop.permute.xlu0 %6848  ;;  %v5788_v6 = vsel %vm14628_vm10, %v5033_v31, 0.0  ;;  %vm14633_vm10 = vcmask 851712  }
 0xd7d   : > { %7040 = vperm.xlu0 %9725, %v6053_v58   ;;  %v13671_v38 = vpop.xlane.xlu0 %5792  ;;  %v7930_v58 = vrot.slane %v13634_v2, %v12554_v35  ;;  %v7945_v2 = vrot.slane %v13638_v52, %v12571_v21  ;;  %v7955_v52 = vrot.slane %v13632_v16, %v12620_v19 }
 0xd7f   : > { %v7931_v57 = vsel %vm7114_vm4, %v7930_v58, %v7926_v5  ;;  %v14630_v5 = vld [vmem:[#allocation139_spill] sm:$0xff] }
 0xd80   : > { %v7936_v49 = vsel %vm7121_vm5, %v7935_v18, %v7931_v57  ;;  %v7965_v57 = vrot.slane %v13652_v40, %v12614_v29 }
 0xd81   : > { %7055 = vperm.xlu0 %9725, %v6058_v12   ;;  %v5787_v39 = vpop.xlane.xlu0 %5786  ;;  %v6840_v12 = vpop.permute.xlu1 %6839 }
 0xd82   : > { %v6064_v13 = vadd.f32 %v13426_v45, %v5787_v39  ;;  %v7970_v18 = vrot.slane %v6840_v12, %v12680_v3 }
 0xd83   : > { %5795 = vadd.xlane.f32.xlu1 %v5794_v0  ;;  %v6055_v0 = vadd.f32 %v13426_v45, %v5760_v17  ;;  %v5996_v17 = vadd.f32 %v13426_v45, %v14630_v5 }
 0xd85   : > { %7049 = vperm.xlu0 %9725, %v6056_v26   ;;  %v7941_v26 = vsel %vm7128_vm6, %v7940_v4, %v7936_v49  ;;  %v6834_v31 = vpop.permute.xlu1 %6833  ;;  %v7975_v49 = vrot.slane %v13648_v42, %v12611_v20 }
 0xd87   : > { %5789 = vadd.xlane.f32.xlu1 %v5788_v6  ;;  %v5998_v6 = vadd.f32 %v13426_v45, %v14629_v37 }
 0xd89   : > { %7067 = vperm.xlu0 %9725, %v6062_v61   ;;  %v7946_v61 = vsel %vm7135_vm7, %v7945_v2, %v7941_v26 }
 0xd8a   : > { %v7951_v15 = vsel %vm7142_vm8, %v7950_v46, %v7946_v61  ;;  %v7995_v46 = vrot.slane %v13662_v11, %v12759_v51 }
 0xd8b   : > { %v7956_v58 = vsel %vm14631_vm14, %v7955_v52, %v7951_v15  ;;  %vm14634_vm14 = vcmask 917312   ;;  %v4510_v15 = vadd.f32 %v13388_v9, %v13586_v32  ;;  %v6867_v32 = vpop.permute.xlu0 %6866 }
 0xd8d   : > { %7061 = vperm.xlu0 %9725, %v6060_v44   ;;  %v7960_v44 = vrot.slane %v6834_v31, %v12623_v36  ;;  %v7985_v31 = vrot.slane %v6849_v22, %v12672_v56  ;;  %v4774_v52 = vmax.f32 %v4510_v15, 0.0  ;;  %v14642_v15 = vld [vmem:[#allocation17_spill] sm:$0xff] }
 0xd8f   : > { %v7961_v39 = vsel %vm14632_vm1, %v7960_v44, %v7956_v58  ;;  %vm14635_vm1 = vcmask 982912   ;;  %v5037_v5 = vmul.f32 %v13281_v63, %v4774_v52  ;;  %v14638_v58 = vld [vmem:[#allocation145_spill] sm:$0xff] }
 0xd90   : > { %v7966_v4 = vsel %vm7163_vm11, %v7965_v57, %v7961_v39  ;;  %v6002_v39 = vadd.f32 %v13426_v45, %v14638_v58  ;;  %v6020_v58 = vadd.f32 %v13426_v45, %v13412_v33 }
 0xd91   : > { %7073 = vperm.xlu0 %9725, %v6064_v13   ;;  %v7971_v16 = vsel %vm7170_vm12, %v7970_v18, %v7966_v4 }
 0xd95   : > { %7046 = vperm.xlu0 %9725, %v6055_v0   ;;  %v7976_v0 = vsel %vm7177_vm13, %v7975_v49, %v7971_v16  ;;  %v6861_v16 = vpop.permute.xlu0 %6860  ;;  %v6004_v49 = vadd.f32 %v13426_v45, %v12734_v50  ;;  %v6008_v50 = vadd.f32 %v13426_v45, %v12873_v47  ;;  %v6022_v47 = vadd.f32 %v13426_v45, %v13408_v14 }
 0xd96   : > { %v13694_v1 = vpop.xlane.xlu1 %5771  ;;  %v6030_v14 = vadd.f32 %v13426_v45, %v13456_v24 }
 0xd98   : > { %6875 = vperm.xlu1 %9724, %v5998_v6   ;;  %v4518_v6 = vadd.f32 %v13388_v9, %v13584_v60  ;;  %v14639_v60 = vld [vmem:[#allocation147_spill] sm:$0xff] }
 0xd99   : > { %v6000_v9 = vadd.f32 %v13426_v45, %v14639_v60  ;;  %v13760_v52 = vpop.xlane.xlu0 %5804 }
 0xd9a   : > { %v13703_v34 = vpop.xlane.xlu1 %5765  ;;  %v4776_v22 = vmax.f32 %v4518_v6, 0.0  ;;  %v14641_v6 = vld [vmem:[#allocation37_spill] sm:$0xff] }
 0xd9c   : > { %6869 = vperm.xlu1 %9724, %v5996_v17   ;;  %v5039_v44 = vmul.f32 %v13281_v63, %v4776_v22  ;;  %v14640_v63 = vld [vmem:[#allocation16_spill] sm:$0xff]  ;;  %v6014_v22 = vadd.f32 %v13426_v45, %v14641_v6 }
 0xd9e   : > { %v6852_v13 = vpop.permute.xlu1 %6851 }
 0xd9f   : > { %v7990_v40 = vrot.slane %v6852_v13, %v12742_v23  ;;  %v6006_v13 = vadd.f32 %v13426_v45, %v14640_v63 }
 0xda2   : > { %v6846_v26 = vpop.permute.xlu1 %6845 }
 0xda3   : > { %v7980_v2 = vrot.slane %v6846_v26, %v12689_v53 }
 0xda5   : > { %v7981_v61 = vsel %vm14633_vm10, %v7980_v2, %v7976_v0  ;;  %vm14636_vm10 = vcmask 261120   ;;  %v8004_v2 = vrot.slane %v6861_v16, %v12531_v30 }
 0xda6   : > { %v7986_v12 = vsel %vm14634_vm14, %v7985_v31, %v7981_v61  ;;  %v5806_v11 = vsel %vm14636_vm10, %v5039_v44, 0.0  ;;  %vm14637_vm14 = vmmov %vm14636_vm10  ;;  %v6012_v44 = vadd.f32 %v13426_v45, %v14642_v15 }
 0xda7   : > { %v7991_v37 = vsel %vm14635_vm1, %v7990_v40, %v7986_v12  ;;  %v5800_v17 = vsel %vm14637_vm14, %v5037_v5, 0.0  ;;  %v8014_v40 = vrot.slane %v6867_v32, %v12561_v62  ;;  %v6016_v5 = vadd.f32 %v13426_v45, %v13392_v54 }
 0xda8   : > { %v13723_v42 = vsel %vm7205_vm2, %v7995_v46, %v7991_v37  ;;  %v6010_v46 = vadd.f32 %v13426_v45, %v12833_v55  ;;  %v6018_v55 = vadd.f32 %v13426_v45, %v13383_v48  ;;  %v6024_v54 = vadd.f32 %v13426_v45, %v13442_v28 }
 0xda9   : > { %vm14647_vm1 = vcmask 523712   ;;  %vm14670_vm14 = vcmask 589312  }
 0xdaa   : > { %vm14669_vm10 = vmmov %vm14647_vm1 }
 0xdab   : > { %vm14672_vm9 = vmmov %vm14670_vm14 }
 0xdc0   : > { %5807 = vadd.xlane.f32.xlu1 %v5806_v11  ;;  %v13766_v11 = vpop.xlane.xlu0 %5798 }
 0xdc4   : > { %5801 = vadd.xlane.f32.xlu1 %v5800_v17  ;;  %v6879_v17 = vpop.permute.xlu0 %6878 }
 0xdc8   : > { %v6873_v48 = vpop.permute.xlu0 %6872 }
 0xdcc   : > { %v13776_v60 = vpop.permute.xlu0 %6890 }
 0xdd0   : > { %v13782_v33 = vpop.permute.xlu0 %6884 }
 0xdd3   : > { %v13735_v57 = vpop.xlane.xlu1 %5783 }
 0xdd4   : > { %v13790_v28 = vpop.permute.xlu0 %6902 }
 0xdd5   : > { %6887 = vperm.xlu1 %9724, %v6002_v39   ;;  %v6026_v39 = vadd.f32 %v13426_v45, %v13435_v43  ;;  %v14643_v43 = vld [vmem:[#allocation25_spill] sm:$0xff] }
 0xdd6   : > { %v6034_v63 = vadd.f32 %v13426_v45, %v14643_v43 }
 0xdd7   : > { %v13739_v4 = vpop.xlane.xlu1 %5777 }
 0xdd9   : > { %6881 = vperm.xlu1 %9724, %v6000_v9   ;;  %v6028_v9 = vadd.f32 %v13426_v45, %v13464_v41 }
 0xddb   : > { %v6864_v18 = vpop.permute.xlu1 %6863 }
 0xddc   : > { %v8009_v0 = vrot.slane %v6864_v18, %v12554_v35  ;;  %v14644_v18 = vld [vmem:[#allocation39_spill] sm:$0xff] }
 0xddd   : > { %6899 = vperm.xlu1 %9724, %v6006_v13   ;;  %v6032_v24 = vadd.f32 %v13426_v45, %v14644_v18  ;;  %v14652_v18 = vld [vmem:[#allocation11_spill] sm:$0xff] }
 0xddf   : > { %v6858_v26 = vpop.permute.xlu1 %6857 }
 0xde0   : > { %v8000_v31 = vrot.slane %v6858_v26, %v12540_v10  ;;  %v13796_v26 = vpop.permute.xlu0 %6896 }
 0xde1   : > { %6893 = vperm.xlu1 %9724, %v6004_v49   ;;  %v14645_v49 = vld [vmem:[#allocation44_spill] sm:$0xff] }
 0xde2   : > { %v8005_v61 = vsel %vm7107_vm3, %v8004_v2, %v8000_v31  ;;  %v6038_v41 = vadd.f32 %v13426_v45, %v14645_v49 }
 0xde3   : > { %v8010_v12 = vsel %vm7114_vm4, %v8009_v0, %v8005_v61  ;;  %v8024_v0 = vrot.slane %v6873_v48, %v12571_v21  ;;  %v14649_v48 = vld [vmem:[#allocation66_spill] sm:$0xff] }
 0xde4   : > { %v8015_v37 = vsel %vm7121_vm5, %v8014_v40, %v8010_v12  ;;  %v14646_v40 = vld [vmem:[#allocation23_spill] sm:$0xff] }
 0xde5   : > { %6911 = vperm.xlu1 %9724, %v6010_v46   ;;  %v6036_v61 = vadd.f32 %v13426_v45, %v14646_v40 }
 0xde9   : > { %6905 = vperm.xlu1 %9724, %v6008_v50   ;;  %v8034_v50 = vrot.slane %v6879_v17, %v12620_v19 }
 0xded   : > { %6923 = vperm.xlu1 %9724, %v6014_v22   ;;  %v13806_v22 = vpop.permute.xlu0 %6914 }
 0xdf1   : > { %6917 = vperm.xlu1 %9724, %v6012_v44  }
 0xdf5   : > { %6935 = vperm.xlu1 %9724, %v6018_v55   ;;  %v6042_v55 = vadd.f32 %v13426_v45, %v13530_v8  ;;  %v6050_v8 = vadd.f32 %v13426_v45, %v14649_v48 }
 0xdf9   : > { %6929 = vperm.xlu1 %9724, %v6016_v5   ;;  %v6040_v5 = vadd.f32 %v13426_v45, %v13539_v25  ;;  %v14650_v25 = vld [vmem:[#allocation63_spill] sm:$0xff] }
 0xdfd   : > { %6947 = vperm.xlu1 %9724, %v6022_v47   ;;  %v6046_v47 = vadd.f32 %v13426_v45, %v13562_v27  ;;  %v14651_v27 = vld [vmem:[#allocation42_spill] sm:$0xff] }
 0xdfe   : > { %v7842_v43 = vrot.slane %v14651_v27, %v12540_v10 }
 0xe01   : > { %6941 = vperm.xlu1 %9724, %v6020_v58   ;;  %v14648_v58 = vld [vmem:[#allocation48_spill] sm:$0xff] }
 0xe05   : > { %6959 = vperm.xlu1 %9724, %v6026_v39   ;;  %v6044_v39 = vadd.f32 %v13426_v45, %v14648_v58 }
 0xe09   : > { %6953 = vperm.xlu1 %9724, %v6024_v54  }
 0xe0d   : > { %6971 = vperm.xlu1 %9724, %v6030_v14   ;;  %v6048_v14 = vadd.f32 %v13426_v45, %v14650_v25 }
 0xe10   : > { %v13784_v32 = vpop.xlane.xlu1 %5795 }
 0xe11   : > { %6965 = vperm.xlu1 %9724, %v6028_v9  }
 0xe14   : > { %v13788_v13 = vpop.xlane.xlu1 %5789 }
 0xe15   : > { %6983 = vperm.xlu1 %9724, %v6034_v63   ;;  %v6059_v63 = vadd.f32 %v13426_v45, %v13694_v1 }
 0xe18   : > { %v6876_v16 = vpop.permute.xlu1 %6875 }
 0xe19   : > { %6977 = vperm.xlu1 %9724, %v6032_v24   ;;  %v8029_v46 = vrot.slane %v6876_v16, %v12603_v59  ;;  %v7763_v24 = vrot.slane %v14652_v18, %v12540_v10  ;;  %v14653_v16 = vld [vmem:[#allocation30_spill] sm:$0xff]  ;;  %v14661_v18 = vld [vmem:[#allocation51_spill] sm:$0xff] }
 0xe1a   : > { %v7846_v49 = vrot.slane %v14653_v16, %v12531_v30 }
 0xe1c   : > { %v6870_v2 = vpop.permute.xlu1 %6869 }
 0xe1d   : > { %v8019_v31 = vrot.slane %v6870_v2, %v12564_v7  ;;  %6995 = vperm.xlu1 %9724, %v6038_v41   ;;  %v14654_v41 = vld [vmem:[#allocation28_spill] sm:$0xff] }
 0xe1e   : > { %v7767_v2 = vrot.slane %v14654_v41, %v12531_v30 }
 0xe1f   : > { %v8020_v12 = vsel %vm7128_vm6, %v8019_v31, %v8015_v37  ;;  %v13816_v37 = vpop.permute.xlu0 %6908  ;;  %v7847_v31 = vsel %vm7107_vm3, %v7846_v49, %v7842_v43  ;;  %v14662_v49 = vld [vmem:[#allocation35_spill] sm:$0xff] }
 0xe20   : > { %v8025_v6 = vsel %vm7135_vm7, %v8024_v0, %v8020_v12  ;;  %v6057_v0 = vadd.f32 %v13426_v45, %v13703_v34  ;;  %v14656_v12 = vld [vmem:[#allocation22_spill] sm:$0xff]  ;;  %v6063_v34 = vadd.f32 %v13426_v45, %v13735_v57  ;;  %v7866_v57 = vrot.slane %v14661_v18, %v12571_v21  ;;  %v14671_v18 = vld [vmem:[#allocation40_spill] sm:$0xff] }
 0xe21   : > { %6989 = vperm.xlu1 %9724, %v6036_v61   ;;  %v8030_v15 = vsel %vm7142_vm8, %v8029_v46, %v8025_v6  ;;  %v14655_v61 = vld [vmem:[#allocation36_spill] sm:$0xff]  ;;  %v7768_v46 = vsel %vm7107_vm3, %v7767_v2, %v7763_v24  ;;  %v6061_v24 = vadd.f32 %v13426_v45, %v13739_v4  ;;  %v7787_v41 = vrot.slane %v14662_v49, %v12571_v21  ;;  %v14664_v4 = vld [vmem:[#allocation41_spill] sm:$0xff] }
 0xe22   : > { %v13810_v44 = vsel %vm14647_vm1, %v8034_v50, %v8030_v15  ;;  %v7851_v1 = vrot.slane %v14655_v61, %v12554_v35  ;;  %v7772_v50 = vrot.slane %v14656_v12, %v12554_v35  ;;  %v14657_v15 = vld [vmem:[#allocation49_spill] sm:$0xff]  ;;  %v7792_v12 = vrot.slane %v14664_v4, %v12603_v59 }
 0xe23   : > { %v13820_v17 = vpop.permute.xlu0 %6926 }
 0xe24   : > { %v7852_v6 = vsel %vm7114_vm4, %v7851_v1, %v7847_v31  ;;  %v7773_v58 = vsel %vm7114_vm4, %v7772_v50, %v7768_v46  ;;  %v14663_v31 = vld [vmem:[#allocation34_spill] sm:$0xff]  ;;  %v6066_v1 = vadd.f32 %v13426_v45, %v13671_v38 }
 0xe25   : > { %7007 = vperm.xlu1 %9724, %v6042_v55   ;;  %v7861_v55 = vrot.slane %v14657_v15, %v12564_v7 }
 0xe27   : > { %v13826_v54 = vpop.permute.xlu0 %6920 }
 0xe29   : > { %7001 = vperm.xlu1 %9724, %v6040_v5   ;;  %v14658_v5 = vld [vmem:[#allocation45_spill] sm:$0xff] }
 0xe2b   : > { %v13830_v9 = vpop.permute.xlu0 %6938 }
 0xe2d   : > { %7019 = vperm.xlu1 %9724, %v6046_v47   ;;  %v7856_v47 = vrot.slane %v14658_v5, %v12561_v62 }
 0xe2f   : > { %v13845_v40 = vpop.permute.xlu0 %6932 }
 0xe31   : > { %7013 = vperm.xlu1 %9724, %v6044_v39   ;;  %v14659_v39 = vld [vmem:[#allocation27_spill] sm:$0xff] }
 0xe32   : > { %v7782_v48 = vrot.slane %v14659_v39, %v12564_v7 }
 0xe33   : > { %v13865_v27 = vpop.permute.xlu0 %6950 }
 0xe35   : > { %7031 = vperm.xlu1 %9724, %v6050_v8   ;;  %v14660_v8 = vld [vmem:[#allocation6_spill] sm:$0xff] }
 0xe36   : > { %v7777_v25 = vrot.slane %v14660_v8, %v12561_v62 }
 0xe37   : > { %v13882_v46 = vpop.permute.xlu0 %6944 }
 0xe39   : > { %7025 = vperm.xlu1 %9724, %v6048_v14   ;;  %v7857_v14 = vsel %vm7121_vm5, %v7856_v47, %v7852_v6  ;;  %v14665_v6 = vld [vmem:[#allocation56_spill] sm:$0xff] }
 0xe3a   : > { %v7862_v43 = vsel %vm7128_vm6, %v7861_v55, %v7857_v14  ;;  %v7881_v15 = vrot.slane %v14665_v6, %v12623_v36  ;;  %v14666_v55 = vld [vmem:[#allocation9_spill] sm:$0xff]  ;;  %v6067_v14 = vadd.f32 %v13426_v45, %v13784_v32  ;;  %v6065_v32 = vadd.f32 %v13426_v45, %v13788_v13 }
 0xe3b   : > { %v7867_v2 = vsel %vm7135_vm7, %v7866_v57, %v7862_v43  ;;  %v7876_v5 = vrot.slane %v14666_v55, %v12620_v19  ;;  %v7886_v57 = vrot.slane %v14671_v18, %v12614_v29  ;;  %v6068_v13 = vadd.f32 %v13426_v45, %v13766_v11  ;;  %v14681_v18 = vld [vmem:[#allocation47_spill] sm:$0xff] }
 0xe3d   : > { %7058 = vperm.xlu1 %9724, %v6059_v63   ;;  %v7778_v63 = vsel %vm7121_vm5, %v7777_v25, %v7773_v58  ;;  %v14667_v58 = vld [vmem:[#allocation32_spill] sm:$0xff] }
 0xe3e   : > { %v7783_v16 = vsel %vm7128_vm6, %v7782_v48, %v7778_v63  ;;  %v7802_v38 = vrot.slane %v14667_v58, %v12623_v36  ;;  %v14668_v48 = vld [vmem:[#allocation8_spill] sm:$0xff] }
 0xe3f   : > { %v7788_v61 = vsel %vm7135_vm7, %v7787_v41, %v7783_v16  ;;  %v7797_v8 = vrot.slane %v14668_v48, %v12620_v19  ;;  %v14673_v41 = vld [vmem:[#allocation26_spill] sm:$0xff]  ;;  %v14679_v48 = vld [vmem:[#allocation15_spill] sm:$0xff] }
 0xe41   : > { %7052 = vperm.xlu1 %9724, %v6057_v0   ;;  %v7871_v0 = vrot.slane %v14663_v31, %v12603_v59 }
 0xe43   : > { %v7872_v50 = vsel %vm7142_vm8, %v7871_v0, %v7867_v2  ;;  %v7807_v2 = vrot.slane %v14673_v41, %v12614_v29  ;;  %v14674_v0 = vld [vmem:[#allocation46_spill] sm:$0xff] }
 0xe44   : > { %v7877_v25 = vsel %vm14669_vm10, %v7876_v5, %v7872_v50  ;;  %v14677_v5 = vld [vmem:[#allocation43_spill] sm:$0xff] }
 0xe45   : > { %7070 = vperm.xlu1 %9724, %v6063_v34   ;;  %v7793_v34 = vsel %vm7142_vm8, %v7792_v12, %v7788_v61  ;;  %v7882_v43 = vsel %vm14670_vm14, %v7881_v15, %v7877_v25  ;;  %v7891_v61 = vrot.slane %v14674_v0, %v12680_v3  ;;  %v14675_v12 = vld [vmem:[#allocation33_spill] sm:$0xff] }
 0xe46   : > { %v7798_v63 = vsel %vm14647_vm1, %v7797_v8, %v7793_v34  ;;  %v7887_v31 = vsel %vm7163_vm11, %v7886_v57, %v7882_v43  ;;  %v7812_v50 = vrot.slane %v14675_v12, %v12680_v3  ;;  %v14676_v15 = vld [vmem:[#allocation77_spill] sm:$0xff]  ;;  %v7817_v8 = vrot.slane %v14679_v48, %v12611_v20 }
 0xe47   : > { %v7803_v49 = vsel %vm14672_vm9, %v7802_v38, %v7798_v63  ;;  %v7892_v6 = vsel %vm7170_vm12, %v7891_v61, %v7887_v31  ;;  %v7901_v55 = vrot.slane %v14676_v15, %v12689_v53  ;;  %v14678_v38 = vld [vmem:[#allocation31_spill] sm:$0xff]  ;;  %vm14680_vm9 = vcmask 851712   ;;  %v14683_v0 = vld [vmem:[#allocation21_spill] sm:$0xff] }
 0xe48   : > { %v7906_v57 = vrot.slane %v14681_v18, %v12672_v56  ;;  %vm14682_vm10 = vmmov %vm14680_vm9  ;;  %v7827_v61 = vrot.slane %v14683_v0, %v12672_v56  ;;  %vm14684_vm1 = vcmask 917312   ;;  %v8054_v12 = vrot.slane %v13776_v60, %v12611_v20  ;;  %v14687_v60 = vld [vmem:[#allocation18_spill] sm:$0xff] }
 0xe49   : > { %7064 = vperm.xlu1 %9724, %v6061_v24   ;;  %v13904_v24 = vpop.permute.xlu0 %6962 }
 0xe4d   : > { %v5808_v47 = vpop.xlane.xlu1 %5807  ;;  %7079 = vperm.xlu1 %9724, %v6066_v1   ;;  %v7808_v1 = vsel %vm7163_vm11, %v7807_v2, %v7803_v49  ;;  %v13924_v34 = vpop.permute.xlu0 %6956  ;;  %v8044_v49 = vrot.slane %v13782_v33, %v12614_v29 }
 0xe4e   : > { %v6071_v39 = vadd.f32 %v13426_v45, %v5808_v47  ;;  %v7896_v47 = vrot.slane %v14677_v5, %v12611_v20  ;;  %v7813_v58 = vsel %vm7170_vm12, %v7812_v50, %v7808_v1 }
 0xe4f   : > { %v7818_v11 = vsel %vm7177_vm13, %v7817_v8, %v7813_v58  ;;  %v14689_v58 = vld [vmem:[#allocation71_spill] sm:$0xff] }
 0xe50   : > { %7094 = vperm.xlu0 %9725, %v6071_v39   ;;  %v7822_v39 = vrot.slane %v14678_v38, %v12689_v53  ;;  %v7897_v25 = vsel %vm7177_vm13, %v7896_v47, %v7892_v6  ;;  %v14685_v6 = vld [vmem:[#allocation72_spill] sm:$0xff]  ;;  %v7832_v47 = vrot.slane %v14687_v60, %v12742_v23  ;;  %v7916_v38 = vrot.slane %v14689_v58, %v12759_v51 }
 0xe51   : > { %v5802_v16 = vpop.xlane.xlu1 %5801  ;;  %7082 = vperm.xlu1 %9724, %v6067_v14   ;;  %v7902_v43 = vsel %vm14680_vm9, %v7901_v55, %v7897_v25  ;;  %v13949_v50 = vpop.permute.xlu0 %6974  ;;  %vm14686_vm9 = vmmov %vm14684_vm1  ;;  %v6070_v55 = vadd.f32 %v13426_v45, %v13760_v52  ;;  %v14691_v25 = vld [vmem:[#allocation20_spill] sm:$0xff]  ;;  %v8064_v52 = vrot.slane %v13796_v26, %v12672_v56 }
 0xe52   : > { %v6069_v41 = vadd.f32 %v13426_v45, %v5802_v16  ;;  %v7823_v2 = vsel %vm14682_vm10, %v7822_v39, %v7818_v11  ;;  %v7907_v1 = vsel %vm14684_vm1, %v7906_v57, %v7902_v43  ;;  %vm14688_vm10 = vcmask 982912  }
 0xe53   : > { %vm14692_vm1 = vcmask 851712   ;;  %v8074_v57 = vrot.slane %v13790_v28, %v12759_v51  ;;  %v8083_v28 = vrot.slane %v13816_v37, %v12531_v30  ;;  %v8103_v37 = vrot.slane %v13826_v54, %v12571_v21 }
 0xe54   : > { %v8123_v54 = vrot.slane %v13845_v40, %v12614_v29 }
 0xe55   : > { %v6888_v4 = vpop.permute.xlu1 %6887  ;;  %7076 = vperm.xlu1 %9724, %v6065_v32   ;;  %v13971_v43 = vpop.permute.xlu0 %6968 }
 0xe56   : > { %v8049_v31 = vrot.slane %v6888_v4, %v12680_v3  ;;  %v7911_v4 = vrot.slane %v14685_v6, %v12742_v23 }
 0xe59   : > { %v6882_v14 = vpop.permute.xlu1 %6881  ;;  %7085 = vperm.xlu1 %9724, %v6068_v13   ;;  %v7912_v13 = vsel %vm14688_vm10, %v7911_v4, %v7907_v1 }
 0xe5a   : > { %v8039_v63 = vrot.slane %v6882_v14, %v12623_v36  ;;  %v7837_v14 = vrot.slane %v14691_v25, %v12759_v51  ;;  %v7917_v45 = vsel %vm7205_vm2, %v7916_v38, %v7912_v13 }
 0xe5c   : > { %v8040_v32 = vsel %vm14670_vm14, %v8039_v63, %v13810_v44  ;;  %v7828_v44 = vsel %vm14686_vm9, %v7827_v61, %v7823_v2  ;;  %vm14690_vm14 = vmmov %vm14688_vm10  ;;  %vm14693_vm10 = vcmask 1041409   ;;  %v13985_v61 = vpop.permute.xlu0 %6986 }
 0xe5d   : > { %v8045_v33 = vsel %vm7163_vm11, %v8044_v49, %v8040_v32  ;;  %v6900_v16 = vpop.permute.xlu1 %6899  ;;  %7088 = vperm.xlu1 %9724, %v6069_v41   ;;  %v7833_v48 = vsel %vm14690_vm14, %v7832_v47, %v7828_v44 }
 0xe5e   : > { %v8050_v15 = vsel %vm7170_vm12, %v8049_v31, %v8045_v33  ;;  %v8069_v63 = vrot.slane %v6900_v16, %v12742_v23  ;;  %v7838_v18 = vsel %vm7205_vm2, %v7837_v14, %v7833_v48  ;;  %v8093_v16 = vrot.slane %v13806_v22, %v12561_v62 }
 0xe5f   : > { %v8055_v5 = vsel %vm7177_vm13, %v8054_v12, %v8050_v15  ;;  %v8406_v2 = vsel %vm14693_vm10, %v7917_v45, %v7838_v18  ;;  %v8113_v22 = vrot.slane %v13820_v17, %v12620_v19  ;;  %vm14698_vm10 = vmmov %vm14690_vm14 }
 0xe60   : > { %v8407_v26 = vsel %vm14694_vm0, %v13723_v42, %v8406_v2  ;;  %v13996_v44 = vpop.permute.xlu0 %6980  ;;  %vm14697_vm0 = vcmask 589312   ;;  %v8143_v2 = vrot.slane %v13882_v46, %v12672_v56  ;;  %v8162_v46 = vrot.slane %v13924_v34, %v12531_v30 }
 0xe61   : > { %v6894_v39 = vpop.permute.xlu1 %6893  ;;  %7091 = vperm.xlu1 %9724, %v6070_v55   ;;  %v8182_v34 = vrot.slane %v13971_v43, %v12571_v21 }
 0xe62   : > { %v8059_v8 = vrot.slane %v6894_v39, %v12689_v53 }
 0xe64   : > { %v8060_v11 = vsel %vm14692_vm1, %v8059_v8, %v8055_v5  ;;  %v14005_v13 = vpop.permute.xlu0 %6998 }
 0xe65   : > { %v8065_v49 = vsel %vm14686_vm9, %v8064_v52, %v8060_v11  ;;  %v6912_v41 = vpop.permute.xlu1 %6911  ;;  %v8133_v52 = vrot.slane %v13830_v9, %v12611_v20  ;;  %v8153_v9 = vrot.slane %v13865_v27, %v12759_v51  ;;  %v8172_v27 = vrot.slane %v13904_v24, %v12561_v62 }
 0xe66   : > { %v8070_v31 = vsel %vm14690_vm14, %v8069_v63, %v8065_v49  ;;  %v8088_v33 = vrot.slane %v6912_v41, %v12554_v35  ;;  %vm14699_vm14 = vcmask 1044484  }
 0xe67   : > { %v8075_v32 = vsel %vm7205_vm2, %v8074_v57, %v8070_v31 }
 0xe68   : > { %v8408_v0 = vsel %vm14695_vm15, %v8075_v32, %v8407_v26  ;;  %vm14696_vm15 = vcmask 523712   ;;  %v14013_v14 = vpop.permute.xlu0 %6992 }
 0xe69   : > { %v6906_v1 = vpop.permute.xlu1 %6905 }
 0xe6a   : > { %v8079_v12 = vrot.slane %v6906_v1, %v12540_v10 }
 0xe6c   : > { %v8084_v6 = vsel %vm7107_vm3, %v8083_v28, %v8079_v12  ;;  %v14022_v49 = vpop.permute.xlu0 %7010 }
 0xe6d   : > { %v8089_v42 = vsel %vm7114_vm4, %v8088_v33, %v8084_v6  ;;  %v6924_v4 = vpop.permute.xlu1 %6923 }
 0xe6e   : > { %v8094_v15 = vsel %vm7121_vm5, %v8093_v16, %v8089_v42  ;;  %v8108_v60 = vrot.slane %v6924_v4, %v12603_v59 }
 0xe70   : > { %v7005_v12 = vpop.permute.xlu0 %7004 }
 0xe71   : > { %v6918_v55 = vpop.permute.xlu1 %6917 }
 0xe72   : > { %v8098_v5 = vrot.slane %v6918_v55, %v12564_v7 }
 0xe74   : > { %v8099_v47 = vsel %vm7128_vm6, %v8098_v5, %v8094_v15  ;;  %v14042_v55 = vpop.permute.xlu0 %7022 }
 0xe75   : > { %v8104_v58 = vsel %vm7135_vm7, %v8103_v37, %v8099_v47  ;;  %v6936_v38 = vpop.permute.xlu1 %6935 }
 0xe76   : > { %v8109_v39 = vsel %vm7142_vm8, %v8108_v60, %v8104_v58  ;;  %v8128_v45 = vrot.slane %v6936_v38, %v12680_v3  ;;  %v8192_v38 = vrot.slane %v13949_v50, %v12620_v19  ;;  %v8212_v50 = vrot.slane %v13985_v61, %v12611_v20 }
 0xe77   : > { %v8114_v48 = vsel %vm14696_vm15, %v8113_v22, %v8109_v39  ;;  %v8232_v61 = vrot.slane %v14005_v13, %v12759_v51 }
 0xe78   : > { %v7017_v22 = vpop.permute.xlu0 %7016 }
 0xe79   : > { %v6930_v8 = vpop.permute.xlu1 %6929 }
 0xe7a   : > { %v8118_v25 = vrot.slane %v6930_v8, %v12623_v36 }
 0xe7c   : > { %v8119_v17 = vsel %vm14697_vm0, %v8118_v25, %v8114_v48 }
 0xe7d   : > { %v8124_v63 = vsel %vm7163_vm11, %v8123_v54, %v8119_v17  ;;  %v6948_v11 = vpop.permute.xlu1 %6947  ;;  %v14056_v54 = vpop.permute.xlu0 %7034  ;;  %v8202_v17 = vrot.slane %v13996_v44, %v12614_v29  ;;  %v8222_v44 = vrot.slane %v14013_v14, %v12672_v56 }
 0xe7e   : > { %v8129_v18 = vsel %vm7170_vm12, %v8128_v45, %v8124_v63  ;;  %v8148_v31 = vrot.slane %v6948_v11, %v12742_v23 }
 0xe7f   : > { %v8134_v57 = vsel %vm7177_vm13, %v8133_v52, %v8129_v18 }
 0xe81   : > { %v6942_v41 = vpop.permute.xlu1 %6941 }
 0xe82   : > { %v8138_v40 = vrot.slane %v6942_v41, %v12689_v53  ;;  %v7029_v41 = vpop.permute.xlu0 %7028 }
 0xe84   : > { %v8139_v26 = vsel %vm14692_vm1, %v8138_v40, %v8134_v57 }
 0xe85   : > { %v8144_v32 = vsel %vm14686_vm9, %v8143_v2, %v8139_v26  ;;  %v6960_v1 = vpop.permute.xlu1 %6959 }
 0xe86   : > { %v8149_v28 = vsel %vm14698_vm10, %v8148_v31, %v8144_v32  ;;  %v8167_v4 = vrot.slane %v6960_v1, %v12554_v35  ;;  %v14075_v32 = vpop.permute.xlu0 %7043 }
 0xe87   : > { %v8154_v33 = vsel %vm7205_vm2, %v8153_v9, %v8149_v28 }
 0xe88   : > { %v8409_v16 = vsel %vm14699_vm14, %v8154_v33, %v8408_v0  ;;  %vm14700_vm14 = vcmask 1045509  }
 0xe89   : > { %v6954_v6 = vpop.permute.xlu1 %6953 }
 0xe8a   : > { %v8158_v42 = vrot.slane %v6954_v6, %v12540_v10 }
 0xe8c   : > { %v8163_v15 = vsel %vm7107_vm3, %v8162_v46, %v8158_v42  ;;  %v7038_v42 = vpop.permute.xlu0 %7037 }
 0xe8d   : > { %v8168_v5 = vsel %vm7114_vm4, %v8167_v4, %v8163_v15  ;;  %v6972_v37 = vpop.permute.xlu1 %6971 }
 0xe8e   : > { %v8173_v0 = vsel %vm7121_vm5, %v8172_v27, %v8168_v5  ;;  %v8187_v58 = vrot.slane %v6972_v37, %v12603_v59 }
 0xe90   : > { %v14083_v27 = vpop.permute.xlu0 %7040 }
 0xe91   : > { %v6966_v60 = vpop.permute.xlu1 %6965 }
 0xe92   : > { %v8177_v47 = vrot.slane %v6966_v60, %v12564_v7  ;;  %v8241_v60 = vrot.slane %v7005_v12, %v12531_v30 }
 0xe94   : > { %v8178_v24 = vsel %vm7128_vm6, %v8177_v47, %v8173_v0  ;;  %v7056_v13 = vpop.permute.xlu0 %7055 }
 0xe95   : > { %v8183_v39 = vsel %vm7135_vm7, %v8182_v34, %v8178_v24  ;;  %v6984_v48 = vpop.permute.xlu1 %6983 }
 0xe96   : > { %v8188_v8 = vsel %vm7142_vm8, %v8187_v58, %v8183_v39  ;;  %v8207_v52 = vrot.slane %v6984_v48, %v12680_v3  ;;  %v8251_v39 = vrot.slane %v14022_v49, %v12561_v62 }
 0xe97   : > { %v8193_v25 = vsel %vm14696_vm15, %v8192_v38, %v8188_v8 }
 0xe98   : > { %v7050_v34 = vpop.permute.xlu0 %7049 }
 0xe99   : > { %v6978_v45 = vpop.permute.xlu1 %6977  ;;  %v8316_v12 = vrot.slane %v7050_v34, %v12540_v10 }
 0xe9a   : > { %v8197_v43 = vrot.slane %v6978_v45, %v12623_v36 }
 0xe9c   : > { %v8198_v63 = vsel %vm14697_vm0, %v8197_v43, %v8193_v25  ;;  %v7068_v45 = vpop.permute.xlu0 %7067 }
 0xe9d   : > { %v8203_v11 = vsel %vm7163_vm11, %v8202_v17, %v8198_v63  ;;  %v6996_v18 = vpop.permute.xlu1 %6995  ;;  %v8261_v17 = vrot.slane %v7017_v22, %v12571_v21  ;;  %v8271_v22 = vrot.slane %v14042_v55, %v12620_v19 }
 0xe9e   : > { %v8208_v57 = vsel %vm7170_vm12, %v8207_v52, %v8203_v11  ;;  %v8227_v26 = vrot.slane %v6996_v18, %v12742_v23 }
 0xe9f   : > { %v8213_v40 = vsel %vm7177_vm13, %v8212_v50, %v8208_v57  ;;  %v8325_v50 = vrot.slane %v7056_v13, %v12554_v35 }
 0xea0   : > { %v7062_v57 = vpop.permute.xlu0 %7061 }
 0xea1   : > { %v6990_v2 = vpop.permute.xlu1 %6989 }
 0xea2   : > { %v8217_v31 = vrot.slane %v6990_v2, %v12689_v53 }
 0xea4   : > { %v8218_v9 = vsel %vm14692_vm1, %v8217_v31, %v8213_v40 }
 0xea5   : > { %v8223_v1 = vsel %vm14686_vm9, %v8222_v44, %v8218_v9  ;;  %v7008_v28 = vpop.permute.xlu1 %7007  ;;  %v8335_v44 = vrot.slane %v7062_v57, %v12564_v7 }
 0xea6   : > { %v8228_v33 = vsel %vm14698_vm10, %v8227_v26, %v8223_v1  ;;  %v8246_v58 = vrot.slane %v7008_v28, %v12554_v35  ;;  %v8281_v1 = vrot.slane %v7029_v41, %v12614_v29  ;;  %v8291_v41 = vrot.slane %v14056_v54, %v12611_v20 }
 0xea7   : > { %v8233_v6 = vsel %vm7205_vm2, %v8232_v61, %v8228_v33  ;;  %v8345_v33 = vrot.slane %v7068_v45, %v12603_v59  ;;  %v8301_v54 = vrot.slane %v14083_v27, %v12672_v56 }
 0xea8   : > { %v14081_v46 = vsel %vm14700_vm14, %v8233_v6, %v8409_v16 }
 0xea9   : > { %v7002_v14 = vpop.permute.xlu1 %7001 }
 0xeaa   : > { %v8237_v37 = vrot.slane %v7002_v14, %v12540_v10  ;;  %v7074_v14 = vpop.permute.xlu0 %7073 }
 0xeac   : > { %v8242_v47 = vsel %vm7107_vm3, %v8241_v60, %v8237_v37  ;;  %v8296_v60 = vrot.slane %v7038_v42, %v12689_v53  ;;  %v8306_v42 = vrot.slane %v14075_v32, %v12742_v23 }
 0xead   : > { %v7020_v4 = vpop.permute.xlu1 %7019  ;;  %v8247_v24 = vsel %vm7114_vm4, %v8246_v58, %v8242_v47 }
 0xeae   : > { %v8252_v8 = vsel %vm7121_vm5, %v8251_v39, %v8247_v24  ;;  %v8266_v49 = vrot.slane %v7020_v4, %v12603_v59  ;;  %v8355_v59 = vrot.slane %v7074_v14, %v12623_v36 }
 0xeb1   : > { %v7014_v15 = vpop.permute.xlu1 %7013 }
 0xeb2   : > { %v8256_v38 = vrot.slane %v7014_v15, %v12564_v7 }
 0xeb4   : > { %v8257_v43 = vsel %vm7128_vm6, %v8256_v38, %v8252_v8 }
 0xeb5   : > { %v7032_v5 = vpop.permute.xlu1 %7031  ;;  %v8262_v11 = vsel %vm7135_vm7, %v8261_v17, %v8257_v43 }
 0xeb6   : > { %v8286_v6 = vrot.slane %v7032_v5, %v12680_v3 }
 0xeb9   : > { %v7026_v0 = vpop.permute.xlu1 %7025 }
 0xeba   : > { %v8276_v10 = vrot.slane %v7026_v0, %v12623_v36  ;;  %v7047_v36 = vpop.permute.xlu0 %7046 }
 0xebd   : > { %v7059_v16 = vpop.permute.xlu1 %7058 }
 0xebe   : > { %v8330_v40 = vrot.slane %v7059_v16, %v12561_v62 }
 0xec1   : > { %v7053_v48 = vpop.permute.xlu1 %7052 }
 0xec2   : > { %v8320_v25 = vrot.slane %v7053_v48, %v12531_v30  ;;  %v8267_v30 = vsel %vm7142_vm8, %v8266_v49, %v8262_v11 }
 0xec4   : > { %v8321_v52 = vsel %vm7107_vm3, %v8320_v25, %v8316_v12  ;;  %vm14701_vm3 = vmmov %vm14696_vm15  ;;  %v8311_v25 = vrot.slane %v7047_v36, %v12759_v51 }
 0xec5   : > { %v7071_v63 = vpop.permute.xlu1 %7070  ;;  %v8326_v18 = vsel %vm7114_vm4, %v8325_v50, %v8321_v52  ;;  %v8272_v26 = vsel %vm14701_vm3, %v8271_v22, %v8267_v30  ;;  %vm14702_vm4 = vmmov %vm14697_vm0 }
 0xec6   : > { %v8331_v31 = vsel %vm7121_vm5, %v8330_v40, %v8326_v18  ;;  %v8277_v9 = vsel %vm14702_vm4, %v8276_v10, %v8272_v26  ;;  %v8350_v15 = vrot.slane %v7071_v63, %v12620_v19  ;;  %vm14703_vm5 = vmmov %vm14701_vm3 }
 0xec7   : > { %v8336_v28 = vsel %vm7128_vm6, %v8335_v44, %v8331_v31  ;;  %v8282_v55 = vsel %vm7163_vm11, %v8281_v1, %v8277_v9  ;;  %vm14704_vm6 = vmmov %vm14697_vm0  ;;  %vm14711_vm0 = vcmask 1046534  }
 0xec8   : > { %v8287_v4 = vsel %vm7170_vm12, %v8286_v6, %v8282_v55  ;;  %vm14710_vm15 = vmmov %vm14698_vm10 }
 0xec9   : > { %v7065_v2 = vpop.permute.xlu1 %7064  ;;  %v8292_v0 = vsel %vm7177_vm13, %v8291_v41, %v8287_v4 }
 0xeca   : > { %v8340_v35 = vrot.slane %v7065_v2, %v12571_v21 }
 0xecc   : > { %v8341_v62 = vsel %vm7135_vm7, %v8340_v35, %v8336_v28  ;;  %vm14705_vm7 = vmmov %vm14692_vm1 }
 0xecd   : > { %v7080_v61 = vpop.permute.xlu1 %7079  ;;  %v8346_v7 = vsel %vm7142_vm8, %v8345_v33, %v8341_v62  ;;  %v8297_v34 = vsel %vm14705_vm7, %v8296_v60, %v8292_v0  ;;  %vm14706_vm8 = vmmov %vm14686_vm9 }
 0xece   : > { %v8351_v37 = vsel %vm14703_vm5, %v8350_v15, %v8346_v7  ;;  %v8365_v16 = vrot.slane %v7080_v61, %v12680_v3  ;;  %v8302_v24 = vsel %vm14706_vm8, %v8301_v54, %v8297_v34 }
 0xecf   : > { %v8356_v47 = vsel %vm14704_vm6, %v8355_v59, %v8351_v37  ;;  %v7095_v12 = vpop.permute.xlu0 %7094 }
 0xed0   : > { %v8390_v43 = vrot.slane %v7095_v12, %v12759_v51 }
 0xed1   : > { %v7083_v21 = vpop.permute.xlu1 %7082 }
 0xed2   : > { %v8370_v38 = vrot.slane %v7083_v21, %v12611_v20 }
 0xed5   : > { %v7077_v13 = vpop.permute.xlu1 %7076 }
 0xed6   : > { %v8360_v5 = vrot.slane %v7077_v13, %v12614_v29 }
 0xed8   : > { %v8361_v19 = vsel %vm7163_vm11, %v8360_v5, %v8356_v47  ;;  %vm14707_vm11 = vmmov %vm14698_vm10 }
 0xed9   : > { %v7086_v58 = vpop.permute.xlu1 %7085  ;;  %v8366_v29 = vsel %vm7170_vm12, %v8365_v16, %v8361_v19  ;;  %v8307_v3 = vsel %vm14707_vm11, %v8306_v42, %v8302_v24  ;;  %vm14708_vm12 = vmmov %vm14692_vm1  ;;  %vm14712_vm1 = vcmask 1047559  }
 0xeda   : > { %v8375_v48 = vrot.slane %v7086_v58, %v12689_v53  ;;  %v8371_v8 = vsel %vm7177_vm13, %v8370_v38, %v8366_v29  ;;  %v8312_v32 = vsel %vm7205_vm2, %v8311_v25, %v8307_v3  ;;  %vm14709_vm13 = vmmov %vm14706_vm8 }
 0xedc   : > { %v8376_v20 = vsel %vm14708_vm12, %v8375_v48, %v8371_v8 }
 0xedd   : > { %v7089_v39 = vpop.permute.xlu1 %7088 }
 0xede   : > { %v8380_v27 = vrot.slane %v7089_v39, %v12672_v56 }
 0xee0   : > { %v8381_v56 = vsel %vm14709_vm13, %v8380_v27, %v8376_v20 }
 0xee1   : > { %v7092_v45 = vpop.permute.xlu1 %7091 }
 0xee2   : > { %v8385_v53 = vrot.slane %v7092_v45, %v12742_v23  ;;  %v8411_v23 = vsel %vm14711_vm0, %v8312_v32, %v14081_v46 }
 0xee4   : > { %v8386_v17 = vsel %vm14710_vm15, %v8385_v53, %v8381_v56 }
 0xee5   : > { %v8391_v52 = vsel %vm7205_vm2, %v8390_v43, %v8386_v17 }
 0xee6   : > { %v8412_v51 = vsel %vm14712_vm1, %v8391_v52, %v8411_v23 }
 0xee7   : > { %8416 = vst [vmem:[%s13131_s30 + $0x8] sm:$0xff] %v8412_v51 }
 0xee8   : > { %9895 = shalt.err (!%p9892_p3)
}
 0xee9   : > { %s9896_s21 = scalar_lea.hbm %s14156_s20, 256  ;;  %s9900_s9 = scalar_lea.hbm %s14215_s7, 512 }
 0xeea   : > { %p9897_p4 = scmp.ne.s32.totalorder %s14156_s20, %s9896_s21  ;;  %p9901_p9 = scmp.lt.u32.totalorder %s14156_s20, %s14215_s7 }
 0xeeb   : > { %p9902_p10 = scmp.lt.u32.totalorder %s9900_s9, %s9896_s21  ;;  %p9904_p12 = scmp.lt.u32.totalorder %s9896_s21, %s14156_s20 }
 0xeec   : > { %p9898_p7 = pnand %p9897_p4, %p10028_p5 }
 0xeed   : > { %p9903_p11 = por %p9902_p10, %p9901_p9 }
 0xeee   : > { %p9899_p8 = pneg %p9898_p7 }
 0xeef   : > { %p9905_p13 = por %p9904_p12, %p9903_p11 }
 0xef1   : > { %p9906_p0 = pnand %p9905_p13, %p9899_p8 }
 0xef3   : > { %9909 = shalt.err (!%p9906_p0)
}
 0xef4   : > { %s9948_s15 = smov 128   ;;  %s9949_s18 = smov 8  }
 0xef5   : > { %9682 = dma.vmem_to_hbm [thread:$0]  (%p10028_p5), %s14158_s17, 256, %s14156_s20, %s14167_s22, %s9948_s15, %s9948_s15, %s9949_s18  }
 0xef6 PF: > { %p9688_p1 = scmp.ge.s32.totalorder %s9944_s29, 2  ;;  %s8446_s19 = sand.u32 1, %s9932_s26  }
 0xef7   : > { %s8447_s23 = scalar_lea.sflag [#allocation4], %s8446_s19 }
 0xef8   : > { %p9685_p2 = pnand %p9688_p1, %p10032_p6 }
 0xefa   : > { %9927 = dma.done.wait (!%p9685_p2), %s8447_s23, 256  }
 0xefb   : > { %9929 = vsyncadd (!%p9685_p2), %s8447_s23, 4294967040  ;;  %p19_p3 = scmp.ge.s32.totalorder %s10016_s8, 4   ;;  %s14713_s26 = smov %s9936_s27 }
 0xefc   : > { %s14714_s27 = smov %s9940_s28  ;;  %s14715_s28 = smov %s10026_s11 }
 0xefd   : > { %s14716_s29 = smov %s10016_s8  ;;  %21 = sbr.rel (!%p19_p3) target bundleno = 6 (0x6), region = 83 }
 0xf04   :  { %8452 = vsyncpa [#allocation4], 1 }
 0xf05   :  { %8454 = vsyncpa [#allocation4 + $0x1], 1 }

</bundles_post_ra>
